<compile_context>
chip_gen: v7x
topology: tpu7x:2x2x1
jax: 0.10.0
libtpu: 0.0.40
codegen_flags: <defaults>
</compile_context>

<pallas_src>
import functools

import jax
import jax.numpy as jnp
from jax.experimental import pallas as pl
from jax.experimental.pallas import tpu as pltpu

# Layer sizes fixed by the PyTorch module (its hidden_size/... ctor args are unused).
H1, H2, H3, OUT = 1500, 512, 256, 1
LANE = 128
H1_P = 1536      # H1 padded to a multiple of 128
OUT_P = 128      # output padded to a full lane width (lane-dense stores)


def _round_up(n, m):
    return (n + m - 1) // m * m


def _sigmoid_f32(x):
    # sigmoid(x) = 0.5*tanh(0.5*x) + 0.5 : tanh -> EUP, mul/add -> VPU (no divide).
    return 0.5 * jnp.tanh(0.5 * x) + 0.5


def mlp_kernel(x_ref,
               w1_ref, b1_ref,
               w2_ref, b2_ref,
               w3_ref, b3_ref,
               w4_ref, b4_ref,
               o_ref):
    # x / weights are bf16 (MXU); accumulation + bias + sigmoid are f32 (VPU/EUP).
    x = x_ref[...]
    h1 = _sigmoid_f32(
        jnp.dot(x, w1_ref[...], preferred_element_type=jnp.float32) + b1_ref[...])
    h2 = _sigmoid_f32(
        jnp.dot(h1.astype(jnp.bfloat16), w2_ref[...],
                preferred_element_type=jnp.float32) + b2_ref[...])
    h3 = _sigmoid_f32(
        jnp.dot(h2.astype(jnp.bfloat16), w3_ref[...],
                preferred_element_type=jnp.float32) + b3_ref[...])
    h4 = _sigmoid_f32(
        jnp.dot(h3.astype(jnp.bfloat16), w4_ref[...],
                preferred_element_type=jnp.float32) + b4_ref[...])
    o_ref[...] = h4.astype(o_ref.dtype)


def _pad2d(a, rows, cols):
    r, c = a.shape
    return jnp.pad(a, ((0, rows - r), (0, cols - c)))


def _prepare_operands(x, params, batch_tile):
    """Zero-pad ragged dims to 128-multiples and cast MXU operands to bf16."""
    w1, b1, w2, b2, w3, b3, w4, b4 = params
    B, in_features = x.shape
    in_p = _round_up(in_features, LANE)
    b_p = _round_up(max(B, 1), batch_tile)

    xk = _pad2d(x, b_p, in_p).astype(jnp.bfloat16)
    w1k = _pad2d(w1, in_p, H1_P).astype(jnp.bfloat16)
    b1k = _pad2d(b1, 1, H1_P)                       # biases stay f32
    w2k = _pad2d(w2, H1_P, H2).astype(jnp.bfloat16)
    b2k = b2
    w3k = w3.astype(jnp.bfloat16)
    b3k = b3
    w4k = _pad2d(w4, H3, OUT_P).astype(jnp.bfloat16)
    b4k = _pad2d(b4, 1, OUT_P)
    return xk, w1k, b1k, w2k, b2k, w3k, b3k, w4k, b4k


@functools.partial(jax.jit, static_argnames=("batch_tile",))
def mlp_forward(x, params, batch_tile=256):
    """x: [B, input_size] f32; params: (w1,b1,...,w4,b4) with w as (in, out) f32."""
    B = x.shape[0]
    # Clamp the tile to the (sublane-aligned) batch: tiny batches don't pad to 256.
    tile = min(batch_tile, _round_up(max(B, 1), 8))
    ops = _prepare_operands(x, params, tile)
    xk = ops[0]
    b_p, in_p = xk.shape
    grid = (b_p // tile,)

    # Weights/biases: full-array blocks, constant block index -> VMEM-resident
    # across grid steps (Mosaic elides the redundant per-step weight DMA).
    full = lambda a: pl.BlockSpec(a.shape, lambda i: (0,) * a.ndim)

    out_padded = pl.pallas_call(
        mlp_kernel,
        out_shape=jax.ShapeDtypeStruct((b_p, OUT_P), jnp.float32),
        grid_spec=pltpu.PrefetchScalarGridSpec(
            num_scalar_prefetch=0,
            grid=grid,
            in_specs=[
                pl.BlockSpec((tile, in_p), lambda i: (i, 0)),   # x tile
                full(ops[1]), full(ops[2]),
                full(ops[3]), full(ops[4]),
                full(ops[5]), full(ops[6]),
                full(ops[7]), full(ops[8]),
            ],
            out_specs=pl.BlockSpec((tile, OUT_P), lambda i: (i, 0)),
        ),
        compiler_params=pltpu.CompilerParams(
            dimension_semantics=("parallel",),
            vmem_limit_bytes=32 << 20,
        ),
    )(*ops)

    # Drop batch padding and the 127 padded output lanes.
    return out_padded[:B, :OUT]


def init_params(key, input_size):
    """nn.Linear-style U(-1/sqrt(fan_in), +1/sqrt(fan_in)) init.

    Weights stored as (in_features, out_features) so the kernel computes x @ W + b
    (identical to PyTorch's x @ W.T + b with W (out, in)). Biases are (1, out).
    """
    dims = [(input_size, H1), (H1, H2), (H2, H3), (H3, OUT)]
    params = []
    for i, (fan_in, fan_out) in enumerate(dims):
        kw, kb = jax.random.split(jax.random.fold_in(key, i))
        bound = 1.0 / jnp.sqrt(jnp.float32(fan_in))
        w = jax.random.uniform(kw, (fan_in, fan_out), jnp.float32, -bound, bound)
        b = jax.random.uniform(kb, (1, fan_out), jnp.float32, -bound, bound)
        params += [w, b]
    return tuple(params)


def mlp_reference_f32(x, params):
    """Pure-f32 reference matching the original PyTorch module's math."""
    w1, b1, w2, b2, w3, b3, w4, b4 = params
    h = jax.nn.sigmoid(x @ w1 + b1)
    h = jax.nn.sigmoid(h @ w2 + b2)
    h = jax.nn.sigmoid(h @ w3 + b3)
    return jax.nn.sigmoid(h @ w4 + b4)


def mlp_reference_matched(x, params):
    """Reference mirroring the kernel's dtype choices (bf16 MXU ops, f32 acc)."""
    w1, b1, w2, b2, w3, b3, w4, b4 = params

    def layer(h, w, b):
        acc = jnp.dot(h.astype(jnp.bfloat16), w.astype(jnp.bfloat16),
                      preferred_element_type=jnp.float32) + b
        return 0.5 * jnp.tanh(0.5 * acc) + 0.5

    h = layer(x, w1, b1)
    h = layer(h, w2, b2)
    h = layer(h, w3, b3)
    return layer(h, w4, b4)


if __name__ == "__main__":
    key = jax.random.PRNGKey(0)
    # 512 rows -> two 256-row batch tiles: the MXU M-dim is full and the
    # "parallel" grid spans both TensorCores on v7x. Input feature dim follows
    # the module's ctor argument (small, 32).
    batch, input_size = 512, 32

    kx, kp = jax.random.split(key)
    x = jax.random.normal(kx, (batch, input_size), jnp.float32)
    params = init_params(kp, input_size)

    out = mlp_forward(x, params)          # batch_tile defaults to 256
    out = jax.block_until_ready(out)
    assert out.shape == (batch, OUT)

    ref_matched = mlp_reference_matched(x, params)
    ref_f32 = mlp_reference_f32(x, params)
    assert jnp.allclose(out, ref_matched, rtol=1e-4, atol=1e-4), \
        "mismatch vs dtype-matched reference"
    assert jnp.allclose(out, ref_f32, atol=5e-2), \
        "mismatch vs f32 reference (bf16 weight quantization out of tolerance)"

    print("KERNEL_OK")
</pallas_src>

<mosaic_0001>
module attributes {stable_mosaic.version = 11 : i64} {
  func.func @mlp_kernel(%arg0: i32, %arg1: memref<256x128xbf16, #tpu.memory_space<vmem>>, %arg2: memref<128x1536xbf16, #tpu.memory_space<vmem>>, %arg3: memref<1x1536xf32, #tpu.memory_space<vmem>>, %arg4: memref<1536x512xbf16, #tpu.memory_space<vmem>>, %arg5: memref<1x512xf32, #tpu.memory_space<vmem>>, %arg6: memref<512x256xbf16, #tpu.memory_space<vmem>>, %arg7: memref<1x256xf32, #tpu.memory_space<vmem>>, %arg8: memref<256x128xbf16, #tpu.memory_space<vmem>>, %arg9: memref<1x128xf32, #tpu.memory_space<vmem>>, %arg10: memref<256x128xf32, #tpu.memory_space<vmem>>) attributes {dimension_semantics = [#tpu.dimension_semantics<parallel>], iteration_bounds = array<i64: 2>, scalar_prefetch = 0 : i64, scratch_operands = 0 : i64, tpu.core_type = #tpu.core_type<tc>, window_params = [{transform_indices = @transform_0, window_bounds = array<i64: 256, 128>}, {pipeline_mode = #tpu.pipeline_mode<synchronous>, transform_indices = @transform_1, window_bounds = array<i64: 128, 1536>}, {pipeline_mode = #tpu.pipeline_mode<synchronous>, transform_indices = @transform_2, window_bounds = array<i64: 1, 1536>}, {pipeline_mode = #tpu.pipeline_mode<synchronous>, transform_indices = @transform_3, window_bounds = array<i64: 1536, 512>}, {pipeline_mode = #tpu.pipeline_mode<synchronous>, transform_indices = @transform_4, window_bounds = array<i64: 1, 512>}, {pipeline_mode = #tpu.pipeline_mode<synchronous>, transform_indices = @transform_5, window_bounds = array<i64: 512, 256>}, {pipeline_mode = #tpu.pipeline_mode<synchronous>, transform_indices = @transform_6, window_bounds = array<i64: 1, 256>}, {pipeline_mode = #tpu.pipeline_mode<synchronous>, transform_indices = @transform_7, window_bounds = array<i64: 256, 128>}, {pipeline_mode = #tpu.pipeline_mode<synchronous>, transform_indices = @transform_8, window_bounds = array<i64: 1, 128>}, {transform_indices = @transform_9, window_bounds = array<i64: 256, 128>}]} {
    %c0 = arith.constant 0 : index
    %c0_0 = arith.constant 0 : index
    %0 = vector.load %arg1[%c0, %c0_0] : memref<256x128xbf16, #tpu.memory_space<vmem>>, vector<256x128xbf16>
    %c0_1 = arith.constant 0 : index
    %c0_2 = arith.constant 0 : index
    %1 = vector.load %arg2[%c0_1, %c0_2] : memref<128x1536xbf16, #tpu.memory_space<vmem>>, vector<128x1536xbf16>
    %cst = arith.constant dense<0.000000e+00> : vector<256x1536xf32>
    %2 = tpu.matmul %0, %1, %cst {dimension_numbers = #tpu.dot_dimension_numbers<[1], [0], [0], [1], [0, 0, 1, 1], [], []>} : vector<256x128xbf16>, vector<128x1536xbf16>, vector<256x1536xf32> -> vector<256x1536xf32>
    %c0_3 = arith.constant 0 : index
    %c0_4 = arith.constant 0 : index
    %3 = vector.load %arg3[%c0_3, %c0_4] : memref<1x1536xf32, #tpu.memory_space<vmem>>, vector<1x1536xf32>
    %4 = vector.broadcast %3 : vector<1x1536xf32> to vector<256x1536xf32>
    %5 = arith.addf %2, %4 : vector<256x1536xf32>
    %cst_5 = arith.constant 5.000000e-01 : f32
    %6 = vector.broadcast %cst_5 : f32 to vector<256x1536xf32>
    %7 = arith.mulf %6, %5 : vector<256x1536xf32>
    %8 = math.tanh %7 : vector<256x1536xf32>
    %cst_6 = arith.constant 5.000000e-01 : f32
    %9 = vector.broadcast %cst_6 : f32 to vector<256x1536xf32>
    %10 = arith.mulf %9, %8 : vector<256x1536xf32>
    %cst_7 = arith.constant 5.000000e-01 : f32
    %11 = vector.broadcast %cst_7 : f32 to vector<256x1536xf32>
    %12 = arith.addf %10, %11 : vector<256x1536xf32>
    %13 = arith.truncf %12 : vector<256x1536xf32> to vector<256x1536xbf16>
    %c0_8 = arith.constant 0 : index
    %c0_9 = arith.constant 0 : index
    %14 = vector.load %arg4[%c0_8, %c0_9] : memref<1536x512xbf16, #tpu.memory_space<vmem>>, vector<1536x512xbf16>
    %cst_10 = arith.constant dense<0.000000e+00> : vector<256x512xf32>
    %15 = tpu.matmul %13, %14, %cst_10 {dimension_numbers = #tpu.dot_dimension_numbers<[1], [0], [0], [1], [0, 0, 1, 1], [], []>} : vector<256x1536xbf16>, vector<1536x512xbf16>, vector<256x512xf32> -> vector<256x512xf32>
    %c0_11 = arith.constant 0 : index
    %c0_12 = arith.constant 0 : index
    %16 = vector.load %arg5[%c0_11, %c0_12] : memref<1x512xf32, #tpu.memory_space<vmem>>, vector<1x512xf32>
    %17 = vector.broadcast %16 : vector<1x512xf32> to vector<256x512xf32>
    %18 = arith.addf %15, %17 : vector<256x512xf32>
    %cst_13 = arith.constant 5.000000e-01 : f32
    %19 = vector.broadcast %cst_13 : f32 to vector<256x512xf32>
    %20 = arith.mulf %19, %18 : vector<256x512xf32>
    %21 = math.tanh %20 : vector<256x512xf32>
    %cst_14 = arith.constant 5.000000e-01 : f32
    %22 = vector.broadcast %cst_14 : f32 to vector<256x512xf32>
    %23 = arith.mulf %22, %21 : vector<256x512xf32>
    %cst_15 = arith.constant 5.000000e-01 : f32
    %24 = vector.broadcast %cst_15 : f32 to vector<256x512xf32>
    %25 = arith.addf %23, %24 : vector<256x512xf32>
    %26 = arith.truncf %25 : vector<256x512xf32> to vector<256x512xbf16>
    %c0_16 = arith.constant 0 : index
    %c0_17 = arith.constant 0 : index
    %27 = vector.load %arg6[%c0_16, %c0_17] : memref<512x256xbf16, #tpu.memory_space<vmem>>, vector<512x256xbf16>
    %cst_18 = arith.constant dense<0.000000e+00> : vector<256x256xf32>
    %28 = tpu.matmul %26, %27, %cst_18 {dimension_numbers = #tpu.dot_dimension_numbers<[1], [0], [0], [1], [0, 0, 1, 1], [], []>} : vector<256x512xbf16>, vector<512x256xbf16>, vector<256x256xf32> -> vector<256x256xf32>
    %c0_19 = arith.constant 0 : index
    %c0_20 = arith.constant 0 : index
    %29 = vector.load %arg7[%c0_19, %c0_20] : memref<1x256xf32, #tpu.memory_space<vmem>>, vector<1x256xf32>
    %30 = vector.broadcast %29 : vector<1x256xf32> to vector<256x256xf32>
    %31 = arith.addf %28, %30 : vector<256x256xf32>
    %cst_21 = arith.constant 5.000000e-01 : f32
    %32 = vector.broadcast %cst_21 : f32 to vector<256x256xf32>
    %33 = arith.mulf %32, %31 : vector<256x256xf32>
    %34 = math.tanh %33 : vector<256x256xf32>
    %cst_22 = arith.constant 5.000000e-01 : f32
    %35 = vector.broadcast %cst_22 : f32 to vector<256x256xf32>
    %36 = arith.mulf %35, %34 : vector<256x256xf32>
    %cst_23 = arith.constant 5.000000e-01 : f32
    %37 = vector.broadcast %cst_23 : f32 to vector<256x256xf32>
    %38 = arith.addf %36, %37 : vector<256x256xf32>
    %39 = arith.truncf %38 : vector<256x256xf32> to vector<256x256xbf16>
    %c0_24 = arith.constant 0 : index
    %c0_25 = arith.constant 0 : index
    %40 = vector.load %arg8[%c0_24, %c0_25] : memref<256x128xbf16, #tpu.memory_space<vmem>>, vector<256x128xbf16>
    %cst_26 = arith.constant dense<0.000000e+00> : vector<256x128xf32>
    %41 = tpu.matmul %39, %40, %cst_26 {dimension_numbers = #tpu.dot_dimension_numbers<[1], [0], [0], [1], [0, 0, 1, 1], [], []>} : vector<256x256xbf16>, vector<256x128xbf16>, vector<256x128xf32> -> vector<256x128xf32>
    %c0_27 = arith.constant 0 : index
    %c0_28 = arith.constant 0 : index
    %42 = vector.load %arg9[%c0_27, %c0_28] : memref<1x128xf32, #tpu.memory_space<vmem>>, vector<1x128xf32>
    %43 = vector.broadcast %42 : vector<1x128xf32> to vector<256x128xf32>
    %44 = arith.addf %41, %43 : vector<256x128xf32>
    %cst_29 = arith.constant 5.000000e-01 : f32
    %45 = vector.broadcast %cst_29 : f32 to vector<256x128xf32>
    %46 = arith.mulf %45, %44 : vector<256x128xf32>
    %47 = math.tanh %46 : vector<256x128xf32>
    %cst_30 = arith.constant 5.000000e-01 : f32
    %48 = vector.broadcast %cst_30 : f32 to vector<256x128xf32>
    %49 = arith.mulf %48, %47 : vector<256x128xf32>
    %cst_31 = arith.constant 5.000000e-01 : f32
    %50 = vector.broadcast %cst_31 : f32 to vector<256x128xf32>
    %51 = arith.addf %49, %50 : vector<256x128xf32>
    %c0_32 = arith.constant 0 : index
    %c0_33 = arith.constant 0 : index
    %52 = vector.load %arg10[%c0_32, %c0_33] : memref<256x128xf32, #tpu.memory_space<vmem>>, vector<256x128xf32>
    tpu.vector_store %arg10[%c0_32, %c0_33], %51 {strides = array<i32>} : memref<256x128xf32, #tpu.memory_space<vmem>>, vector<256x128xf32>,
    return
  }
  func.func @transform_0(%arg0: i32) -> (i32, i32) {
    %c0_i32 = arith.constant 0 : i32
    %c0_i32_0 = arith.constant 0 : i32
    return %arg0, %c0_i32 : i32, i32
  }
  func.func @transform_1(%arg0: i32) -> (i32, i32) {
    %c0_i32 = arith.constant 0 : i32
    %c0_i32_0 = arith.constant 0 : i32
    %c0_i32_1 = arith.constant 0 : i32
    return %c0_i32, %c0_i32_0 : i32, i32
  }
  func.func @transform_2(%arg0: i32) -> (i32, i32) {
    %c0_i32 = arith.constant 0 : i32
    %c0_i32_0 = arith.constant 0 : i32
    %c0_i32_1 = arith.constant 0 : i32
    return %c0_i32, %c0_i32_0 : i32, i32
  }
  func.func @transform_3(%arg0: i32) -> (i32, i32) {
    %c0_i32 = arith.constant 0 : i32
    %c0_i32_0 = arith.constant 0 : i32
    %c0_i32_1 = arith.constant 0 : i32
    return %c0_i32, %c0_i32_0 : i32, i32
  }
  func.func @transform_4(%arg0: i32) -> (i32, i32) {
    %c0_i32 = arith.constant 0 : i32
    %c0_i32_0 = arith.constant 0 : i32
    %c0_i32_1 = arith.constant 0 : i32
    return %c0_i32, %c0_i32_0 : i32, i32
  }
  func.func @transform_5(%arg0: i32) -> (i32, i32) {
    %c0_i32 = arith.constant 0 : i32
    %c0_i32_0 = arith.constant 0 : i32
    %c0_i32_1 = arith.constant 0 : i32
    return %c0_i32, %c0_i32_0 : i32, i32
  }
  func.func @transform_6(%arg0: i32) -> (i32, i32) {
    %c0_i32 = arith.constant 0 : i32
    %c0_i32_0 = arith.constant 0 : i32
    %c0_i32_1 = arith.constant 0 : i32
    return %c0_i32, %c0_i32_0 : i32, i32
  }
  func.func @transform_7(%arg0: i32) -> (i32, i32) {
    %c0_i32 = arith.constant 0 : i32
    %c0_i32_0 = arith.constant 0 : i32
    %c0_i32_1 = arith.constant 0 : i32
    return %c0_i32, %c0_i32_0 : i32, i32
  }
  func.func @transform_8(%arg0: i32) -> (i32, i32) {
    %c0_i32 = arith.constant 0 : i32
    %c0_i32_0 = arith.constant 0 : i32
    %c0_i32_1 = arith.constant 0 : i32
    return %c0_i32, %c0_i32_0 : i32, i32
  }
  func.func @transform_9(%arg0: i32) -> (i32, i32) {
    %c0_i32 = arith.constant 0 : i32
    %c0_i32_0 = arith.constant 0 : i32
    return %arg0, %c0_i32 : i32, i32
  }
}

</mosaic_0001>

<bundles_post_ra>
// kernel: mlp_forward.1
= control target key start
LH: loop header
LB: loop body
LE: loop exit
PB: predicated region body
PF: predicated region fallthrough
CT: control target
= control target key end

     0   :  { %s14566_s30 = smov 0   ;;  %s20294_s0 = inlined_call_operand.vmem [shape: bf16[512,128], index: 0, kind: input, shape index: {}]   ;;  %s20295_s1 = inlined_call_operand.vmem [shape: bf16[128,1536], index: 1, kind: input, shape index: {}]   ;;  %s20296_s2 = inlined_call_operand.vmem [shape: f32[1,1536], index: 2, kind: input, shape index: {}]   ;;  %s20297_s3 = inlined_call_operand.vmem [shape: bf16[1536,512], index: 3, kind: input, shape index: {}]   ;;  %s20298_s4 = inlined_call_operand.vmem [shape: f32[1,512], index: 4, kind: input, shape index: {}]   ;;  %s20299_s5 = inlined_call_operand.vmem [shape: bf16[512,256], index: 5, kind: input, shape index: {}]   ;;  %s20300_s6 = inlined_call_operand.vmem [shape: f32[1,256], index: 6, kind: input, shape index: {}]   ;;  %s20301_s7 = inlined_call_operand.vmem [shape: bf16[256,128], index: 7, kind: input, shape index: {}]   ;;  %s20302_s8 = inlined_call_operand.vmem [shape: f32[1,128], index: 8, kind: input, shape index: {}]   ;;  %s20303_s9 = inlined_call_operand.vmem [shape: f32[512,128], index: 9, kind: output, shape index: {}]  }
   0x1 LB: > { %s10791_s10 = sadd.s32 4294967295, %s14513_s30   ;;  %p10795_p0 = scmp.ge.s32.totalorder %s14513_s30, 1  ;;  %s14513_s30 = sphi %s14566_s30, %s19_s30  }
   0x2   : > { %p288_p1 = scmp.lt.s32.totalorder %s14513_s30, 3 }
   0x4   : > { %p289_p2 = pnand %p10795_p0, %p288_p1 }
   0x6   : > { %292 = sbr.rel (%p289_p2) target bundleno = 2099 (0x833), region = 56 }
   0xd   : > { %v12412_v0 = vld [vmem:[%s20295_s1 + $0x4] ss:$48 sps:$4 sm:$0xff]   ;;  %s10796_s13 = sshll.u32 %s10791_s10, 5  ;;  %v12414_v1 = vld [vmem:[%s20295_s1] ss:$48 sps:$4 sm:$0xff]   ;;  %v20304_v2 = vmov 0  }
   0xe   : > { %1137 = vmatprep.mubr.bf16.mxu0 %v20304_v2  ;;  %1217 = vmatprep.mubr.bf16.mxu1 %v20304_v2  ;;  %p325_p3 = scmp.lt.s32.totalorder %s10796_s13, 63  ;;  %v12415_v3 = vld [vmem:[%s20295_s1 + $0x64] ss:$48 sps:$4 sm:$0xff]   ;;  %v12417_v4 = vld [vmem:[%s20295_s1 + $0x60] ss:$48 sps:$4 sm:$0xff]  }
   0xf   : > { %1105 = vmatprep.subr.bf16.mxu0 %v12412_v0  ;;  %11491 = vmatprep.subr.bf16.mxu1 %v12412_v0  ;;  %v12418_v5 = vld [vmem:[%s20295_s1 + $0xc4] ss:$48 sps:$4 sm:$0xff]   ;;  %v12420_v6 = vld [vmem:[%s20295_s1 + $0xc0] ss:$48 sps:$4 sm:$0xff]   ;;  %v12440_v17 = vld [vmem:[%s20295_s1 + $0xc] ss:$48 sps:$4 sm:$0xff]  }
  0x10   : > { %1106 = vmatpush1.bf16.msra.mxu0 %v12414_v1  ;;  %11499 = vmatpush1.bf16.msra.mxu1 %v12414_v1  ;;  %s21550_s13 = smov (!%p325_p3, %s10796_s13), 63  ;;  %v12421_v7 = vld [vmem:[%s20295_s1 + $0x124] ss:$48 sps:$4 sm:$0xff]   ;;  %v12423_v8 = vld [vmem:[%s20295_s1 + $0x120] ss:$48 sps:$4 sm:$0xff]  }
  0x11   : > { %1107 = vmatprep.subr.bf16.mxu0 %v12415_v3  ;;  %11492 = vmatprep.subr.bf16.mxu1 %v12415_v3  ;;  %s10797_s22 = sshll.u32 %s21550_s13, 2  ;;  %v12424_v9 = vld [vmem:[%s20295_s1 + $0x184] ss:$48 sps:$4 sm:$0xff]   ;;  %v12426_v10 = vld [vmem:[%s20295_s1 + $0x180] ss:$48 sps:$4 sm:$0xff]   ;;  %s10799_s15 = sshll.u32 %s21550_s13, 3 }
  0x12   : > { %s14603_s29 = scalar_lea.vmem %s20294_s0, %s10797_s22  ;;  %v12427_v11 = vld [vmem:[%s20295_s1 + $0x1e4] ss:$48 sps:$4 sm:$0xff]   ;;  %v12429_v12 = vld [vmem:[%s20295_s1 + $0x1e0] ss:$48 sps:$4 sm:$0xff]   ;;  %v12438_v21 = vld [vmem:[%s20295_s1 + $0x8] ss:$48 sps:$4 sm:$0xff]   ;;  %s20229_s18 = scalar_lea.vmem %s20303_s9, %s10799_s15 }
  0x13   : > { %v12430_v13 = vld [vmem:[%s20295_s1 + $0x244] ss:$48 sps:$4 sm:$0xff]   ;;  %v12432_v14 = vld [vmem:[%s20295_s1 + $0x240] ss:$48 sps:$4 sm:$0xff]   ;;  %v12446_v23 = vld [vmem:[%s20295_s1 + $0x68] ss:$48 sps:$4 sm:$0xff]  }
  0x14   : > { %1108 = vmatpush1.bf16.msra.mxu0 %v12417_v4  ;;  %11500 = vmatpush1.bf16.msra.mxu1 %v12417_v4  ;;  %v12433_v15 = vld [vmem:[%s20295_s1 + $0x2a4] ss:$48 sps:$4 sm:$0xff]   ;;  %v12435_v16 = vld [vmem:[%s20295_s1 + $0x2a0] ss:$48 sps:$4 sm:$0xff]   ;;  %v12448_v24 = vld [vmem:[%s20295_s1 + $0x6c] ss:$48 sps:$4 sm:$0xff]  }
  0x15   : > { %1109 = vmatprep.subr.bf16.mxu0 %v12418_v5  ;;  %11493 = vmatprep.subr.bf16.mxu1 %v12418_v5  ;;  %v14636_v18 = vld [vmem:[%s14603_s29] sm:$0xff]   ;;  %v12456_v27 = vld [vmem:[%s20295_s1 + $0xcc] ss:$48 sps:$4 sm:$0xff]   ;;  %v12454_v31 = vld [vmem:[%s20295_s1 + $0xc8] ss:$48 sps:$4 sm:$0xff]  }
  0x16   : > { %v12443_v19 = vld [vmem:[%s20295_s1 + $0x14] ss:$48 sps:$4 sm:$0xff]   ;;  %v12441_v22 = vld [vmem:[%s20295_s1 + $0x10] ss:$48 sps:$4 sm:$0xff]   ;;  %v14670_v29 = vld [vmem:[%s14603_s29 + $0x8] sm:$0xff]  }
  0x17   : > { %v12437_v20 = vld [vmem:[%s14603_s29 + $0x40] sm:$0xff]   ;;  %v12445_v30 = vld [vmem:[%s14603_s29 + $0x48] sm:$0xff]   ;;  %v14701_v39 = vld [vmem:[%s14603_s29 + $0x10] sm:$0xff]  }
  0x18   : > { %1110 = vmatpush1.bf16.msra.mxu0 %v12420_v6  ;;  %11501 = vmatpush1.bf16.msra.mxu1 %v12420_v6  ;;  %v12451_v25 = vld [vmem:[%s20295_s1 + $0x74] ss:$48 sps:$4 sm:$0xff]   ;;  %v12449_v26 = vld [vmem:[%s20295_s1 + $0x70] ss:$48 sps:$4 sm:$0xff]   ;;  %v12464_v33 = vld [vmem:[%s20295_s1 + $0x12c] ss:$48 sps:$4 sm:$0xff]  }
  0x19   : > { %1111 = vmatprep.subr.bf16.mxu0 %v12421_v7  ;;  %11494 = vmatprep.subr.bf16.mxu1 %v12421_v7  ;;  %v12459_v28 = vld [vmem:[%s20295_s1 + $0xd4] ss:$48 sps:$4 sm:$0xff]   ;;  %v12457_v32 = vld [vmem:[%s20295_s1 + $0xd0] ss:$48 sps:$4 sm:$0xff]   ;;  %v12462_v35 = vld [vmem:[%s20295_s1 + $0x128] ss:$48 sps:$4 sm:$0xff]  }
  0x1a   : > { %v12467_v34 = vld [vmem:[%s20295_s1 + $0x134] ss:$48 sps:$4 sm:$0xff]   ;;  %v12465_v36 = vld [vmem:[%s20295_s1 + $0x130] ss:$48 sps:$4 sm:$0xff]   ;;  %v12472_v37 = vld [vmem:[%s20295_s1 + $0x18c] ss:$48 sps:$4 sm:$0xff]  }
  0x1b   : > { %v12475_v38 = vld [vmem:[%s20295_s1 + $0x194] ss:$48 sps:$4 sm:$0xff]   ;;  %v12470_v41 = vld [vmem:[%s20295_s1 + $0x188] ss:$48 sps:$4 sm:$0xff]   ;;  %v12473_v42 = vld [vmem:[%s20295_s1 + $0x190] ss:$48 sps:$4 sm:$0xff]  }
  0x1c   : > { %1112 = vmatpush1.bf16.msra.mxu0 %v12423_v8  ;;  %11502 = vmatpush1.bf16.msra.mxu1 %v12423_v8  ;;  %v14704_v40 = vld [vmem:[%s14603_s29 + $0x50] sm:$0xff]   ;;  %v12480_v43 = vld [vmem:[%s20295_s1 + $0x1ec] ss:$48 sps:$4 sm:$0xff]   ;;  %v12478_v45 = vld [vmem:[%s20295_s1 + $0x1e8] ss:$48 sps:$4 sm:$0xff]  }
  0x1d   : > { %1113 = vmatprep.subr.bf16.mxu0 %v12424_v9  ;;  %11495 = vmatprep.subr.bf16.mxu1 %v12424_v9  ;;  %v12483_v44 = vld [vmem:[%s20295_s1 + $0x1f4] ss:$48 sps:$4 sm:$0xff]   ;;  %v12481_v46 = vld [vmem:[%s20295_s1 + $0x1f0] ss:$48 sps:$4 sm:$0xff]   ;;  %v12488_v47 = vld [vmem:[%s20295_s1 + $0x24c] ss:$48 sps:$4 sm:$0xff]  }
  0x1e   : > { %v12491_v48 = vld [vmem:[%s20295_s1 + $0x254] ss:$48 sps:$4 sm:$0xff]   ;;  %v14735_v49 = vld [vmem:[%s14603_s29 + $0x18] sm:$0xff]   ;;  %v12489_v52 = vld [vmem:[%s20295_s1 + $0x250] ss:$48 sps:$4 sm:$0xff]  }
  0x1f   : > { %v14738_v50 = vld [vmem:[%s14603_s29 + $0x58] sm:$0xff]   ;;  %v12499_v54 = vld [vmem:[%s20295_s1 + $0x2b4] ss:$48 sps:$4 sm:$0xff]   ;;  %v12497_v56 = vld [vmem:[%s20295_s1 + $0x2b0] ss:$48 sps:$4 sm:$0xff]  }
  0x20   : > { %1114 = vmatpush1.bf16.msra.mxu0 %v12426_v10  ;;  %11503 = vmatpush1.bf16.msra.mxu1 %v12426_v10  ;;  %v12486_v51 = vld [vmem:[%s20295_s1 + $0x248] ss:$48 sps:$4 sm:$0xff]   ;;  %v12496_v53 = vld [vmem:[%s20295_s1 + $0x2ac] ss:$48 sps:$4 sm:$0xff]   ;;  %v12505_v58 = vld [vmem:[%s20295_s1 + $0x24] ss:$48 sps:$4 sm:$0xff]  }
  0x21   : > { %1115 = vmatprep.subr.bf16.mxu0 %v12427_v11  ;;  %11496 = vmatprep.subr.bf16.mxu1 %v12427_v11  ;;  %v12494_v55 = vld [vmem:[%s20295_s1 + $0x2a8] ss:$48 sps:$4 sm:$0xff]   ;;  %v12502_v57 = vld [vmem:[%s20295_s1 + $0x1c] ss:$48 sps:$4 sm:$0xff]   ;;  %v14769_v59 = vld [vmem:[%s14603_s29 + $0x20] sm:$0xff]  }
  0x22   : > { %v14772_v60 = vld [vmem:[%s14603_s29 + $0x60] sm:$0xff]   ;;  %v14779_v61 = vld [vmem:[%s14603_s29 + $0x28] sm:$0xff]   ;;  %v14789_v63 = vld [vmem:[%s14603_s29 + $0x30] sm:$0xff]  }
  0x23   : > { %v14782_v62 = vld [vmem:[%s14603_s29 + $0x68] sm:$0xff]   ;;  %v14792_v0 = vld [vmem:[%s14603_s29 + $0x70] sm:$0xff]   ;;  %v14799_v1 = vld [vmem:[%s14603_s29 + $0x38] sm:$0xff]  }
  0x24   : > { %1116 = vmatpush1.bf16.msra.mxu0 %v12429_v12  ;;  %11504 = vmatpush1.bf16.msra.mxu1 %v12429_v12  ;;  %v14802_v3 = vld [vmem:[%s14603_s29 + $0x78] sm:$0xff]   ;;  %v12503_v5 = vld [vmem:[%s20295_s1 + $0x20] ss:$48 sps:$4 sm:$0xff]   ;;  %v12511_v7 = vld [vmem:[%s20295_s1 + $0x84] ss:$48 sps:$4 sm:$0xff]  }
  0x25   : > { %1117 = vmatprep.subr.bf16.mxu0 %v12430_v13  ;;  %11497 = vmatprep.subr.bf16.mxu1 %v12430_v13  ;;  %v12500_v4 = vld [vmem:[%s20295_s1 + $0x18] ss:$48 sps:$4 sm:$0xff]   ;;  %v12508_v6 = vld [vmem:[%s20295_s1 + $0x7c] ss:$48 sps:$4 sm:$0xff]   ;;  %v12509_v9 = vld [vmem:[%s20295_s1 + $0x80] ss:$48 sps:$4 sm:$0xff]  }
  0x26   : > { %v12506_v8 = vld [vmem:[%s20295_s1 + $0x78] ss:$48 sps:$4 sm:$0xff]   ;;  %v12514_v10 = vld [vmem:[%s20295_s1 + $0xdc] ss:$48 sps:$4 sm:$0xff]   ;;  %v12517_v11 = vld [vmem:[%s20295_s1 + $0xe4] ss:$48 sps:$4 sm:$0xff]  }
  0x27   : > { %v12512_v12 = vld [vmem:[%s20295_s1 + $0xd8] ss:$48 sps:$4 sm:$0xff]   ;;  %v12515_v13 = vld [vmem:[%s20295_s1 + $0xe0] ss:$48 sps:$4 sm:$0xff]  }
  0x28   : > { %1118 = vmatpush1.bf16.msra.mxu0 %v12432_v14  ;;  %11505 = vmatpush1.bf16.msra.mxu1 %v12432_v14  ;;  %v12520_v14 = vld [vmem:[%s20295_s1 + $0x13c] ss:$48 sps:$4 sm:$0xff]  }
  0x29   : > { %1119 = vmatprep.subr.bf16.mxu0 %v12433_v15  ;;  %11498 = vmatprep.subr.bf16.mxu1 %v12433_v15  ;;  %v12523_v15 = vld [vmem:[%s20295_s1 + $0x144] ss:$48 sps:$4 sm:$0xff]  }
  0x2c   : > { %1120 = vmatpush1.bf16.msra.mxu0 %v12435_v16  ;;  %11506 = vmatpush1.bf16.msra.mxu1 %v12435_v16  ;;  %v12518_v16 = vld [vmem:[%s20295_s1 + $0x138] ss:$48 sps:$4 sm:$0xff]  }
  0x2d   : > { %1298 = vmatprep.subr.bf16.mxu1 %v12440_v17  ;;  %1491 = vmatprep.subr.bf16.mxu0 %v12443_v19  ;;  %v12521_v17 = vld [vmem:[%s20295_s1 + $0x140] ss:$48 sps:$4 sm:$0xff]   ;;  %v12529_v19 = vld [vmem:[%s20295_s1 + $0x1a4] ss:$48 sps:$4 sm:$0xff]  }
  0x2f   : > { %1138 = vmatmul.mubr.bf16.vlgmr.msra.gmra.mrb[0].mxu0 %v14636_v18  ;;  %1218 = vmatmul.mubr.bf16.vlgmr.msra.gmra.mrb[0].mxu1 %v12437_v20  ;;  %v12524_v20 = vld [vmem:[%s20295_s1 + $0x198] ss:$48 sps:$4 sm:$0xff]  }
  0x30   : > { %1299 = vmatpush1.bf16.msra.mxu1 %v12438_v21  ;;  %1492 = vmatpush1.bf16.msra.mxu0 %v12441_v22  ;;  %v12527_v21 = vld [vmem:[%s20295_s1 + $0x1a0] ss:$48 sps:$4 sm:$0xff]   ;;  %v12532_v22 = vld [vmem:[%s20295_s1 + $0x1fc] ss:$48 sps:$4 sm:$0xff]  }
  0x31   : > { %1147 = vmatprep.mubr.bf16.mxu0 %v20304_v2  ;;  %1227 = vmatprep.mubr.bf16.mxu1 %v20304_v2 }
  0x32   : > { %1300 = vmatprep.subr.bf16.mxu1 %v12448_v24  ;;  %1493 = vmatprep.subr.bf16.mxu0 %v12451_v25  ;;  %v12530_v24 = vld [vmem:[%s20295_s1 + $0x1f8] ss:$48 sps:$4 sm:$0xff]   ;;  %v12533_v25 = vld [vmem:[%s20295_s1 + $0x200] ss:$48 sps:$4 sm:$0xff]  }
  0x34   : > { %1301 = vmatpush1.bf16.msra.mxu1 %v12446_v23  ;;  %1494 = vmatpush1.bf16.msra.mxu0 %v12449_v26  ;;  %v12535_v23 = vld [vmem:[%s20295_s1 + $0x204] ss:$48 sps:$4 sm:$0xff]   ;;  %v12538_v26 = vld [vmem:[%s20295_s1 + $0x25c] ss:$48 sps:$4 sm:$0xff]  }
  0x35   : > { %1302 = vmatprep.subr.bf16.mxu1 %v12456_v27  ;;  %1495 = vmatprep.subr.bf16.mxu0 %v12459_v28  ;;  %v12541_v27 = vld [vmem:[%s20295_s1 + $0x264] ss:$48 sps:$4 sm:$0xff]   ;;  %v12536_v28 = vld [vmem:[%s20295_s1 + $0x258] ss:$48 sps:$4 sm:$0xff]  }
  0x37   : > { %1148 = vmatmul.mubr.bf16.gmra.mrb[4].mxu0 %v14670_v29  ;;  %1228 = vmatmul.mubr.bf16.gmra.mrb[4].mxu1 %v12445_v30  ;;  %v12544_v30 = vld [vmem:[%s20295_s1 + $0x2bc] ss:$48 sps:$4 sm:$0xff]  }
  0x38   : > { %1157 = vmatprep.mubr.bf16.mxu0 %v20304_v2  ;;  %1237 = vmatprep.mubr.bf16.mxu1 %v20304_v2 }
  0x39   : > { %1303 = vmatpush1.bf16.msra.mxu1 %v12454_v31  ;;  %1496 = vmatpush1.bf16.msra.mxu0 %v12457_v32  ;;  %v12547_v31 = vld [vmem:[%s20295_s1 + $0x2c4] ss:$48 sps:$4 sm:$0xff]   ;;  %v12542_v32 = vld [vmem:[%s20295_s1 + $0x2b8] ss:$48 sps:$4 sm:$0xff]  }
  0x3a   : > { %1304 = vmatprep.subr.bf16.mxu1 %v12464_v33  ;;  %1497 = vmatprep.subr.bf16.mxu0 %v12467_v34  ;;  %v12545_v33 = vld [vmem:[%s20295_s1 + $0x2c0] ss:$48 sps:$4 sm:$0xff]   ;;  %v12550_v34 = vld [vmem:[%s20295_s1 + $0x2c] ss:$48 sps:$4 sm:$0xff]  }
  0x3d   : > { %1305 = vmatpush1.bf16.msra.mxu1 %v12462_v35  ;;  %1498 = vmatpush1.bf16.msra.mxu0 %v12465_v36  ;;  %v12553_v35 = vld [vmem:[%s20297_s3 + $0x4] ss:$16 sps:$4 sm:$0xff]  }
  0x3e   : > { %1306 = vmatprep.subr.bf16.mxu1 %v12472_v37  ;;  %1499 = vmatprep.subr.bf16.mxu0 %v12475_v38  ;;  %v14476_v36 = vld [vmem:[%s14603_s29 + $0x40] sm:$0xff]   ;;  %v14477_v37 = vld [vmem:[%s14603_s29 + $0x48] sm:$0xff]  }
  0x3f   : > { %1158 = vmatmul.mubr.bf16.gmra.mrb[8].mxu0 %v14701_v39  ;;  %1238 = vmatmul.mubr.bf16.gmra.mrb[8].mxu1 %v14704_v40  ;;  %v12548_v38 = vld [vmem:[%s20295_s1 + $0x28] ss:$48 sps:$4 sm:$0xff]  }
  0x40   : > { %1167 = vmatprep.mubr.bf16.mxu0 %v20304_v2  ;;  %1247 = vmatprep.mubr.bf16.mxu1 %v20304_v2 }
  0x41   : > { %1307 = vmatpush1.bf16.msra.mxu1 %v12470_v41  ;;  %1500 = vmatpush1.bf16.msra.mxu0 %v12473_v42  ;;  %v12559_v41 = vld [vmem:[%s20295_s1 + $0x8c] ss:$48 sps:$4 sm:$0xff]   ;;  %v14478_v42 = vld [vmem:[%s14603_s29] sm:$0xff]  }
  0x42   : > { %1308 = vmatprep.subr.bf16.mxu1 %v12480_v43  ;;  %1501 = vmatprep.subr.bf16.mxu0 %v12483_v44  ;;  %v12554_v43 = vld [vmem:[%s20297_s3 + $0x20] ss:$16 sps:$4 sm:$0xff]   ;;  %v12557_v44 = vld [vmem:[%s20295_s1 + $0x88] ss:$48 sps:$4 sm:$0xff]  }
  0x45   : > { %1309 = vmatpush1.bf16.msra.mxu1 %v12478_v45  ;;  %1502 = vmatpush1.bf16.msra.mxu0 %v12481_v46  ;;  %v12562_v45 = vld [vmem:[%s20297_s3 + $0x44] ss:$16 sps:$4 sm:$0xff]   ;;  %v12568_v46 = vld [vmem:[%s20295_s1 + $0xec] ss:$48 sps:$4 sm:$0xff]  }
  0x46   : > { %1310 = vmatprep.subr.bf16.mxu1 %v12488_v47  ;;  %1503 = vmatprep.subr.bf16.mxu0 %v12491_v48  ;;  %v12560_v47 = vld [vmem:[%s20297_s3 + $0x40] ss:$16 sps:$4 sm:$0xff]   ;;  %v469_v48 = vlaneseq }
  0x47   : > { %1168 = vmatmul.mubr.bf16.gmra.mrb[12].mxu0 %v14735_v49  ;;  %1248 = vmatmul.mubr.bf16.gmra.mrb[12].mxu1 %v14738_v50 }
  0x48   : > { %1177 = vmatprep.mubr.bf16.mxu0 %v20304_v2  ;;  %1257 = vmatprep.mubr.bf16.mxu1 %v20304_v2 }
  0x49   : > { %1311 = vmatpush1.bf16.msra.mxu1 %v12486_v51  ;;  %1504 = vmatpush1.bf16.msra.mxu0 %v12489_v52  ;;  %v12577_v51 = vld [vmem:[%s20295_s1 + $0x14c] ss:$48 sps:$4 sm:$0xff]  }
  0x4a   : > { %1312 = vmatprep.subr.bf16.mxu1 %v12496_v53  ;;  %1505 = vmatprep.subr.bf16.mxu0 %v12499_v54  ;;  %v14479_v52 = vld [vmem:[%s14603_s29 + $0x8] sm:$0xff]   ;;  %v15006_v53 = vshrl.u32 %v469_v48, 7  ;;  %v12563_v54 = vld [vmem:[%s20297_s3 + $0x60] ss:$16 sps:$4 sm:$0xff]  }
  0x4c   : > { %20414 = vst [vmem:[#allocation2_spill] sm:$0xff] %v15006_v53 }
  0x4d   : > { %1313 = vmatpush1.bf16.msra.mxu1 %v12494_v55  ;;  %1506 = vmatpush1.bf16.msra.mxu0 %v12497_v56  ;;  %v12575_v55 = vld [vmem:[%s20295_s1 + $0x148] ss:$48 sps:$4 sm:$0xff]   ;;  %v12571_v56 = vld [vmem:[%s20297_s3 + $0x84] ss:$16 sps:$4 sm:$0xff]  }
  0x4e   : > { %1684 = vmatprep.subr.bf16.mxu1 %v12502_v57  ;;  %1877 = vmatprep.subr.bf16.mxu0 %v12505_v58  ;;  %v12586_v57 = vld [vmem:[%s20295_s1 + $0x1ac] ss:$48 sps:$4 sm:$0xff]   ;;  %v15025_v58 = vld [vmem:[%s20296_s2] sm:$0xff] }
  0x4f   : > { %1178 = vmatmul.mubr.bf16.gmra.mrb[16].mxu0 %v14769_v59  ;;  %1258 = vmatmul.mubr.bf16.gmra.mrb[16].mxu1 %v14772_v60 }
  0x50   : > { %1187 = vmatprep.mubr.bf16.mxu0 %v20304_v2  ;;  %1267 = vmatprep.mubr.bf16.mxu1 %v20304_v2 }
  0x57   : > { %1188 = vmatmul.mubr.bf16.gmra.mrb[20].mxu0 %v14779_v61  ;;  %1268 = vmatmul.mubr.bf16.gmra.mrb[20].mxu1 %v14782_v62 }
  0x58   : > { %1197 = vmatprep.mubr.bf16.mxu0 %v20304_v2  ;;  %1277 = vmatprep.mubr.bf16.mxu1 %v20304_v2 }
  0x5f   : > { %1198 = vmatmul.mubr.bf16.gmra.mrb[24].mxu0 %v14789_v63  ;;  %1278 = vmatmul.mubr.bf16.gmra.mrb[24].mxu1 %v14792_v0 }
  0x60   : > { %1207 = vmatprep.mubr.bf16.mxu0 %v20304_v2  ;;  %1287 = vmatprep.mubr.bf16.mxu1 %v20304_v2 }
  0x67   : > { %1208 = vmatmul.mubr.bf16.gmra.mrb[28].mxu0 %v14799_v1  ;;  %1288 = vmatmul.mubr.bf16.gmra.mrb[28].mxu1 %v14802_v3 }
  0x68   : > { %1330 = vmatprep.mubr.bf16.mxu1 %v20304_v2  ;;  %1523 = vmatprep.mubr.bf16.mxu0 %v20304_v2 }
  0x6f   : > { %1331 = vmatmul.mubr.bf16.vlgmr.msra.gmra.mrb[32].mxu1 %v14636_v18  ;;  %1524 = vmatmul.mubr.bf16.vlgmr.msra.gmra.mrb[32].mxu0 %v14636_v18  ;;  %v12526_v18 = vld [vmem:[%s20295_s1 + $0x19c] ss:$48 sps:$4 sm:$0xff]  }
  0x70   : > { %1685 = vmatpush1.bf16.msra.mxu1 %v12500_v4  ;;  %1878 = vmatpush1.bf16.msra.mxu0 %v12503_v5  ;;  %v12572_v4 = vld [vmem:[%s20297_s3 + $0xa0] ss:$16 sps:$4 sm:$0xff]   ;;  %v12593_v5 = vld [vmem:[%s20295_s1 + $0x208] ss:$48 sps:$4 sm:$0xff]  }
  0x71   : > { %1340 = vmatprep.mubr.bf16.mxu1 %v20304_v2  ;;  %1533 = vmatprep.mubr.bf16.mxu0 %v20304_v2 }
  0x72   : > { %1686 = vmatprep.subr.bf16.mxu1 %v12508_v6  ;;  %1879 = vmatprep.subr.bf16.mxu0 %v12511_v7  ;;  %v12580_v7 = vld [vmem:[%s20297_s3 + $0xc4] ss:$16 sps:$4 sm:$0xff]  }
  0x74   : > { %1687 = vmatpush1.bf16.msra.mxu1 %v12506_v8  ;;  %1880 = vmatpush1.bf16.msra.mxu0 %v12509_v9  ;;  %v12604_v8 = vld [vmem:[%s20295_s1 + $0x26c] ss:$48 sps:$4 sm:$0xff]  }
  0x75   : > { %1688 = vmatprep.subr.bf16.mxu1 %v12514_v10  ;;  %1881 = vmatprep.subr.bf16.mxu0 %v12517_v11 }
  0x77   : > { %1341 = vmatmul.mubr.bf16.gmra.mrb[36].mxu1 %v14670_v29  ;;  %1534 = vmatmul.mubr.bf16.gmra.mrb[36].mxu0 %v14670_v29  ;;  %v12539_v29 = vld [vmem:[%s20295_s1 + $0x260] ss:$48 sps:$4 sm:$0xff]  }
  0x78   : > { %1350 = vmatprep.mubr.bf16.mxu1 %v20304_v2  ;;  %1543 = vmatprep.mubr.bf16.mxu0 %v20304_v2 }
  0x79   : > { %1689 = vmatpush1.bf16.msra.mxu1 %v12512_v12  ;;  %1882 = vmatpush1.bf16.msra.mxu0 %v12515_v13 }
  0x7a   : > { %1690 = vmatprep.subr.bf16.mxu1 %v12520_v14  ;;  %1883 = vmatprep.subr.bf16.mxu0 %v12523_v15  ;;  %v12578_v14 = vld [vmem:[%s20297_s3 + $0xc0] ss:$16 sps:$4 sm:$0xff]  }
  0x7d   : > { %1691 = vmatpush1.bf16.msra.mxu1 %v12518_v16  ;;  %1884 = vmatpush1.bf16.msra.mxu0 %v12521_v17 }
  0x7e   : > { %1692 = vmatprep.subr.bf16.mxu1 %v12526_v18  ;;  %1885 = vmatprep.subr.bf16.mxu0 %v12529_v19 }
  0x7f   : > { %1351 = vmatmul.mubr.bf16.gmra.mrb[40].mxu1 %v14701_v39  ;;  %1544 = vmatmul.mubr.bf16.gmra.mrb[40].mxu0 %v14701_v39  ;;  %v12551_v39 = vld [vmem:[%s20297_s3] ss:$16 sps:$4 sm:$0xff]  }
  0x80   : > { %1360 = vmatprep.mubr.bf16.mxu1 %v20304_v2  ;;  %1553 = vmatprep.mubr.bf16.mxu0 %v20304_v2 }
  0x81   : > { %1693 = vmatpush1.bf16.msra.mxu1 %v12524_v20  ;;  %1886 = vmatpush1.bf16.msra.mxu0 %v12527_v21 }
  0x82   : > { %1694 = vmatprep.subr.bf16.mxu1 %v12532_v22  ;;  %1887 = vmatprep.subr.bf16.mxu0 %v12535_v23 }
  0x85   : > { %1695 = vmatpush1.bf16.msra.mxu1 %v12530_v24  ;;  %1888 = vmatpush1.bf16.msra.mxu0 %v12533_v25  ;;  %v12602_v24 = vld [vmem:[%s20295_s1 + $0x268] ss:$48 sps:$4 sm:$0xff]  }
  0x86   : > { %1696 = vmatprep.subr.bf16.mxu1 %v12538_v26  ;;  %1889 = vmatprep.subr.bf16.mxu0 %v12541_v27 }
  0x87   : > { %1361 = vmatmul.mubr.bf16.gmra.mrb[44].mxu1 %v14735_v49  ;;  %1554 = vmatmul.mubr.bf16.gmra.mrb[44].mxu0 %v14735_v49  ;;  %v12566_v49 = vld [vmem:[%s20295_s1 + $0xe8] ss:$48 sps:$4 sm:$0xff]  }
  0x88   : > { %1370 = vmatprep.mubr.bf16.mxu1 %v20304_v2  ;;  %1563 = vmatprep.mubr.bf16.mxu0 %v20304_v2 }
  0x89   : > { %1697 = vmatpush1.bf16.msra.mxu1 %v12536_v28  ;;  %1890 = vmatpush1.bf16.msra.mxu0 %v12539_v29  ;;  %v12583_v28 = vld [vmem:[%s20297_s3 + $0xe4] ss:$16 sps:$4 sm:$0xff]   ;;  %v12613_v29 = vld [vmem:[%s20295_s1 + $0x2cc] ss:$48 sps:$4 sm:$0xff]  }
  0x8a   : > { %1698 = vmatprep.subr.bf16.mxu1 %v12544_v30  ;;  %1891 = vmatprep.subr.bf16.mxu0 %v12547_v31 }
  0x8d   : > { %1699 = vmatpush1.bf16.msra.mxu1 %v12542_v32  ;;  %1892 = vmatpush1.bf16.msra.mxu0 %v12545_v33  ;;  %v14481_v33 = vld [vmem:[%s14603_s29 + $0x18] sm:$0xff]  }
  0x8e   : > { %2070 = vmatprep.subr.bf16.mxu1 %v12550_v34  ;;  %6317 = vmatprep.subr.bf16.mxu0 %v12553_v35  ;;  %v12581_v34 = vld [vmem:[%s20297_s3 + $0xe0] ss:$16 sps:$4 sm:$0xff]   ;;  %v12611_v35 = vld [vmem:[%s20295_s1 + $0x2c8] ss:$48 sps:$4 sm:$0xff]  }
  0x8f   : > { %1371 = vmatmul.mubr.bf16.gmra.mrb[48].mxu1 %v14769_v59  ;;  %1564 = vmatmul.mubr.bf16.gmra.mrb[48].mxu0 %v14769_v59  ;;  %v15028_v59 = vsub.s32 0, %v15006_v53 }
  0x90   : > { %1380 = vmatprep.mubr.bf16.mxu1 %v20304_v2  ;;  %1573 = vmatprep.mubr.bf16.mxu0 %v20304_v2 }
  0x91   : > { %20415 = vst [vmem:[#allocation3_spill] sm:$0xff] %v15028_v59 }
  0x97   : > { %1381 = vmatmul.mubr.bf16.gmra.mrb[52].mxu1 %v14779_v61  ;;  %1574 = vmatmul.mubr.bf16.gmra.mrb[52].mxu0 %v14779_v61  ;;  %v12584_v61 = vld [vmem:[%s20295_s1 + $0x1a8] ss:$48 sps:$4 sm:$0xff]  }
  0x98   : > { %1390 = vmatprep.mubr.bf16.mxu1 %v20304_v2  ;;  %1583 = vmatprep.mubr.bf16.mxu0 %v20304_v2 }
  0x9f   : > { %1391 = vmatmul.mubr.bf16.gmra.mrb[56].mxu1 %v14789_v63  ;;  %1584 = vmatmul.mubr.bf16.gmra.mrb[56].mxu0 %v14789_v63  ;;  %v12574_v63 = vld [vmem:[%s20297_s3 + $0xa4] ss:$16 sps:$4 sm:$0xff]  }
  0xa0   : > { %1400 = vmatprep.mubr.bf16.mxu1 %v20304_v2  ;;  %1593 = vmatprep.mubr.bf16.mxu0 %v20304_v2 }
  0xa7   : > { %1401 = vmatmul.mubr.bf16.gmra.mrb[60].mxu1 %v14799_v1  ;;  %1594 = vmatmul.mubr.bf16.gmra.mrb[60].mxu0 %v14799_v1  ;;  %v14480_v1 = vld [vmem:[%s14603_s29 + $0x10] sm:$0xff]  }
  0xa8   : > { %1410 = vmatprep.mubr.bf16.mxu1 %v20304_v2  ;;  %1603 = vmatprep.mubr.bf16.mxu0 %v20304_v2 }
  0xaf   : > { %1411 = vmatmul.mubr.bf16.gmra.mrb[64].mxu1 %v14476_v36  ;;  %1604 = vmatmul.mubr.bf16.gmra.mrb[64].mxu0 %v14476_v36 }
  0xb0   : > { %1420 = vmatprep.mubr.bf16.mxu1 %v20304_v2  ;;  %1613 = vmatprep.mubr.bf16.mxu0 %v20304_v2 }
  0xb7   : > { %1421 = vmatmul.mubr.bf16.gmra.mrb[68].mxu1 %v14477_v37  ;;  %1614 = vmatmul.mubr.bf16.gmra.mrb[68].mxu0 %v14477_v37 }
  0xb8   : > { %1430 = vmatprep.mubr.bf16.mxu1 %v20304_v2  ;;  %1623 = vmatprep.mubr.bf16.mxu0 %v20304_v2 }
  0xbf   : > { %1431 = vmatmul.mubr.bf16.gmra.mrb[72].mxu1 %v14704_v40  ;;  %1624 = vmatmul.mubr.bf16.gmra.mrb[72].mxu0 %v14704_v40  ;;  %v12556_v40 = vld [vmem:[%s20297_s3 + $0x24] ss:$16 sps:$4 sm:$0xff]  }
  0xc0   : > { %1440 = vmatprep.mubr.bf16.mxu1 %v20304_v2  ;;  %1633 = vmatprep.mubr.bf16.mxu0 %v20304_v2 }
  0xc7   : > { %1441 = vmatmul.mubr.bf16.gmra.mrb[76].mxu1 %v14738_v50  ;;  %1634 = vmatmul.mubr.bf16.gmra.mrb[76].mxu0 %v14738_v50  ;;  %v12565_v50 = vld [vmem:[%s20297_s3 + $0x64] ss:$16 sps:$4 sm:$0xff]  }
  0xc8   : > { %1450 = vmatprep.mubr.bf16.mxu1 %v20304_v2  ;;  %1643 = vmatprep.mubr.bf16.mxu0 %v20304_v2 }
  0xcf   : > { %1451 = vmatmul.mubr.bf16.gmra.mrb[80].mxu1 %v14772_v60  ;;  %1644 = vmatmul.mubr.bf16.gmra.mrb[80].mxu0 %v14772_v60  ;;  %v12569_v60 = vld [vmem:[%s20297_s3 + $0x80] ss:$16 sps:$4 sm:$0xff]  }
  0xd0   : > { %1460 = vmatprep.mubr.bf16.mxu1 %v20304_v2  ;;  %1653 = vmatprep.mubr.bf16.mxu0 %v20304_v2 }
  0xd7   : > { %1461 = vmatmul.mubr.bf16.gmra.mrb[84].mxu1 %v14782_v62  ;;  %1654 = vmatmul.mubr.bf16.gmra.mrb[84].mxu0 %v14782_v62  ;;  %v15037_v62 = vsub.s32 1, %v15006_v53 }
  0xd8   : > { %1470 = vmatprep.mubr.bf16.mxu1 %v20304_v2  ;;  %1663 = vmatprep.mubr.bf16.mxu0 %v20304_v2 }
  0xd9   : > { %20416 = vst [vmem:[#allocation4_spill] sm:$0xff] %v15037_v62  ;;  %v15058_v6 = vrot.slane %v15025_v58, %v15037_v62 }
  0xdf   : > { %1471 = vmatmul.mubr.bf16.gmra.mrb[88].mxu1 %v14792_v0  ;;  %1664 = vmatmul.mubr.bf16.gmra.mrb[88].mxu0 %v14792_v0  ;;  %v12595_v0 = vld [vmem:[%s20295_s1 + $0x20c] ss:$48 sps:$4 sm:$0xff]  }
  0xe0   : > { %1480 = vmatprep.mubr.bf16.mxu1 %v20304_v2  ;;  %1673 = vmatprep.mubr.bf16.mxu0 %v20304_v2 }
  0xe7   : > { %1481 = vmatmul.mubr.bf16.gmra.mrb[92].mxu1 %v14802_v3  ;;  %1674 = vmatmul.mubr.bf16.gmra.mrb[92].mxu0 %v14802_v3  ;;  %v15048_v3 = vrot.slane %v15025_v58, %v15028_v59 }
  0xe8   : > { %1716 = vmatprep.mubr.bf16.mxu1 %v20304_v2  ;;  %1909 = vmatprep.mubr.bf16.mxu0 %v20304_v2 }
  0xef   : > { %1717 = vmatmul.mubr.bf16.vlgmr.msra.gmra.mrb[96].mxu1 %v14478_v42  ;;  %1910 = vmatmul.mubr.bf16.vlgmr.msra.gmra.mrb[96].mxu0 %v14478_v42 }
  0xf0   : > { %2071 = vmatpush1.bf16.msra.mxu1 %v12548_v38  ;;  %6318 = vmatpush1.bf16.msra.mxu0 %v12551_v39  ;;  %v12589_v39 = vld [vmem:[%s20297_s3 + $0x104] ss:$16 sps:$4 sm:$0xff]  }
  0xf1   : > { %1726 = vmatprep.mubr.bf16.mxu1 %v20304_v2  ;;  %1919 = vmatprep.mubr.bf16.mxu0 %v20304_v2 }
  0xf2   : > { %6319 = vmatprep.subr.bf16.mxu0 %v12556_v40  ;;  %2072 = vmatprep.subr.bf16.mxu1 %v12559_v41  ;;  %v12625_v40 = vld [vmem:[%s20297_s3 + $0xc] ss:$16 sps:$4 sm:$0xff]  }
  0xf4   : > { %6320 = vmatpush1.bf16.msra.mxu0 %v12554_v43  ;;  %2073 = vmatpush1.bf16.msra.mxu1 %v12557_v44 }
  0xf5   : > { %6321 = vmatprep.subr.bf16.mxu0 %v12562_v45  ;;  %2074 = vmatprep.subr.bf16.mxu1 %v12568_v46 }
  0xf7   : > { %1727 = vmatmul.mubr.bf16.gmra.mrb[100].mxu1 %v14479_v52  ;;  %1920 = vmatmul.mubr.bf16.gmra.mrb[100].mxu0 %v14479_v52 }
  0xf8   : > { %1736 = vmatprep.mubr.bf16.mxu1 %v20304_v2  ;;  %1929 = vmatprep.mubr.bf16.mxu0 %v20304_v2 }
  0xf9   : > { %6322 = vmatpush1.bf16.msra.mxu0 %v12560_v47  ;;  %2075 = vmatpush1.bf16.msra.mxu1 %v12566_v49 }
  0xfa   : > { %6323 = vmatprep.subr.bf16.mxu0 %v12565_v50  ;;  %2076 = vmatprep.subr.bf16.mxu1 %v12577_v51 }
  0xfd   : > { %6324 = vmatpush1.bf16.msra.mxu0 %v12563_v54  ;;  %2077 = vmatpush1.bf16.msra.mxu1 %v12575_v55 }
  0xfe   : > { %6325 = vmatprep.subr.bf16.mxu0 %v12571_v56  ;;  %2078 = vmatprep.subr.bf16.mxu1 %v12586_v57  ;;  %v12587_v56 = vld [vmem:[%s20297_s3 + $0x100] ss:$16 sps:$4 sm:$0xff]  }
  0xff   : > { %1737 = vmatmul.mubr.bf16.gmra.mrb[104].mxu1 %v14480_v1  ;;  %1930 = vmatmul.mubr.bf16.gmra.mrb[104].mxu0 %v14480_v1 }
 0x100   : > { %1746 = vmatprep.mubr.bf16.mxu1 %v20304_v2  ;;  %1939 = vmatprep.mubr.bf16.mxu0 %v20304_v2 }
 0x101   : > { %6326 = vmatpush1.bf16.msra.mxu0 %v12569_v60  ;;  %2079 = vmatpush1.bf16.msra.mxu1 %v12584_v61 }
 0x102   : > { %v1139_v9 = vpop.f32.mrb[0].mxu0  ;;  %v1219_v10 = vpop.f32.mrb[0].mxu1  ;;  %6327 = vmatprep.subr.bf16.mxu0 %v12574_v63  ;;  %2080 = vmatprep.subr.bf16.mxu1 %v12595_v0  ;;  %v12592_v63 = vld [vmem:[%s20297_s3 + $0x124] ss:$16 sps:$4 sm:$0xff]  }
 0x103   : > { %v1140_v11 = vadd.f32 %v1139_v9, %v15048_v3  ;;  %v1141_v12 = vpop.f32.mrb[1].mxu0  ;;  %v1221_v13 = vpop.f32.mrb[1].mxu1  ;;  %v1220_v15 = vadd.f32 %v1219_v10, %v15048_v3 }
 0x104   : > { %v1142_v16 = vadd.f32 %v1141_v12, %v15058_v6  ;;  %v1143_v17 = vpop.f32.mrb[2].mxu0  ;;  %v1223_v18 = vpop.f32.mrb[2].mxu1  ;;  %v1222_v19 = vadd.f32 %v1221_v13, %v15058_v6 }
 0x105   : > { %v2263_v20 = vmul.f32 0.5, %v1140_v11  ;;  %v1144_v21 = vadd.f32 %v1143_v17, %v15048_v3  ;;  %v1145_v22 = vpop.f32.mrb[3].mxu0  ;;  %v1225_v23 = vpop.f32.mrb[3].mxu1  ;;  %6328 = vmatpush1.bf16.msra.mxu0 %v12572_v4  ;;  %2081 = vmatpush1.bf16.msra.mxu1 %v12593_v5  ;;  %v1224_v25 = vadd.f32 %v1223_v18, %v15048_v3  ;;  %v2455_v31 = vmul.f32 0.5, %v1220_v15  ;;  %v14482_v4 = vld [vmem:[%s14603_s29 + $0x20] sm:$0xff]  }
 0x106   : > { %v2264_v26 = vmul.f32 0.5, %v1142_v16  ;;  %v1146_v27 = vadd.f32 %v1145_v22, %v15058_v6  ;;  %6329 = vmatprep.subr.bf16.mxu0 %v12580_v7  ;;  %2082 = vmatprep.subr.bf16.mxu1 %v12604_v8  ;;  %v1226_v30 = vadd.f32 %v1225_v23, %v15058_v6  ;;  %v2456_v36 = vmul.f32 0.5, %v1222_v19  ;;  %v12590_v11 = vld [vmem:[%s20297_s3 + $0x120] ss:$16 sps:$4 sm:$0xff]   ;;  %v12598_v16 = vld [vmem:[%s20297_s3 + $0x144] ss:$16 sps:$4 sm:$0xff]  }
 0x107   : > { %13260 = vtanh.f32 %v2263_v20  ;;  %v2275_v32 = vmul.f32 0.5, %v1144_v21  ;;  %1747 = vmatmul.mubr.bf16.gmra.mrb[108].mxu1 %v14481_v33  ;;  %1940 = vmatmul.mubr.bf16.gmra.mrb[108].mxu0 %v14481_v33  ;;  %v2467_v37 = vmul.f32 0.5, %v1224_v25 }
 0x108   : > { %13262 = vtanh.f32 %v2264_v26  ;;  %v2276_v38 = vmul.f32 0.5, %v1146_v27  ;;  %1756 = vmatprep.mubr.bf16.mxu1 %v20304_v2  ;;  %1949 = vmatprep.mubr.bf16.mxu0 %v20304_v2  ;;  %v2468_v41 = vmul.f32 0.5, %v1226_v30 }
 0x109   : > { %13264 = vtanh.f32 %v2275_v32  ;;  %6330 = vmatpush1.bf16.msra.mxu0 %v12578_v14  ;;  %2083 = vmatpush1.bf16.msra.mxu1 %v12602_v24 }
 0x10a   : > { %13266 = vtanh.f32 %v2276_v38  ;;  %v1149_v42 = vpop.f32.mrb[4].mxu0  ;;  %v1229_v43 = vpop.f32.mrb[4].mxu1  ;;  %6331 = vmatprep.subr.bf16.mxu0 %v12583_v28  ;;  %2084 = vmatprep.subr.bf16.mxu1 %v12613_v29  ;;  %v12596_v28 = vld [vmem:[%s20297_s3 + $0x140] ss:$16 sps:$4 sm:$0xff]  }
 0x10b   : > { %v1150_v44 = vadd.f32 %v1149_v42, %v15048_v3  ;;  %v1151_v45 = vpop.f32.mrb[5].mxu0  ;;  %v1231_v46 = vpop.f32.mrb[5].mxu1  ;;  %13268 = vtanh.f32 %v2456_v36  ;;  %v1230_v57 = vadd.f32 %v1229_v43, %v15048_v3 }
 0x10c   : > { %v1152_v47 = vadd.f32 %v1151_v45, %v15058_v6  ;;  %v1153_v48 = vpop.f32.mrb[6].mxu0  ;;  %v1233_v49 = vpop.f32.mrb[6].mxu1  ;;  %13270 = vtanh.f32 %v2468_v41  ;;  %v1232_v50 = vadd.f32 %v1231_v46, %v15058_v6  ;;  %v12601_v41 = vld [vmem:[%s20297_s3 + $0x164] ss:$16 sps:$4 sm:$0xff]  }
 0x10d   : > { %v2287_v51 = vmul.f32 0.5, %v1150_v44  ;;  %v1154_v52 = vadd.f32 %v1153_v48, %v15048_v3  ;;  %v1155_v54 = vpop.f32.mrb[7].mxu0  ;;  %v1235_v55 = vpop.f32.mrb[7].mxu1  ;;  %6332 = vmatpush1.bf16.msra.mxu0 %v12581_v34  ;;  %2085 = vmatpush1.bf16.msra.mxu1 %v12611_v35  ;;  %13272 = vtanh.f32 %v2455_v31  ;;  %v1234_v9 = vadd.f32 %v1233_v49, %v15048_v3  ;;  %v14483_v44 = vld [vmem:[%s14603_s29 + $0x28] sm:$0xff]  }
 0x10e   : > { %v2288_v60 = vmul.f32 0.5, %v1152_v47  ;;  %v1156_v61 = vadd.f32 %v1155_v54, %v15058_v6  ;;  %6333 = vmatprep.subr.bf16.mxu0 %v12589_v39  ;;  %7475 = vmatprep.subr.bf16.mxu1 %v12625_v40  ;;  %13274 = vtanh.f32 %v2467_v37  ;;  %v1236_v0 = vadd.f32 %v1235_v55, %v15058_v6  ;;  %v12607_v54 = vld [vmem:[%s20297_s3 + $0x184] ss:$16 sps:$4 sm:$0xff]  }
 0x10f   : > { %13276 = vtanh.f32 %v2287_v51  ;;  %v2299_v1 = vmul.f32 0.5, %v1154_v52  ;;  %1757 = vmatmul.mubr.bf16.gmra.mrb[112].mxu1 %v14482_v4  ;;  %1950 = vmatmul.mubr.bf16.gmra.mrb[112].mxu0 %v14482_v4  ;;  %v2480_v5 = vmul.f32 0.5, %v1232_v50  ;;  %v2479_v17 = vmul.f32 0.5, %v1230_v57  ;;  %v12599_v52 = vld [vmem:[%s20297_s3 + $0x160] ss:$16 sps:$4 sm:$0xff]  }
 0x110   : > { %13278 = vtanh.f32 %v2288_v60  ;;  %v2300_v7 = vmul.f32 0.5, %v1156_v61  ;;  %1766 = vmatprep.mubr.bf16.mxu1 %v20304_v2  ;;  %1959 = vmatprep.mubr.bf16.mxu0 %v20304_v2  ;;  %v2492_v8 = vmul.f32 0.5, %v1236_v0  ;;  %v15137_v29 = vmul.f32 0.5, %v1234_v9 }
 0x111   : > { %v13261_v10 = vpop.eup %13260  ;;  %13280 = vtanh.f32 %v2299_v1  ;;  %6334 = vmatpush1.bf16.msra.mxu0 %v12587_v56 }
 0x112   : > { %v13263_v12 = vpop.eup %13262  ;;  %v3031_v13 = vmul.f32 0.5, %v13261_v10  ;;  %13282 = vtanh.f32 %v2300_v7  ;;  %v1159_v14 = vpop.f32.mrb[8].mxu0  ;;  %6335 = vmatprep.subr.bf16.mxu0 %v12592_v63  ;;  %v12605_v10 = vld [vmem:[%s20297_s3 + $0x180] ss:$16 sps:$4 sm:$0xff]  }
 0x113   : > { %v15123_v15 = vpop.f32.mrb[8].mxu1  ;;  %v13265_v18 = vpop.eup %13264  ;;  %v1160_v19 = vadd.f32 %v1159_v14, %v15048_v3  ;;  %v3032_v22 = vmul.f32 0.5, %v13263_v12  ;;  %13284 = vtanh.f32 %v2480_v5 }
 0x114   : > { %v1161_v20 = vpop.f32.mrb[9].mxu0  ;;  %v15129_v21 = vpop.f32.mrb[9].mxu1  ;;  %v3043_v24 = vmul.f32 0.5, %v13265_v18  ;;  %13286 = vtanh.f32 %v2492_v8  ;;  %v3415_v31 = vadd.f32 0.5, %v3031_v13 }
 0x115   : > { %v13267_v23 = vpop.eup %13266  ;;  %v1162_v25 = vadd.f32 %v1161_v20, %v15058_v6  ;;  %v1163_v26 = vpop.f32.mrb[10].mxu0  ;;  %v2311_v32 = vmul.f32 0.5, %v1160_v19  ;;  %6336 = vmatpush1.bf16.msra.mxu0 %v12590_v11  ;;  %13288 = vtanh.f32 %v2479_v17  ;;  %v3416_v45 = vadd.f32 0.5, %v3032_v22 }
 0x116   : > { %v15132_v27 = vpop.f32.mrb[10].mxu1  ;;  %v13269_v30 = vpop.eup %13268  ;;  %v1164_v33 = vadd.f32 %v1163_v26, %v15048_v3  ;;  %v3044_v36 = vmul.f32 0.5, %v13267_v23  ;;  %v3427_v38 = vadd.f32 0.5, %v3043_v24  ;;  %6337 = vmatprep.subr.bf16.mxu0 %v12598_v16 }
 0x117   : > { %v1165_v34 = vpop.f32.mrb[11].mxu0  ;;  %v15140_v35 = vpop.f32.mrb[11].mxu1  ;;  %v2312_v39 = vmul.f32 0.5, %v1162_v25  ;;  %13290 = vtanh.f32 %v2311_v32  ;;  %1767 = vmatmul.mubr.bf16.gmra.mrb[116].mxu1 %v14483_v44  ;;  %1960 = vmatmul.mubr.bf16.gmra.mrb[116].mxu0 %v14483_v44  ;;  %v3224_v50 = vmul.f32 0.5, %v13269_v30 }
 0x118   : > { %v13271_v37 = vpop.eup %13270  ;;  %v1166_v40 = vadd.f32 %v1165_v34, %v15058_v6  ;;  %v2323_v43 = vmul.f32 0.5, %v1164_v33  ;;  %v3428_v46 = vadd.f32 0.5, %v3044_v36  ;;  %1776 = vmatprep.mubr.bf16.mxu1 %v20304_v2  ;;  %1969 = vmatprep.mubr.bf16.mxu0 %v20304_v2  ;;  %v15149_v49 = vpack.c.bf16 %v3427_v38, %v3415_v31  ;;  %v12610_v36 = vld [vmem:[%s20297_s3 + $0x1a4] ss:$16 sps:$4 sm:$0xff]  }
 0x119   : > { %v13273_v42 = vpop.eup %13272  ;;  %13292 = vtanh.f32 %v2312_v39  ;;  %6338 = vmatpush1.bf16.msra.mxu0 %v12596_v28  ;;  %v3236_v56 = vmul.f32 0.5, %v13271_v37  ;;  %v3608_v1 = vadd.f32 0.5, %v3224_v50 }
 0x11a   : > { %v13275_v47 = vpop.eup %13274  ;;  %v2324_v48 = vmul.f32 0.5, %v1166_v40  ;;  %20417 = vst [vmem:[#allocation5_spill] sm:$0xff] %v15149_v49  ;;  %13294 = vtanh.f32 %v2323_v43  ;;  %v15157_v55 = vpack.c.bf16 %v3428_v46, %v3416_v45  ;;  %v3223_v57 = vmul.f32 0.5, %v13273_v42  ;;  %v1169_v61 = vpop.f32.mrb[12].mxu0  ;;  %6339 = vmatprep.subr.bf16.mxu0 %v12601_v41  ;;  %v15180_v40 = vld [vmem:[%s14603_s29 + $0x30] sm:$0xff]  }
 0x11b   : > { %v13277_v51 = vpop.eup %13276  ;;  %v15159_v63 = vpop.f32.mrb[12].mxu1  ;;  %v3235_v4 = vmul.f32 0.5, %v13275_v47  ;;  %v1170_v7 = vadd.f32 %v1169_v61, %v15048_v3  ;;  %v3620_v12 = vadd.f32 0.5, %v3236_v56  ;;  %v1242_v61 = vadd.f32 %v15129_v21, %v15058_v6  ;;  %v12614_v21 = vld [vmem:[%s20297_s3 + $0x1c0] ss:$16 sps:$4 sm:$0xff]  }
 0x11c   : > { %20418 = vst [vmem:[#allocation6_spill] sm:$0xff] %v15157_v55  ;;  %v13279_v60 = vpop.eup %13278  ;;  %13296 = vtanh.f32 %v2324_v48  ;;  %20419 = vst [vmem:[#allocation7_spill] sm:$0xff] %v15159_v63  ;;  %v3055_v0 = vmul.f32 0.5, %v13277_v51  ;;  %v1171_v8 = vpop.f32.mrb[13].mxu0  ;;  %v3607_v13 = vadd.f32 0.5, %v3223_v57 }
 0x11d   : > { %v13281_v5 = vpop.eup %13280  ;;  %v15162_v9 = vpop.f32.mrb[13].mxu1  ;;  %v3056_v11 = vmul.f32 0.5, %v13279_v60  ;;  %v1172_v16 = vadd.f32 %v1171_v8, %v15058_v6  ;;  %v3619_v22 = vadd.f32 0.5, %v3235_v4  ;;  %v2335_v24 = vmul.f32 0.5, %v1170_v7  ;;  %6340 = vmatpush1.bf16.msra.mxu0 %v12599_v52  ;;  %v12608_v48 = vld [vmem:[%s20297_s3 + $0x1a0] ss:$16 sps:$4 sm:$0xff]  }
 0x11e   : > { %v13283_v14 = vpop.eup %13282  ;;  %v1173_v17 = vpop.f32.mrb[14].mxu0  ;;  %v3067_v19 = vmul.f32 0.5, %v13281_v5  ;;  %v3439_v20 = vadd.f32 0.5, %v3055_v0  ;;  %6341 = vmatprep.subr.bf16.mxu0 %v12607_v54  ;;  %v15177_v38 = vpack.c.bf16 %v3620_v12, %v3608_v1  ;;  %v12616_v57 = vld [vmem:[%s20297_s3 + $0x1c4] ss:$16 sps:$4 sm:$0xff]  }
 0x11f   : > { %v15168_v18 = vpop.f32.mrb[14].mxu1  ;;  %v13285_v23 = vpop.eup %13284  ;;  %v1174_v25 = vadd.f32 %v1173_v17, %v15048_v3  ;;  %v3068_v30 = vmul.f32 0.5, %v13283_v14  ;;  %v3440_v31 = vadd.f32 0.5, %v3056_v11  ;;  %v2336_v33 = vmul.f32 0.5, %v1172_v16  ;;  %1777 = vmatmul.mubr.bf16.gmra.mrb[120].mxu1 %v15180_v40  ;;  %1970 = vmatmul.mubr.bf16.gmra.mrb[120].mxu0 %v15180_v40 }
 0x120   : > { %20420 = vst [vmem:[#allocation8_spill] sm:$0xff] %v15168_v18  ;;  %v1175_v26 = vpop.f32.mrb[15].mxu0  ;;  %v15171_v28 = vpop.f32.mrb[15].mxu1  ;;  %v3451_v37 = vadd.f32 0.5, %v3067_v19  ;;  %13298 = vtanh.f32 %v2335_v24  ;;  %v15184_v42 = vpack.c.bf16 %v3619_v22, %v3607_v13  ;;  %1786 = vmatprep.mubr.bf16.mxu1 %v20304_v2  ;;  %1979 = vmatprep.mubr.bf16.mxu0 %v20304_v2  ;;  %v3248_v46 = vmul.f32 0.5, %v13285_v23 }
 0x121   : > { %v13287_v32 = vpop.eup %13286  ;;  %v1176_v34 = vadd.f32 %v1175_v26, %v15058_v6  ;;  %v2347_v39 = vmul.f32 0.5, %v1174_v25  ;;  %v3452_v41 = vadd.f32 0.5, %v3068_v30  ;;  %13300 = vtanh.f32 %v2336_v33  ;;  %6342 = vmatpush1.bf16.msra.mxu0 %v12605_v10  ;;  %v12619_v30 = vld [vmem:[%s20297_s3 + $0x1e4] ss:$16 sps:$4 sm:$0xff]   ;;  %v15226_v33 = vld [vmem:[%s14603_s29 + $0x38] sm:$0xff]  }
 0x122   : > { %v15186_v43 = vpop.eup %13288  ;;  %v15190_v45 = vpack.c.bf16 %v3451_v37, %v3439_v20  ;;  %v3260_v51 = vmul.f32 0.5, %v13287_v32  ;;  %v1179_v54 = vpop.f32.mrb[16].mxu0  ;;  %6343 = vmatprep.subr.bf16.mxu0 %v12610_v36  ;;  %v3632_v16 = vadd.f32 0.5, %v3248_v46  ;;  %v1246_v17 = vadd.f32 %v15140_v35, %v15058_v6  ;;  %v12617_v46 = vld [vmem:[%s20297_s3 + $0x1e0] ss:$16 sps:$4 sm:$0xff]  }
 0x123   : > { %v2348_v44 = vmul.f32 0.5, %v1176_v34  ;;  %v13291_v47 = vpop.eup %13290  ;;  %13302 = vtanh.f32 %v2347_v39  ;;  %v15195_v50 = vpack.c.bf16 %v3452_v41, %v3440_v31  ;;  %v15197_v56 = vpop.f32.mrb[16].mxu1  ;;  %v1180_v1 = vadd.f32 %v1179_v54, %v15048_v3 }
 0x124   : > { %20421 = vst [vmem:[#allocation9_spill] sm:$0xff] %v15190_v45  ;;  %v13293_v52 = vpop.eup %13292  ;;  %20423 = vst [vmem:[#allocation11_spill] sm:$0xff] %v15197_v56  ;;  %v3079_v60 = vmul.f32 0.5, %v13291_v47  ;;  %v1181_v4 = vpop.f32.mrb[17].mxu0  ;;  %v3644_v8 = vadd.f32 0.5, %v3260_v51  ;;  %v2504_v41 = vmul.f32 0.5, %v1242_v61  ;;  %v1244_v51 = vadd.f32 %v15132_v27, %v15048_v3 }
 0x125   : > { %20422 = vst [vmem:[#allocation10_spill] sm:$0xff] %v15195_v50  ;;  %13304 = vtanh.f32 %v2348_v44  ;;  %v13295_v0 = vpop.eup %13294  ;;  %v15205_v5 = vpop.f32.mrb[17].mxu1  ;;  %v3080_v7 = vmul.f32 0.5, %v13293_v52  ;;  %v1182_v11 = vadd.f32 %v1181_v4, %v15058_v6  ;;  %v2359_v19 = vmul.f32 0.5, %v1180_v1  ;;  %6344 = vmatpush1.bf16.msra.mxu0 %v12608_v48 }
 0x126   : > { %20424 = vst [vmem:[#allocation12_spill] sm:$0xff] %v15205_v5  ;;  %13306 = vtanh.f32 %v15137_v29  ;;  %v13297_v10 = vpop.eup %13296  ;;  %v1183_v12 = vpop.f32.mrb[18].mxu0  ;;  %v3091_v14 = vmul.f32 0.5, %v13295_v0  ;;  %v3463_v24 = vadd.f32 0.5, %v3079_v60  ;;  %6345 = vmatprep.subr.bf16.mxu0 %v12616_v57  ;;  %v15223_v35 = vpack.c.bf16 %v3644_v8, %v3632_v16  ;;  %v12622_v60 = vld [vmem:[%s20297_s3 + $0x204] ss:$16 sps:$4 sm:$0xff]  }
 0x127   : > { %v15209_v13 = vpop.f32.mrb[18].mxu1  ;;  %v1184_v20 = vadd.f32 %v1183_v12, %v15048_v3  ;;  %v1185_v29 = vpop.f32.mrb[19].mxu0  ;;  %v3092_v23 = vmul.f32 0.5, %v13297_v10  ;;  %v2360_v25 = vmul.f32 0.5, %v1182_v11  ;;  %13308 = vtanh.f32 %v2359_v19  ;;  %1787 = vmatmul.mubr.bf16.gmra.mrb[124].mxu1 %v15226_v33  ;;  %1980 = vmatmul.mubr.bf16.gmra.mrb[124].mxu0 %v15226_v33 }
 0x128   : > { %20425 = vst [vmem:[#allocation13_spill] sm:$0xff] %v15209_v13  ;;  %v15217_v22 = vpop.f32.mrb[19].mxu1  ;;  %v1186_v26 = vadd.f32 %v1185_v29, %v15058_v6  ;;  %v3475_v31 = vadd.f32 0.5, %v3091_v14  ;;  %20427 = vst [vmem:[#allocation15_spill] sm:$0xff] %v15223_v35  ;;  %v3464_v34 = vadd.f32 0.5, %v3080_v7  ;;  %1796 = vmatprep.mubr.bf16.mxu1 %v20304_v2  ;;  %1989 = vmatprep.mubr.bf16.mxu0 %v20304_v2  ;;  %v2516_v48 = vmul.f32 0.5, %v1246_v17 }
 0x129   : > { %20426 = vst [vmem:[#allocation14_spill] sm:$0xff] %v15217_v22  ;;  %v2371_v32 = vmul.f32 0.5, %v1184_v20  ;;  %v3476_v36 = vadd.f32 0.5, %v3092_v23  ;;  %13310 = vtanh.f32 %v2360_v25  ;;  %6346 = vmatpush1.bf16.msra.mxu0 %v12614_v21  ;;  %v1240_v27 = vadd.f32 %v15123_v15, %v15048_v3  ;;  %v15348_v13 = vld [vmem:[%s14603_s29 + $0x58] sm:$0xff]  }
 0x12a   : > { %v2372_v37 = vmul.f32 0.5, %v1186_v26  ;;  %v15232_v39 = vpack.c.bf16 %v3475_v31, %v3463_v24  ;;  %v13299_v44 = vpop.eup %13298  ;;  %v1189_v54 = vpop.f32.mrb[20].mxu0  ;;  %6347 = vmatprep.subr.bf16.mxu0 %v12619_v30  ;;  %v3247_v16 = vmul.f32 0.5, %v15186_v43  ;;  %v2515_v24 = vmul.f32 0.5, %v1244_v51  ;;  %20449 = vst [vmem:[#allocation36_spill] sm:$0xff] %v15348_v13 }
 0x12b   : > { %13312 = vtanh.f32 %v2371_v32  ;;  %v15237_v47 = vpack.c.bf16 %v3476_v36, %v3464_v34  ;;  %v13301_v52 = vpop.eup %13300  ;;  %v15241_v57 = vpop.f32.mrb[20].mxu1  ;;  %v3103_v61 = vmul.f32 0.5, %v13299_v44  ;;  %v1190_v1 = vadd.f32 %v1189_v54, %v15048_v3  ;;  %v15260_v32 = vld [vmem:[%s14603_s29 + $0x40] sm:$0xff]  }
 0x12c   : > { %20428 = vst [vmem:[#allocation16_spill] sm:$0xff] %v15232_v39  ;;  %13314 = vtanh.f32 %v2372_v37  ;;  %20430 = vst [vmem:[#allocation18_spill] sm:$0xff] %v15241_v57  ;;  %v1191_v4 = vpop.f32.mrb[21].mxu0  ;;  %v15247_v7 = vpop.f32.mrb[21].mxu1  ;;  %v3104_v8 = vmul.f32 0.5, %v13301_v52  ;;  %v2503_v51 = vmul.f32 0.5, %v1240_v27 }
 0x12d   : > { %20429 = vst [vmem:[#allocation17_spill] sm:$0xff] %v15237_v47  ;;  %v13303_v0 = vpop.eup %13302  ;;  %20431 = vst [vmem:[#allocation19_spill] sm:$0xff] %v15247_v7  ;;  %13316 = vtanh.f32 %v2504_v41  ;;  %v1192_v11 = vadd.f32 %v1191_v4, %v15058_v6  ;;  %v1193_v12 = vpop.f32.mrb[22].mxu0  ;;  %v2383_v19 = vmul.f32 0.5, %v1190_v1  ;;  %6348 = vmatpush1.bf16.msra.mxu0 %v12617_v46  ;;  %v3487_v30 = vadd.f32 0.5, %v3103_v61 }
 0x12e   : > { %v15252_v21 = vpop.f32.mrb[22].mxu1  ;;  %v3115_v14 = vmul.f32 0.5, %v13303_v0  ;;  %13318 = vtanh.f32 %v2516_v48  ;;  %v1194_v20 = vadd.f32 %v1193_v12, %v15048_v3  ;;  %v1195_v29 = vpop.f32.mrb[23].mxu0  ;;  %6510 = vmatprep.subr.bf16.mxu0 %v12622_v60  ;;  %v3488_v34 = vadd.f32 0.5, %v3104_v8 }
 0x12f   : > { %v13305_v10 = vpop.eup %13304  ;;  %20432 = vst [vmem:[#allocation20_spill] sm:$0xff] %v15252_v21  ;;  %v15256_v23 = vpop.f32.mrb[23].mxu1  ;;  %v2384_v25 = vmul.f32 0.5, %v1192_v11  ;;  %v1196_v26 = vadd.f32 %v1195_v29, %v15058_v6  ;;  %13320 = vtanh.f32 %v2383_v19  ;;  %1797 = vmatmul.mubr.bf16.gmra.mrb[128].mxu1 %v15260_v32  ;;  %1990 = vmatmul.mubr.bf16.gmra.mrb[128].mxu0 %v15260_v32  ;;  %v3631_v0 = vadd.f32 0.5, %v3247_v16 }
 0x130   : > { %v13307_v17 = vpop.eup %13306  ;;  %20433 = vst [vmem:[#allocation21_spill] sm:$0xff] %v15256_v23  ;;  %v3116_v15 = vmul.f32 0.5, %v13305_v10  ;;  %v3499_v31 = vadd.f32 0.5, %v3115_v14  ;;  %v2395_v43 = vmul.f32 0.5, %v1194_v20  ;;  %1806 = vmatprep.mubr.bf16.mxu1 %v20304_v2  ;;  %1999 = vmatprep.mubr.bf16.mxu0 %v20304_v2 }
 0x131   : > { %13322 = vtanh.f32 %v2384_v25  ;;  %v2396_v37 = vmul.f32 0.5, %v1196_v26  ;;  %v3259_v44 = vmul.f32 0.5, %v13307_v17  ;;  %v13309_v46 = vpop.eup %13308 }
 0x132   : > { %v3500_v36 = vadd.f32 0.5, %v3116_v15  ;;  %v15266_v41 = vpack.c.bf16 %v3499_v31, %v3487_v30  ;;  %13324 = vtanh.f32 %v2395_v43  ;;  %v1199_v54 = vpop.f32.mrb[24].mxu0  ;;  %v15270_v60 = vpop.f32.mrb[24].mxu1  ;;  %v3127_v61 = vmul.f32 0.5, %v13309_v46  ;;  %v15285_v46 = vld [vmem:[%s14603_s29 + $0x48] sm:$0xff]  }
 0x133   : > { %v13311_v52 = vpop.eup %13310  ;;  %13326 = vtanh.f32 %v2396_v37  ;;  %20435 = vst [vmem:[#allocation23_spill] sm:$0xff] %v15270_v60  ;;  %v3643_v1 = vadd.f32 0.5, %v3259_v44  ;;  %v1200_v8 = vadd.f32 %v1199_v54, %v15048_v3  ;;  %v1201_v10 = vpop.f32.mrb[25].mxu0 }
 0x134   : > { %v15268_v48 = vpack.c.bf16 %v3500_v36, %v3488_v34  ;;  %v15273_v11 = vpop.f32.mrb[25].mxu1  ;;  %v3128_v12 = vmul.f32 0.5, %v13311_v52  ;;  %13328 = vtanh.f32 %v2515_v24  ;;  %v1202_v17 = vadd.f32 %v1201_v10, %v15058_v6  ;;  %v1203_v27 = vpop.f32.mrb[26].mxu0 }
 0x135   : > { %v13313_v4 = vpop.eup %13312  ;;  %20436 = vst [vmem:[#allocation24_spill] sm:$0xff] %v15273_v11  ;;  %v15276_v19 = vpop.f32.mrb[26].mxu1  ;;  %v15278_v29 = vpack.c.bf16 %v3643_v1, %v3631_v0  ;;  %v2407_v15 = vmul.f32 0.5, %v1200_v8  ;;  %v1204_v25 = vadd.f32 %v1203_v27, %v15048_v3  ;;  %13330 = vtanh.f32 %v2503_v51 }
 0x136   : > { %20434 = vst [vmem:[#allocation22_spill] sm:$0xff] %v15268_v48  ;;  %v13315_v14 = vpop.eup %13314  ;;  %20437 = vst [vmem:[#allocation25_spill] sm:$0xff] %v15276_v19  ;;  %v3139_v20 = vmul.f32 0.5, %v13313_v4  ;;  %v1205_v26 = vpop.f32.mrb[27].mxu0  ;;  %v2408_v43 = vmul.f32 0.5, %v1202_v17  ;;  %v3511_v36 = vadd.f32 0.5, %v3127_v61 }
 0x137   : > { %20438 = vst [vmem:[#allocation26_spill] sm:$0xff] %v15278_v29  ;;  %v13317_v16 = vpop.eup %13316  ;;  %v15281_v30 = vpop.f32.mrb[27].mxu1  ;;  %v3140_v31 = vmul.f32 0.5, %v13315_v14  ;;  %v1206_v34 = vadd.f32 %v1205_v26, %v15058_v6  ;;  %13332 = vtanh.f32 %v2407_v15  ;;  %v2419_v44 = vmul.f32 0.5, %v1204_v25  ;;  %1807 = vmatmul.mubr.bf16.gmra.mrb[132].mxu1 %v15285_v46  ;;  %2000 = vmatmul.mubr.bf16.gmra.mrb[132].mxu0 %v15285_v46 }
 0x138   : > { %20439 = vst [vmem:[#allocation27_spill] sm:$0xff] %v15281_v30  ;;  %v13319_v24 = vpop.eup %13318  ;;  %v3523_v37 = vadd.f32 0.5, %v3139_v20  ;;  %v3512_v52 = vadd.f32 0.5, %v3128_v12  ;;  %13334 = vtanh.f32 %v2408_v43  ;;  %1816 = vmatprep.mubr.bf16.mxu1 %v20304_v2  ;;  %2009 = vmatprep.mubr.bf16.mxu0 %v20304_v2  ;;  %v3272_v61 = vmul.f32 0.5, %v13317_v16 }
 0x139   : > { %v3524_v54 = vadd.f32 0.5, %v3140_v31  ;;  %v2420_v0 = vmul.f32 0.5, %v1206_v34  ;;  %v13321_v1 = vpop.eup %13320  ;;  %13336 = vtanh.f32 %v2419_v44  ;;  %v3284_v8 = vmul.f32 0.5, %v13319_v24 }
 0x13a   : > { %v15291_v51 = vpack.c.bf16 %v3523_v37, %v3511_v36  ;;  %v15295_v14 = vpop.f32.mrb[28].mxu0  ;;  %v15297_v12 = vpop.f32.mrb[28].mxu1  ;;  %v3151_v17 = vmul.f32 0.5, %v13321_v1  ;;  %v15304_v25 = vsub.s32 2, %v15006_v53  ;;  %v487_v16 = vsub.s32 4, %v15006_v53 }
 0x13b   : > { %v15293_v4 = vpack.c.bf16 %v3524_v54, %v3512_v52  ;;  %v13323_v10 = vpop.eup %13322  ;;  %13338 = vtanh.f32 %v2420_v0  ;;  %20441 = vst [vmem:[#allocation29_spill] sm:$0xff] %v15297_v12  ;;  %v15299_v20 = vpop.f32.mrb[29].mxu0  ;;  %v3668_v31 = vadd.f32 0.5, %v3284_v8  ;;  %v3656_v37 = vadd.f32 0.5, %v3272_v61 }
 0x13c   : > { %v13325_v27 = vpop.eup %13324  ;;  %v15301_v15 = vpop.f32.mrb[29].mxu1  ;;  %20443 = vst [vmem:[#allocation31_spill] sm:$0xff] %v15304_v25  ;;  %v3152_v26 = vmul.f32 0.5, %v13323_v10  ;;  %v3535_v1 = vadd.f32 0.5, %v3151_v17  ;;  %v15318_v10 = vld [vmem:[%s14603_s29 + $0x50] sm:$0xff]   ;;  %v15324_v61 = vrot.slane %v15025_v58, %v15304_v25  ;;  %v15327_v8 = vrot.slane %v15025_v58, %v487_v16 }
 0x13d   : > { %20440 = vst [vmem:[#allocation28_spill] sm:$0xff] %v15293_v4  ;;  %20442 = vst [vmem:[#allocation30_spill] sm:$0xff] %v15301_v15  ;;  %v13327_v24 = vpop.eup %13326  ;;  %v15307_v43 = vpop.f32.mrb[30].mxu0  ;;  %v3163_v36 = vmul.f32 0.5, %v13325_v27  ;;  %v15315_v62 = vpack.c.bf16 %v3668_v31, %v3656_v37  ;;  %v20448_v17 = vmov 0  }
 0x13e   : > { %v15309_v34 = vpop.f32.mrb[30].mxu1  ;;  %v13329_v44 = vpop.eup %13328  ;;  %v3164_v0 = vmul.f32 0.5, %v13327_v24  ;;  %20447 = vst [vmem:[#allocation35_spill] sm:$0xff] %v15318_v10  ;;  %v3536_v27 = vadd.f32 0.5, %v3152_v26 }
 0x13f   : > { %20444 = vst [vmem:[#allocation32_spill] sm:$0xff] %v15309_v34  ;;  %v15311_v52 = vpop.f32.mrb[31].mxu0  ;;  %v15313_v54 = vpop.f32.mrb[31].mxu1  ;;  %v3547_v2 = vadd.f32 0.5, %v3163_v36  ;;  %20446 = vst [vmem:[#allocation34_spill] sm:$0xff] %v15315_v62  ;;  %1817 = vmatmul.mubr.bf16.gmra.mrb[136].mxu1 %v15318_v10  ;;  %2010 = vmatmul.mubr.bf16.gmra.mrb[136].mxu0 %v15318_v10  ;;  %v3283_v36 = vmul.f32 0.5, %v13329_v44 }
 0x140   : > { %20445 = vst [vmem:[#allocation33_spill] sm:$0xff] %v15313_v54  ;;  %v13331_v12 = vpop.eup %13330  ;;  %v3548_v24 = vadd.f32 0.5, %v3164_v0  ;;  %1826 = vmatprep.mubr.bf16.mxu1 %v20448_v17  ;;  %2019 = vmatprep.mubr.bf16.mxu0 %v20448_v17  ;;  %v14491_v62 = vld [vmem:[%s14603_s29 + $0x68] sm:$0xff]  }
 0x141   : > { %v15331_v31 = vpack.c.bf16 %v3547_v2, %v3535_v1  ;;  %v13333_v37 = vpop.eup %13332  ;;  %v3271_v0 = vmul.f32 0.5, %v13331_v12 }
 0x142   : > { %v15333_v34 = vpack.c.bf16 %v3548_v24, %v3536_v27  ;;  %v13335_v54 = vpop.eup %13334  ;;  %v1332_v15 = vpop.f32.mrb[32].mxu1  ;;  %v3667_v24 = vadd.f32 0.5, %v3283_v36  ;;  %v3175_v7 = vmul.f32 0.5, %v13333_v37 }
 0x143   : > { %v1525_v19 = vpop.f32.mrb[32].mxu0  ;;  %v13337_v25 = vpop.eup %13336  ;;  %v1333_v60 = vadd.f32 %v1332_v15, %v15324_v61  ;;  %v3176_v30 = vmul.f32 0.5, %v13335_v54 }
 0x144   : > { %v1526_v58 = vadd.f32 %v1525_v19, %v15327_v8  ;;  %v15337_v16 = vpop.f32.mrb[33].mxu1  ;;  %v15339_v26 = vpop.f32.mrb[33].mxu0  ;;  %v3187_v27 = vmul.f32 0.5, %v13337_v25 }
 0x145   : > { %v13339_v2 = vpop.eup %13338  ;;  %v1336_v1 = vpop.f32.mrb[34].mxu1  ;;  %v2265_v11 = vmul.f32 0.5, %v1333_v60  ;;  %v3655_v60 = vadd.f32 0.5, %v3271_v0  ;;  %v3560_v36 = vadd.f32 0.5, %v3176_v30 }
 0x146   : > { %v1529_v44 = vpop.f32.mrb[34].mxu0  ;;  %v2267_v21 = vmul.f32 0.5, %v1526_v58  ;;  %v1337_v57 = vadd.f32 %v1336_v1, %v15324_v61  ;;  %v15343_v23 = vpop.f32.mrb[35].mxu1  ;;  %v3188_v25 = vmul.f32 0.5, %v13339_v2  ;;  %v3571_v37 = vadd.f32 0.5, %v3187_v27 }
 0x147   : > { %v1530_v15 = vadd.f32 %v1529_v44, %v15327_v8  ;;  %v15345_v19 = vpop.f32.mrb[35].mxu0  ;;  %13340 = vtanh.f32 %v2265_v11  ;;  %1827 = vmatmul.mubr.bf16.gmra.mrb[140].mxu1 %v15348_v13  ;;  %2020 = vmatmul.mubr.bf16.gmra.mrb[140].mxu0 %v15348_v13  ;;  %v15354_v11 = vpack.c.bf16 %v3667_v24, %v3655_v60  ;;  %v3559_v44 = vadd.f32 0.5, %v3175_v7  ;;  %v15377_v60 = vld [vmem:[%s14603_s29 + $0x60] sm:$0xff]  }
 0x148   : > { %v2277_v12 = vmul.f32 0.5, %v1337_v57  ;;  %13342 = vtanh.f32 %v2267_v21  ;;  %1836 = vmatprep.mubr.bf16.mxu1 %v20448_v17  ;;  %2029 = vmatprep.mubr.bf16.mxu0 %v20448_v17  ;;  %v3572_v58 = vadd.f32 0.5, %v3188_v25  ;;  %20453 = vst [vmem:[#allocation40_spill] sm:$0xff] %v15377_v60 }
 0x149   : > { %v2279_v54 = vmul.f32 0.5, %v1530_v15  ;;  %20450 = vst [vmem:[#allocation37_spill] sm:$0xff] %v15354_v11  ;;  %v15370_v27 = vpack.c.bf16 %v3571_v37, %v3559_v44 }
 0x14a   : > { %v15356_v57 = vpop.f32.mrb[36].mxu1  ;;  %v15358_v1 = vpop.f32.mrb[36].mxu0  ;;  %13344 = vtanh.f32 %v2277_v12  ;;  %v15364_v0 = vpack.c.bf16 %v3572_v58, %v3560_v36 }
 0x14b   : > { %v15360_v2 = vpop.f32.mrb[37].mxu1  ;;  %v15362_v21 = vpop.f32.mrb[37].mxu0  ;;  %13346 = vtanh.f32 %v2279_v54  ;;  %20452 = vst [vmem:[#allocation39_spill] sm:$0xff] %v15370_v27 }
 0x14c   : > { %20451 = vst [vmem:[#allocation38_spill] sm:$0xff] %v15364_v0  ;;  %v15366_v15 = vpop.f32.mrb[38].mxu1  ;;  %v15368_v30 = vpop.f32.mrb[38].mxu0 }
 0x14d   : > { %v15372_v24 = vpop.f32.mrb[39].mxu1  ;;  %v15374_v25 = vpop.f32.mrb[39].mxu0 }
 0x14f   : > { %1837 = vmatmul.mubr.bf16.gmra.mrb[144].mxu1 %v15377_v60  ;;  %2030 = vmatmul.mubr.bf16.gmra.mrb[144].mxu0 %v15377_v60 }
 0x150   : > { %1846 = vmatprep.mubr.bf16.mxu1 %v20448_v17  ;;  %2039 = vmatprep.mubr.bf16.mxu0 %v20448_v17 }
 0x151   : > { %v13341_v7 = vpop.eup %13340 }
 0x152   : > { %v13343_v12 = vpop.eup %13342  ;;  %v15383_v54 = vpop.f32.mrb[40].mxu1  ;;  %v3033_v44 = vmul.f32 0.5, %v13341_v7 }
 0x153   : > { %v15385_v36 = vpop.f32.mrb[40].mxu0  ;;  %v15387_v58 = vpop.f32.mrb[41].mxu1  ;;  %v3035_v5 = vmul.f32 0.5, %v13343_v12 }
 0x154   : > { %v15389_v37 = vpop.f32.mrb[41].mxu0  ;;  %v15391_v56 = vpop.f32.mrb[42].mxu1  ;;  %v3417_v29 = vadd.f32 0.5, %v3033_v44 }
 0x155   : > { %20454 = vst [vmem:[#allocation41_spill] sm:$0xff] %v15391_v56  ;;  %v15393_v22 = vpop.f32.mrb[42].mxu0  ;;  %v13345_v60 = vpop.eup %13344  ;;  %v3419_v7 = vadd.f32 0.5, %v3035_v5  ;;  %v14492_v5 = vld [vmem:[%s14603_s29 + $0x70] sm:$0xff]  }
 0x156   : > { %20455 = vst [vmem:[#allocation42_spill] sm:$0xff] %v15393_v22  ;;  %v15395_v11 = vpop.f32.mrb[43].mxu1  ;;  %v15397_v18 = vpop.f32.mrb[43].mxu0  ;;  %v3045_v59 = vmul.f32 0.5, %v13345_v60 }
 0x157   : > { %20456 = vst [vmem:[#allocation43_spill] sm:$0xff] %v15395_v11  ;;  %20457 = vst [vmem:[#allocation44_spill] sm:$0xff] %v15397_v18  ;;  %v13347_v13 = vpop.eup %13346  ;;  %1847 = vmatmul.mubr.bf16.gmra.mrb[148].mxu1 %v14491_v62  ;;  %2040 = vmatmul.mubr.bf16.gmra.mrb[148].mxu0 %v14491_v62 }
 0x158   : > { %v3047_v63 = vmul.f32 0.5, %v13347_v13  ;;  %v3429_v10 = vadd.f32 0.5, %v3045_v59  ;;  %1856 = vmatprep.mubr.bf16.mxu1 %v20448_v17  ;;  %2049 = vmatprep.mubr.bf16.mxu0 %v20448_v17 }
 0x15a   : > { %v3431_v22 = vadd.f32 0.5, %v3047_v63  ;;  %v15402_v12 = vpack.c.bf16 %v3429_v10, %v3417_v29  ;;  %v15404_v11 = vpop.f32.mrb[44].mxu1  ;;  %v15406_v18 = vpop.f32.mrb[44].mxu0 }
 0x15b   : > { %v15410_v13 = vpop.f32.mrb[45].mxu1  ;;  %v15412_v62 = vpop.f32.mrb[45].mxu0 }
 0x15c   : > { %20458 = vst [vmem:[#allocation45_spill] sm:$0xff] %v15402_v12  ;;  %v15408_v60 = vpack.c.bf16 %v3431_v22, %v3419_v7  ;;  %v15414_v44 = vpop.f32.mrb[46].mxu1  ;;  %v15416_v59 = vpop.f32.mrb[46].mxu0 }
 0x15d   : > { %20460 = vst [vmem:[#allocation47_spill] sm:$0xff] %v15416_v59  ;;  %v15418_v56 = vpop.f32.mrb[47].mxu1  ;;  %v15420_v63 = vpop.f32.mrb[47].mxu0 }
 0x15e   : > { %20459 = vst [vmem:[#allocation46_spill] sm:$0xff] %v15408_v60  ;;  %20461 = vst [vmem:[#allocation48_spill] sm:$0xff] %v15418_v56 }
 0x15f   : > { %20462 = vst [vmem:[#allocation49_spill] sm:$0xff] %v15420_v63  ;;  %1857 = vmatmul.mubr.bf16.gmra.mrb[152].mxu1 %v14492_v5  ;;  %2050 = vmatmul.mubr.bf16.gmra.mrb[152].mxu0 %v14492_v5  ;;  %v14493_v5 = vld [vmem:[%s14603_s29 + $0x78] sm:$0xff]  }
 0x160   : > { %1866 = vmatprep.mubr.bf16.mxu1 %v20448_v17  ;;  %2059 = vmatprep.mubr.bf16.mxu0 %v20448_v17 }
 0x162   : > { %v15425_v22 = vpop.f32.mrb[48].mxu1  ;;  %v15427_v29 = vpop.f32.mrb[48].mxu0 }
 0x163   : > { %20463 = vst [vmem:[#allocation50_spill] sm:$0xff] %v15425_v22  ;;  %20464 = vst [vmem:[#allocation51_spill] sm:$0xff] %v15427_v29  ;;  %v15429_v10 = vpop.f32.mrb[49].mxu1  ;;  %v15431_v7 = vpop.f32.mrb[49].mxu0 }
 0x164   : > { %20465 = vst [vmem:[#allocation52_spill] sm:$0xff] %v15429_v10  ;;  %20466 = vst [vmem:[#allocation53_spill] sm:$0xff] %v15431_v7  ;;  %v15433_v60 = vpop.f32.mrb[50].mxu1  ;;  %v15435_v12 = vpop.f32.mrb[50].mxu0 }
 0x165   : > { %20467 = vst [vmem:[#allocation54_spill] sm:$0xff] %v15433_v60  ;;  %20468 = vst [vmem:[#allocation55_spill] sm:$0xff] %v15435_v12  ;;  %v15437_v63 = vpop.f32.mrb[51].mxu1  ;;  %v15439_v56 = vpop.f32.mrb[51].mxu0 }
 0x166   : > { %20469 = vst [vmem:[#allocation56_spill] sm:$0xff] %v15437_v63  ;;  %20470 = vst [vmem:[#allocation57_spill] sm:$0xff] %v15439_v56 }
 0x167   : > { %1867 = vmatmul.mubr.bf16.gmra.mrb[156].mxu1 %v14493_v5  ;;  %2060 = vmatmul.mubr.bf16.gmra.mrb[156].mxu0 %v14493_v5  ;;  %v12620_v5 = vld [vmem:[%s20297_s3 + $0x200] ss:$16 sps:$4 sm:$0xff]  }
 0x168   : > { %6349 = vmatprep.mubr.bf16.mxu0 %v15157_v55  ;;  %2102 = vmatprep.mubr.bf16.mxu1 %v20448_v17 }
 0x16a   : > { %v15444_v29 = vpop.f32.mrb[52].mxu1  ;;  %v15446_v10 = vpop.f32.mrb[52].mxu0 }
 0x16b   : > { %20471 = vst [vmem:[#allocation58_spill] sm:$0xff] %v15444_v29  ;;  %20472 = vst [vmem:[#allocation59_spill] sm:$0xff] %v15446_v10  ;;  %v15448_v7 = vpop.f32.mrb[53].mxu1  ;;  %v15450_v60 = vpop.f32.mrb[53].mxu0  ;;  %v12623_v10 = vld [vmem:[%s20297_s3 + $0x8] ss:$16 sps:$4 sm:$0xff]  }
 0x16c   : > { %20473 = vst [vmem:[#allocation60_spill] sm:$0xff] %v15448_v7  ;;  %20474 = vst [vmem:[#allocation61_spill] sm:$0xff] %v15450_v60  ;;  %v15452_v12 = vpop.f32.mrb[54].mxu1  ;;  %v15454_v63 = vpop.f32.mrb[54].mxu0  ;;  %v12628_v60 = vld [vmem:[%s20297_s3 + $0x224] ss:$16 sps:$4 sm:$0xff]  }
 0x16d   : > { %20475 = vst [vmem:[#allocation62_spill] sm:$0xff] %v15452_v12  ;;  %20476 = vst [vmem:[#allocation63_spill] sm:$0xff] %v15454_v63  ;;  %v15459_v56 = vpop.f32.mrb[55].mxu1  ;;  %v15461_v55 = vpop.f32.mrb[55].mxu0  ;;  %v12631_v63 = vld [vmem:[%s20297_s3 + $0x2c] ss:$16 sps:$4 sm:$0xff]  }
 0x16e   : > { %20477 = vst [vmem:[#allocation64_spill] sm:$0xff] %v15459_v56  ;;  %20478 = vst [vmem:[#allocation65_spill] sm:$0xff] %v15461_v55  ;;  %v14494_v12 = vld [vmem:[%s14603_s29] sm:$0xff]   ;;  %v12629_v56 = vld [vmem:[%s20297_s3 + $0x28] ss:$16 sps:$4 sm:$0xff]  }
 0x16f   : > { %2103 = vmatmul.mubr.bf16.vlgmr.msra.gmra.mrb[160].mxu1 %v14494_v12  ;;  %6350 = vmatmul.mubr.bf16.vlgmr.msra.gmra.mrb[160].mxu0 %v15149_v49  ;;  %v12626_v55 = vld [vmem:[%s20297_s3 + $0x220] ss:$16 sps:$4 sm:$0xff]   ;;  %v12634_v12 = vld [vmem:[%s20297_s3 + $0x244] ss:$16 sps:$4 sm:$0xff]  }
 0x170   : > { %6359 = vmatprep.mubr.bf16.mxu0 %v15195_v50  ;;  %6511 = vmatpush1.bf16.msra.mxu0 %v12620_v5 }
 0x171   : > { %7476 = vmatpush1.bf16.msra.mxu1 %v12623_v10  ;;  %2112 = vmatprep.mubr.bf16.mxu1 %v20448_v17  ;;  %v12637_v10 = vld [vmem:[%s20297_s3 + $0x4c] ss:$16 sps:$4 sm:$0xff]  }
 0x172   : > { %v15485_v7 = vpop.f32.mrb[56].mxu1  ;;  %v15487_v49 = vpop.f32.mrb[56].mxu0  ;;  %6512 = vmatprep.subr.bf16.mxu0 %v12628_v60  ;;  %7477 = vmatprep.subr.bf16.mxu1 %v12631_v63  ;;  %v12632_v60 = vld [vmem:[%s20297_s3 + $0x240] ss:$16 sps:$4 sm:$0xff]   ;;  %v12635_v63 = vld [vmem:[%s20297_s3 + $0x48] ss:$16 sps:$4 sm:$0xff]  }
 0x173   : > { %20479 = vst [vmem:[#allocation66_spill] sm:$0xff] %v15485_v7  ;;  %v15492_v5 = vpop.f32.mrb[57].mxu1  ;;  %v15494_v50 = vpop.f32.mrb[57].mxu0 }
 0x174   : > { %v15496_v29 = vpop.f32.mrb[58].mxu1  ;;  %v15498_v22 = vpop.f32.mrb[58].mxu0  ;;  %6513 = vmatpush1.bf16.msra.mxu0 %v12626_v55  ;;  %v12643_v55 = vld [vmem:[%s20297_s3 + $0x6c] ss:$16 sps:$4 sm:$0xff]  }
 0x175   : > { %20480 = vst [vmem:[#allocation67_spill] sm:$0xff] %v15498_v22  ;;  %v15500_v59 = vpop.f32.mrb[59].mxu1  ;;  %v15502_v7 = vpop.f32.mrb[59].mxu0  ;;  %7478 = vmatpush1.bf16.msra.mxu1 %v12629_v56  ;;  %6514 = vmatprep.subr.bf16.mxu0 %v12634_v12  ;;  %v12640_v22 = vld [vmem:[%s20297_s3 + $0x264] ss:$16 sps:$4 sm:$0xff]  }
 0x176   : > { %20481 = vst [vmem:[#allocation68_spill] sm:$0xff] %v15500_v59  ;;  %20482 = vst [vmem:[#allocation69_spill] sm:$0xff] %v15502_v7  ;;  %7479 = vmatprep.subr.bf16.mxu1 %v12637_v10  ;;  %v14495_v7 = vld [vmem:[%s14603_s29 + $0x8] sm:$0xff]   ;;  %v12638_v56 = vld [vmem:[%s20297_s3 + $0x260] ss:$16 sps:$4 sm:$0xff]  }
 0x177   : > { %2113 = vmatmul.mubr.bf16.gmra.mrb[164].mxu1 %v14495_v7  ;;  %6360 = vmatmul.mubr.bf16.gmra.mrb[164].mxu0 %v15190_v45  ;;  %v12641_v12 = vld [vmem:[%s20297_s3 + $0x68] ss:$16 sps:$4 sm:$0xff]   ;;  %v12646_v7 = vld [vmem:[%s20297_s3 + $0x284] ss:$16 sps:$4 sm:$0xff]  }
 0x178   : > { %6369 = vmatprep.mubr.bf16.mxu0 %v15237_v47  ;;  %2122 = vmatprep.mubr.bf16.mxu1 %v20448_v17 }
 0x179   : > { %6515 = vmatpush1.bf16.msra.mxu0 %v12632_v60  ;;  %7480 = vmatpush1.bf16.msra.mxu1 %v12635_v63  ;;  %v12649_v60 = vld [vmem:[%s20297_s3 + $0x8c] ss:$16 sps:$4 sm:$0xff]  }
 0x17a   : > { %v15526_v10 = vpop.f32.mrb[60].mxu1  ;;  %v15528_v59 = vpop.f32.mrb[60].mxu0  ;;  %6516 = vmatprep.subr.bf16.mxu0 %v12640_v22  ;;  %7481 = vmatprep.subr.bf16.mxu1 %v12643_v55  ;;  %v12644_v55 = vld [vmem:[%s20297_s3 + $0x280] ss:$16 sps:$4 sm:$0xff]  }
 0x17b   : > { %20483 = vst [vmem:[#allocation70_spill] sm:$0xff] %v15526_v10  ;;  %20484 = vst [vmem:[#allocation71_spill] sm:$0xff] %v15528_v59  ;;  %v15536_v63 = vpop.f32.mrb[61].mxu1  ;;  %v15538_v47 = vpop.f32.mrb[61].mxu0 }
 0x17c   : > { %20485 = vst [vmem:[#allocation72_spill] sm:$0xff] %v15536_v63  ;;  %v15540_v45 = vpop.f32.mrb[62].mxu1  ;;  %v15542_v10 = vpop.f32.mrb[62].mxu0  ;;  %v12647_v63 = vld [vmem:[%s20297_s3 + $0x88] ss:$16 sps:$4 sm:$0xff]  }
 0x17d   : > { %20486 = vst [vmem:[#allocation73_spill] sm:$0xff] %v15542_v10  ;;  %v15544_v59 = vpop.f32.mrb[63].mxu1  ;;  %v15546_v22 = vpop.f32.mrb[63].mxu0  ;;  %6517 = vmatpush1.bf16.msra.mxu0 %v12638_v56  ;;  %7482 = vmatpush1.bf16.msra.mxu1 %v12641_v12  ;;  %v12652_v10 = vld [vmem:[%s20297_s3 + $0x2a4] ss:$16 sps:$4 sm:$0xff]  }
 0x17e   : > { %20487 = vst [vmem:[#allocation74_spill] sm:$0xff] %v15544_v59  ;;  %20488 = vst [vmem:[#allocation75_spill] sm:$0xff] %v15546_v22  ;;  %6518 = vmatprep.subr.bf16.mxu0 %v12646_v7  ;;  %7483 = vmatprep.subr.bf16.mxu1 %v12649_v60  ;;  %v12655_v22 = vld [vmem:[%s20297_s3 + $0xac] ss:$16 sps:$4 sm:$0xff]   ;;  %v14496_v56 = vld [vmem:[%s14603_s29 + $0x10] sm:$0xff]  }
 0x17f   : > { %2123 = vmatmul.mubr.bf16.gmra.mrb[168].mxu1 %v14496_v56  ;;  %6370 = vmatmul.mubr.bf16.gmra.mrb[168].mxu0 %v15232_v39  ;;  %v12650_v12 = vld [vmem:[%s20297_s3 + $0x2a0] ss:$16 sps:$4 sm:$0xff]   ;;  %v12653_v7 = vld [vmem:[%s20297_s3 + $0xa8] ss:$16 sps:$4 sm:$0xff]   ;;  %v12658_v56 = vld [vmem:[%s20297_s3 + $0x2c4] ss:$16 sps:$4 sm:$0xff]  }
 0x180   : > { %6379 = vmatprep.mubr.bf16.mxu0 %v15268_v48  ;;  %2132 = vmatprep.mubr.bf16.mxu1 %v20448_v17 }
 0x181   : > { %6519 = vmatpush1.bf16.msra.mxu0 %v12644_v55  ;;  %7484 = vmatpush1.bf16.msra.mxu1 %v12647_v63  ;;  %v12661_v63 = vld [vmem:[%s20297_s3 + $0xcc] ss:$16 sps:$4 sm:$0xff]  }
 0x182   : > { %v15570_v60 = vpop.f32.mrb[64].mxu1  ;;  %v15572_v59 = vpop.f32.mrb[64].mxu0  ;;  %6520 = vmatprep.subr.bf16.mxu0 %v12652_v10  ;;  %7485 = vmatprep.subr.bf16.mxu1 %v12655_v22  ;;  %v1216_v10 = vadd.f32 %v15311_v52, %v15058_v6  ;;  %v12664_v52 = vld [vmem:[%s20297_s3 + $0x2e4] ss:$16 sps:$4 sm:$0xff]  }
 0x183   : > { %20489 = vst [vmem:[#allocation76_spill] sm:$0xff] %v15570_v60  ;;  %20490 = vst [vmem:[#allocation77_spill] sm:$0xff] %v15572_v59  ;;  %v15580_v55 = vpop.f32.mrb[65].mxu1  ;;  %v15582_v48 = vpop.f32.mrb[65].mxu0 }
 0x184   : > { %20491 = vst [vmem:[#allocation78_spill] sm:$0xff] %v15580_v55  ;;  %20492 = vst [vmem:[#allocation79_spill] sm:$0xff] %v15582_v48  ;;  %v15584_v39 = vpop.f32.mrb[66].mxu1  ;;  %v15586_v60 = vpop.f32.mrb[66].mxu0  ;;  %v12656_v55 = vld [vmem:[%s20297_s3 + $0x2c0] ss:$16 sps:$4 sm:$0xff]  }
 0x185   : > { %20493 = vst [vmem:[#allocation80_spill] sm:$0xff] %v15584_v39  ;;  %20494 = vst [vmem:[#allocation81_spill] sm:$0xff] %v15586_v60  ;;  %v15590_v22 = vpop.f32.mrb[67].mxu1  ;;  %v15592_v59 = vpop.f32.mrb[67].mxu0  ;;  %6521 = vmatpush1.bf16.msra.mxu0 %v12650_v12  ;;  %7486 = vmatpush1.bf16.msra.mxu1 %v12653_v7  ;;  %v12659_v48 = vld [vmem:[%s20297_s3 + $0xc8] ss:$16 sps:$4 sm:$0xff]   ;;  %v1212_v12 = vadd.f32 %v15299_v20, %v15058_v6 }
 0x186   : > { %20495 = vst [vmem:[#allocation82_spill] sm:$0xff] %v15590_v22  ;;  %20496 = vst [vmem:[#allocation83_spill] sm:$0xff] %v15592_v59  ;;  %6522 = vmatprep.subr.bf16.mxu0 %v12658_v56  ;;  %7487 = vmatprep.subr.bf16.mxu1 %v12661_v63  ;;  %v12667_v59 = vld [vmem:[%s20297_s3 + $0xec] ss:$16 sps:$4 sm:$0xff]   ;;  %v2444_v56 = vmul.f32 0.5, %v1216_v10 }
 0x187   : > { %v14497_v7 = vld [vmem:[%s14603_s29 + $0x18] sm:$0xff]   ;;  %6380 = vmatmul.mubr.bf16.gmra.mrb[172].mxu0 %v15266_v41  ;;  %v12662_v63 = vld [vmem:[%s20297_s3 + $0x2e0] ss:$16 sps:$4 sm:$0xff]   ;;  %v12670_v10 = vld [vmem:[%s20297_s3 + $0x304] ss:$16 sps:$4 sm:$0xff]  }
 0x188   : > { %2133 = vmatmul.mubr.bf16.gmra.mrb[172].mxu1 %v14497_v7  ;;  %6389 = vmatprep.mubr.bf16.mxu0 %v15293_v4  ;;  %v12665_v22 = vld [vmem:[%s20297_s3 + $0xe8] ss:$16 sps:$4 sm:$0xff]   ;;  %13348 = vtanh.f32 %v2444_v56  ;;  %v12674_v56 = vld [vmem:[%s20297_s3 + $0x320] ss:$16 sps:$4 sm:$0xff]  }
 0x189   : > { %2142 = vmatprep.mubr.bf16.mxu1 %v20448_v17  ;;  %6523 = vmatpush1.bf16.msra.mxu0 %v12656_v55  ;;  %v2432_v55 = vmul.f32 0.5, %v1212_v12  ;;  %v12671_v12 = vld [vmem:[%s20297_s3 + $0x108] ss:$16 sps:$4 sm:$0xff]  }
 0x18a   : > { %7488 = vmatpush1.bf16.msra.mxu1 %v12659_v48  ;;  %v15618_v20 = vpop.f32.mrb[68].mxu1  ;;  %v15620_v7 = vpop.f32.mrb[68].mxu0  ;;  %6524 = vmatprep.subr.bf16.mxu0 %v12664_v52  ;;  %v12673_v48 = vld [vmem:[%s20297_s3 + $0x10c] ss:$16 sps:$4 sm:$0xff]  }
 0x18b   : > { %20497 = vst [vmem:[#allocation84_spill] sm:$0xff] %v15618_v20  ;;  %20498 = vst [vmem:[#allocation85_spill] sm:$0xff] %v15620_v7  ;;  %7489 = vmatprep.subr.bf16.mxu1 %v12667_v59  ;;  %v15628_v60 = vpop.f32.mrb[69].mxu1  ;;  %v15630_v39 = vpop.f32.mrb[69].mxu0  ;;  %v12668_v7 = vld [vmem:[%s20297_s3 + $0x300] ss:$16 sps:$4 sm:$0xff]   ;;  %13350 = vtanh.f32 %v2432_v55 }
 0x18c   : > { %v15632_v4 = vpop.f32.mrb[70].mxu1  ;;  %v15634_v20 = vpop.f32.mrb[70].mxu0 }
 0x18d   : > { %20499 = vst [vmem:[#allocation86_spill] sm:$0xff] %v15632_v4  ;;  %20500 = vst [vmem:[#allocation87_spill] sm:$0xff] %v15634_v20  ;;  %v15636_v52 = vpop.f32.mrb[71].mxu1  ;;  %v15638_v59 = vpop.f32.mrb[71].mxu0  ;;  %6525 = vmatpush1.bf16.msra.mxu0 %v12662_v63  ;;  %v12676_v20 = vld [vmem:[%s20297_s3 + $0x324] ss:$16 sps:$4 sm:$0xff]  }
 0x18e   : > { %20501 = vst [vmem:[#allocation88_spill] sm:$0xff] %v15636_v52  ;;  %20502 = vst [vmem:[#allocation89_spill] sm:$0xff] %v15638_v59  ;;  %7490 = vmatpush1.bf16.msra.mxu1 %v12665_v22  ;;  %6526 = vmatprep.subr.bf16.mxu0 %v12670_v10  ;;  %v12679_v63 = vld [vmem:[%s20297_s3 + $0x12c] ss:$16 sps:$4 sm:$0xff]   ;;  %v14498_v22 = vld [vmem:[%s14603_s29 + $0x20] sm:$0xff]   ;;  %v1214_v59 = vadd.f32 %v15307_v43, %v15048_v3 }
 0x18f   : > { %7491 = vmatprep.subr.bf16.mxu1 %v12673_v48  ;;  %6390 = vmatmul.mubr.bf16.gmra.mrb[176].mxu0 %v15291_v51  ;;  %v12677_v10 = vld [vmem:[%s20297_s3 + $0x128] ss:$16 sps:$4 sm:$0xff]   ;;  %v1210_v48 = vadd.f32 %v15295_v14, %v15048_v3  ;;  %v12680_v4 = vld [vmem:[%s20297_s3 + $0x340] ss:$16 sps:$4 sm:$0xff]  }
 0x190   : > { %2143 = vmatmul.mubr.bf16.gmra.mrb[176].mxu1 %v14498_v22  ;;  %6399 = vmatprep.mubr.bf16.mxu0 %v15333_v34  ;;  %v12683_v43 = vld [vmem:[%s20297_s3 + $0x148] ss:$16 sps:$4 sm:$0xff]  }
 0x191   : > { %2152 = vmatprep.mubr.bf16.mxu1 %v20448_v17  ;;  %6527 = vmatpush1.bf16.msra.mxu0 %v12668_v7  ;;  %v12682_v7 = vld [vmem:[%s20297_s3 + $0x344] ss:$16 sps:$4 sm:$0xff]  }
 0x192   : > { %7492 = vmatpush1.bf16.msra.mxu1 %v12671_v12  ;;  %v15664_v55 = vpop.f32.mrb[72].mxu1  ;;  %v15666_v22 = vpop.f32.mrb[72].mxu0  ;;  %6528 = vmatprep.subr.bf16.mxu0 %v12676_v20  ;;  %v12685_v12 = vld [vmem:[%s20297_s3 + $0x14c] ss:$16 sps:$4 sm:$0xff]  }
 0x193   : > { %20503 = vst [vmem:[#allocation90_spill] sm:$0xff] %v15664_v55  ;;  %20504 = vst [vmem:[#allocation91_spill] sm:$0xff] %v15666_v22  ;;  %7493 = vmatprep.subr.bf16.mxu1 %v12679_v63  ;;  %v15676_v52 = vpop.f32.mrb[73].mxu1  ;;  %v15678_v14 = vpop.f32.mrb[73].mxu0 }
 0x194   : > { %20505 = vst [vmem:[#allocation92_spill] sm:$0xff] %v15676_v52  ;;  %20506 = vst [vmem:[#allocation93_spill] sm:$0xff] %v15678_v14  ;;  %v15680_v55 = vpop.f32.mrb[74].mxu1  ;;  %v15682_v20 = vpop.f32.mrb[74].mxu0  ;;  %v2431_v52 = vmul.f32 0.5, %v1210_v48 }
 0x195   : > { %20507 = vst [vmem:[#allocation94_spill] sm:$0xff] %v15680_v55  ;;  %20508 = vst [vmem:[#allocation95_spill] sm:$0xff] %v15682_v20  ;;  %v15684_v63 = vpop.f32.mrb[75].mxu1  ;;  %v15686_v22 = vpop.f32.mrb[75].mxu0  ;;  %6529 = vmatpush1.bf16.msra.mxu0 %v12674_v56  ;;  %v12688_v20 = vld [vmem:[%s20297_s3 + $0x364] ss:$16 sps:$4 sm:$0xff]  }
 0x196   : > { %20509 = vst [vmem:[#allocation96_spill] sm:$0xff] %v15684_v63  ;;  %20510 = vst [vmem:[#allocation97_spill] sm:$0xff] %v15686_v22  ;;  %7494 = vmatpush1.bf16.msra.mxu1 %v12677_v10  ;;  %6530 = vmatprep.subr.bf16.mxu0 %v12682_v7  ;;  %v12691_v56 = vld [vmem:[%s20297_s3 + $0x16c] ss:$16 sps:$4 sm:$0xff]   ;;  %v2443_v10 = vmul.f32 0.5, %v1214_v59  ;;  %v13349_v63 = vpop.eup %13348  ;;  %13352 = vtanh.f32 %v2431_v52 }
 0x197   : > { %7495 = vmatprep.subr.bf16.mxu1 %v12685_v12  ;;  %v14499_v22 = vld [vmem:[%s14603_s29 + $0x28] sm:$0xff]   ;;  %6400 = vmatmul.mubr.bf16.gmra.mrb[180].mxu0 %v15331_v31  ;;  %v13351_v48 = vpop.eup %13350  ;;  %v12686_v7 = vld [vmem:[%s20297_s3 + $0x360] ss:$16 sps:$4 sm:$0xff]   ;;  %v3212_v52 = vmul.f32 0.5, %v13349_v63  ;;  %v12700_v63 = vld [vmem:[%s20297_s3 + $0x3a4] ss:$16 sps:$4 sm:$0xff]  }
 0x198   : > { %2153 = vmatmul.mubr.bf16.gmra.mrb[180].mxu1 %v14499_v22  ;;  %6409 = vmatprep.mubr.bf16.mxu0 %v15364_v0  ;;  %v12689_v59 = vld [vmem:[%s20297_s3 + $0x168] ss:$16 sps:$4 sm:$0xff]   ;;  %13354 = vtanh.f32 %v2443_v10  ;;  %v12692_v10 = vld [vmem:[%s20297_s3 + $0x380] ss:$16 sps:$4 sm:$0xff]  }
 0x199   : > { %2162 = vmatprep.mubr.bf16.mxu1 %v20448_v17  ;;  %6531 = vmatpush1.bf16.msra.mxu0 %v12680_v4  ;;  %v12694_v4 = vld [vmem:[%s20297_s3 + $0x384] ss:$16 sps:$4 sm:$0xff]  }
 0x19a   : > { %7496 = vmatpush1.bf16.msra.mxu1 %v12683_v43  ;;  %v15710_v22 = vpop.f32.mrb[76].mxu1  ;;  %v15712_v12 = vpop.f32.mrb[76].mxu0  ;;  %6532 = vmatprep.subr.bf16.mxu0 %v12688_v20  ;;  %v12697_v43 = vld [vmem:[%s20297_s3 + $0x18c] ss:$16 sps:$4 sm:$0xff]   ;;  %v3200_v20 = vmul.f32 0.5, %v13351_v48 }
 0x19b   : > { %20511 = vst [vmem:[#allocation98_spill] sm:$0xff] %v15710_v22  ;;  %20512 = vst [vmem:[#allocation99_spill] sm:$0xff] %v15712_v12  ;;  %7497 = vmatprep.subr.bf16.mxu1 %v12691_v56  ;;  %v15720_v55 = vpop.f32.mrb[77].mxu1  ;;  %v15722_v14 = vpop.f32.mrb[77].mxu0  ;;  %v12703_v48 = vld [vmem:[%s20297_s3 + $0x1ac] ss:$16 sps:$4 sm:$0xff]  }
 0x19c   : > { %20513 = vst [vmem:[#allocation100_spill] sm:$0xff] %v15720_v55  ;;  %20514 = vst [vmem:[#allocation101_spill] sm:$0xff] %v15722_v14  ;;  %v15724_v0 = vpop.f32.mrb[78].mxu1  ;;  %v15726_v22 = vpop.f32.mrb[78].mxu0  ;;  %v12695_v14 = vld [vmem:[%s20297_s3 + $0x188] ss:$16 sps:$4 sm:$0xff]  }
 0x19d   : > { %20515 = vst [vmem:[#allocation102_spill] sm:$0xff] %v15724_v0  ;;  %20516 = vst [vmem:[#allocation103_spill] sm:$0xff] %v15726_v22  ;;  %v15728_v56 = vpop.f32.mrb[79].mxu1  ;;  %v15730_v12 = vpop.f32.mrb[79].mxu0  ;;  %6533 = vmatpush1.bf16.msra.mxu0 %v12686_v7  ;;  %v3596_v7 = vadd.f32 0.5, %v3212_v52 }
 0x19e   : > { %20517 = vst [vmem:[#allocation104_spill] sm:$0xff] %v15728_v56  ;;  %20518 = vst [vmem:[#allocation105_spill] sm:$0xff] %v15730_v12  ;;  %7498 = vmatpush1.bf16.msra.mxu1 %v12689_v59  ;;  %6534 = vmatprep.subr.bf16.mxu0 %v12694_v4  ;;  %v3584_v59 = vadd.f32 0.5, %v3200_v20  ;;  %v12698_v4 = vld [vmem:[%s20297_s3 + $0x3a0] ss:$16 sps:$4 sm:$0xff]  }
 0x19f   : > { %7499 = vmatprep.subr.bf16.mxu1 %v12697_v43  ;;  %6410 = vmatmul.mubr.bf16.gmra.mrb[184].mxu0 %v15370_v27  ;;  %v12706_v52 = vld [vmem:[%s20297_s3 + $0x3c4] ss:$16 sps:$4 sm:$0xff]  }
 0x1a0   : > { %2163 = vmatmul.mubr.bf16.gmra.mrb[184].mxu1 %v15180_v40  ;;  %v12701_v40 = vld [vmem:[%s20297_s3 + $0x1a8] ss:$16 sps:$4 sm:$0xff]   ;;  %v15760_v20 = vpack.c.bf16 %v3596_v7, %v3584_v59  ;;  %v491_v7 = vsub.s32 5, %v15006_v53 }
 0x1a1   : > { %2172 = vmatprep.mubr.bf16.mxu1 %v20448_v17  ;;  %6535 = vmatpush1.bf16.msra.mxu0 %v12692_v10 }
 0x1a2   : > { %7500 = vmatpush1.bf16.msra.mxu1 %v12695_v14  ;;  %v15750_v43 = vpop.f32.mrb[80].mxu1  ;;  %v15752_v12 = vpop.f32.mrb[80].mxu0  ;;  %6536 = vmatprep.subr.bf16.mxu0 %v12700_v63  ;;  %20521 = vst [vmem:[#allocation108_spill] sm:$0xff] %v15760_v20 }
 0x1a3   : > { %20519 = vst [vmem:[#allocation106_spill] sm:$0xff] %v15750_v43  ;;  %20520 = vst [vmem:[#allocation107_spill] sm:$0xff] %v15752_v12  ;;  %7501 = vmatprep.subr.bf16.mxu1 %v12703_v48  ;;  %v15762_v14 = vpop.f32.mrb[81].mxu1  ;;  %v15764_v10 = vpop.f32.mrb[81].mxu0  ;;  %v12709_v12 = vld [vmem:[%s20297_s3 + $0x1cc] ss:$16 sps:$4 sm:$0xff]   ;;  %6419 = vmatprep.mubr.bf16.mxu0 %v15760_v20 }
 0x1a4   : > { %20522 = vst [vmem:[#allocation109_spill] sm:$0xff] %v15762_v14  ;;  %20523 = vst [vmem:[#allocation110_spill] sm:$0xff] %v15764_v10  ;;  %v13353_v63 = vpop.eup %13352  ;;  %v15770_v43 = vsub.s32 3, %v15006_v53  ;;  %v15772_v56 = vpop.f32.mrb[82].mxu1  ;;  %v12704_v14 = vld [vmem:[%s20297_s3 + $0x3c0] ss:$16 sps:$4 sm:$0xff]  }
 0x1a5   : > { %20525 = vst [vmem:[#allocation112_spill] sm:$0xff] %v15772_v56  ;;  %v15774_v48 = vpop.f32.mrb[82].mxu0  ;;  %v13355_v22 = vpop.eup %13354  ;;  %6537 = vmatpush1.bf16.msra.mxu0 %v12698_v4  ;;  %v12712_v56 = vld [vmem:[%s20297_s3 + $0x3e4] ss:$16 sps:$4 sm:$0xff]   ;;  %v12715_v4 = vld [vmem:[%s20297_s3 + $0x1ec] ss:$16 sps:$4 sm:$0xff]  }
 0x1a6   : > { %20524 = vst [vmem:[#allocation111_spill] sm:$0xff] %v15770_v43  ;;  %20526 = vst [vmem:[#allocation113_spill] sm:$0xff] %v15774_v48  ;;  %v15778_v59 = vpop.f32.mrb[83].mxu1  ;;  %v15780_v10 = vpop.f32.mrb[83].mxu0  ;;  %7502 = vmatpush1.bf16.msra.mxu1 %v12701_v40  ;;  %6538 = vmatprep.subr.bf16.mxu0 %v12706_v52  ;;  %v12707_v48 = vld [vmem:[%s20297_s3 + $0x1c8] ss:$16 sps:$4 sm:$0xff]  }
 0x1a7   : > { %20527 = vst [vmem:[#allocation114_spill] sm:$0xff] %v15778_v59  ;;  %20528 = vst [vmem:[#allocation115_spill] sm:$0xff] %v15780_v10  ;;  %7503 = vmatprep.subr.bf16.mxu1 %v12709_v12  ;;  %v15798_v40 = vld [vmem:[%s20296_s2] sm:$0xff]  ;;  %v3199_v10 = vmul.f32 0.5, %v13353_v63  ;;  %v3211_v59 = vmul.f32 0.5, %v13355_v22 }
 0x1a8   : > { %2173 = vmatmul.mubr.bf16.gmra.mrb[188].mxu1 %v15226_v33  ;;  %v15802_v52 = vrot.slane %v15798_v40, %v15770_v43  ;;  %v15806_v33 = vrot.slane %v15798_v40, %v491_v7  ;;  %v12710_v12 = vld [vmem:[%s20297_s3 + $0x3e0] ss:$16 sps:$4 sm:$0xff]   ;;  %v1252_v43 = vadd.f32 %v15162_v9, %v15058_v6  ;;  %v12713_v22 = vld [vmem:[%s20297_s3 + $0x1e8] ss:$16 sps:$4 sm:$0xff]   ;;  %v1256_v7 = vadd.f32 %v15171_v28, %v15058_v6  ;;  %v12718_v28 = vld [vmem:[%s20297_s3 + $0x404] ss:$16 sps:$4 sm:$0xff]  }
 0x1a9   : > { %2182 = vmatprep.mubr.bf16.mxu1 %v20448_v17  ;;  %6539 = vmatpush1.bf16.msra.mxu0 %v12704_v14  ;;  %v3595_v20 = vadd.f32 0.5, %v3211_v59 }
 0x1aa   : > { %v15811_v0 = vpop.f32.mrb[84].mxu1  ;;  %v15813_v55 = vpop.f32.mrb[84].mxu0  ;;  %7504 = vmatpush1.bf16.msra.mxu1 %v12707_v48  ;;  %6540 = vmatprep.subr.bf16.mxu0 %v12712_v56  ;;  %v1528_v48 = vadd.f32 %v15339_v26, %v15806_v33  ;;  %v2528_v59 = vmul.f32 0.5, %v1252_v43  ;;  %v12721_v26 = vld [vmem:[%s20297_s3 + $0x20c] ss:$16 sps:$4 sm:$0xff]  }
 0x1ab   : > { %20529 = vst [vmem:[#allocation116_spill] sm:$0xff] %v15811_v0  ;;  %20530 = vst [vmem:[#allocation117_spill] sm:$0xff] %v15813_v55  ;;  %v15820_v63 = vpop.f32.mrb[85].mxu1  ;;  %v15822_v14 = vpop.f32.mrb[85].mxu0  ;;  %7505 = vmatprep.subr.bf16.mxu1 %v12715_v4  ;;  %v1335_v55 = vadd.f32 %v15337_v16, %v15802_v52  ;;  %v3583_v0 = vadd.f32 0.5, %v3199_v10  ;;  %v1339_v16 = vadd.f32 %v15343_v23, %v15802_v52 }
 0x1ac   : > { %20531 = vst [vmem:[#allocation118_spill] sm:$0xff] %v15820_v63  ;;  %20532 = vst [vmem:[#allocation119_spill] sm:$0xff] %v15822_v14  ;;  %v15828_v9 = vpop.f32.mrb[86].mxu1  ;;  %v15830_v56 = vpop.f32.mrb[86].mxu0  ;;  %v1532_v4 = vadd.f32 %v15345_v19, %v15806_v33  ;;  %v2268_v23 = vmul.f32 0.5, %v1528_v48  ;;  %13356 = vtanh.f32 %v2528_v59  ;;  %v1347_v48 = vadd.f32 %v15366_v15, %v15324_v61 }
 0x1ad   : > { %20533 = vst [vmem:[#allocation120_spill] sm:$0xff] %v15828_v9  ;;  %20534 = vst [vmem:[#allocation121_spill] sm:$0xff] %v15830_v56  ;;  %v15834_v27 = vpop.f32.mrb[87].mxu1  ;;  %v15836_v63 = vpop.f32.mrb[87].mxu0  ;;  %6541 = vmatpush1.bf16.msra.mxu0 %v12710_v12  ;;  %v15843_v10 = vpack.c.bf16 %v3595_v20, %v3583_v0  ;;  %v2540_v12 = vmul.f32 0.5, %v1256_v7  ;;  %v1536_v0 = vadd.f32 %v15358_v1, %v15327_v8  ;;  %v2278_v19 = vmul.f32 0.5, %v1339_v16 }
 0x1ae   : > { %20535 = vst [vmem:[#allocation122_spill] sm:$0xff] %v15834_v27  ;;  %20536 = vst [vmem:[#allocation123_spill] sm:$0xff] %v15836_v63  ;;  %7506 = vmatpush1.bf16.msra.mxu1 %v12713_v22  ;;  %6703 = vmatprep.subr.bf16.mxu0 %v12718_v28  ;;  %v2266_v63 = vmul.f32 0.5, %v1335_v55  ;;  %v1343_v27 = vadd.f32 %v15356_v57, %v15324_v61  ;;  %v2280_v57 = vmul.f32 0.5, %v1532_v4 }
 0x1af   : > { %6420 = vmatmul.mubr.bf16.gmra.mrb[188].mxu0 %v15843_v10  ;;  %7668 = vmatprep.subr.bf16.mxu1 %v12721_v26  ;;  %v1538_v20 = vadd.f32 %v15362_v21, %v15806_v33  ;;  %13358 = vtanh.f32 %v2540_v12  ;;  %v2291_v16 = vmul.f32 0.5, %v1536_v0  ;;  %v1540_v59 = vadd.f32 %v15368_v30, %v15327_v8 }
 0x1b0   : > { %2183 = vmatmul.mubr.bf16.gmra.mrb[192].mxu1 %v15260_v32  ;;  %6429 = vmatprep.mubr.bf16.mxu0 %v15177_v38  ;;  %v1345_v32 = vadd.f32 %v15360_v2, %v15802_v52  ;;  %13360 = vtanh.f32 %v2266_v63  ;;  %v2289_v1 = vmul.f32 0.5, %v1343_v27  ;;  %v1349_v27 = vadd.f32 %v15372_v24, %v15802_v52 }
 0x1b1   : > { %2192 = vmatprep.mubr.bf16.mxu1 %v20448_v17  ;;  %13362 = vtanh.f32 %v2268_v23  ;;  %v2292_v15 = vmul.f32 0.5, %v1538_v20  ;;  %v1542_v63 = vadd.f32 %v15374_v25, %v15806_v33  ;;  %v2301_v12 = vmul.f32 0.5, %v1347_v48  ;;  %v20549_v48 = vld [vmem:[#allocation41_spill] sm:$0xff] }
 0x1b2   : > { %v15860_v43 = vpop.f32.mrb[88].mxu1  ;;  %v15862_v55 = vpop.f32.mrb[88].mxu0  ;;  %13364 = vtanh.f32 %v2278_v19  ;;  %v2290_v4 = vmul.f32 0.5, %v1345_v32  ;;  %v1353_v30 = vadd.f32 %v15383_v54, %v15324_v61  ;;  %v2303_v23 = vmul.f32 0.5, %v1540_v59 }
 0x1b3   : > { %20537 = vst [vmem:[#allocation124_spill] sm:$0xff] %v15860_v43  ;;  %20538 = vst [vmem:[#allocation125_spill] sm:$0xff] %v15862_v55  ;;  %v15866_v22 = vpop.f32.mrb[89].mxu1  ;;  %v15868_v7 = vpop.f32.mrb[89].mxu0  ;;  %13366 = vtanh.f32 %v2280_v57  ;;  %v1546_v24 = vadd.f32 %v15385_v36, %v15327_v8  ;;  %v2302_v25 = vmul.f32 0.5, %v1349_v27  ;;  %v2304_v54 = vmul.f32 0.5, %v1542_v63 }
 0x1b4   : > { %20539 = vst [vmem:[#allocation126_spill] sm:$0xff] %v15866_v22  ;;  %20540 = vst [vmem:[#allocation127_spill] sm:$0xff] %v15868_v7  ;;  %v15872_v2 = vpop.f32.mrb[90].mxu1  ;;  %v15874_v28 = vpop.f32.mrb[90].mxu0  ;;  %13368 = vtanh.f32 %v2289_v1  ;;  %v1548_v32 = vadd.f32 %v15389_v37, %v15806_v33  ;;  %v2313_v1 = vmul.f32 0.5, %v1353_v30  ;;  %v495_v7 = vsub.s32 6, %v15006_v53 }
 0x1b5   : > { %20541 = vst [vmem:[#allocation128_spill] sm:$0xff] %v15872_v2  ;;  %20542 = vst [vmem:[#allocation129_spill] sm:$0xff] %v15874_v28  ;;  %v15878_v21 = vpop.f32.mrb[91].mxu1  ;;  %v15880_v26 = vpop.f32.mrb[91].mxu0  ;;  %13370 = vtanh.f32 %v2291_v16  ;;  %v1357_v16 = vadd.f32 %v20549_v48, %v15324_v61  ;;  %v2315_v27 = vmul.f32 0.5, %v1546_v24 }
 0x1b6   : > { %20543 = vst [vmem:[#allocation130_spill] sm:$0xff] %v15878_v21  ;;  %20544 = vst [vmem:[#allocation131_spill] sm:$0xff] %v15880_v26  ;;  %13372 = vtanh.f32 %v2290_v4  ;;  %v13357_v36 = vpop.eup %13356  ;;  %v2316_v48 = vmul.f32 0.5, %v1548_v32  ;;  %v1363_v32 = vadd.f32 %v15404_v11, %v15324_v61  ;;  %v466_v11 = vld [vmem:[%s20296_s2 + $0x8] sm:$0xf] }
 0x1b7   : > { %6430 = vmatmul.mubr.bf16.gmra.mrb[192].mxu0 %v15184_v42  ;;  %13374 = vtanh.f32 %v2292_v15  ;;  %v20552_v15 = vld [vmem:[#allocation42_spill] sm:$0xff] }
 0x1b8   : > { %2193 = vmatmul.mubr.bf16.gmra.mrb[196].mxu1 %v15285_v46  ;;  %6439 = vmatprep.mubr.bf16.mxu0 %v15223_v35  ;;  %v1355_v46 = vadd.f32 %v15387_v58, %v15802_v52  ;;  %13376 = vtanh.f32 %v2301_v12  ;;  %v1550_v37 = vadd.f32 %v20552_v15, %v15327_v8  ;;  %v2325_v15 = vmul.f32 0.5, %v1357_v16 }
 0x1b9   : > { %2202 = vmatprep.mubr.bf16.mxu1 %v20448_v17  ;;  %v13359_v4 = vpop.eup %13358  ;;  %13378 = vtanh.f32 %v2303_v23  ;;  %v3296_v23 = vmul.f32 0.5, %v13357_v36 }
 0x1ba   : > { %v15896_v0 = vpop.f32.mrb[92].mxu1  ;;  %v15898_v19 = vpop.f32.mrb[92].mxu0  ;;  %13380 = vtanh.f32 %v2302_v25  ;;  %v2314_v12 = vmul.f32 0.5, %v1355_v46  ;;  %v3308_v25 = vmul.f32 0.5, %v13359_v4 }
 0x1bb   : > { %20545 = vst [vmem:[#allocation132_spill] sm:$0xff] %v15896_v0  ;;  %20546 = vst [vmem:[#allocation133_spill] sm:$0xff] %v15898_v19  ;;  %v15902_v57 = vpop.f32.mrb[93].mxu1  ;;  %v15904_v20 = vpop.f32.mrb[93].mxu0  ;;  %13382 = vtanh.f32 %v2304_v54  ;;  %v20558_v19 = vld [vmem:[#allocation26_spill] sm:$0xff]  ;;  %v2327_v54 = vmul.f32 0.5, %v1550_v37 }
 0x1bc   : > { %20547 = vst [vmem:[#allocation134_spill] sm:$0xff] %v15902_v57  ;;  %20548 = vst [vmem:[#allocation135_spill] sm:$0xff] %v15904_v20  ;;  %v15908_v58 = vpop.f32.mrb[94].mxu1  ;;  %v15910_v59 = vpop.f32.mrb[94].mxu0  ;;  %v20556_v20 = vld [vmem:[#allocation35_spill] sm:$0xff]  ;;  %13384 = vtanh.f32 %v2313_v1  ;;  %v1556_v1 = vadd.f32 %v15406_v18, %v15327_v8  ;;  %v3680_v21 = vadd.f32 0.5, %v3296_v23  ;;  %v1558_v23 = vadd.f32 %v15412_v62, %v15806_v33 }
 0x1bd   : > { %20550 = vst [vmem:[#allocation41_spill] sm:$0xff] %v15908_v58  ;;  %20551 = vst [vmem:[#allocation136_spill] sm:$0xff] %v15910_v59  ;;  %v15914_v63 = vpop.f32.mrb[95].mxu1  ;;  %v15916_v57 = vpop.f32.mrb[95].mxu0  ;;  %v20555_v58 = vld [vmem:[#allocation43_spill] sm:$0xff]  ;;  %13386 = vtanh.f32 %v2315_v27  ;;  %v1365_v27 = vadd.f32 %v15410_v13, %v15802_v52  ;;  %v3692_v28 = vadd.f32 0.5, %v3308_v25  ;;  %v1367_v62 = vadd.f32 %v15414_v44, %v15324_v61 }
 0x1be   : > { %20553 = vst [vmem:[#allocation42_spill] sm:$0xff] %v15914_v63  ;;  %20554 = vst [vmem:[#allocation137_spill] sm:$0xff] %v15916_v57  ;;  %v15918_v0 = vpop.eup %13360  ;;  %v1359_v59 = vadd.f32 %v20555_v58, %v15802_v52  ;;  %v20557_v63 = vld [vmem:[#allocation44_spill] sm:$0xff]  ;;  %13388 = vtanh.f32 %v2314_v12  ;;  %v2337_v13 = vmul.f32 0.5, %v1363_v32  ;;  %v20566_v25 = vld [vmem:[#allocation3_spill] sm:$0xff]  ;;  %v2340_v44 = vmul.f32 0.5, %v1558_v23 }
 0x1bf   : > { %v13363_v30 = vpop.eup %13362  ;;  %v1552_v57 = vadd.f32 %v20557_v63, %v15806_v33  ;;  %6440 = vmatmul.mubr.bf16.gmra.mrb[196].mxu0 %v20558_v19  ;;  %13390 = vtanh.f32 %v2316_v48  ;;  %v2338_v53 = vmul.f32 0.5, %v1365_v27  ;;  %v2349_v23 = vmul.f32 0.5, %v1367_v62 }
 0x1c0   : > { %2203 = vmatmul.mubr.bf16.gmra.mrb[200].mxu1 %v20556_v20  ;;  %v15923_v24 = vpop.eup %13364  ;;  %v20559_v20 = vld [vmem:[#allocation34_spill] sm:$0xff]  ;;  %v2326_v63 = vmul.f32 0.5, %v1359_v59  ;;  %13392 = vtanh.f32 %v2325_v15  ;;  %v15964_v15 = vpack.c.bf16 %v3692_v28, %v3680_v21  ;;  %v3036_v9 = vmul.f32 0.5, %v13363_v30  ;;  %v20571_v28 = vld [vmem:[#allocation37_spill] sm:$0xff] }
 0x1c1   : > { %2212 = vmatprep.mubr.bf16.mxu1 %v20448_v17  ;;  %v15929_v46 = vpop.eup %13366  ;;  %6449 = vmatprep.mubr.bf16.mxu0 %v20559_v20  ;;  %v2328_v18 = vmul.f32 0.5, %v1552_v57  ;;  %13394 = vtanh.f32 %v2327_v54  ;;  %v2339_v57 = vmul.f32 0.5, %v1556_v1  ;;  %v15967_v54 = vrot.slane %v466_v11, %v20566_v25 }
 0x1c2   : > { %v15934_v36 = vpop.eup %13368  ;;  %v1718_v16 = vpop.f32.mrb[96].mxu1  ;;  %13396 = vtanh.f32 %v2326_v63 }
 0x1c3   : > { %v1911_v58 = vpop.f32.mrb[96].mxu0  ;;  %v15938_v4 = vpop.eup %13370  ;;  %20567 = vst [vmem:[#allocation139_spill] sm:$0xff] %v15967_v54  ;;  %13398 = vtanh.f32 %v2328_v18 }
 0x1c4   : > { %v15945_v37 = vpop.f32.mrb[97].mxu1  ;;  %v15947_v26 = vpop.f32.mrb[97].mxu0  ;;  %v1912_v21 = vadd.f32 %v1911_v58, %v15967_v54  ;;  %13400 = vtanh.f32 %v2337_v13  ;;  %v3059_v62 = vmul.f32 0.5, %v15938_v4  ;;  %v20588_v4 = vld [vmem:[#allocation14_spill] sm:$0xff] }
 0x1c5   : > { %20560 = vst [vmem:[#allocation43_spill] sm:$0xff] %v15945_v37  ;;  %20561 = vst [vmem:[#allocation35_spill] sm:$0xff] %v15947_v26  ;;  %v15949_v12 = vpop.eup %13372  ;;  %v1722_v2 = vpop.f32.mrb[98].mxu1  ;;  %v20564_v37 = vld [vmem:[#allocation7_spill] sm:$0xff]  ;;  %13402 = vtanh.f32 %v2339_v57 }
 0x1c6   : > { %v1915_v48 = vpop.f32.mrb[98].mxu0  ;;  %v15951_v59 = vpop.eup %13374  ;;  %v1250_v26 = vadd.f32 %v20564_v37, %v15048_v3  ;;  %20565 = vst [vmem:[#allocation7_spill] sm:$0xff] %v15964_v15  ;;  %v20570_v37 = vld [vmem:[#allocation8_spill] sm:$0xff]  ;;  %v2271_v11 = vmul.f32 0.5, %v1912_v21  ;;  %13404 = vtanh.f32 %v2338_v53  ;;  %v3048_v53 = vmul.f32 0.5, %v15929_v46 }
 0x1c7   : > { %v15954_v22 = vpop.f32.mrb[99].mxu1  ;;  %v15956_v55 = vpop.f32.mrb[99].mxu0  ;;  %v1254_v56 = vadd.f32 %v20570_v37, %v15048_v3  ;;  %6450 = vmatmul.mubr.bf16.gmra.mrb[200].mxu0 %v20571_v28  ;;  %v1916_v58 = vadd.f32 %v1915_v48, %v15967_v54  ;;  %v3060_v46 = vmul.f32 0.5, %v15951_v59  ;;  %v20590_v59 = vld [vmem:[#allocation50_spill] sm:$0xff] }
 0x1c8   : > { %20562 = vst [vmem:[#allocation44_spill] sm:$0xff] %v15954_v22  ;;  %20563 = vst [vmem:[#allocation138_spill] sm:$0xff] %v15956_v55  ;;  %v15960_v43 = vpop.eup %13376  ;;  %v15970_v22 = vrot.slane %v15798_v40, %v495_v7  ;;  %v20569_v55 = vld [vmem:[#allocation36_spill] sm:$0xff]  ;;  %6459 = vmatprep.mubr.bf16.mxu0 %v15964_v15  ;;  %13406 = vtanh.f32 %v2271_v11  ;;  %v2527_v48 = vmul.f32 0.5, %v1250_v26 }
 0x1c9   : > { %v13379_v32 = vpop.eup %13378  ;;  %2213 = vmatmul.mubr.bf16.gmra.mrb[204].mxu1 %v20569_v55  ;;  %v20572_v55 = vld [vmem:[#allocation47_spill] sm:$0xff]  ;;  %v20584_v11 = vld [vmem:[#allocation12_spill] sm:$0xff] }
 0x1ca   : > { %20568 = vst [vmem:[#allocation140_spill] sm:$0xff] %v15970_v22  ;;  %v15975_v1 = vpop.eup %13380  ;;  %2222 = vmatprep.mubr.bf16.mxu1 %v20448_v17  ;;  %v1560_v7 = vadd.f32 %v20572_v55, %v15327_v8  ;;  %v1719_v63 = vadd.f32 %v1718_v16, %v15970_v22  ;;  %v1723_v30 = vadd.f32 %v1722_v2, %v15970_v22  ;;  %v15990_v18 = vpop.f32.mrb[100].mxu1  ;;  %v20576_v55 = vld [vmem:[#allocation48_spill] sm:$0xff]  ;;  %v16039_v22 = vadd.f32 0.5, %v3060_v46 }
 0x1cb   : > { %v13383_v40 = vpop.eup %13382  ;;  %20574 = vst [vmem:[#allocation8_spill] sm:$0xff] %v15990_v18  ;;  %v15992_v37 = vpop.f32.mrb[100].mxu0  ;;  %v1369_v25 = vadd.f32 %v20576_v55, %v15802_v52  ;;  %v2283_v55 = vmul.f32 0.5, %v1916_v58  ;;  %v16016_v18 = vadd.f32 0.5, %v3036_v9  ;;  %v3071_v58 = vmul.f32 0.5, %v13379_v32 }
 0x1cc   : > { %v15987_v27 = vpop.eup %13384  ;;  %20575 = vst [vmem:[#allocation47_spill] sm:$0xff] %v15992_v37  ;;  %v2269_v15 = vmul.f32 0.5, %v1719_v63  ;;  %v2281_v16 = vmul.f32 0.5, %v1723_v30  ;;  %v15996_v28 = vpop.f32.mrb[101].mxu1  ;;  %v2539_v63 = vmul.f32 0.5, %v1254_v56  ;;  %v2351_v26 = vmul.f32 0.5, %v1560_v7 }
 0x1cd   : > { %20573 = vst [vmem:[#allocation36_spill] sm:$0xff] %v15987_v27  ;;  %v13387_v13 = vpop.eup %13386  ;;  %20577 = vst [vmem:[#allocation48_spill] sm:$0xff] %v15996_v28  ;;  %v15998_v2 = vpop.f32.mrb[101].mxu0  ;;  %v20586_v56 = vld [vmem:[#allocation40_spill] sm:$0xff]  ;;  %v1266_v7 = vadd.f32 %v20588_v4, %v15058_v6  ;;  %v16027_v9 = vadd.f32 0.5, %v3048_v53  ;;  %v16031_v32 = vadd.f32 0.5, %v3059_v62 }
 0x1ce   : > { %20578 = vst [vmem:[#allocation141_spill] sm:$0xff] %v15998_v2  ;;  %v16000_v57 = vpop.eup %13388  ;;  %v16002_v21 = vpop.f32.mrb[102].mxu1  ;;  %13408 = vtanh.f32 %v2269_v15  ;;  %20585 = vst [vmem:[#allocation12_spill] sm:$0xff] %v16016_v18  ;;  %v2350_v15 = vmul.f32 0.5, %v1369_v25  ;;  %v1373_v25 = vadd.f32 %v20590_v59, %v15324_v61 }
 0x1cf   : > { %20579 = vst [vmem:[#allocation142_spill] sm:$0xff] %v16002_v21  ;;  %v16004_v54 = vpop.f32.mrb[102].mxu0  ;;  %v13391_v37 = vpop.eup %13390  ;;  %13410 = vtanh.f32 %v2340_v44  ;;  %v1262_v21 = vadd.f32 %v20584_v11, %v15058_v6  ;;  %20589 = vst [vmem:[#allocation40_spill] sm:$0xff] %v16027_v9  ;;  %v3072_v11 = vmul.f32 0.5, %v13383_v40  ;;  %v20596_v40 = vld [vmem:[#allocation51_spill] sm:$0xff]  ;;  %v2564_v59 = vmul.f32 0.5, %v1266_v7 }
 0x1d0   : > { %20580 = vst [vmem:[#allocation143_spill] sm:$0xff] %v16004_v54  ;;  %v16007_v30 = vpop.f32.mrb[103].mxu1  ;;  %v16009_v28 = vpop.f32.mrb[103].mxu0  ;;  %13412 = vtanh.f32 %v2281_v16  ;;  %20595 = vst [vmem:[#allocation148_spill] sm:$0xff] %v16039_v22  ;;  %v1566_v53 = vadd.f32 %v20596_v40, %v15327_v8  ;;  %v2361_v40 = vmul.f32 0.5, %v1373_v25  ;;  %v20610_v25 = vld [vmem:[#allocation55_spill] sm:$0xff] }
 0x1d1   : > { %20581 = vst [vmem:[#allocation144_spill] sm:$0xff] %v16007_v30  ;;  %20582 = vst [vmem:[#allocation145_spill] sm:$0xff] %v16009_v28  ;;  %v16011_v2 = vpop.eup %13392  ;;  %2223 = vmatmul.mubr.bf16.gmra.mrb[208].mxu1 %v20586_v56  ;;  %13414 = vtanh.f32 %v2349_v23  ;;  %v20587_v28 = vld [vmem:[#allocation49_spill] sm:$0xff]  ;;  %v3083_v23 = vmul.f32 0.5, %v13387_v13  ;;  %v16059_v7 = vadd.f32 0.5, %v3072_v11 }
 0x1d2   : > { %20583 = vst [vmem:[#allocation146_spill] sm:$0xff] %v16011_v2  ;;  %v13395_v54 = vpop.eup %13394  ;;  %v1562_v30 = vadd.f32 %v20587_v28, %v15806_v33  ;;  %2232 = vmatprep.mubr.bf16.mxu1 %v20448_v17  ;;  %13416 = vtanh.f32 %v2283_v55  ;;  %20591 = vst [vmem:[#allocation49_spill] sm:$0xff] %v16031_v32  ;;  %v2552_v28 = vmul.f32 0.5, %v1262_v21  ;;  %v16033_v56 = vpop.f32.mrb[104].mxu1  ;;  %v16049_v21 = vadd.f32 0.5, %v3071_v58  ;;  %v20600_v32 = vld [vmem:[#allocation52_spill] sm:$0xff] }
 0x1d3   : > { %v16025_v44 = vpop.eup %13396  ;;  %13418 = vtanh.f32 %v2351_v26  ;;  %20592 = vst [vmem:[#allocation14_spill] sm:$0xff] %v16033_v56  ;;  %v16035_v4 = vpop.f32.mrb[104].mxu0  ;;  %v1375_v9 = vadd.f32 %v20600_v32, %v15802_v52  ;;  %20604 = vst [vmem:[#allocation153_spill] sm:$0xff] %v16059_v7  ;;  %v2363_v7 = vmul.f32 0.5, %v1566_v53 }
 0x1d4   : > { %v13399_v16 = vpop.eup %13398  ;;  %20593 = vst [vmem:[#allocation50_spill] sm:$0xff] %v16035_v4  ;;  %13420 = vtanh.f32 %v2350_v15  ;;  %v16043_v55 = vpop.f32.mrb[105].mxu1  ;;  %20599 = vst [vmem:[#allocation150_spill] sm:$0xff] %v16049_v21  ;;  %v2352_v26 = vmul.f32 0.5, %v1562_v30  ;;  %v16069_v21 = vmul.f32 0.5, %v13391_v37  ;;  %v1570_v4 = vadd.f32 %v20610_v25, %v15327_v8 }
 0x1d5   : > { %v16037_v18 = vpop.eup %13400  ;;  %20597 = vst [vmem:[#allocation51_spill] sm:$0xff] %v16043_v55  ;;  %v16045_v62 = vpop.f32.mrb[105].mxu0  ;;  %13422 = vtanh.f32 %v2527_v48  ;;  %v16067_v48 = vadd.f32 0.5, %v3083_v23  ;;  %v16080_v23 = vmul.f32 0.5, %v13395_v54  ;;  %v2362_v37 = vmul.f32 0.5, %v1375_v9 }
 0x1d6   : > { %20594 = vst [vmem:[#allocation147_spill] sm:$0xff] %v16037_v18  ;;  %20598 = vst [vmem:[#allocation149_spill] sm:$0xff] %v16045_v62  ;;  %v16047_v13 = vpop.eup %13402  ;;  %v16053_v46 = vpop.f32.mrb[106].mxu1  ;;  %v20605_v62 = vld [vmem:[#allocation53_spill] sm:$0xff]  ;;  %13424 = vtanh.f32 %v2539_v63  ;;  %v20611_v63 = vld [vmem:[#allocation56_spill] sm:$0xff] }
 0x1d7   : > { %20601 = vst [vmem:[#allocation52_spill] sm:$0xff] %v16053_v46  ;;  %v16055_v15 = vpop.f32.mrb[106].mxu0  ;;  %v16057_v22 = vpop.eup %13404  ;;  %v1568_v55 = vadd.f32 %v20605_v62, %v15806_v33  ;;  %20608 = vst [vmem:[#allocation155_spill] sm:$0xff] %v16067_v48  ;;  %13426 = vtanh.f32 %v2552_v28  ;;  %v1379_v62 = vadd.f32 %v20611_v63, %v15802_v52  ;;  %v20613_v63 = vld [vmem:[#allocation11_spill] sm:$0xff] }
 0x1d8   : > { %20602 = vst [vmem:[#allocation151_spill] sm:$0xff] %v16055_v15  ;;  %20603 = vst [vmem:[#allocation152_spill] sm:$0xff] %v16057_v22  ;;  %v16063_v58 = vpop.f32.mrb[107].mxu1  ;;  %v16065_v30 = vpop.f32.mrb[107].mxu0  ;;  %v20609_v15 = vld [vmem:[#allocation54_spill] sm:$0xff]  ;;  %13428 = vtanh.f32 %v2564_v59  ;;  %v1260_v59 = vadd.f32 %v20613_v63, %v15048_v3 }
 0x1d9   : > { %20606 = vst [vmem:[#allocation53_spill] sm:$0xff] %v16063_v58  ;;  %20607 = vst [vmem:[#allocation154_spill] sm:$0xff] %v16065_v30  ;;  %v13407_v32 = vpop.eup %13406  ;;  %v1377_v46 = vadd.f32 %v20609_v15, %v15324_v61  ;;  %v14501_v58 = vld [vmem:[%s14603_s29 + $0x68] sm:$0xff]   ;;  %13430 = vtanh.f32 %v2352_v26  ;;  %v2364_v53 = vmul.f32 0.5, %v1568_v55  ;;  %v20612_v15 = vld [vmem:[#allocation57_spill] sm:$0xff]  ;;  %v16095_v55 = vmul.f32 0.5, %v13399_v16 }
 0x1da   : > { %v13409_v11 = vpop.eup %13408  ;;  %2233 = vmatmul.mubr.bf16.gmra.mrb[212].mxu1 %v14501_v58  ;;  %13432 = vtanh.f32 %v2361_v40  ;;  %v1572_v25 = vadd.f32 %v20612_v15, %v15806_v33  ;;  %v3039_v18 = vmul.f32 0.5, %v13407_v32  ;;  %v20615_v26 = vld [vmem:[#allocation13_spill] sm:$0xff]  ;;  %v16093_v14 = vpop.f32.mrb[108].mxu0  ;;  %v2375_v15 = vmul.f32 0.5, %v1570_v4 }
 0x1db   : > { %v16078_v30 = vpop.eup %13410  ;;  %v3037_v48 = vmul.f32 0.5, %v13409_v11  ;;  %2242 = vmatprep.mubr.bf16.mxu1 %v20448_v17  ;;  %v2373_v58 = vmul.f32 0.5, %v1377_v46  ;;  %v1264_v9 = vadd.f32 %v20615_v26, %v15048_v3  ;;  %v16091_v11 = vpop.f32.mrb[108].mxu1  ;;  %20617 = vst [vmem:[#allocation56_spill] sm:$0xff] %v16093_v14  ;;  %13434 = vtanh.f32 %v2363_v7 }
 0x1dc   : > { %v13413_v28 = vpop.eup %13412  ;;  %20616 = vst [vmem:[#allocation55_spill] sm:$0xff] %v16091_v11  ;;  %v16097_v20 = vmul.f32 0.5, %v1379_v62  ;;  %v16099_v63 = vpop.f32.mrb[109].mxu1  ;;  %v2551_v19 = vmul.f32 0.5, %v1260_v59  ;;  %13436 = vtanh.f32 %v2362_v37  ;;  %v16111_v4 = vmul.f32 0.5, %v1572_v25  ;;  %v20623_v62 = vld [vmem:[#allocation19_spill] sm:$0xff] }
 0x1dd   : > { %v16087_v56 = vpop.eup %13414  ;;  %v3049_v54 = vmul.f32 0.5, %v13413_v28  ;;  %20618 = vst [vmem:[#allocation57_spill] sm:$0xff] %v16099_v63  ;;  %v3421_v32 = vadd.f32 0.5, %v3037_v48  ;;  %v16105_v11 = vpop.f32.mrb[110].mxu1  ;;  %v2563_v7 = vmul.f32 0.5, %v1264_v9  ;;  %13438 = vtanh.f32 %v2364_v53  ;;  %v20627_v37 = vld [vmem:[#allocation58_spill] sm:$0xff] }
 0x1de   : > { %20614 = vst [vmem:[#allocation54_spill] sm:$0xff] %v16087_v56  ;;  %v13417_v40 = vpop.eup %13416  ;;  %v16101_v56 = vpop.f32.mrb[109].mxu0  ;;  %20620 = vst [vmem:[#allocation13_spill] sm:$0xff] %v16105_v11  ;;  %v3423_v59 = vadd.f32 0.5, %v3039_v18  ;;  %13440 = vtanh.f32 %v2373_v58  ;;  %v1383_v25 = vadd.f32 %v20627_v37, %v15324_v61  ;;  %v20628_v9 = vld [vmem:[#allocation21_spill] sm:$0xff] }
 0x1df   : > { %20619 = vst [vmem:[#allocation11_spill] sm:$0xff] %v16101_v56  ;;  %v16103_v46 = vpop.eup %13418  ;;  %v3433_v28 = vadd.f32 0.5, %v3049_v54  ;;  %v3051_v26 = vmul.f32 0.5, %v13417_v40  ;;  %v16107_v14 = vpop.f32.mrb[110].mxu0  ;;  %v1272_v56 = vadd.f32 %v20623_v62, %v15058_v6  ;;  %v1276_v22 = vadd.f32 %v20628_v9, %v15058_v6  ;;  %v14502_v62 = vld [vmem:[%s14603_s29 + $0x70] sm:$0xff]  }
 0x1e0   : > { %20621 = vst [vmem:[#allocation156_spill] sm:$0xff] %v16107_v14  ;;  %v16109_v16 = vpop.eup %13420  ;;  %v16115_v63 = vpop.f32.mrb[111].mxu1  ;;  %13442 = vtanh.f32 %v2551_v19  ;;  %v2385_v19 = vmul.f32 0.5, %v1383_v25 }
 0x1e1   : > { %20622 = vst [vmem:[#allocation157_spill] sm:$0xff] %v16109_v16  ;;  %20624 = vst [vmem:[#allocation19_spill] sm:$0xff] %v16115_v63  ;;  %v16117_v48 = vpop.f32.mrb[111].mxu0  ;;  %v13423_v54 = vpop.eup %13422  ;;  %v16119_v40 = vpack.c.bf16 %v3433_v28, %v3421_v32  ;;  %v3435_v14 = vadd.f32 0.5, %v3051_v26  ;;  %v20631_v32 = vld [vmem:[#allocation60_spill] sm:$0xff]  ;;  %13444 = vtanh.f32 %v2563_v7  ;;  %v2588_v27 = vmul.f32 0.5, %v1276_v22 }
 0x1e2   : > { %20625 = vst [vmem:[#allocation158_spill] sm:$0xff] %v16117_v48  ;;  %v13425_v11 = vpop.eup %13424  ;;  %v3295_v16 = vmul.f32 0.5, %v13423_v54  ;;  %2243 = vmatmul.mubr.bf16.gmra.mrb[216].mxu1 %v14502_v62  ;;  %v20629_v48 = vld [vmem:[#allocation59_spill] sm:$0xff]  ;;  %v1385_v28 = vadd.f32 %v20631_v32, %v15802_v52  ;;  %v2576_v54 = vmul.f32 0.5, %v1272_v56  ;;  %v16133_v35 = vpop.f32.mrb[112].mxu1 }
 0x1e3   : > { %20626 = vst [vmem:[#allocation159_spill] sm:$0xff] %v16119_v40  ;;  %v13427_v63 = vpop.eup %13426  ;;  %v1576_v2 = vadd.f32 %v20629_v48, %v15327_v8  ;;  %v16128_v53 = vpack.c.bf16 %v3435_v14, %v3423_v59  ;;  %v3307_v18 = vmul.f32 0.5, %v13425_v11  ;;  %2252 = vmatprep.mubr.bf16.mxu1 %v20448_v17  ;;  %20632 = vst [vmem:[#allocation21_spill] sm:$0xff] %v16133_v35  ;;  %v16135_v14 = vpop.f32.mrb[112].mxu0  ;;  %v3107_v17 = vmul.f32 0.5, %v16047_v13  ;;  %v20634_v48 = vld [vmem:[#allocation61_spill] sm:$0xff] }
 0x1e4   : > { %v13429_v58 = vpop.eup %13428  ;;  %v3320_v26 = vmul.f32 0.5, %v13427_v63  ;;  %v3679_v9 = vadd.f32 0.5, %v3295_v16  ;;  %20633 = vst [vmem:[#allocation59_spill] sm:$0xff] %v16135_v14  ;;  %v1578_v59 = vadd.f32 %v20634_v48, %v15806_v33  ;;  %13446 = vtanh.f32 %v2576_v54  ;;  %v16142_v63 = vpop.f32.mrb[113].mxu1  ;;  %v20639_v54 = vld [vmem:[#allocation62_spill] sm:$0xff]  ;;  %v20685_v35 = vld [vmem:[#allocation17_spill] sm:$0xff] }
 0x1e5   : > { %20630 = vst [vmem:[#allocation58_spill] sm:$0xff] %v16128_v53  ;;  %v13431_v37 = vpop.eup %13430  ;;  %v3691_v62 = vadd.f32 0.5, %v3307_v18  ;;  %v3332_v40 = vmul.f32 0.5, %v13429_v58  ;;  %20635 = vst [vmem:[#allocation60_spill] sm:$0xff] %v16142_v63  ;;  %v16144_v56 = vpop.f32.mrb[113].mxu0  ;;  %13448 = vtanh.f32 %v2588_v27  ;;  %v3108_v13 = vmul.f32 0.5, %v16078_v30 }
 0x1e6   : > { %v16137_v11 = vpop.eup %13432  ;;  %20636 = vst [vmem:[#allocation61_spill] sm:$0xff] %v16144_v56  ;;  %v3704_v22 = vadd.f32 0.5, %v3320_v26  ;;  %v16148_v18 = vpop.f32.mrb[114].mxu1  ;;  %13450 = vtanh.f32 %v2375_v15  ;;  %v2387_v25 = vmul.f32 0.5, %v1576_v2  ;;  %v1387_v48 = vadd.f32 %v20639_v54, %v15324_v61  ;;  %v20642_v27 = vld [vmem:[#allocation63_spill] sm:$0xff]  ;;  %v20643_v26 = vld [vmem:[#allocation64_spill] sm:$0xff] }
 0x1e7   : > { %v16146_v16 = vpack.c.bf16 %v3691_v62, %v3679_v9  ;;  %v3716_v7 = vadd.f32 0.5, %v3332_v40  ;;  %20637 = vst [vmem:[#allocation160_spill] sm:$0xff] %v16148_v18  ;;  %v16150_v58 = vpop.f32.mrb[114].mxu0  ;;  %v16152_v32 = vpop.eup %13434  ;;  %v1580_v40 = vadd.f32 %v20642_v27, %v15327_v8  ;;  %v1389_v62 = vadd.f32 %v20643_v26, %v15802_v52 }
 0x1e8   : > { %20638 = vst [vmem:[#allocation161_spill] sm:$0xff] %v16150_v58  ;;  %v16157_v53 = vpop.f32.mrb[115].mxu1  ;;  %v16159_v9 = vpop.f32.mrb[115].mxu0  ;;  %v20644_v58 = vld [vmem:[#allocation65_spill] sm:$0xff]  ;;  %v16173_v15 = vadd.f32 0.5, %v16069_v21  ;;  %v3119_v54 = vmul.f32 0.5, %v16103_v46  ;;  %13452 = vtanh.f32 %v16097_v20 }
 0x1e9   : > { %20640 = vst [vmem:[#allocation62_spill] sm:$0xff] %v16157_v53  ;;  %20641 = vst [vmem:[#allocation162_spill] sm:$0xff] %v16159_v9  ;;  %v1582_v18 = vadd.f32 %v20644_v58, %v15806_v33  ;;  %6460 = vmatmul.mubr.bf16.gmra.mrb[204].mxu0 %v16146_v16  ;;  %v16168_v30 = vpack.c.bf16 %v3716_v7, %v3704_v22  ;;  %v16170_v2 = vpop.eup %13436  ;;  %v2386_v27 = vmul.f32 0.5, %v1385_v28  ;;  %v14503_v9 = vld [vmem:[%s14603_s29 + $0x78] sm:$0xff]   ;;  %v16181_v58 = vadd.f32 0.5, %v16080_v23  ;;  %v20648_v21 = vld [vmem:[#allocation6_spill] sm:$0xff] }
 0x1ea   : > { %20645 = vst [vmem:[#allocation63_spill] sm:$0xff] %v16173_v15  ;;  %2253 = vmatmul.mubr.bf16.gmra.mrb[220].mxu1 %v14503_v9  ;;  %v16178_v26 = vpop.eup %13438  ;;  %v16184_v22 = vadd.f32 0.5, %v16095_v55  ;;  %13454 = vtanh.f32 %v16111_v4  ;;  %v2388_v7 = vmul.f32 0.5, %v1578_v59  ;;  %v16191_v20 = vadd.f32 0.5, %v3107_v17  ;;  %v16195_v15 = vpop.f32.mrb[116].mxu1 }
 0x1eb   : > { %20646 = vst [vmem:[#allocation64_spill] sm:$0xff] %v16181_v58  ;;  %6469 = vmatprep.mubr.bf16.mxu0 %v16168_v30  ;;  %7507 = vmatprep.mubr.bf16.mxu1 %v20648_v21  ;;  %v16189_v46 = vpop.eup %13440  ;;  %v16193_v28 = vadd.f32 0.5, %v3108_v13  ;;  %13456 = vtanh.f32 %v2385_v19  ;;  %v2397_v9 = vmul.f32 0.5, %v1387_v48  ;;  %v2399_v58 = vmul.f32 0.5, %v1580_v40  ;;  %20651 = vst [vmem:[#allocation164_spill] sm:$0xff] %v16195_v15  ;;  %v16197_v4 = vpop.f32.mrb[116].mxu0 }
 0x1ec   : > { %20647 = vst [vmem:[#allocation65_spill] sm:$0xff] %v16184_v22  ;;  %20649 = vst [vmem:[#allocation6_spill] sm:$0xff] %v16191_v20  ;;  %v13443_v23 = vpop.eup %13442  ;;  %13458 = vtanh.f32 %v2387_v25  ;;  %v2398_v55 = vmul.f32 0.5, %v1389_v62  ;;  %v2400_v22 = vmul.f32 0.5, %v1582_v18  ;;  %v16199_v53 = vadd.f32 0.5, %v3119_v54  ;;  %v16203_v13 = vpop.f32.mrb[117].mxu1 }
 0x1ed   : > { %20650 = vst [vmem:[#allocation163_spill] sm:$0xff] %v16193_v28  ;;  %20652 = vst [vmem:[#allocation165_spill] sm:$0xff] %v16197_v4  ;;  %v13445_v59 = vpop.eup %13444  ;;  %v16201_v21 = vmul.f32 0.5, %v13431_v37  ;;  %13460 = vtanh.f32 %v2386_v27  ;;  %v3319_v17 = vmul.f32 0.5, %v13443_v23  ;;  %v16205_v19 = vpop.f32.mrb[117].mxu0  ;;  %v20656_v25 = vld [vmem:[#allocation66_spill] sm:$0xff]  ;;  %v1586_v18 = vadd.f32 %v15487_v49, %v15327_v8 }
 0x1ee   : > { %20653 = vst [vmem:[#allocation166_spill] sm:$0xff] %v16199_v53  ;;  %20654 = vst [vmem:[#allocation167_spill] sm:$0xff] %v16203_v13  ;;  %13462 = vtanh.f32 %v2388_v7  ;;  %v1393_v48 = vadd.f32 %v20656_v25, %v15324_v61  ;;  %v3331_v40 = vmul.f32 0.5, %v13445_v59  ;;  %v16211_v62 = vpop.f32.mrb[118].mxu1  ;;  %v16213_v54 = vpop.f32.mrb[118].mxu0  ;;  %v1395_v7 = vadd.f32 %v15492_v5, %v15802_v52  ;;  %v20659_v25 = vld [vmem:[#allocation18_spill] sm:$0xff] }
 0x1ef   : > { %20655 = vst [vmem:[#allocation168_spill] sm:$0xff] %v16205_v19  ;;  %20657 = vst [vmem:[#allocation66_spill] sm:$0xff] %v16211_v62  ;;  %v12719_v37 = vld [vmem:[%s20297_s3 + $0x208] ss:$16 sps:$4 sm:$0xff]   ;;  %v13447_v27 = vpop.eup %13446  ;;  %13464 = vtanh.f32 %v2397_v9  ;;  %v1588_v23 = vadd.f32 %v15494_v50, %v15806_v33  ;;  %v1270_v49 = vadd.f32 %v20659_v25, %v15048_v3  ;;  %v16224_v59 = vpop.f32.mrb[119].mxu1  ;;  %v3703_v9 = vadd.f32 0.5, %v3319_v17 }
 0x1f0   : > { %20658 = vst [vmem:[#allocation169_spill] sm:$0xff] %v16213_v54  ;;  %20660 = vst [vmem:[#allocation18_spill] sm:$0xff] %v16224_v59  ;;  %v16226_v53 = vpop.f32.mrb[119].mxu0  ;;  %v12727_v20 = vld [vmem:[%s20297_s3 + $0x22c] ss:$16 sps:$4 sm:$0xff]   ;;  %v13449_v28 = vpop.eup %13448  ;;  %13466 = vtanh.f32 %v2399_v58  ;;  %v3715_v54 = vadd.f32 0.5, %v3331_v40 }
 0x1f1   : > { %20661 = vst [vmem:[#allocation170_spill] sm:$0xff] %v16226_v53  ;;  %v3344_v62 = vmul.f32 0.5, %v13447_v27  ;;  %v13451_v5 = vpop.eup %13450  ;;  %13468 = vtanh.f32 %v2398_v55  ;;  %v3356_v19 = vmul.f32 0.5, %v13449_v28  ;;  %v20662_v50 = vld [vmem:[#allocation20_spill] sm:$0xff]  ;;  %v2575_v25 = vmul.f32 0.5, %v1270_v49  ;;  %v20663_v4 = vld [vmem:[#allocation5_spill] sm:$0xff] }
 0x1f2   : > { %v1274_v13 = vadd.f32 %v20662_v50, %v15048_v3  ;;  %7508 = vmatmul.mubr.bf16.vlgmr.msra.gmra.mrb[224].mxu1 %v20663_v4  ;;  %13470 = vtanh.f32 %v2400_v22  ;;  %v2409_v53 = vmul.f32 0.5, %v1393_v48  ;;  %v16234_v59 = vpack.c.bf16 %v3715_v54, %v3703_v9  ;;  %v20664_v15 = vld [vmem:[#allocation24_spill] sm:$0xff]  ;;  %v20665_v58 = vld [vmem:[#allocation10_spill] sm:$0xff]  ;;  %v12725_v28 = vld [vmem:[%s20297_s3 + $0x228] ss:$16 sps:$4 sm:$0xff]   ;;  %v16242_v55 = vpop.eup %13452 }
 0x1f3   : > { %v1282_v56 = vadd.f32 %v20664_v15, %v15058_v6  ;;  %7517 = vmatprep.mubr.bf16.mxu1 %v20665_v58  ;;  %7669 = vmatpush1.bf16.msra.mxu1 %v12719_v37  ;;  %v3728_v17 = vadd.f32 0.5, %v3344_v62  ;;  %v3740_v40 = vadd.f32 0.5, %v3356_v19  ;;  %v20666_v22 = vld [vmem:[#allocation27_spill] sm:$0xff]  ;;  %v2411_v54 = vmul.f32 0.5, %v1586_v18  ;;  %v16252_v62 = vpop.f32.mrb[120].mxu1 }
 0x1f4   : > { %v2587_v27 = vmul.f32 0.5, %v1274_v13  ;;  %v1286_v4 = vadd.f32 %v20666_v22, %v15058_v6  ;;  %7670 = vmatprep.subr.bf16.mxu1 %v12727_v20  ;;  %v12733_v15 = vld [vmem:[%s20297_s3 + $0x24c] ss:$16 sps:$4 sm:$0xff]   ;;  %v13455_v48 = vpop.eup %13454  ;;  %v1397_v37 = vadd.f32 %v15496_v29, %v15324_v61  ;;  %6470 = vmatmul.mubr.bf16.gmra.mrb[208].mxu0 %v16234_v59  ;;  %13472 = vtanh.f32 %v2575_v25  ;;  %20667 = vst [vmem:[#allocation20_spill] sm:$0xff] %v16252_v62  ;;  %v16254_v13 = vpop.f32.mrb[120].mxu0  ;;  %v20673_v62 = vld [vmem:[#allocation68_spill] sm:$0xff] }
 0x1f5   : > { %v2600_v49 = vmul.f32 0.5, %v1282_v56  ;;  %20668 = vst [vmem:[#allocation5_spill] sm:$0xff] %v16254_v13  ;;  %v16256_v19 = vpop.eup %13456  ;;  %v20670_v20 = vld [vmem:[#allocation67_spill] sm:$0xff]  ;;  %v16260_v50 = vpack.c.bf16 %v3740_v40, %v3728_v17  ;;  %v16262_v58 = vpop.f32.mrb[121].mxu1  ;;  %v3131_v56 = vmul.f32 0.5, %v16152_v32  ;;  %v2410_v25 = vmul.f32 0.5, %v1395_v7 }
 0x1f6   : > { %20669 = vst [vmem:[#allocation24_spill] sm:$0xff] %v16256_v19  ;;  %v1590_v9 = vadd.f32 %v20670_v20, %v15327_v8  ;;  %13474 = vtanh.f32 %v2587_v27  ;;  %v2612_v18 = vmul.f32 0.5, %v1286_v4  ;;  %20671 = vst [vmem:[#allocation10_spill] sm:$0xff] %v16262_v58  ;;  %v16264_v29 = vpop.f32.mrb[121].mxu0  ;;  %v13459_v22 = vpop.eup %13458  ;;  %v1399_v13 = vadd.f32 %v20673_v62, %v15802_v52  ;;  %v12731_v17 = vld [vmem:[%s20297_s3 + $0x248] ss:$16 sps:$4 sm:$0xff]  }
 0x1f7   : > { %20672 = vst [vmem:[#allocation27_spill] sm:$0xff] %v16264_v29  ;;  %13476 = vtanh.f32 %v2600_v49  ;;  %v16269_v63 = vpop.f32.mrb[122].mxu1  ;;  %v16271_v14 = vpop.f32.mrb[122].mxu0  ;;  %7671 = vmatpush1.bf16.msra.mxu1 %v12725_v28  ;;  %v3132_v27 = vmul.f32 0.5, %v16178_v26  ;;  %v2412_v4 = vmul.f32 0.5, %v1588_v23  ;;  %v20676_v32 = vld [vmem:[#allocation69_spill] sm:$0xff]  ;;  %6479 = vmatprep.mubr.bf16.mxu0 %v16260_v50 }
 0x1f8   : > { %20674 = vst [vmem:[#allocation67_spill] sm:$0xff] %v16269_v63  ;;  %20675 = vst [vmem:[#allocation68_spill] sm:$0xff] %v16271_v14  ;;  %v16276_v40 = vpop.eup %13460  ;;  %v1592_v7 = vadd.f32 %v20676_v32, %v15806_v33  ;;  %13478 = vtanh.f32 %v2612_v18  ;;  %v16282_v49 = vpop.f32.mrb[123].mxu1  ;;  %7672 = vmatprep.subr.bf16.mxu1 %v12733_v15  ;;  %v12739_v28 = vld [vmem:[%s20297_s3 + $0x26c] ss:$16 sps:$4 sm:$0xff]   ;;  %v3143_v14 = vmul.f32 0.5, %v13451_v5 }
 0x1f9   : > { %20677 = vst [vmem:[#allocation69_spill] sm:$0xff] %v16282_v49  ;;  %v16284_v62 = vpop.f32.mrb[123].mxu0  ;;  %v16289_v20 = vpop.eup %13462  ;;  %13480 = vtanh.f32 %v2409_v53  ;;  %v2421_v26 = vmul.f32 0.5, %v1397_v37  ;;  %v20679_v23 = vld [vmem:[#allocation70_spill] sm:$0xff]  ;;  %v16296_v18 = vadd.f32 0.5, %v16201_v21  ;;  %v20682_v15 = vld [vmem:[#allocation71_spill] sm:$0xff] }
 0x1fa   : > { %20678 = vst [vmem:[#allocation171_spill] sm:$0xff] %v16284_v62  ;;  %v1403_v32 = vadd.f32 %v20679_v23, %v15324_v61  ;;  %v16293_v63 = vpop.eup %13464  ;;  %13482 = vtanh.f32 %v2411_v54  ;;  %v2423_v62 = vmul.f32 0.5, %v1590_v9  ;;  %v1596_v49 = vadd.f32 %v20682_v15, %v15327_v8  ;;  %v20683_v29 = vld [vmem:[#allocation9_spill] sm:$0xff]  ;;  %v20684_v5 = vld [vmem:[#allocation72_spill] sm:$0xff] }
 0x1fb   : > { %20680 = vst [vmem:[#allocation70_spill] sm:$0xff] %v16293_v63  ;;  %20681 = vst [vmem:[#allocation172_spill] sm:$0xff] %v16296_v18  ;;  %7518 = vmatmul.mubr.bf16.gmra.mrb[228].mxu1 %v20683_v29  ;;  %v16301_v58 = vpop.eup %13466  ;;  %13484 = vtanh.f32 %v2410_v25  ;;  %v2422_v53 = vmul.f32 0.5, %v1399_v13  ;;  %v1405_v37 = vadd.f32 %v20684_v5, %v15802_v52  ;;  %v1598_v23 = vadd.f32 %v15538_v47, %v15806_v33  ;;  %v12737_v21 = vld [vmem:[%s20297_s3 + $0x268] ss:$16 sps:$4 sm:$0xff]   ;;  %v16326_v5 = vpop.f32.mrb[124].mxu1 }
 0x1fc   : > { %7527 = vmatprep.mubr.bf16.mxu1 %v20685_v35  ;;  %7673 = vmatpush1.bf16.msra.mxu1 %v12731_v17  ;;  %v16311_v54 = vpop.eup %13468  ;;  %v16313_v9 = vadd.f32 0.5, %v3131_v56  ;;  %v16315_v29 = vadd.f32 0.5, %v3132_v27  ;;  %13486 = vtanh.f32 %v2412_v4  ;;  %v2424_v13 = vmul.f32 0.5, %v1592_v7  ;;  %v12745_v47 = vld [vmem:[%s20297_s3 + $0x28c] ss:$16 sps:$4 sm:$0xff]   ;;  %20689 = vst [vmem:[#allocation17_spill] sm:$0xff] %v16326_v5 }
 0x1fd   : > { %7674 = vmatprep.subr.bf16.mxu1 %v12739_v28  ;;  %v16320_v25 = vpop.eup %13470  ;;  %v16322_v35 = vadd.f32 0.5, %v3143_v14  ;;  %v16324_v17 = vmul.f32 0.5, %v13455_v48  ;;  %13488 = vtanh.f32 %v2421_v26  ;;  %v2433_v15 = vmul.f32 0.5, %v1403_v32  ;;  %v16328_v56 = vpop.f32.mrb[124].mxu0  ;;  %v20691_v7 = vld [vmem:[#allocation23_spill] sm:$0xff] }
 0x1fe   : > { %20686 = vst [vmem:[#allocation71_spill] sm:$0xff] %v16313_v9  ;;  %20687 = vst [vmem:[#allocation9_spill] sm:$0xff] %v16315_v29  ;;  %v16330_v27 = vmul.f32 0.5, %v13459_v22  ;;  %13490 = vtanh.f32 %v2423_v62  ;;  %v2435_v4 = vmul.f32 0.5, %v1596_v49  ;;  %v1280_v28 = vadd.f32 %v20691_v7, %v15048_v3  ;;  %v16334_v9 = vpop.f32.mrb[125].mxu1  ;;  %v16336_v29 = vpop.f32.mrb[125].mxu0 }
 0x1ff   : > { %20688 = vst [vmem:[#allocation72_spill] sm:$0xff] %v16322_v35  ;;  %20690 = vst [vmem:[#allocation173_spill] sm:$0xff] %v16328_v56  ;;  %v13473_v14 = vpop.eup %13472  ;;  %13492 = vtanh.f32 %v2422_v53  ;;  %v16338_v48 = vmul.f32 0.5, %v1405_v37  ;;  %v16340_v26 = vmul.f32 0.5, %v1598_v23  ;;  %v16342_v32 = vpop.f32.mrb[126].mxu1  ;;  %v20696_v7 = vld [vmem:[#allocation25_spill] sm:$0xff] }
 0x200   : > { %20692 = vst [vmem:[#allocation23_spill] sm:$0xff] %v16334_v9  ;;  %20693 = vst [vmem:[#allocation174_spill] sm:$0xff] %v16336_v29  ;;  %v16344_v35 = vpop.f32.mrb[126].mxu0  ;;  %7675 = vmatpush1.bf16.msra.mxu1 %v12737_v21  ;;  %v12743_v22 = vld [vmem:[%s20297_s3 + $0x288] ss:$16 sps:$4 sm:$0xff]   ;;  %v13475_v49 = vpop.eup %13474  ;;  %13494 = vtanh.f32 %v2424_v13  ;;  %v3343_v62 = vmul.f32 0.5, %v13473_v14  ;;  %v1284_v18 = vadd.f32 %v20696_v7, %v15048_v3 }
 0x201   : > { %20694 = vst [vmem:[#allocation175_spill] sm:$0xff] %v16342_v32  ;;  %20695 = vst [vmem:[#allocation176_spill] sm:$0xff] %v16344_v35  ;;  %v2599_v53 = vmul.f32 0.5, %v1280_v28  ;;  %v16351_v37 = vpop.f32.mrb[127].mxu1  ;;  %v16353_v23 = vpop.f32.mrb[127].mxu0  ;;  %7676 = vmatprep.subr.bf16.mxu1 %v12745_v47  ;;  %13496 = vtanh.f32 %v2433_v15  ;;  %v1407_v32 = vadd.f32 %v15540_v45, %v15324_v61  ;;  %v3355_v13 = vmul.f32 0.5, %v13475_v49 }
 0x202   : > { %20697 = vst [vmem:[#allocation25_spill] sm:$0xff] %v16351_v37  ;;  %20698 = vst [vmem:[#allocation177_spill] sm:$0xff] %v16353_v23  ;;  %v12751_v21 = vld [vmem:[%s20297_s3 + $0x2ac] ss:$16 sps:$4 sm:$0xff]   ;;  %v13477_v35 = vpop.eup %13476  ;;  %v20699_v14 = vld [vmem:[#allocation30_spill] sm:$0xff]  ;;  %13498 = vtanh.f32 %v2435_v4  ;;  %v3727_v28 = vadd.f32 0.5, %v3343_v62 }
 0x203   : > { %v1292_v29 = vadd.f32 %v20699_v14, %v15058_v6  ;;  %v13479_v7 = vpop.eup %13478  ;;  %v3368_v37 = vmul.f32 0.5, %v13477_v35  ;;  %v2611_v9 = vmul.f32 0.5, %v1284_v18  ;;  %v20700_v23 = vld [vmem:[#allocation16_spill] sm:$0xff]  ;;  %v3739_v56 = vadd.f32 0.5, %v3355_v13  ;;  %v20702_v15 = vld [vmem:[#allocation33_spill] sm:$0xff]  ;;  %v20703_v45 = vld [vmem:[#allocation22_spill] sm:$0xff] }
 0x204   : > { %7528 = vmatmul.mubr.bf16.gmra.mrb[232].mxu1 %v20700_v23  ;;  %v16363_v47 = vpop.eup %13480  ;;  %v3380_v5 = vmul.f32 0.5, %v13479_v7  ;;  %13500 = vtanh.f32 %v2599_v53  ;;  %v1296_v63 = vadd.f32 %v20702_v15, %v15058_v6  ;;  %v12749_v4 = vld [vmem:[%s20297_s3 + $0x2a8] ss:$16 sps:$4 sm:$0xff]   ;;  %v20705_v62 = vld [vmem:[#allocation74_spill] sm:$0xff]  ;;  %v12757_v6 = vld [vmem:[%s20297_s3 + $0x2cc] ss:$16 sps:$4 sm:$0xff]  }
 0x205   : > { %20701 = vst [vmem:[#allocation30_spill] sm:$0xff] %v16363_v47  ;;  %7537 = vmatprep.mubr.bf16.mxu1 %v20703_v45  ;;  %7677 = vmatpush1.bf16.msra.mxu1 %v12743_v22  ;;  %v13483_v49 = vpop.eup %13482  ;;  %v20704_v18 = vld [vmem:[#allocation73_spill] sm:$0xff]  ;;  %v1409_v23 = vadd.f32 %v20705_v62, %v15802_v52  ;;  %13502 = vtanh.f32 %v2611_v9  ;;  %v2624_v13 = vmul.f32 0.5, %v1292_v29  ;;  %v16380_v22 = vpack.c.bf16 %v3739_v56, %v3727_v28  ;;  %v16382_v45 = vpop.f32.mrb[128].mxu1 }
 0x206   : > { %v1600_v35 = vadd.f32 %v20704_v18, %v15327_v8  ;;  %7678 = vmatprep.subr.bf16.mxu1 %v12751_v21  ;;  %v16378_v53 = vpop.eup %13484  ;;  %v3752_v14 = vadd.f32 0.5, %v3368_v37  ;;  %v3764_v7 = vadd.f32 0.5, %v3380_v5  ;;  %v2636_v15 = vmul.f32 0.5, %v1296_v63  ;;  %20706 = vst [vmem:[#allocation16_spill] sm:$0xff] %v16382_v45  ;;  %v16384_v18 = vpop.f32.mrb[128].mxu0  ;;  %v20708_v21 = vld [vmem:[#allocation75_spill] sm:$0xff] }
 0x207   : > { %20707 = vst [vmem:[#allocation33_spill] sm:$0xff] %v16384_v18  ;;  %v13487_v47 = vpop.eup %13486  ;;  %v3156_v9 = vmul.f32 0.5, %v16289_v20  ;;  %v3167_v29 = vmul.f32 0.5, %v16301_v58  ;;  %v1602_v62 = vadd.f32 %v20708_v21, %v15806_v33  ;;  %13504 = vtanh.f32 %v2624_v13  ;;  %v16390_v19 = vpop.f32.mrb[129].mxu1  ;;  %6480 = vmatmul.mubr.bf16.gmra.mrb[212].mxu0 %v16380_v22  ;;  %v12755_v13 = vld [vmem:[%s20297_s3 + $0x2c8] ss:$16 sps:$4 sm:$0xff]  }
 0x208   : > { %20709 = vst [vmem:[#allocation22_spill] sm:$0xff] %v16390_v19  ;;  %v16392_v56 = vpop.f32.mrb[129].mxu0  ;;  %v16394_v37 = vpop.eup %13488  ;;  %v3168_v63 = vmul.f32 0.5, %v16320_v25  ;;  %v2445_v5 = vmul.f32 0.5, %v1407_v32  ;;  %v16398_v28 = vpack.c.bf16 %v3764_v7, %v3752_v14  ;;  %13506 = vtanh.f32 %v2636_v15  ;;  %v20714_v25 = vld [vmem:[#allocation76_spill] sm:$0xff]  ;;  %v20715_v18 = vld [vmem:[#allocation77_spill] sm:$0xff] }
 0x209   : > { %20710 = vst [vmem:[#allocation73_spill] sm:$0xff] %v16392_v56  ;;  %20711 = vst [vmem:[#allocation74_spill] sm:$0xff] %v16394_v37  ;;  %v16400_v20 = vpop.f32.mrb[130].mxu1  ;;  %v16402_v58 = vpop.f32.mrb[130].mxu0  ;;  %7679 = vmatpush1.bf16.msra.mxu1 %v12749_v4  ;;  %v2447_v56 = vmul.f32 0.5, %v1600_v35  ;;  %v2446_v19 = vmul.f32 0.5, %v1409_v23  ;;  %v1413_v32 = vadd.f32 %v20714_v25, %v15324_v61  ;;  %v1606_v14 = vadd.f32 %v20715_v18, %v15327_v8 }
 0x20a   : > { %20712 = vst [vmem:[#allocation75_spill] sm:$0xff] %v16400_v20  ;;  %20713 = vst [vmem:[#allocation178_spill] sm:$0xff] %v16402_v58  ;;  %v13491_v21 = vpop.eup %13490  ;;  %v16411_v7 = vpop.f32.mrb[131].mxu1  ;;  %7680 = vmatprep.subr.bf16.mxu1 %v12757_v6  ;;  %v3179_v4 = vmul.f32 0.5, %v13483_v49  ;;  %13508 = vtanh.f32 %v16338_v48  ;;  %v20718_v20 = vld [vmem:[#allocation78_spill] sm:$0xff]  ;;  %v20719_v23 = vld [vmem:[#allocation79_spill] sm:$0xff]  ;;  %6489 = vmatprep.mubr.bf16.mxu0 %v16398_v28 }
 0x20b   : > { %20716 = vst [vmem:[#allocation76_spill] sm:$0xff] %v16411_v7  ;;  %v16413_v15 = vpop.f32.mrb[131].mxu0  ;;  %v16415_v58 = vpop.eup %13492  ;;  %v1415_v35 = vadd.f32 %v20718_v20, %v15802_v52  ;;  %v1608_v45 = vadd.f32 %v20719_v23, %v15806_v33  ;;  %v12763_v18 = vld [vmem:[%s20297_s3 + $0x2ec] ss:$16 sps:$4 sm:$0xff]   ;;  %v16429_v6 = vadd.f32 0.5, %v16324_v17  ;;  %v16432_v49 = vadd.f32 0.5, %v16330_v27 }
 0x20c   : > { %20717 = vst [vmem:[#allocation77_spill] sm:$0xff] %v16413_v15  ;;  %v16426_v25 = vpop.eup %13494  ;;  %13510 = vtanh.f32 %v16340_v26  ;;  %v2448_v48 = vmul.f32 0.5, %v1602_v62  ;;  %7538 = vmatmul.mubr.bf16.gmra.mrb[236].mxu1 %v15266_v41  ;;  %v16438_v23 = vadd.f32 0.5, %v3156_v9  ;;  %v16440_v15 = vadd.f32 0.5, %v3167_v29  ;;  %v20726_v37 = vld [vmem:[#allocation28_spill] sm:$0xff] }
 0x20d   : > { %20720 = vst [vmem:[#allocation78_spill] sm:$0xff] %v16429_v6  ;;  %20721 = vst [vmem:[#allocation79_spill] sm:$0xff] %v16432_v49  ;;  %v16436_v20 = vpop.eup %13496  ;;  %v16442_v7 = vadd.f32 0.5, %v3168_v63  ;;  %13512 = vtanh.f32 %v2445_v5  ;;  %7547 = vmatprep.mubr.bf16.mxu1 %v20726_v37  ;;  %7681 = vmatpush1.bf16.msra.mxu1 %v12755_v13  ;;  %v12761_v17 = vld [vmem:[%s20297_s3 + $0x2e8] ss:$16 sps:$4 sm:$0xff]   ;;  %v2457_v41 = vmul.f32 0.5, %v1413_v32 }
 0x20e   : > { %20722 = vst [vmem:[#allocation179_spill] sm:$0xff] %v16436_v20  ;;  %20723 = vst [vmem:[#allocation180_spill] sm:$0xff] %v16438_v23  ;;  %v16448_v27 = vpop.eup %13498  ;;  %13514 = vtanh.f32 %v2447_v56  ;;  %v2459_v26 = vmul.f32 0.5, %v1606_v14  ;;  %v20727_v9 = vld [vmem:[#allocation80_spill] sm:$0xff]  ;;  %7682 = vmatprep.subr.bf16.mxu1 %v12763_v18  ;;  %v16452_v63 = vadd.f32 0.5, %v3179_v4  ;;  %v2458_v5 = vmul.f32 0.5, %v1415_v35 }
 0x20f   : > { %20724 = vst [vmem:[#allocation181_spill] sm:$0xff] %v16440_v15  ;;  %20725 = vst [vmem:[#allocation182_spill] sm:$0xff] %v16442_v7  ;;  %v1417_v62 = vadd.f32 %v20727_v9, %v15324_v61  ;;  %v13501_v29 = vpop.eup %13500  ;;  %13516 = vtanh.f32 %v2446_v19  ;;  %v16454_v37 = vmul.f32 0.5, %v1608_v45  ;;  %v16456_v13 = vpop.f32.mrb[132].mxu1  ;;  %v16460_v7 = vmul.f32 0.5, %v13487_v47  ;;  %v20731_v56 = vld [vmem:[#allocation81_spill] sm:$0xff] }
 0x210   : > { %20728 = vst [vmem:[#allocation28_spill] sm:$0xff] %v16452_v63  ;;  %20729 = vst [vmem:[#allocation80_spill] sm:$0xff] %v16456_v13  ;;  %v16458_v15 = vpop.f32.mrb[132].mxu0  ;;  %v13503_v49 = vpop.eup %13502  ;;  %13518 = vtanh.f32 %v2448_v48  ;;  %v1610_v32 = vadd.f32 %v20731_v56, %v15327_v8  ;;  %v3367_v14 = vmul.f32 0.5, %v13501_v29  ;;  %v20734_v19 = vld [vmem:[#allocation82_spill] sm:$0xff]  ;;  %v20735_v35 = vld [vmem:[#allocation83_spill] sm:$0xff] }
 0x211   : > { %20730 = vst [vmem:[#allocation183_spill] sm:$0xff] %v16458_v15  ;;  %v16464_v18 = vpop.f32.mrb[133].mxu1  ;;  %v16466_v4 = vpop.f32.mrb[133].mxu0  ;;  %v1419_v45 = vadd.f32 %v20734_v19, %v15802_v52  ;;  %v1612_v9 = vadd.f32 %v20735_v35, %v15806_v33  ;;  %v3379_v63 = vmul.f32 0.5, %v13503_v49  ;;  %v20736_v23 = vld [vmem:[#allocation29_spill] sm:$0xff]  ;;  %7683 = vmatpush1.bf16.msra.mxu1 %v12761_v17  ;;  %v16478_v56 = vmul.f32 0.5, %v13491_v21 }
 0x212   : > { %20732 = vst [vmem:[#allocation81_spill] sm:$0xff] %v16464_v18  ;;  %20733 = vst [vmem:[#allocation184_spill] sm:$0xff] %v16466_v4  ;;  %v1290_v47 = vadd.f32 %v20736_v23, %v15048_v3  ;;  %v16474_v6 = vpop.f32.mrb[134].mxu1  ;;  %v16476_v48 = vpop.f32.mrb[134].mxu0  ;;  %13520 = vtanh.f32 %v2457_v41  ;;  %v16480_v4 = vmul.f32 0.5, %v1417_v62  ;;  %v20739_v19 = vld [vmem:[#allocation32_spill] sm:$0xff] }
 0x213   : > { %20737 = vst [vmem:[#allocation82_spill] sm:$0xff] %v16474_v6  ;;  %20738 = vst [vmem:[#allocation83_spill] sm:$0xff] %v16476_v48  ;;  %v13505_v29 = vpop.eup %13504  ;;  %v1294_v18 = vadd.f32 %v20739_v19, %v15048_v3  ;;  %v16484_v15 = vpop.f32.mrb[135].mxu1  ;;  %v3751_v23 = vadd.f32 0.5, %v3367_v14  ;;  %v3763_v13 = vadd.f32 0.5, %v3379_v63  ;;  %13522 = vtanh.f32 %v2459_v26 }
 0x214   : > { %20740 = vst [vmem:[#allocation29_spill] sm:$0xff] %v16484_v15  ;;  %v16486_v49 = vpop.f32.mrb[135].mxu0  ;;  %v13507_v35 = vpop.eup %13506  ;;  %v3392_v6 = vmul.f32 0.5, %v13505_v29  ;;  %v2623_v20 = vmul.f32 0.5, %v1290_v47  ;;  %v3034_v21 = vmul.f32 0.5, %v15918_v0  ;;  %7548 = vmatmul.mubr.bf16.gmra.mrb[240].mxu1 %v15291_v51  ;;  %v2471_v62 = vmul.f32 0.5, %v1610_v32 }
 0x215   : > { %20741 = vst [vmem:[#allocation32_spill] sm:$0xff] %v16486_v49  ;;  %v3404_v17 = vmul.f32 0.5, %v13507_v35  ;;  %v2635_v48 = vmul.f32 0.5, %v1294_v18  ;;  %v16490_v41 = vpop.eup %13508  ;;  %v16492_v3 = vpack.c.bf16 %v3763_v13, %v3751_v23  ;;  %v3046_v19 = vmul.f32 0.5, %v15923_v24  ;;  %7557 = vmatprep.mubr.bf16.mxu1 %v15333_v34  ;;  %v12767_v26 = vld [vmem:[%s20297_s3 + $0x308] ss:$16 sps:$4 sm:$0xff]  }
 0x216   : > { %13524 = vtanh.f32 %v2623_v20  ;;  %v12769_v0 = vld [vmem:[%s20297_s3 + $0x30c] ss:$16 sps:$4 sm:$0xff]   ;;  %v13511_v63 = vpop.eup %13510  ;;  %v20742_v51 = vld [vmem:[#allocation84_spill] sm:$0xff]  ;;  %v3776_v32 = vadd.f32 0.5, %v3392_v6  ;;  %v2472_v24 = vmul.f32 0.5, %v1612_v9  ;;  %v3418_v47 = vadd.f32 0.5, %v3034_v21 }
 0x217   : > { %v1423_v14 = vadd.f32 %v20742_v51, %v15324_v61  ;;  %v3788_v13 = vadd.f32 0.5, %v3404_v17  ;;  %13526 = vtanh.f32 %v2635_v48  ;;  %v16504_v20 = vpop.eup %13512  ;;  %v20743_v34 = vld [vmem:[#allocation85_spill] sm:$0xff]  ;;  %6490 = vmatmul.mubr.bf16.gmra.mrb[216].mxu0 %v16492_v3  ;;  %v3430_v29 = vadd.f32 0.5, %v3046_v19  ;;  %v16509_v35 = vpop.f32.mrb[136].mxu1  ;;  %7684 = vmatprep.subr.bf16.mxu1 %v12769_v0 }
 0x218   : > { %v1616_v18 = vadd.f32 %v20743_v34, %v15327_v8  ;;  %20744 = vst [vmem:[#allocation84_spill] sm:$0xff] %v16509_v35  ;;  %v16511_v23 = vpop.f32.mrb[136].mxu0  ;;  %v13515_v49 = vpop.eup %13514  ;;  %v3192_v6 = vmul.f32 0.5, %v16426_v25  ;;  %13528 = vtanh.f32 %v2458_v5  ;;  %v2470_v48 = vmul.f32 0.5, %v1419_v45  ;;  %7685 = vmatpush1.bf16.msra.mxu1 %v12767_v26 }
 0x219   : > { %20745 = vst [vmem:[#allocation85_spill] sm:$0xff] %v16511_v23  ;;  %v16514_v17 = vpack.c.bf16 %v3788_v13, %v3776_v32  ;;  %v16516_v9 = vpop.f32.mrb[137].mxu1  ;;  %v16518_v51 = vpop.f32.mrb[137].mxu0  ;;  %13530 = vtanh.f32 %v16454_v37  ;;  %v1425_v21 = vadd.f32 %v15628_v60, %v15802_v52  ;;  %v1618_v19 = vadd.f32 %v15630_v39, %v15806_v33 }
 0x21a   : > { %20746 = vst [vmem:[#allocation185_spill] sm:$0xff] %v16516_v9  ;;  %20747 = vst [vmem:[#allocation186_spill] sm:$0xff] %v16518_v51  ;;  %v16520_v34 = vpop.eup %13516  ;;  %v16527_v25 = vpack.c.bf16 %v3430_v29, %v3418_v47  ;;  %v16529_v5 = vpop.f32.mrb[138].mxu1  ;;  %v16534_v32 = vadd.f32 0.5, %v16460_v7  ;;  %v3203_v26 = vmul.f32 0.5, %v16448_v27  ;;  %13532 = vtanh.f32 %v2471_v62  ;;  %v20753_v29 = vld [vmem:[#allocation86_spill] sm:$0xff] }
 0x21b   : > { %20748 = vst [vmem:[#allocation187_spill] sm:$0xff] %v16529_v5  ;;  %v16531_v45 = vpop.f32.mrb[138].mxu0  ;;  %v13519_v0 = vpop.eup %13518  ;;  %v2481_v37 = vmul.f32 0.5, %v1423_v14  ;;  %6499 = vmatprep.mubr.bf16.mxu0 %v16514_v17  ;;  %v3204_v39 = vmul.f32 0.5, %v13511_v63  ;;  %13534 = vtanh.f32 %v2472_v24  ;;  %v2483_v47 = vmul.f32 0.5, %v1616_v18  ;;  %v20755_v27 = vld [vmem:[#allocation87_spill] sm:$0xff] }
 0x21c   : > { %20749 = vst [vmem:[#allocation188_spill] sm:$0xff] %v16531_v45  ;;  %20750 = vst [vmem:[#allocation189_spill] sm:$0xff] %v16534_v32  ;;  %v16538_v60 = vpop.f32.mrb[139].mxu1  ;;  %v16540_v13 = vpop.f32.mrb[139].mxu0  ;;  %v1427_v45 = vadd.f32 %v20753_v29, %v15324_v61  ;;  %v16547_v7 = vadd.f32 0.5, %v16478_v56  ;;  %13536 = vtanh.f32 %v16480_v4  ;;  %v1620_v62 = vadd.f32 %v20755_v27, %v15327_v8  ;;  %v20756_v14 = vld [vmem:[#allocation88_spill] sm:$0xff]  ;;  %7558 = vmatmul.mubr.bf16.gmra.mrb[244].mxu1 %v15331_v31 }
 0x21d   : > { %20751 = vst [vmem:[#allocation190_spill] sm:$0xff] %v16538_v60  ;;  %20752 = vst [vmem:[#allocation191_spill] sm:$0xff] %v16540_v13  ;;  %v16544_v5 = vpop.eup %13520  ;;  %v1429_v32 = vadd.f32 %v20756_v14, %v15802_v52  ;;  %v16555_v63 = vadd.f32 0.5, %v3192_v6  ;;  %13538 = vtanh.f32 %v2470_v48  ;;  %v2482_v24 = vmul.f32 0.5, %v1425_v21  ;;  %v20758_v29 = vld [vmem:[#allocation38_spill] sm:$0xff]  ;;  %v20760_v4 = vld [vmem:[#allocation89_spill] sm:$0xff] }
 0x21e   : > { %20754 = vst [vmem:[#allocation86_spill] sm:$0xff] %v16547_v7  ;;  %v2484_v18 = vmul.f32 0.5, %v1618_v19  ;;  %7567 = vmatprep.mubr.bf16.mxu1 %v20758_v29  ;;  %v13523_v13 = vpop.eup %13522  ;;  %v16558_v56 = vadd.f32 0.5, %v3203_v26  ;;  %v3215_v7 = vmul.f32 0.5, %v13515_v49  ;;  %13540 = vtanh.f32 %v2481_v37  ;;  %v16564_v6 = vpop.f32.mrb[140].mxu1 }
 0x21f   : > { %20757 = vst [vmem:[#allocation87_spill] sm:$0xff] %v16555_v63  ;;  %v1622_v27 = vadd.f32 %v20760_v4, %v15806_v33  ;;  %v16562_v51 = vadd.f32 0.5, %v3204_v39  ;;  %v3216_v14 = vmul.f32 0.5, %v13519_v0  ;;  %13542 = vtanh.f32 %v2483_v47  ;;  %20762 = vst [vmem:[#allocation89_spill] sm:$0xff] %v16564_v6  ;;  %v16566_v48 = vpop.f32.mrb[140].mxu0  ;;  %v16569_v37 = vpop.f32.mrb[141].mxu1 }
 0x220   : > { %20759 = vst [vmem:[#allocation88_spill] sm:$0xff] %v16558_v56  ;;  %v13525_v60 = vpop.eup %13524  ;;  %v2493_v31 = vmul.f32 0.5, %v1427_v45  ;;  %20763 = vst [vmem:[#allocation192_spill] sm:$0xff] %v16566_v48  ;;  %v2495_v19 = vmul.f32 0.5, %v1620_v62  ;;  %v2494_v29 = vmul.f32 0.5, %v1429_v32  ;;  %v3058_v49 = vmul.f32 0.5, %v15949_v12 }
 0x221   : > { %20761 = vst [vmem:[#allocation38_spill] sm:$0xff] %v16562_v51  ;;  %v13527_v21 = vpop.eup %13526  ;;  %v3391_v26 = vmul.f32 0.5, %v13525_v60  ;;  %20764 = vst [vmem:[#allocation193_spill] sm:$0xff] %v16569_v37  ;;  %v16571_v56 = vpop.f32.mrb[141].mxu0  ;;  %13544 = vtanh.f32 %v2482_v24  ;;  %v20766_v39 = vld [vmem:[#allocation90_spill] sm:$0xff]  ;;  %v20767_v45 = vld [vmem:[#allocation91_spill] sm:$0xff] }
 0x222   : > { %20765 = vst [vmem:[#allocation194_spill] sm:$0xff] %v16571_v56  ;;  %v1433_v0 = vadd.f32 %v20766_v39, %v15324_v61  ;;  %v1626_v47 = vadd.f32 %v20767_v45, %v15327_v8  ;;  %v3403_v4 = vmul.f32 0.5, %v13527_v21  ;;  %v16577_v51 = vpop.f32.mrb[142].mxu1  ;;  %v16579_v63 = vpop.f32.mrb[142].mxu0  ;;  %v16583_v60 = vadd.f32 0.5, %v3215_v7  ;;  %v20775_v7 = vld [vmem:[#allocation93_spill] sm:$0xff] }
 0x223   : > { %20768 = vst [vmem:[#allocation90_spill] sm:$0xff] %v16577_v51  ;;  %20769 = vst [vmem:[#allocation91_spill] sm:$0xff] %v16579_v63  ;;  %v16581_v32 = vpop.eup %13528  ;;  %13546 = vtanh.f32 %v2484_v18  ;;  %v2496_v12 = vmul.f32 0.5, %v1622_v27  ;;  %v3070_v62 = vmul.f32 0.5, %v15975_v1  ;;  %v16586_v24 = vpop.f32.mrb[143].mxu1  ;;  %v16590_v37 = vadd.f32 0.5, %v3216_v14 }
 0x224   : > { %20770 = vst [vmem:[#allocation195_spill] sm:$0xff] %v16583_v60  ;;  %20771 = vst [vmem:[#allocation196_spill] sm:$0xff] %v16586_v24  ;;  %v16588_v56 = vpop.f32.mrb[143].mxu0  ;;  %v13531_v39 = vpop.eup %13530  ;;  %v3227_v21 = vmul.f32 0.5, %v13523_v13  ;;  %v3775_v45 = vadd.f32 0.5, %v3391_v26  ;;  %v3787_v51 = vadd.f32 0.5, %v3403_v4  ;;  %v1628_v18 = vadd.f32 %v20775_v7, %v15806_v33 }
 0x225   : > { %20772 = vst [vmem:[#allocation197_spill] sm:$0xff] %v16588_v56  ;;  %20773 = vst [vmem:[#allocation198_spill] sm:$0xff] %v16590_v37  ;;  %v13533_v48 = vpop.eup %13532  ;;  %v20774_v63 = vld [vmem:[#allocation92_spill] sm:$0xff]  ;;  %v3442_v27 = vadd.f32 0.5, %v3058_v49  ;;  %v3454_v60 = vadd.f32 0.5, %v3070_v62  ;;  %v20776_v1 = vld [vmem:[#allocation39_spill] sm:$0xff]  ;;  %13548 = vtanh.f32 %v2495_v19 }
 0x226   : > { %v1435_v6 = vadd.f32 %v20774_v63, %v15802_v52  ;;  %7568 = vmatmul.mubr.bf16.gmra.mrb[248].mxu1 %v20776_v1  ;;  %v12773_v56 = vld [vmem:[%s20297_s3 + $0x328] ss:$16 sps:$4 sm:$0xff]   ;;  %v12775_v13 = vld [vmem:[%s20297_s3 + $0x32c] ss:$16 sps:$4 sm:$0xff]   ;;  %v13535_v14 = vpop.eup %13534  ;;  %v2505_v26 = vmul.f32 0.5, %v1433_v0  ;;  %v2507_v4 = vmul.f32 0.5, %v1626_v47  ;;  %v16603_v63 = vpack.c.bf16 %v3787_v51, %v3775_v45 }
 0x227   : > { %v20777_v37 = vld [vmem:[#allocation108_spill] sm:$0xff]  ;;  %v16606_v49 = vpop.eup %13536  ;;  %v3228_v62 = vmul.f32 0.5, %v13531_v39  ;;  %13550 = vtanh.f32 %v2496_v12  ;;  %v20778_v7 = vld [vmem:[#allocation94_spill] sm:$0xff]  ;;  %v16610_v24 = vpack.c.bf16 %v3454_v60, %v3442_v27  ;;  %7686 = vmatprep.subr.bf16.mxu1 %v12775_v13  ;;  %v20779_v19 = vld [vmem:[#allocation95_spill] sm:$0xff]  ;;  %v16621_v12 = vpop.f32.mrb[144].mxu1  ;;  %v3239_v27 = vmul.f32 0.5, %v13533_v48 }
 0x228   : > { %7577 = vmatprep.mubr.bf16.mxu1 %v20777_v37  ;;  %v1437_v1 = vadd.f32 %v20778_v7, %v15324_v61  ;;  %v16612_v9 = vpop.eup %13538  ;;  %13552 = vtanh.f32 %v2493_v31  ;;  %v1630_v0 = vadd.f32 %v20779_v19, %v15327_v8  ;;  %v20780_v51 = vld [vmem:[#allocation96_spill] sm:$0xff]  ;;  %v20781_v37 = vld [vmem:[#allocation97_spill] sm:$0xff]  ;;  %6500 = vmatmul.mubr.bf16.gmra.mrb[220].mxu0 %v16603_v63  ;;  %20782 = vst [vmem:[#allocation92_spill] sm:$0xff] %v16621_v12  ;;  %v16623_v39 = vpop.f32.mrb[144].mxu0  ;;  %v3240_v31 = vmul.f32 0.5, %v13535_v14  ;;  %v20792_v14 = vld [vmem:[#allocation99_spill] sm:$0xff] }
 0x229   : > { %v1439_v47 = vadd.f32 %v20780_v51, %v15802_v52  ;;  %v1632_v45 = vadd.f32 %v20781_v37, %v15806_v33  ;;  %20783 = vst [vmem:[#allocation93_spill] sm:$0xff] %v16623_v39  ;;  %7687 = vmatpush1.bf16.msra.mxu1 %v12773_v56  ;;  %v16625_v60 = vpop.eup %13540  ;;  %13554 = vtanh.f32 %v2494_v29  ;;  %v2508_v13 = vmul.f32 0.5, %v1628_v18  ;;  %6542 = vmatprep.mubr.bf16.mxu0 %v16527_v25  ;;  %v16628_v7 = vpop.f32.mrb[145].mxu1  ;;  %v20788_v39 = vld [vmem:[#allocation98_spill] sm:$0xff] }
 0x22a   : > { %20784 = vst [vmem:[#allocation39_spill] sm:$0xff] %v16625_v60  ;;  %20785 = vst [vmem:[#allocation108_spill] sm:$0xff] %v16628_v7  ;;  %v16630_v19 = vpop.f32.mrb[145].mxu0  ;;  %v13543_v51 = vpop.eup %13542  ;;  %v16632_v37 = vadd.f32 0.5, %v3227_v21  ;;  %13556 = vtanh.f32 %v2505_v26  ;;  %v2506_v12 = vmul.f32 0.5, %v1435_v6  ;;  %v1443_v56 = vadd.f32 %v20788_v39, %v15324_v61  ;;  %v20843_v60 = vld [vmem:[#allocation115_spill] sm:$0xff] }
 0x22b   : > { %20786 = vst [vmem:[#allocation94_spill] sm:$0xff] %v16630_v19  ;;  %v16636_v23 = vpop.f32.mrb[146].mxu1  ;;  %v16638_v48 = vpop.f32.mrb[146].mxu0  ;;  %v16640_v29 = vadd.f32 0.5, %v3228_v62  ;;  %13558 = vtanh.f32 %v2507_v4  ;;  %v16642_v18 = vmul.f32 0.5, %v1437_v1  ;;  %v1636_v19 = vadd.f32 %v20792_v14, %v15327_v8 }
 0x22c   : > { %20787 = vst [vmem:[#allocation95_spill] sm:$0xff] %v16632_v37  ;;  %20789 = vst [vmem:[#allocation96_spill] sm:$0xff] %v16636_v23  ;;  %v16646_v7 = vpop.f32.mrb[147].mxu1  ;;  %v16648_v21 = vpop.f32.mrb[147].mxu0  ;;  %v2519_v26 = vmul.f32 0.5, %v1630_v0  ;;  %v16652_v39 = vmul.f32 0.5, %v1439_v47  ;;  %13560 = vtanh.f32 %v2508_v13 }
 0x22d   : > { %20790 = vst [vmem:[#allocation97_spill] sm:$0xff] %v16638_v48  ;;  %20791 = vst [vmem:[#allocation98_spill] sm:$0xff] %v16640_v29  ;;  %v16650_v6 = vpop.eup %13544  ;;  %v2520_v23 = vmul.f32 0.5, %v1632_v45  ;;  %v20796_v48 = vld [vmem:[#allocation100_spill] sm:$0xff]  ;;  %v16656_v4 = vadd.f32 0.5, %v3239_v27  ;;  %v16658_v1 = vadd.f32 0.5, %v3240_v31  ;;  %13562 = vtanh.f32 %v2506_v12 }
 0x22e   : > { %20793 = vst [vmem:[#allocation99_spill] sm:$0xff] %v16646_v7  ;;  %20794 = vst [vmem:[#allocation199_spill] sm:$0xff] %v16648_v21  ;;  %v1445_v62 = vadd.f32 %v20796_v48, %v15802_v52  ;;  %v13547_v37 = vpop.eup %13546  ;;  %v12716_v14 = vld [vmem:[%s20297_s3 + $0x400] ss:$16 sps:$4 sm:$0xff]   ;;  %v3057_v21 = vmul.f32 0.5, %v15934_v36  ;;  %7578 = vmatmul.mubr.bf16.gmra.mrb[252].mxu1 %v15843_v10  ;;  %v3251_v0 = vmul.f32 0.5, %v13543_v51  ;;  %13564 = vtanh.f32 %v2519_v26 }
 0x22f   : > { %20795 = vst [vmem:[#allocation200_spill] sm:$0xff] %v16650_v6  ;;  %20797 = vst [vmem:[#allocation100_spill] sm:$0xff] %v16656_v4  ;;  %v2529_v47 = vmul.f32 0.5, %v1443_v56  ;;  %v3069_v45 = vmul.f32 0.5, %v15960_v43  ;;  %v12724_v27 = vld [vmem:[%s20297_s3 + $0x424] ss:$16 sps:$4 sm:$0xff]   ;;  %7587 = vmatprep.mubr.bf16.mxu1 %v15177_v38  ;;  %v13549_v51 = vpop.eup %13548  ;;  %13566 = vtanh.f32 %v2520_v23 }
 0x230   : > { %20798 = vst [vmem:[#allocation201_spill] sm:$0xff] %v16658_v1  ;;  %v3082_v31 = vmul.f32 0.5, %v16000_v57  ;;  %v2531_v13 = vmul.f32 0.5, %v1636_v19  ;;  %v20799_v48 = vld [vmem:[#allocation101_spill] sm:$0xff]  ;;  %v3094_v36 = vmul.f32 0.5, %v16025_v44  ;;  %v3252_v56 = vmul.f32 0.5, %v13547_v37 }
 0x231   : > { %v1638_v7 = vadd.f32 %v20799_v48, %v15806_v33  ;;  %v12779_v10 = vld [vmem:[%s20297_s3 + $0x348] ss:$16 sps:$4 sm:$0xff]   ;;  %v12781_v43 = vld [vmem:[%s20297_s3 + $0x34c] ss:$16 sps:$4 sm:$0xff]   ;;  %v2530_v57 = vmul.f32 0.5, %v1445_v62  ;;  %v3441_v38 = vadd.f32 0.5, %v3057_v21  ;;  %v13551_v44 = vpop.eup %13550 }
 0x232   : > { %v20800_v4 = vld [vmem:[#allocation45_spill] sm:$0xff]  ;;  %v3453_v12 = vadd.f32 0.5, %v3069_v45  ;;  %v16681_v19 = vpop.f32.mrb[148].mxu1  ;;  %v16683_v48 = vpop.f32.mrb[148].mxu0  ;;  %v20803_v1 = vld [vmem:[#allocation102_spill] sm:$0xff]  ;;  %v3466_v62 = vadd.f32 0.5, %v3082_v31  ;;  %7688 = vmatprep.subr.bf16.mxu1 %v12781_v43  ;;  %13568 = vtanh.f32 %v2531_v13 }
 0x233   : > { %6543 = vmatmul.mubr.bf16.vlgmr.msra.gmra.mrb[160].mxu0 %v20800_v4  ;;  %20801 = vst [vmem:[#allocation101_spill] sm:$0xff] %v16681_v19  ;;  %20802 = vst [vmem:[#allocation45_spill] sm:$0xff] %v16683_v48  ;;  %v1447_v29 = vadd.f32 %v20803_v1, %v15324_v61  ;;  %v12722_v37 = vld [vmem:[%s20297_s3 + $0x420] ss:$16 sps:$4 sm:$0xff]   ;;  %v3478_v35 = vadd.f32 0.5, %v3094_v36  ;;  %v16691_v21 = vpop.f32.mrb[149].mxu1  ;;  %v16695_v19 = vpop.eup %13552  ;;  %7689 = vmatpush1.bf16.msra.mxu1 %v12779_v10  ;;  %13570 = vtanh.f32 %v16642_v18 }
 0x234   : > { %6552 = vmatprep.mubr.bf16.mxu0 %v16610_v24  ;;  %6704 = vmatpush1.bf16.msra.mxu0 %v12716_v14  ;;  %20804 = vst [vmem:[#allocation102_spill] sm:$0xff] %v16691_v21  ;;  %v16693_v45 = vpop.f32.mrb[149].mxu0  ;;  %20806 = vst [vmem:[#allocation203_spill] sm:$0xff] %v16695_v19  ;;  %v20807_v26 = vld [vmem:[#allocation103_spill] sm:$0xff]  ;;  %v20808_v1 = vld [vmem:[#allocation104_spill] sm:$0xff]  ;;  %v16701_v14 = vpack.c.bf16 %v3453_v12, %v3441_v38  ;;  %v16706_v36 = vpop.f32.mrb[150].mxu1  ;;  %13572 = vtanh.f32 %v16652_v39 }
 0x235   : > { %20805 = vst [vmem:[#allocation202_spill] sm:$0xff] %v16693_v45  ;;  %v1640_v48 = vadd.f32 %v20807_v26, %v15327_v8  ;;  %v1449_v15 = vadd.f32 %v20808_v1, %v15802_v52  ;;  %6705 = vmatprep.subr.bf16.mxu0 %v12724_v27  ;;  %v12730_v31 = vld [vmem:[%s20297_s3 + $0x444] ss:$16 sps:$4 sm:$0xff]   ;;  %20809 = vst [vmem:[#allocation103_spill] sm:$0xff] %v16706_v36  ;;  %v16708_v21 = vpop.f32.mrb[150].mxu0  ;;  %v16710_v45 = vpop.eup %13554  ;;  %v3263_v23 = vmul.f32 0.5, %v13549_v51  ;;  %13574 = vtanh.f32 %v2529_v47 }
 0x236   : > { %20810 = vst [vmem:[#allocation104_spill] sm:$0xff] %v16708_v21  ;;  %20811 = vst [vmem:[#allocation204_spill] sm:$0xff] %v16710_v45  ;;  %v20812_v26 = vld [vmem:[#allocation105_spill] sm:$0xff]  ;;  %v16714_v1 = vpack.c.bf16 %v3478_v35, %v3466_v62  ;;  %v16716_v38 = vpop.f32.mrb[151].mxu1  ;;  %v16718_v27 = vpop.f32.mrb[151].mxu0  ;;  %v3264_v36 = vmul.f32 0.5, %v13551_v44  ;;  %7588 = vmatmul.mubr.bf16.gmra.mrb[0].mxu1 %v15184_v42  ;;  %13576 = vtanh.f32 %v2530_v57  ;;  %v1652_v45 = vadd.f32 %v20843_v60, %v15806_v33 }
 0x237   : > { %v1642_v19 = vadd.f32 %v20812_v26, %v15806_v33  ;;  %20813 = vst [vmem:[#allocation105_spill] sm:$0xff] %v16716_v38  ;;  %20814 = vst [vmem:[#allocation205_spill] sm:$0xff] %v16718_v27  ;;  %v16720_v12 = vpop.eup %13556  ;;  %v2532_v43 = vmul.f32 0.5, %v1638_v7  ;;  %v20816_v21 = vld [vmem:[#allocation106_spill] sm:$0xff]  ;;  %v2541_v26 = vmul.f32 0.5, %v1447_v29  ;;  %v20817_v35 = vld [vmem:[#allocation107_spill] sm:$0xff] }
 0x238   : > { %20815 = vst [vmem:[#allocation206_spill] sm:$0xff] %v16720_v12  ;;  %v1453_v51 = vadd.f32 %v20816_v21, %v15324_v61  ;;  %v13559_v13 = vpop.eup %13558  ;;  %v1646_v62 = vadd.f32 %v20817_v35, %v15327_v8  ;;  %v20818_v38 = vld [vmem:[#allocation109_spill] sm:$0xff]  ;;  %6706 = vmatpush1.bf16.msra.mxu0 %v12722_v37  ;;  %v12728_v10 = vld [vmem:[%s20297_s3 + $0x440] ss:$16 sps:$4 sm:$0xff]   ;;  %v16734_v7 = vadd.f32 0.5, %v3251_v0  ;;  %v16736_v18 = vadd.f32 0.5, %v3252_v56 }
 0x239   : > { %v1455_v27 = vadd.f32 %v20818_v38, %v15802_v52  ;;  %v2543_v39 = vmul.f32 0.5, %v1640_v48  ;;  %6707 = vmatprep.subr.bf16.mxu0 %v12730_v31  ;;  %v12736_v29 = vld [vmem:[%s20297_s3 + $0x464] ss:$16 sps:$4 sm:$0xff]   ;;  %v20821_v44 = vld [vmem:[#allocation15_spill] sm:$0xff]  ;;  %v13561_v37 = vpop.eup %13560  ;;  %v16742_v21 = vadd.f32 0.5, %v3263_v23  ;;  %v2542_v38 = vmul.f32 0.5, %v1449_v15 }
 0x23a   : > { %20819 = vst [vmem:[#allocation106_spill] sm:$0xff] %v16734_v7  ;;  %20820 = vst [vmem:[#allocation107_spill] sm:$0xff] %v16736_v18  ;;  %7597 = vmatprep.mubr.bf16.mxu1 %v20821_v44  ;;  %v2544_v35 = vmul.f32 0.5, %v1642_v19  ;;  %v16744_v42 = vadd.f32 0.5, %v3264_v36  ;;  %v16746_v0 = vmul.f32 0.5, %v13559_v13  ;;  %13578 = vtanh.f32 %v2532_v43  ;;  %v16749_v56 = vpop.f32.mrb[152].mxu1  ;;  %v16753_v31 = vpop.eup %13562 }
 0x23b   : > { %20822 = vst [vmem:[#allocation109_spill] sm:$0xff] %v16742_v21  ;;  %v2553_v47 = vmul.f32 0.5, %v1453_v51  ;;  %6553 = vmatmul.mubr.bf16.gmra.mrb[164].mxu0 %v16701_v14  ;;  %20824 = vst [vmem:[#allocation207_spill] sm:$0xff] %v16749_v56  ;;  %v16751_v48 = vpop.f32.mrb[152].mxu0  ;;  %13580 = vtanh.f32 %v2541_v26  ;;  %v2555_v23 = vmul.f32 0.5, %v1646_v62  ;;  %v2554_v44 = vmul.f32 0.5, %v1455_v27 }
 0x23c   : > { %20823 = vst [vmem:[#allocation15_spill] sm:$0xff] %v16744_v42  ;;  %20825 = vst [vmem:[#allocation208_spill] sm:$0xff] %v16751_v48  ;;  %6562 = vmatprep.mubr.bf16.mxu0 %v16714_v1  ;;  %6708 = vmatpush1.bf16.msra.mxu0 %v12728_v10  ;;  %v12734_v15 = vld [vmem:[%s20297_s3 + $0x460] ss:$16 sps:$4 sm:$0xff]   ;;  %v16759_v57 = vpop.f32.mrb[153].mxu1  ;;  %v16761_v19 = vpop.f32.mrb[153].mxu0  ;;  %13582 = vtanh.f32 %v2543_v39 }
 0x23d   : > { %20826 = vst [vmem:[#allocation209_spill] sm:$0xff] %v16753_v31  ;;  %20827 = vst [vmem:[#allocation210_spill] sm:$0xff] %v16759_v57  ;;  %v20829_v36 = vld [vmem:[#allocation110_spill] sm:$0xff]  ;;  %v20830_v51 = vld [vmem:[#allocation36_spill] sm:$0xff]  ;;  %6709 = vmatprep.subr.bf16.mxu0 %v12736_v29  ;;  %v16770_v10 = vpop.f32.mrb[154].mxu1  ;;  %v16772_v48 = vpop.f32.mrb[154].mxu0  ;;  %13584 = vtanh.f32 %v2542_v38 }
 0x23e   : > { %20828 = vst [vmem:[#allocation211_spill] sm:$0xff] %v16761_v19  ;;  %v1648_v43 = vadd.f32 %v20829_v36, %v15806_v33  ;;  %v3081_v13 = vmul.f32 0.5, %v20830_v51  ;;  %v20831_v26 = vld [vmem:[#allocation146_spill] sm:$0xff]  ;;  %20832 = vst [vmem:[#allocation110_spill] sm:$0xff] %v16770_v10  ;;  %v13565_v57 = vpop.eup %13564  ;;  %v3276_v56 = vmul.f32 0.5, %v13561_v37  ;;  %v20834_v39 = vld [vmem:[#allocation112_spill] sm:$0xff]  ;;  %13586 = vtanh.f32 %v2544_v35 }
 0x23f   : > { %v3093_v62 = vmul.f32 0.5, %v20831_v26  ;;  %v12742_v27 = vld [vmem:[%s20297_s3 + $0x484] ss:$16 sps:$4 sm:$0xff]   ;;  %20833 = vst [vmem:[#allocation36_spill] sm:$0xff] %v16772_v48  ;;  %v1457_v19 = vadd.f32 %v20834_v39, %v15324_v61  ;;  %v20836_v7 = vld [vmem:[#allocation157_spill] sm:$0xff]  ;;  %v16778_v42 = vpop.f32.mrb[155].mxu1  ;;  %v13567_v26 = vpop.eup %13566  ;;  %13588 = vtanh.f32 %v2553_v47 }
 0x240   : > { %v20835_v21 = vld [vmem:[#allocation152_spill] sm:$0xff]  ;;  %v3118_v51 = vmul.f32 0.5, %v20836_v7  ;;  %20837 = vst [vmem:[#allocation146_spill] sm:$0xff] %v16778_v42  ;;  %v16780_v29 = vpop.f32.mrb[155].mxu0  ;;  %v20839_v18 = vld [vmem:[#allocation113_spill] sm:$0xff]  ;;  %v3465_v12 = vadd.f32 0.5, %v3081_v13  ;;  %v13569_v7 = vpop.eup %13568  ;;  %6710 = vmatpush1.bf16.msra.mxu0 %v12734_v15  ;;  %13590 = vtanh.f32 %v2555_v23 }
 0x241   : > { %v3106_v36 = vmul.f32 0.5, %v20835_v21  ;;  %20838 = vst [vmem:[#allocation112_spill] sm:$0xff] %v16780_v29  ;;  %v1650_v10 = vadd.f32 %v20839_v18, %v15327_v8  ;;  %v3477_v48 = vadd.f32 0.5, %v3093_v62  ;;  %v12785_v37 = vld [vmem:[%s20297_s3 + $0x368] ss:$16 sps:$4 sm:$0xff]   ;;  %v20840_v39 = vld [vmem:[#allocation114_spill] sm:$0xff]  ;;  %v16796_v62 = vpop.eup %13570  ;;  %6711 = vmatprep.subr.bf16.mxu0 %v12742_v27  ;;  %13592 = vtanh.f32 %v2554_v44 }
 0x242   : > { %v12787_v21 = vld [vmem:[%s20297_s3 + $0x36c] ss:$16 sps:$4 sm:$0xff]   ;;  %v1459_v29 = vadd.f32 %v20840_v39, %v15802_v52  ;;  %v3502_v38 = vadd.f32 0.5, %v3118_v51  ;;  %v12740_v18 = vld [vmem:[%s20297_s3 + $0x480] ss:$16 sps:$4 sm:$0xff]   ;;  %20842 = vst [vmem:[#allocation152_spill] sm:$0xff] %v16796_v62  ;;  %v16806_v51 = vpop.eup %13572 }
 0x243   : > { %v3490_v42 = vadd.f32 0.5, %v3106_v36  ;;  %v20841_v13 = vld [vmem:[#allocation26_spill] sm:$0xff]  ;;  %v2556_v31 = vmul.f32 0.5, %v1648_v43  ;;  %v16800_v35 = vpack.c.bf16 %v3477_v48, %v3465_v12  ;;  %20845 = vst [vmem:[#allocation157_spill] sm:$0xff] %v16806_v51  ;;  %v3287_v39 = vmul.f32 0.5, %v13565_v57  ;;  %7690 = vmatprep.subr.bf16.mxu1 %v12787_v21  ;;  %v16810_v47 = vpop.eup %13574  ;;  %v20847_v43 = vld [vmem:[#allocation116_spill] sm:$0xff] }
 0x244   : > { %7598 = vmatmul.mubr.bf16.gmra.mrb[4].mxu1 %v20841_v13  ;;  %v12748_v15 = vld [vmem:[%s20297_s3 + $0x4a4] ss:$16 sps:$4 sm:$0xff]   ;;  %v2565_v13 = vmul.f32 0.5, %v1457_v19  ;;  %20846 = vst [vmem:[#allocation113_spill] sm:$0xff] %v16810_v47  ;;  %v3288_v60 = vmul.f32 0.5, %v13567_v26  ;;  %v3299_v12 = vmul.f32 0.5, %v13569_v7  ;;  %v1463_v27 = vadd.f32 %v20847_v43, %v15324_v61  ;;  %v16819_v23 = vpop.eup %13576  ;;  %6712 = vmatpush1.bf16.msra.mxu0 %v12740_v18 }
 0x245   : > { %v20844_v36 = vld [vmem:[#allocation34_spill] sm:$0xff]  ;;  %v16808_v62 = vpack.c.bf16 %v3502_v38, %v3490_v42  ;;  %v2567_v48 = vmul.f32 0.5, %v1650_v10  ;;  %6563 = vmatmul.mubr.bf16.gmra.mrb[168].mxu0 %v16800_v35  ;;  %v16815_v6 = vpop.f32.mrb[156].mxu1  ;;  %7691 = vmatpush1.bf16.msra.mxu1 %v12785_v37  ;;  %20850 = vst [vmem:[#allocation115_spill] sm:$0xff] %v16819_v23  ;;  %v16822_v42 = vadd.f32 0.5, %v16746_v0  ;;  %v2566_v57 = vmul.f32 0.5, %v1459_v29  ;;  %v13579_v21 = vpop.eup %13578 }
 0x246   : > { %7607 = vmatprep.mubr.bf16.mxu1 %v20844_v36  ;;  %20848 = vst [vmem:[#allocation114_spill] sm:$0xff] %v16815_v6  ;;  %v16817_v36 = vpop.f32.mrb[156].mxu0  ;;  %v12746_v19 = vld [vmem:[%s20297_s3 + $0x4a0] ss:$16 sps:$4 sm:$0xff]   ;;  %v16828_v10 = vpop.f32.mrb[157].mxu1  ;;  %v16832_v37 = vadd.f32 0.5, %v3276_v56  ;;  %13594 = vtanh.f32 %v2556_v31  ;;  %6713 = vmatprep.subr.bf16.mxu0 %v12748_v15 }
 0x247   : > { %20849 = vst [vmem:[#allocation26_spill] sm:$0xff] %v16817_v36  ;;  %20851 = vst [vmem:[#allocation34_spill] sm:$0xff] %v16822_v42  ;;  %6572 = vmatprep.mubr.bf16.mxu0 %v16808_v62  ;;  %v16830_v26 = vpop.f32.mrb[157].mxu0  ;;  %v2568_v7 = vmul.f32 0.5, %v1652_v45  ;;  %v20855_v0 = vld [vmem:[#allocation117_spill] sm:$0xff]  ;;  %v16839_v38 = vpop.f32.mrb[158].mxu1  ;;  %13596 = vtanh.f32 %v2565_v13 }
 0x248   : > { %20852 = vst [vmem:[#allocation116_spill] sm:$0xff] %v16828_v10  ;;  %20853 = vst [vmem:[#allocation212_spill] sm:$0xff] %v16830_v26  ;;  %v1656_v44 = vadd.f32 %v20855_v0, %v15327_v8  ;;  %v12754_v29 = vld [vmem:[%s20297_s3 + $0x4c4] ss:$16 sps:$4 sm:$0xff]   ;;  %v16841_v18 = vpop.f32.mrb[158].mxu0  ;;  %v16843_v43 = vpop.eup %13580  ;;  %v16845_v26 = vadd.f32 0.5, %v3287_v39  ;;  %13598 = vtanh.f32 %v2567_v48  ;;  %6714 = vmatpush1.bf16.msra.mxu0 %v12746_v19 }
 0x249   : > { %20854 = vst [vmem:[#allocation213_spill] sm:$0xff] %v16832_v37  ;;  %20856 = vst [vmem:[#allocation117_spill] sm:$0xff] %v16839_v38  ;;  %v20860_v56 = vld [vmem:[#allocation118_spill] sm:$0xff]  ;;  %v20861_v31 = vld [vmem:[#allocation119_spill] sm:$0xff]  ;;  %v16851_v15 = vpop.f32.mrb[159].mxu1  ;;  %v16853_v10 = vpop.f32.mrb[159].mxu0  ;;  %13600 = vtanh.f32 %v2566_v57  ;;  %6715 = vmatprep.subr.bf16.mxu0 %v12754_v29 }
 0x24a   : > { %20857 = vst [vmem:[#allocation214_spill] sm:$0xff] %v16841_v18  ;;  %20858 = vst [vmem:[#allocation215_spill] sm:$0xff] %v16843_v43  ;;  %v1465_v45 = vadd.f32 %v20860_v56, %v15802_v52  ;;  %v1658_v0 = vadd.f32 %v20861_v31, %v15806_v33  ;;  %v12793_v38 = vld [vmem:[%s20297_s3 + $0x38c] ss:$16 sps:$4 sm:$0xff]   ;;  %v13583_v18 = vpop.eup %13582  ;;  %v16858_v36 = vadd.f32 0.5, %v3288_v60  ;;  %v16860_v39 = vadd.f32 0.5, %v3299_v12 }
 0x24b   : > { %20859 = vst [vmem:[#allocation216_spill] sm:$0xff] %v16845_v26  ;;  %20862 = vst [vmem:[#allocation118_spill] sm:$0xff] %v16851_v15  ;;  %v2577_v13 = vmul.f32 0.5, %v1463_v27  ;;  %v12791_v56 = vld [vmem:[%s20297_s3 + $0x388] ss:$16 sps:$4 sm:$0xff]   ;;  %v16865_v31 = vmul.f32 0.5, %v13579_v21  ;;  %v16874_v48 = vpop.eup %13584  ;;  %13602 = vtanh.f32 %v2568_v7  ;;  %7692 = vmatprep.subr.bf16.mxu1 %v12793_v38 }
 0x24c   : > { %20863 = vst [vmem:[#allocation119_spill] sm:$0xff] %v16853_v10  ;;  %20864 = vst [vmem:[#allocation217_spill] sm:$0xff] %v16858_v36  ;;  %v20866_v10 = vld [vmem:[#allocation120_spill] sm:$0xff]  ;;  %v20867_v6 = vld [vmem:[#allocation147_spill] sm:$0xff]  ;;  %v2579_v27 = vmul.f32 0.5, %v1656_v44  ;;  %v3130_v57 = vmul.f32 0.5, %v16170_v2  ;;  %7693 = vmatpush1.bf16.msra.mxu1 %v12791_v56 }
 0x24d   : > { %20865 = vst [vmem:[#allocation218_spill] sm:$0xff] %v16860_v39  ;;  %v1467_v15 = vadd.f32 %v20866_v10, %v15324_v61  ;;  %v3105_v26 = vmul.f32 0.5, %v20867_v6  ;;  %v12752_v60 = vld [vmem:[%s20297_s3 + $0x4c0] ss:$16 sps:$4 sm:$0xff]   ;;  %v20868_v12 = vld [vmem:[#allocation37_spill] sm:$0xff]  ;;  %20869 = vst [vmem:[#allocation120_spill] sm:$0xff] %v16874_v48  ;;  %v13587_v10 = vpop.eup %13586  ;;  %13604 = vtanh.f32 %v2577_v13 }
 0x24e   : > { %7608 = vmatmul.mubr.bf16.gmra.mrb[8].mxu1 %v20868_v12  ;;  %v20870_v39 = vld [vmem:[#allocation54_spill] sm:$0xff]  ;;  %v20871_v19 = vld [vmem:[#allocation7_spill] sm:$0xff]  ;;  %v3311_v42 = vmul.f32 0.5, %v13583_v18  ;;  %v2578_v36 = vmul.f32 0.5, %v1465_v45  ;;  %v2580_v37 = vmul.f32 0.5, %v1658_v0  ;;  %v20872_v12 = vld [vmem:[#allocation121_spill] sm:$0xff]  ;;  %v16884_v7 = vpop.eup %13588  ;;  %6716 = vmatpush1.bf16.msra.mxu0 %v12752_v60  ;;  %13606 = vtanh.f32 %v2579_v27 }
 0x24f   : > { %v3117_v21 = vmul.f32 0.5, %v20870_v39  ;;  %v12760_v6 = vld [vmem:[%s20297_s3 + $0x4e4] ss:$16 sps:$4 sm:$0xff]   ;;  %7617 = vmatprep.mubr.bf16.mxu1 %v20871_v19  ;;  %v1660_v43 = vadd.f32 %v20872_v12, %v15327_v8  ;;  %20873 = vst [vmem:[#allocation147_spill] sm:$0xff] %v16884_v7  ;;  %v3489_v29 = vadd.f32 0.5, %v3105_v26  ;;  %v3142_v47 = vmul.f32 0.5, %v16242_v55  ;;  %v13591_v45 = vpop.eup %13590 }
 0x250   : > { %v20874_v44 = vld [vmem:[#allocation122_spill] sm:$0xff]  ;;  %v16889_v48 = vpop.f32.mrb[160].mxu1  ;;  %v12797_v18 = vld [vmem:[%s20297_s3 + $0x3a8] ss:$16 sps:$4 sm:$0xff]   ;;  %v2589_v0 = vmul.f32 0.5, %v1467_v15  ;;  %v20878_v56 = vld [vmem:[#allocation124_spill] sm:$0xff]  ;;  %6717 = vmatprep.subr.bf16.mxu0 %v12760_v6  ;;  %v16913_v7 = vpop.eup %13592  ;;  %13608 = vtanh.f32 %v2578_v36 }
 0x251   : > { %v1469_v2 = vadd.f32 %v20874_v44, %v15802_v52  ;;  %v3501_v39 = vadd.f32 0.5, %v3117_v21  ;;  %20875 = vst [vmem:[#allocation37_spill] sm:$0xff] %v16889_v48  ;;  %v20876_v38 = vld [vmem:[#allocation123_spill] sm:$0xff]  ;;  %v12758_v26 = vld [vmem:[%s20297_s3 + $0x4e0] ss:$16 sps:$4 sm:$0xff]   ;;  %v16899_v21 = vpop.f32.mrb[161].mxu1  ;;  %v1473_v12 = vadd.f32 %v20878_v56, %v15324_v61  ;;  %13610 = vtanh.f32 %v2580_v37 }
 0x252   : > { %v1662_v19 = vadd.f32 %v20876_v38, %v15806_v33  ;;  %20877 = vst [vmem:[#allocation54_spill] sm:$0xff] %v16899_v21  ;;  %v12799_v55 = vld [vmem:[%s20297_s3 + $0x3ac] ss:$16 sps:$4 sm:$0xff]   ;;  %v3514_v15 = vadd.f32 0.5, %v3130_v57  ;;  %v3526_v13 = vadd.f32 0.5, %v3142_v47  ;;  %v16911_v38 = vpop.f32.mrb[162].mxu1  ;;  %v13595_v57 = vpop.eup %13594  ;;  %6718 = vmatpush1.bf16.msra.mxu0 %v12758_v26  ;;  %13612 = vtanh.f32 %v2589_v0 }
 0x253   : > { %v16906_v44 = vpack.c.bf16 %v3501_v39, %v3489_v29  ;;  %v12766_v60 = vld [vmem:[%s20297_s3 + $0x504] ss:$16 sps:$4 sm:$0xff]   ;;  %v3312_v21 = vmul.f32 0.5, %v13587_v10  ;;  %v2591_v48 = vmul.f32 0.5, %v1660_v43  ;;  %v20879_v23 = vld [vmem:[#allocation125_spill] sm:$0xff]  ;;  %v16917_v56 = vpop.f32.mrb[163].mxu1  ;;  %7694 = vmatprep.subr.bf16.mxu1 %v12799_v55  ;;  %v16924_v10 = vpop.eup %13596 }
 0x254   : > { %v1666_v51 = vadd.f32 %v20879_v23, %v15327_v8  ;;  %20880 = vst [vmem:[#allocation7_spill] sm:$0xff] %v16917_v56  ;;  %v2590_v47 = vmul.f32 0.5, %v1469_v2  ;;  %v20881_v6 = vld [vmem:[#allocation126_spill] sm:$0xff]  ;;  %v16922_v39 = vpack.c.bf16 %v3526_v13, %v3514_v15  ;;  %7695 = vmatpush1.bf16.msra.mxu1 %v12797_v18  ;;  %20882 = vst [vmem:[#allocation121_spill] sm:$0xff] %v16924_v10  ;;  %v3323_v43 = vmul.f32 0.5, %v13591_v45  ;;  %v13599_v2 = vpop.eup %13598  ;;  %v20884_v37 = vld [vmem:[#allocation127_spill] sm:$0xff] }
 0x255   : > { %v1475_v29 = vadd.f32 %v20881_v6, %v15802_v52  ;;  %6573 = vmatmul.mubr.bf16.gmra.mrb[172].mxu0 %v16906_v44  ;;  %v2592_v27 = vmul.f32 0.5, %v1662_v19  ;;  %v12764_v23 = vld [vmem:[%s20297_s3 + $0x500] ss:$16 sps:$4 sm:$0xff]   ;;  %v12803_v36 = vld [vmem:[%s20297_s3 + $0x3c8] ss:$16 sps:$4 sm:$0xff]   ;;  %v16934_v55 = vadd.f32 0.5, %v16865_v31  ;;  %v1668_v45 = vadd.f32 %v20884_v37, %v15806_v33  ;;  %6719 = vmatprep.subr.bf16.mxu0 %v12766_v60  ;;  %v16945_v26 = vpop.eup %13600 }
 0x256   : > { %7618 = vmatmul.mubr.bf16.gmra.mrb[12].mxu1 %v16146_v16  ;;  %v2601_v18 = vmul.f32 0.5, %v1473_v12  ;;  %6582 = vmatprep.mubr.bf16.mxu0 %v16922_v39  ;;  %v12772_v16 = vld [vmem:[%s20297_s3 + $0x524] ss:$16 sps:$4 sm:$0xff]   ;;  %v12805_v19 = vld [vmem:[%s20297_s3 + $0x3cc] ss:$16 sps:$4 sm:$0xff]   ;;  %v16947_v31 = vadd.f32 0.5, %v3311_v42  ;;  %13614 = vtanh.f32 %v2591_v48  ;;  %v13603_v13 = vpop.eup %13602 }
 0x257   : > { %20883 = vst [vmem:[#allocation122_spill] sm:$0xff] %v16934_v55  ;;  %v2603_v0 = vmul.f32 0.5, %v1666_v51  ;;  %v20886_v12 = vld [vmem:[#allocation128_spill] sm:$0xff]  ;;  %7627 = vmatprep.mubr.bf16.mxu1 %v16168_v30  ;;  %13616 = vtanh.f32 %v2590_v47  ;;  %v2602_v60 = vmul.f32 0.5, %v1475_v29  ;;  %v20887_v6 = vld [vmem:[#allocation129_spill] sm:$0xff]  ;;  %v20888_v56 = vld [vmem:[#allocation130_spill] sm:$0xff]  ;;  %7696 = vmatprep.subr.bf16.mxu1 %v12805_v19 }
 0x258   : > { %20885 = vst [vmem:[#allocation123_spill] sm:$0xff] %v16947_v31  ;;  %v1477_v15 = vadd.f32 %v20886_v12, %v15324_v61  ;;  %v1670_v37 = vadd.f32 %v20887_v6, %v15327_v8  ;;  %v1479_v55 = vadd.f32 %v20888_v56, %v15802_v52  ;;  %v16956_v10 = vpop.f32.mrb[164].mxu1  ;;  %v16958_v42 = vadd.f32 0.5, %v3312_v21  ;;  %6720 = vmatpush1.bf16.msra.mxu0 %v12764_v23  ;;  %v12770_v30 = vld [vmem:[%s20297_s3 + $0x520] ss:$16 sps:$4 sm:$0xff]   ;;  %v20896_v6 = vld [vmem:[#allocation133_spill] sm:$0xff] }
 0x259   : > { %20889 = vst [vmem:[#allocation124_spill] sm:$0xff] %v16956_v10  ;;  %v16960_v51 = vadd.f32 0.5, %v3323_v43  ;;  %v3324_v48 = vmul.f32 0.5, %v13595_v57  ;;  %13618 = vtanh.f32 %v2592_v27  ;;  %v16965_v47 = vpop.f32.mrb[165].mxu1  ;;  %7697 = vmatpush1.bf16.msra.mxu1 %v12803_v36  ;;  %v16967_v29 = vmul.f32 0.5, %v13599_v2  ;;  %6721 = vmatprep.subr.bf16.mxu0 %v12772_v16  ;;  %v16975_v43 = vpop.eup %13604 }
 0x25a   : > { %20890 = vst [vmem:[#allocation125_spill] sm:$0xff] %v16958_v42  ;;  %20892 = vst [vmem:[#allocation127_spill] sm:$0xff] %v16965_v47  ;;  %13620 = vtanh.f32 %v2601_v18  ;;  %v2604_v56 = vmul.f32 0.5, %v1668_v45  ;;  %v3129_v19 = vmul.f32 0.5, %v16137_v11  ;;  %v12778_v21 = vld [vmem:[%s20297_s3 + $0x544] ss:$16 sps:$4 sm:$0xff]   ;;  %v13607_v12 = vpop.eup %13606  ;;  %v1676_v47 = vadd.f32 %v20896_v6, %v15327_v8 }
 0x25b   : > { %20891 = vst [vmem:[#allocation126_spill] sm:$0xff] %v16960_v51  ;;  %v16973_v57 = vpop.f32.mrb[166].mxu1  ;;  %13622 = vtanh.f32 %v2603_v0  ;;  %v2613_v27 = vmul.f32 0.5, %v1477_v15  ;;  %v3141_v23 = vmul.f32 0.5, %v16189_v46  ;;  %v3154_v36 = vmul.f32 0.5, %v16276_v40  ;;  %v20895_v45 = vld [vmem:[#allocation131_spill] sm:$0xff]  ;;  %v16987_v46 = vpop.eup %13608 }
 0x25c   : > { %20893 = vst [vmem:[#allocation128_spill] sm:$0xff] %v16973_v57  ;;  %v16979_v2 = vpop.f32.mrb[167].mxu1  ;;  %13624 = vtanh.f32 %v2602_v60  ;;  %v2615_v18 = vmul.f32 0.5, %v1670_v37  ;;  %v2614_v11 = vmul.f32 0.5, %v1479_v55  ;;  %v1672_v16 = vadd.f32 %v20895_v45, %v15806_v33  ;;  %6722 = vmatpush1.bf16.msra.mxu0 %v12770_v30  ;;  %v20897_v40 = vld [vmem:[#allocation135_spill] sm:$0xff]  ;;  %v13611_v60 = vpop.eup %13610  ;;  %v20898_v37 = vld [vmem:[#allocation136_spill] sm:$0xff] }
 0x25d   : > { %20894 = vst [vmem:[#allocation129_spill] sm:$0xff] %v16979_v2  ;;  %v3513_v10 = vadd.f32 0.5, %v3129_v19  ;;  %v3525_v57 = vadd.f32 0.5, %v3141_v23  ;;  %v3166_v0 = vmul.f32 0.5, %v16311_v54  ;;  %13626 = vtanh.f32 %v2604_v56  ;;  %v12776_v15 = vld [vmem:[%s20297_s3 + $0x540] ss:$16 sps:$4 sm:$0xff]   ;;  %6723 = vmatprep.subr.bf16.mxu0 %v12778_v21  ;;  %v17008_v21 = vpop.eup %13612 }
 0x25e   : > { %7628 = vmatmul.mubr.bf16.gmra.mrb[16].mxu1 %v16234_v59  ;;  %v1678_v55 = vadd.f32 %v20897_v40, %v15806_v33  ;;  %v12809_v54 = vld [vmem:[%s20297_s3 + $0x3e8] ss:$16 sps:$4 sm:$0xff]   ;;  %v12811_v59 = vld [vmem:[%s20297_s3 + $0x3ec] ss:$16 sps:$4 sm:$0xff]   ;;  %v1680_v30 = vadd.f32 %v20898_v37, %v15327_v8  ;;  %v3538_v19 = vadd.f32 0.5, %v3154_v36  ;;  %v3336_v45 = vmul.f32 0.5, %v13603_v13 }
 0x25f   : > { %7637 = vmatprep.mubr.bf16.mxu1 %v16260_v50  ;;  %v17003_v56 = vpack.c.bf16 %v3525_v57, %v3513_v10  ;;  %v3550_v23 = vadd.f32 0.5, %v3166_v0  ;;  %v12784_v50 = vld [vmem:[%s20297_s3 + $0x564] ss:$16 sps:$4 sm:$0xff]   ;;  %13628 = vtanh.f32 %v2615_v18  ;;  %v2616_v6 = vmul.f32 0.5, %v1672_v16  ;;  %v17012_v51 = vpop.f32.mrb[168].mxu1  ;;  %7698 = vmatprep.subr.bf16.mxu1 %v12811_v59 }
 0x260   : > { %v20899_v40 = vld [vmem:[#allocation132_spill] sm:$0xff]  ;;  %20900 = vst [vmem:[#allocation130_spill] sm:$0xff] %v17012_v51  ;;  %v13615_v8 = vpop.eup %13614  ;;  %v3347_v10 = vmul.f32 0.5, %v13607_v12  ;;  %v2627_v57 = vmul.f32 0.5, %v1676_v47  ;;  %v20901_v36 = vld [vmem:[#allocation2_spill] sm:$0xff]  ;;  %v17018_v31 = vpop.f32.mrb[169].mxu1  ;;  %7699 = vmatpush1.bf16.msra.mxu1 %v12809_v54  ;;  %13630 = vtanh.f32 %v2613_v27  ;;  %6724 = vmatpush1.bf16.msra.mxu0 %v12776_v15 }
 0x261   : > { %v1483_v2 = vadd.f32 %v20899_v40, %v15324_v61  ;;  %v499_v0 = vsub.s32 7, %v20901_v36  ;;  %6583 = vmatmul.mubr.bf16.gmra.mrb[176].mxu0 %v17003_v56  ;;  %v17016_v37 = vpack.c.bf16 %v3550_v23, %v3538_v19  ;;  %20902 = vst [vmem:[#allocation131_spill] sm:$0xff] %v17018_v31  ;;  %v17020_v13 = vpop.eup %13616  ;;  %v17022_v18 = vadd.f32 0.5, %v3324_v48  ;;  %v17027_v12 = vld [vmem:[%s20296_s2 + $0x8] sm:$0xf]  ;;  %v20904_v47 = vld [vmem:[#allocation4_spill] sm:$0xff]  ;;  %6725 = vmatprep.subr.bf16.mxu0 %v12784_v50 }
 0x262   : > { %v2628_v16 = vmul.f32 0.5, %v1678_v55  ;;  %v17031_v59 = vrot.slane %v17027_v12, %v20904_v47  ;;  %v12782_v54 = vld [vmem:[%s20297_s3 + $0x560] ss:$16 sps:$4 sm:$0xff]   ;;  %v17036_v19 = vpop.f32.mrb[170].mxu1  ;;  %v3348_v23 = vmul.f32 0.5, %v13611_v60  ;;  %13632 = vtanh.f32 %v2614_v11  ;;  %v20909_v60 = vld [vmem:[#allocation137_spill] sm:$0xff] }
 0x263   : > { %20903 = vst [vmem:[#allocation133_spill] sm:$0xff] %v17022_v18  ;;  %20905 = vst [vmem:[#allocation135_spill] sm:$0xff] %v17036_v19  ;;  %v13619_v48 = vpop.eup %13618  ;;  %v20906_v27 = vld [vmem:[#allocation134_spill] sm:$0xff]  ;;  %v2639_v40 = vmul.f32 0.5, %v1680_v30  ;;  %6592 = vmatprep.mubr.bf16.mxu0 %v17016_v37  ;;  %v17044_v36 = vpop.f32.mrb[171].mxu1  ;;  %v17049_v31 = vadd.f32 0.5, %v16967_v29  ;;  %13634 = vtanh.f32 %v2616_v6 }
 0x264   : > { %v1485_v55 = vadd.f32 %v20906_v27, %v15802_v52  ;;  %v12790_v15 = vld [vmem:[%s20297_s3 + $0x584] ss:$16 sps:$4 sm:$0xff]   ;;  %20907 = vst [vmem:[#allocation136_spill] sm:$0xff] %v17044_v36  ;;  %v17046_v47 = vpop.eup %13620  ;;  %v2625_v11 = vmul.f32 0.5, %v1483_v2  ;;  %v1682_v27 = vadd.f32 %v20909_v60, %v15806_v33  ;;  %v17053_v51 = vadd.f32 0.5, %v3336_v45  ;;  %v20912_v33 = vld [vmem:[#allocation41_spill] sm:$0xff]  ;;  %6726 = vmatpush1.bf16.msra.mxu0 %v12782_v54 }
 0x265   : > { %20908 = vst [vmem:[#allocation132_spill] sm:$0xff] %v17049_v31  ;;  %v13623_v30 = vpop.eup %13622  ;;  %v17055_v50 = vadd.f32 0.5, %v3347_v10  ;;  %13636 = vtanh.f32 %v2627_v57  ;;  %v14505_v36 = vld [vmem:[%s20296_s2] sm:$0xff]  ;;  %v12817_v29 = vld [vmem:[%s20297_s3 + $0x40c] ss:$16 sps:$4 sm:$0xff]   ;;  %v1487_v45 = vadd.f32 %v20912_v33, %v15324_v61  ;;  %v20914_v57 = vld [vmem:[#allocation24_spill] sm:$0xff]  ;;  %6727 = vmatprep.subr.bf16.mxu0 %v12790_v15 }
 0x266   : > { %20910 = vst [vmem:[#allocation2_spill] sm:$0xff] %v17053_v51  ;;  %v17060_v19 = vrot.slane %v14505_v36, %v499_v0  ;;  %7638 = vmatmul.mubr.bf16.gmra.mrb[20].mxu1 %v16380_v22  ;;  %v17066_v2 = vpop.eup %13624  ;;  %13638 = vtanh.f32 %v2628_v16  ;;  %v20913_v6 = vld [vmem:[#allocation35_spill] sm:$0xff]  ;;  %v3153_v60 = vmul.f32 0.5, %v20914_v57  ;;  %v12788_v22 = vld [vmem:[%s20297_s3 + $0x580] ss:$16 sps:$4 sm:$0xff]   ;;  %v17077_v0 = vadd.f32 0.5, %v3348_v23  ;;  %7861 = vmatprep.subr.bf16.mxu1 %v12817_v29 }
 0x267   : > { %20911 = vst [vmem:[#allocation134_spill] sm:$0xff] %v17055_v50  ;;  %v1914_v10 = vadd.f32 %v20913_v6, %v17031_v59  ;;  %7647 = vmatprep.mubr.bf16.mxu1 %v16398_v28  ;;  %v2626_v36 = vmul.f32 0.5, %v1485_v55  ;;  %13640 = vtanh.f32 %v2639_v40  ;;  %v20916_v16 = vld [vmem:[#allocation70_spill] sm:$0xff]  ;;  %v13627_v33 = vpop.eup %13626  ;;  %v3359_v54 = vmul.f32 0.5, %v13615_v8  ;;  %v17085_v28 = vpop.f32.mrb[172].mxu1  ;;  %v20919_v23 = vld [vmem:[#allocation43_spill] sm:$0xff] }
 0x268   : > { %20915 = vst [vmem:[#allocation137_spill] sm:$0xff] %v17077_v0  ;;  %v3165_v50 = vmul.f32 0.5, %v20916_v16  ;;  %v12796_v61 = vld [vmem:[%s20297_s3 + $0x5a4] ss:$16 sps:$4 sm:$0xff]   ;;  %13642 = vtanh.f32 %v2625_v11  ;;  %v2640_v31 = vmul.f32 0.5, %v1682_v27  ;;  %20918 = vst [vmem:[#allocation41_spill] sm:$0xff] %v17085_v28  ;;  %v1721_v55 = vadd.f32 %v20919_v23, %v17060_v19  ;;  %6728 = vmatpush1.bf16.msra.mxu0 %v12788_v22 }
 0x269   : > { %v20917_v6 = vld [vmem:[#allocation42_spill] sm:$0xff]  ;;  %v3537_v40 = vadd.f32 0.5, %v3153_v60  ;;  %v3178_v15 = vmul.f32 0.5, %v16378_v53  ;;  %v17090_v0 = vpop.f32.mrb[173].mxu1  ;;  %v13629_v51 = vpop.eup %13628  ;;  %v2637_v29 = vmul.f32 0.5, %v1487_v45  ;;  %v2272_v18 = vmul.f32 0.5, %v1914_v10  ;;  %6729 = vmatprep.subr.bf16.mxu0 %v12796_v61 }
 0x26a   : > { %v1489_v57 = vadd.f32 %v20917_v6, %v15802_v52  ;;  %v3549_v16 = vadd.f32 0.5, %v3165_v50  ;;  %20920 = vst [vmem:[#allocation35_spill] sm:$0xff] %v17090_v0  ;;  %v20921_v8 = vld [vmem:[#allocation44_spill] sm:$0xff]  ;;  %v3190_v52 = vmul.f32 0.5, %v16415_v58  ;;  %v17098_v6 = vpop.f32.mrb[174].mxu1  ;;  %v3360_v50 = vmul.f32 0.5, %v13619_v48  ;;  %v17109_v10 = vpop.eup %13630 }
 0x26b   : > { %v1725_v11 = vadd.f32 %v20921_v8, %v17060_v19  ;;  %v12794_v27 = vld [vmem:[%s20297_s3 + $0x5a0] ss:$16 sps:$4 sm:$0xff]   ;;  %20922 = vst [vmem:[#allocation24_spill] sm:$0xff] %v17098_v6  ;;  %13644 = vtanh.f32 %v2626_v36  ;;  %v17104_v45 = vpop.f32.mrb[175].mxu1  ;;  %v12802_v58 = vld [vmem:[%s20297_s3 + $0x5c4] ss:$16 sps:$4 sm:$0xff]  }
 0x26c   : > { %v20923_v53 = vld [vmem:[#allocation138_spill] sm:$0xff]  ;;  %v17102_v23 = vpack.c.bf16 %v3549_v16, %v3537_v40  ;;  %20924 = vst [vmem:[#allocation70_spill] sm:$0xff] %v17104_v45  ;;  %v3371_v22 = vmul.f32 0.5, %v13623_v30  ;;  %v2638_v8 = vmul.f32 0.5, %v1489_v57  ;;  %v3562_v0 = vadd.f32 0.5, %v3178_v15  ;;  %v17111_v48 = vpop.eup %13632  ;;  %6730 = vmatpush1.bf16.msra.mxu0 %v12794_v27  ;;  %v20928_v57 = vld [vmem:[#allocation8_spill] sm:$0xff] }
 0x26d   : > { %v1918_v60 = vadd.f32 %v20923_v53, %v17031_v59  ;;  %v3574_v28 = vadd.f32 0.5, %v3190_v52  ;;  %v3372_v36 = vmul.f32 0.5, %v13627_v33  ;;  %v3383_v6 = vmul.f32 0.5, %v13629_v51  ;;  %v13635_v61 = vpop.eup %13634  ;;  %v12800_v30 = vld [vmem:[%s20297_s3 + $0x5c0] ss:$16 sps:$4 sm:$0xff]   ;;  %6731 = vmatprep.subr.bf16.mxu0 %v12802_v58  ;;  %v20931_v15 = vld [vmem:[#allocation47_spill] sm:$0xff] }
 0x26e   : > { %13646 = vtanh.f32 %v2640_v31  ;;  %v2270_v40 = vmul.f32 0.5, %v1721_v55  ;;  %6593 = vmatmul.mubr.bf16.gmra.mrb[180].mxu0 %v17102_v23  ;;  %7648 = vmatmul.mubr.bf16.gmra.mrb[24].mxu1 %v16492_v3  ;;  %v17115_v16 = vadd.f32 0.5, %v3359_v54  ;;  %v2282_v53 = vmul.f32 0.5, %v1725_v11  ;;  %v20927_v3 = vld [vmem:[#allocation140_spill] sm:$0xff]  ;;  %v20930_v55 = vld [vmem:[#allocation139_spill] sm:$0xff]  ;;  %v20936_v58 = vld [vmem:[#allocation141_spill] sm:$0xff] }
 0x26f   : > { %13648 = vtanh.f32 %v2272_v18  ;;  %v17117_v45 = vpack.c.bf16 %v3574_v28, %v3562_v0  ;;  %7657 = vmatprep.mubr.bf16.mxu1 %v16514_v17  ;;  %v13637_v31 = vpop.eup %13636  ;;  %v17123_v51 = vadd.f32 0.5, %v3360_v50  ;;  %v2284_v33 = vmul.f32 0.5, %v1918_v60  ;;  %v12808_v18 = vld [vmem:[%s20297_s3 + $0x5e4] ss:$16 sps:$4 sm:$0xff]  }
 0x270   : > { %20925 = vst [vmem:[#allocation42_spill] sm:$0xff] %v17115_v16  ;;  %13650 = vtanh.f32 %v2637_v29  ;;  %v1729_v54 = vadd.f32 %v20928_v57, %v20927_v3  ;;  %v13639_v0 = vpop.eup %13638  ;;  %v17130_v28 = vadd.f32 0.5, %v3371_v22  ;;  %v1922_v17 = vadd.f32 %v20931_v15, %v20930_v55  ;;  %v20932_v11 = vld [vmem:[#allocation48_spill] sm:$0xff]  ;;  %v17137_v29 = vpop.f32.mrb[176].mxu1  ;;  %6732 = vmatpush1.bf16.msra.mxu0 %v12800_v30 }
 0x271   : > { %20926 = vst [vmem:[#allocation43_spill] sm:$0xff] %v17123_v51  ;;  %13652 = vtanh.f32 %v2638_v8  ;;  %v1731_v52 = vadd.f32 %v20932_v11, %v17060_v19  ;;  %6602 = vmatprep.mubr.bf16.mxu0 %v17117_v45  ;;  %20933 = vst [vmem:[#allocation138_spill] sm:$0xff] %v17137_v29  ;;  %v13641_v27 = vpop.eup %13640  ;;  %v17139_v50 = vadd.f32 0.5, %v3372_v36  ;;  %v17141_v60 = vadd.f32 0.5, %v3383_v6  ;;  %v17145_v8 = vpop.f32.mrb[177].mxu1  ;;  %v20939_v11 = vld [vmem:[#allocation142_spill] sm:$0xff]  ;;  %6733 = vmatprep.subr.bf16.mxu0 %v12808_v18 }
 0x272   : > { %20929 = vst [vmem:[#allocation44_spill] sm:$0xff] %v17130_v28  ;;  %13654 = vtanh.f32 %v2270_v40  ;;  %v1924_v22 = vadd.f32 %v20936_v58, %v17031_v59  ;;  %20937 = vst [vmem:[#allocation139_spill] sm:$0xff] %v17145_v8  ;;  %v17147_v57 = vpop.eup %13642  ;;  %v3384_v15 = vmul.f32 0.5, %v13635_v61  ;;  %v1733_v28 = vadd.f32 %v20939_v11, %v20927_v3  ;;  %v20940_v29 = vld [vmem:[#allocation143_spill] sm:$0xff]  ;;  %v17153_v36 = vpop.f32.mrb[178].mxu1  ;;  %v20943_v11 = vld [vmem:[#allocation30_spill] sm:$0xff] }
 0x273   : > { %20934 = vst [vmem:[#allocation140_spill] sm:$0xff] %v17139_v50  ;;  %20935 = vst [vmem:[#allocation8_spill] sm:$0xff] %v17141_v60  ;;  %13656 = vtanh.f32 %v2282_v53  ;;  %v1926_v16 = vadd.f32 %v20940_v29, %v20930_v55  ;;  %v12806_v6 = vld [vmem:[%s20297_s3 + $0x5e0] ss:$16 sps:$4 sm:$0xff]   ;;  %v3395_v40 = vmul.f32 0.5, %v13637_v31  ;;  %v3396_v58 = vmul.f32 0.5, %v13639_v0 }
 0x274   : > { %20938 = vst [vmem:[#allocation47_spill] sm:$0xff] %v17147_v57  ;;  %20941 = vst [vmem:[#allocation48_spill] sm:$0xff] %v17153_v36  ;;  %13658 = vtanh.f32 %v2284_v33  ;;  %v2293_v8 = vmul.f32 0.5, %v1729_v54  ;;  %v17158_v60 = vpop.f32.mrb[179].mxu1  ;;  %v12814_v61 = vld [vmem:[%s20297_s3 + $0x604] ss:$16 sps:$4 sm:$0xff]   ;;  %6734 = vmatpush1.bf16.msra.mxu0 %v12806_v6 }
 0x275   : > { %20942 = vst [vmem:[#allocation141_spill] sm:$0xff] %v17158_v60  ;;  %v3407_v53 = vmul.f32 0.5, %v13641_v27  ;;  %v2295_v29 = vmul.f32 0.5, %v1922_v17  ;;  %v2294_v30 = vmul.f32 0.5, %v1731_v52  ;;  %v3177_v36 = vmul.f32 0.5, %v20943_v11  ;;  %v17164_v50 = vpop.eup %13644  ;;  %v20945_v31 = vld [vmem:[#allocation144_spill] sm:$0xff]  ;;  %6896 = vmatprep.subr.bf16.mxu0 %v12814_v61 }
 0x276   : > { %20944 = vst [vmem:[#allocation142_spill] sm:$0xff] %v17164_v50  ;;  %v2296_v51 = vmul.f32 0.5, %v1924_v22  ;;  %v1735_v0 = vadd.f32 %v20945_v31, %v17060_v19  ;;  %v20946_v33 = vld [vmem:[#allocation74_spill] sm:$0xff]  ;;  %v3202_v60 = vmul.f32 0.5, %v16490_v41  ;;  %7658 = vmatmul.mubr.bf16.gmra.mrb[28].mxu1 %v16603_v63  ;;  %v2305_v18 = vmul.f32 0.5, %v1733_v28  ;;  %v20947_v27 = vld [vmem:[#allocation145_spill] sm:$0xff] }
 0x277   : > { %v3189_v54 = vmul.f32 0.5, %v20946_v33  ;;  %v2307_v42 = vmul.f32 0.5, %v1926_v16  ;;  %v1928_v17 = vadd.f32 %v20947_v27, %v17031_v59  ;;  %v3214_v52 = vmul.f32 0.5, %v16520_v34  ;;  %7700 = vmatprep.mubr.bf16.mxu1 %v16527_v25  ;;  %v20948_v11 = vld [vmem:[#allocation14_spill] sm:$0xff]  ;;  %v17179_v50 = vpop.f32.mrb[180].mxu1 }
 0x278   : > { %v13647_v22 = vpop.eup %13646  ;;  %13660 = vtanh.f32 %v2293_v8  ;;  %v1739_v31 = vadd.f32 %v20948_v11, %v20927_v3  ;;  %v3561_v33 = vadd.f32 0.5, %v3177_v36  ;;  %v20949_v63 = vld [vmem:[#allocation50_spill] sm:$0xff]  ;;  %v3586_v28 = vadd.f32 0.5, %v3202_v60  ;;  %20950 = vst [vmem:[#allocation143_spill] sm:$0xff] %v17179_v50  ;;  %v20952_v8 = vld [vmem:[#allocation51_spill] sm:$0xff]  ;;  %v17187_v36 = vpop.f32.mrb[181].mxu1 }
 0x279   : > { %v3573_v57 = vadd.f32 0.5, %v3189_v54  ;;  %v13649_v41 = vpop.eup %13648  ;;  %13662 = vtanh.f32 %v2295_v29  ;;  %v1932_v16 = vadd.f32 %v20949_v63, %v20930_v55  ;;  %v3598_v27 = vadd.f32 0.5, %v3214_v52  ;;  %20953 = vst [vmem:[#allocation144_spill] sm:$0xff] %v17187_v36  ;;  %v17193_v52 = vpop.f32.mrb[182].mxu1 }
 0x27a   : > { %v17181_v34 = vpop.eup %13650  ;;  %13664 = vtanh.f32 %v2294_v30  ;;  %v2306_v25 = vmul.f32 0.5, %v1735_v0  ;;  %v1741_v6 = vadd.f32 %v20952_v8, %v17060_v19  ;;  %v3408_v29 = vmul.f32 0.5, %v13647_v22  ;;  %20954 = vst [vmem:[#allocation74_spill] sm:$0xff] %v17193_v52  ;;  %v12815_v30 = vld [vmem:[%s20297_s3 + $0x408] ss:$16 sps:$4 sm:$0xff]   ;;  %v17201_v8 = vpop.f32.mrb[183].mxu1 }
 0x27b   : > { %20951 = vst [vmem:[#allocation30_spill] sm:$0xff] %v17181_v34  ;;  %v17185_v11 = vpack.c.bf16 %v3573_v57, %v3561_v33  ;;  %v17189_v61 = vpop.eup %13652  ;;  %13666 = vtanh.f32 %v2296_v51  ;;  %v2308_v54 = vmul.f32 0.5, %v1928_v17  ;;  %v17191_v60 = vpack.c.bf16 %v3598_v27, %v3586_v28  ;;  %20956 = vst [vmem:[#allocation14_spill] sm:$0xff] %v17201_v8  ;;  %v12823_v51 = vld [vmem:[%s20297_s3 + $0x42c] ss:$16 sps:$4 sm:$0xff]  }
 0x27c   : > { %v13655_v0 = vpop.eup %13654  ;;  %v17198_v63 = vadd.f32 0.5, %v3384_v15  ;;  %v3040_v57 = vmul.f32 0.5, %v13649_v41  ;;  %13668 = vtanh.f32 %v2305_v18  ;;  %v2317_v33 = vmul.f32 0.5, %v1739_v31  ;;  %v20960_v41 = vld [vmem:[#allocation149_spill] sm:$0xff] }
 0x27d   : > { %6603 = vmatmul.mubr.bf16.gmra.mrb[184].mxu0 %v17185_v11  ;;  %v13657_v17 = vpop.eup %13656  ;;  %v17206_v22 = vadd.f32 0.5, %v3395_v40  ;;  %v17208_v28 = vadd.f32 0.5, %v3396_v58  ;;  %13670 = vtanh.f32 %v2307_v42  ;;  %v2319_v27 = vmul.f32 0.5, %v1932_v16  ;;  %v20962_v42 = vld [vmem:[#allocation52_spill] sm:$0xff] }
 0x27e   : > { %20955 = vst [vmem:[#allocation145_spill] sm:$0xff] %v17198_v63  ;;  %6612 = vmatprep.mubr.bf16.mxu0 %v17191_v60  ;;  %v13659_v15 = vpop.eup %13658  ;;  %v17211_v18 = vadd.f32 0.5, %v3407_v53  ;;  %13672 = vtanh.f32 %v2306_v25  ;;  %v2318_v31 = vmul.f32 0.5, %v1741_v6  ;;  %v1934_v36 = vadd.f32 %v20960_v41, %v17031_v59  ;;  %7701 = vmatmul.mubr.bf16.vlgmr.msra.gmra.mrb[224].mxu1 %v20800_v4  ;;  %v12821_v53 = vld [vmem:[%s20297_s3 + $0x428] ss:$16 sps:$4 sm:$0xff]  }
 0x27f   : > { %20957 = vst [vmem:[#allocation50_spill] sm:$0xff] %v17206_v22  ;;  %20958 = vst [vmem:[#allocation51_spill] sm:$0xff] %v17208_v28  ;;  %v17216_v50 = vadd.f32 0.5, %v3408_v29  ;;  %v17218_v40 = vmul.f32 0.5, %v13655_v0  ;;  %13674 = vtanh.f32 %v2308_v54  ;;  %v1743_v58 = vadd.f32 %v20962_v42, %v20927_v3  ;;  %7710 = vmatprep.mubr.bf16.mxu1 %v16610_v24  ;;  %7862 = vmatpush1.bf16.msra.mxu1 %v12815_v30  ;;  %v20964_v4 = vld [vmem:[#allocation151_spill] sm:$0xff]  ;;  %v20965_v24 = vld [vmem:[#allocation53_spill] sm:$0xff] }
 0x280   : > { %20959 = vst [vmem:[#allocation219_spill] sm:$0xff] %v17211_v18  ;;  %v17226_v16 = vadd.f32 0.5, %v3040_v57  ;;  %v17228_v25 = vmul.f32 0.5, %v13657_v17  ;;  %13676 = vtanh.f32 %v2317_v33  ;;  %v1936_v6 = vadd.f32 %v20964_v4, %v20930_v55  ;;  %7863 = vmatprep.subr.bf16.mxu1 %v12823_v51  ;;  %v12829_v29 = vld [vmem:[%s20297_s3 + $0x44c] ss:$16 sps:$4 sm:$0xff]   ;;  %v17238_v57 = vpop.f32.mrb[184].mxu1 }
 0x281   : > { %20961 = vst [vmem:[#allocation149_spill] sm:$0xff] %v17216_v50  ;;  %v3052_v54 = vmul.f32 0.5, %v13659_v15  ;;  %13678 = vtanh.f32 %v2319_v27  ;;  %v1745_v30 = vadd.f32 %v20965_v24, %v17060_v19  ;;  %v20966_v0 = vld [vmem:[#allocation179_spill] sm:$0xff]  ;;  %20967 = vst [vmem:[#allocation151_spill] sm:$0xff] %v17238_v57  ;;  %v2320_v33 = vmul.f32 0.5, %v1934_v36  ;;  %v20968_v42 = vld [vmem:[#allocation154_spill] sm:$0xff] }
 0x282   : > { %20963 = vst [vmem:[#allocation52_spill] sm:$0xff] %v17226_v16  ;;  %v3201_v41 = vmul.f32 0.5, %v20966_v0  ;;  %v13661_v17 = vpop.eup %13660  ;;  %13680 = vtanh.f32 %v2318_v31  ;;  %v1938_v4 = vadd.f32 %v20968_v42, %v17031_v59  ;;  %v3213_v51 = vmul.f32 0.5, %v16504_v20  ;;  %v17243_v8 = vpop.f32.mrb[185].mxu1  ;;  %v20970_v27 = vld [vmem:[#allocation55_spill] sm:$0xff]  ;;  %v20972_v42 = vld [vmem:[#allocation56_spill] sm:$0xff] }
 0x283   : > { %20969 = vst [vmem:[#allocation53_spill] sm:$0xff] %v17243_v8  ;;  %v13663_v52 = vpop.eup %13662  ;;  %v2329_v15 = vmul.f32 0.5, %v1743_v58  ;;  %v1749_v16 = vadd.f32 %v20970_v27, %v20927_v3  ;;  %v3226_v24 = vmul.f32 0.5, %v16581_v32  ;;  %v3238_v0 = vmul.f32 0.5, %v16612_v9  ;;  %v17249_v57 = vpop.f32.mrb[186].mxu1  ;;  %7864 = vmatpush1.bf16.msra.mxu1 %v12821_v53  ;;  %v20974_v27 = vld [vmem:[#allocation57_spill] sm:$0xff] }
 0x284   : > { %20971 = vst [vmem:[#allocation179_spill] sm:$0xff] %v17249_v57  ;;  %v12827_v36 = vld [vmem:[%s20297_s3 + $0x448] ss:$16 sps:$4 sm:$0xff]   ;;  %v13665_v31 = vpop.eup %13664  ;;  %v2331_v20 = vmul.f32 0.5, %v1936_v6  ;;  %v1942_v8 = vadd.f32 %v20972_v42, %v20930_v55  ;;  %v3585_v58 = vadd.f32 0.5, %v3201_v41  ;;  %v3597_v18 = vadd.f32 0.5, %v3213_v51  ;;  %7865 = vmatprep.subr.bf16.mxu1 %v12829_v29 }
 0x285   : > { %v17256_v22 = vpop.f32.mrb[187].mxu1  ;;  %v12835_v9 = vld [vmem:[%s20297_s3 + $0x46c] ss:$16 sps:$4 sm:$0xff]   ;;  %v13667_v32 = vpop.eup %13666  ;;  %v2330_v53 = vmul.f32 0.5, %v1745_v30  ;;  %v1751_v57 = vadd.f32 %v20974_v27, %v17060_v19  ;;  %v3610_v50 = vadd.f32 0.5, %v3226_v24  ;;  %v3622_v28 = vadd.f32 0.5, %v3238_v0 }
 0x286   : > { %20973 = vst [vmem:[#allocation154_spill] sm:$0xff] %v17256_v22  ;;  %v13669_v6 = vpop.eup %13668  ;;  %13682 = vtanh.f32 %v2320_v33  ;;  %v2332_v63 = vmul.f32 0.5, %v1938_v4  ;;  %v20975_v41 = vld [vmem:[#allocation11_spill] sm:$0xff]  ;;  %v17265_v42 = vpack.c.bf16 %v3597_v18, %v3585_v58  ;;  %7711 = vmatmul.mubr.bf16.gmra.mrb[228].mxu1 %v16701_v14  ;;  %v2341_v22 = vmul.f32 0.5, %v1749_v16  ;;  %v20976_v30 = vld [vmem:[#allocation13_spill] sm:$0xff] }
 0x287   : > { %v1944_v51 = vadd.f32 %v20975_v41, %v17031_v59  ;;  %v17268_v29 = vpop.eup %13670  ;;  %13684 = vtanh.f32 %v2329_v15  ;;  %v1753_v34 = vadd.f32 %v20976_v30, %v20927_v3  ;;  %v17272_v27 = vpack.c.bf16 %v3622_v28, %v3610_v50  ;;  %7720 = vmatprep.mubr.bf16.mxu1 %v16714_v1  ;;  %7866 = vmatpush1.bf16.msra.mxu1 %v12827_v36  ;;  %v12833_v33 = vld [vmem:[%s20297_s3 + $0x468] ss:$16 sps:$4 sm:$0xff]   ;;  %v12841_v50 = vld [vmem:[%s20297_s3 + $0x48c] ss:$16 sps:$4 sm:$0xff]   ;;  %v20977_v15 = vld [vmem:[#allocation156_spill] sm:$0xff] }
 0x288   : > { %v17278_v18 = vpop.eup %13672  ;;  %v3061_v4 = vmul.f32 0.5, %v13661_v17  ;;  %v3063_v14 = vmul.f32 0.5, %v13663_v52  ;;  %13686 = vtanh.f32 %v2331_v20  ;;  %v2343_v24 = vmul.f32 0.5, %v1942_v8  ;;  %6613 = vmatmul.mubr.bf16.gmra.mrb[188].mxu0 %v17265_v42  ;;  %7867 = vmatprep.subr.bf16.mxu1 %v12835_v9  ;;  %v17292_v52 = vpop.f32.mrb[188].mxu1  ;;  %v20982_v9 = vld [vmem:[#allocation19_spill] sm:$0xff]  ;;  %v20983_v41 = vld [vmem:[#allocation158_spill] sm:$0xff] }
 0x289   : > { %v17284_v28 = vpop.eup %13674  ;;  %v17287_v1 = vadd.f32 0.5, %v17218_v40  ;;  %13688 = vtanh.f32 %v2330_v53  ;;  %v2342_v16 = vmul.f32 0.5, %v1751_v57  ;;  %v1946_v17 = vadd.f32 %v20977_v15, %v20930_v55  ;;  %6622 = vmatprep.mubr.bf16.mxu0 %v17272_v27  ;;  %20978 = vst [vmem:[#allocation55_spill] sm:$0xff] %v17292_v52  ;;  %v17301_v40 = vpop.f32.mrb[189].mxu1 }
 0x28a   : > { %v17294_v8 = vpop.eup %13676  ;;  %v17297_v0 = vadd.f32 0.5, %v17228_v25  ;;  %v17299_v36 = vadd.f32 0.5, %v3052_v54  ;;  %13690 = vtanh.f32 %v2332_v63  ;;  %v2344_v20 = vmul.f32 0.5, %v1944_v51  ;;  %20981 = vst [vmem:[#allocation11_spill] sm:$0xff] %v17301_v40  ;;  %v17309_v15 = vpop.f32.mrb[190].mxu1 }
 0x28b   : > { %v17303_v58 = vpop.eup %13678  ;;  %13692 = vtanh.f32 %v2341_v22  ;;  %v2353_v57 = vmul.f32 0.5, %v1753_v34  ;;  %v1755_v53 = vadd.f32 %v20982_v9, %v17060_v19  ;;  %v1948_v30 = vadd.f32 %v20983_v41, %v17031_v59  ;;  %20984 = vst [vmem:[#allocation13_spill] sm:$0xff] %v17309_v15  ;;  %7868 = vmatpush1.bf16.msra.mxu1 %v12833_v33  ;;  %v12839_v63 = vld [vmem:[%s20297_s3 + $0x488] ss:$16 sps:$4 sm:$0xff]   ;;  %v17320_v22 = vpop.f32.mrb[191].mxu1 }
 0x28c   : > { %20979 = vst [vmem:[#allocation56_spill] sm:$0xff] %v17297_v0  ;;  %20980 = vst [vmem:[#allocation57_spill] sm:$0xff] %v17299_v36  ;;  %v17314_v25 = vpop.eup %13680  ;;  %v17316_v54 = vadd.f32 0.5, %v3061_v4  ;;  %v17318_v51 = vadd.f32 0.5, %v3063_v14  ;;  %v3062_v34 = vmul.f32 0.5, %v13665_v31  ;;  %13694 = vtanh.f32 %v2343_v24  ;;  %7869 = vmatprep.subr.bf16.mxu1 %v12841_v50  ;;  %v20988_v41 = vld [vmem:[#allocation21_spill] sm:$0xff] }
 0x28d   : > { %20987 = vst [vmem:[#allocation158_spill] sm:$0xff] %v17320_v22  ;;  %v12847_v9 = vld [vmem:[%s20297_s3 + $0x4ac] ss:$16 sps:$4 sm:$0xff]   ;;  %13696 = vtanh.f32 %v2342_v16  ;;  %v2355_v33 = vmul.f32 0.5, %v1946_v17  ;;  %v1759_v40 = vadd.f32 %v20988_v41, %v20927_v3  ;;  %v3225_v52 = vmul.f32 0.5, %v16544_v5  ;;  %v20989_v31 = vld [vmem:[#allocation200_spill] sm:$0xff] }
 0x28e   : > { %20985 = vst [vmem:[#allocation156_spill] sm:$0xff] %v17316_v54  ;;  %20986 = vst [vmem:[#allocation19_spill] sm:$0xff] %v17318_v51  ;;  %v3064_v4 = vmul.f32 0.5, %v13667_v32  ;;  %13698 = vtanh.f32 %v2344_v20  ;;  %v3237_v14 = vmul.f32 0.5, %v16606_v49  ;;  %v3250_v24 = vmul.f32 0.5, %v20989_v31  ;;  %7721 = vmatmul.mubr.bf16.gmra.mrb[232].mxu1 %v16800_v35  ;;  %v20990_v32 = vld [vmem:[#allocation59_spill] sm:$0xff] }
 0x28f   : > { %v3073_v50 = vmul.f32 0.5, %v13669_v6  ;;  %13700 = vtanh.f32 %v2353_v57  ;;  %v2354_v22 = vmul.f32 0.5, %v1755_v53  ;;  %v2356_v15 = vmul.f32 0.5, %v1948_v30  ;;  %7730 = vmatprep.mubr.bf16.mxu1 %v16808_v62  ;;  %7870 = vmatpush1.bf16.msra.mxu1 %v12839_v63  ;;  %v12845_v16 = vld [vmem:[%s20297_s3 + $0x4a8] ss:$16 sps:$4 sm:$0xff]   ;;  %v20991_v41 = vld [vmem:[#allocation204_spill] sm:$0xff] }
 0x290   : > { %v13683_v5 = vpop.eup %13682  ;;  %v1952_v17 = vadd.f32 %v20990_v32, %v20930_v55  ;;  %v3609_v49 = vadd.f32 0.5, %v3225_v52  ;;  %v3621_v20 = vadd.f32 0.5, %v3237_v14  ;;  %v3262_v31 = vmul.f32 0.5, %v20991_v41  ;;  %7871 = vmatprep.subr.bf16.mxu1 %v12847_v9  ;;  %v12853_v35 = vld [vmem:[%s20297_s3 + $0x4cc] ss:$16 sps:$4 sm:$0xff]   ;;  %v20992_v53 = vld [vmem:[#allocation60_spill] sm:$0xff] }
 0x291   : > { %v13685_v6 = vpop.eup %13684  ;;  %v3075_v62 = vmul.f32 0.5, %v17268_v29  ;;  %13702 = vtanh.f32 %v2355_v33  ;;  %v2365_v57 = vmul.f32 0.5, %v1759_v40  ;;  %v1761_v30 = vadd.f32 %v20992_v53, %v17060_v19  ;;  %v17344_v63 = vpop.f32.mrb[192].mxu1  ;;  %v20994_v52 = vld [vmem:[#allocation61_spill] sm:$0xff] }
 0x292   : > { %20993 = vst [vmem:[#allocation21_spill] sm:$0xff] %v17344_v63  ;;  %v13687_v32 = vpop.eup %13686  ;;  %v1954_v14 = vadd.f32 %v20994_v52, %v17031_v59  ;;  %v17348_v41 = vpack.c.bf16 %v3621_v20, %v3609_v49  ;;  %v3634_v9 = vadd.f32 0.5, %v3250_v24  ;;  %v3646_v51 = vadd.f32 0.5, %v3262_v31  ;;  %v17350_v36 = vpop.f32.mrb[193].mxu1  ;;  %v12851_v49 = vld [vmem:[%s20297_s3 + $0x4c8] ss:$16 sps:$4 sm:$0xff]  }
 0x293   : > { %20995 = vst [vmem:[#allocation200_spill] sm:$0xff] %v17350_v36  ;;  %v13689_v54 = vpop.eup %13688  ;;  %v17352_v0 = vadd.f32 0.5, %v3062_v34  ;;  %v3074_v29 = vmul.f32 0.5, %v17278_v18  ;;  %v3076_v40 = vmul.f32 0.5, %v17284_v28  ;;  %13704 = vtanh.f32 %v2354_v22  ;;  %v17356_v33 = vpop.f32.mrb[194].mxu1  ;;  %7872 = vmatpush1.bf16.msra.mxu1 %v12845_v16 }
 0x294   : > { %20996 = vst [vmem:[#allocation59_spill] sm:$0xff] %v17356_v33  ;;  %v13691_v20 = vpop.eup %13690  ;;  %v3085_v24 = vmul.f32 0.5, %v17294_v8  ;;  %13706 = vtanh.f32 %v2356_v15  ;;  %v2367_v31 = vmul.f32 0.5, %v1952_v17  ;;  %6623 = vmatmul.mubr.bf16.gmra.mrb[192].mxu0 %v17348_v41  ;;  %v17363_v34 = vpack.c.bf16 %v3646_v51, %v3634_v9  ;;  %v17365_v18 = vpop.f32.mrb[195].mxu1  ;;  %7873 = vmatprep.subr.bf16.mxu1 %v12853_v35 }
 0x295   : > { %20997 = vst [vmem:[#allocation204_spill] sm:$0xff] %v17365_v18  ;;  %v17367_v28 = vpop.eup %13692  ;;  %v17369_v22 = vadd.f32 0.5, %v3064_v4  ;;  %v17371_v16 = vadd.f32 0.5, %v3073_v50  ;;  %13708 = vtanh.f32 %v2365_v57  ;;  %v2366_v53 = vmul.f32 0.5, %v1761_v30  ;;  %v12859_v4 = vld [vmem:[%s20297_s3 + $0x4ec] ss:$16 sps:$4 sm:$0xff]  }
 0x296   : > { %v13695_v52 = vpop.eup %13694  ;;  %v17373_v36 = vadd.f32 0.5, %v3075_v62  ;;  %v3087_v8 = vmul.f32 0.5, %v17303_v58  ;;  %v3086_v15 = vmul.f32 0.5, %v17314_v25  ;;  %v2368_v51 = vmul.f32 0.5, %v1954_v14  ;;  %6632 = vmatprep.mubr.bf16.mxu0 %v17363_v34  ;;  %7731 = vmatmul.mubr.bf16.gmra.mrb[236].mxu1 %v16906_v44  ;;  %v12857_v58 = vld [vmem:[%s20297_s3 + $0x4e8] ss:$16 sps:$4 sm:$0xff]  }
 0x297   : > { %20998 = vst [vmem:[#allocation60_spill] sm:$0xff] %v17369_v22  ;;  %v13697_v50 = vpop.eup %13696  ;;  %v17382_v17 = vadd.f32 0.5, %v3074_v29  ;;  %v3088_v35 = vmul.f32 0.5, %v13683_v5  ;;  %v3097_v57 = vmul.f32 0.5, %v13685_v6  ;;  %v3099_v62 = vmul.f32 0.5, %v13687_v32  ;;  %7740 = vmatprep.mubr.bf16.mxu1 %v16922_v39  ;;  %7874 = vmatpush1.bf16.msra.mxu1 %v12851_v49  ;;  %v21001_v5 = vld [vmem:[#allocation160_spill] sm:$0xff] }
 0x298   : > { %20999 = vst [vmem:[#allocation61_spill] sm:$0xff] %v17373_v36  ;;  %v13699_v25 = vpop.eup %13698  ;;  %v17388_v30 = vadd.f32 0.5, %v3076_v40  ;;  %v17390_v44 = vadd.f32 0.5, %v3085_v24  ;;  %v3098_v14 = vmul.f32 0.5, %v13689_v54  ;;  %13710 = vtanh.f32 %v2367_v31  ;;  %7875 = vmatprep.subr.bf16.mxu1 %v12859_v4  ;;  %v21002_v39 = vld [vmem:[#allocation161_spill] sm:$0xff]  ;;  %v21003_v29 = vld [vmem:[#allocation39_spill] sm:$0xff] }
 0x299   : > { %v13701_v9 = vpop.eup %13700  ;;  %13712 = vtanh.f32 %v2366_v53  ;;  %v1763_v6 = vadd.f32 %v21001_v5, %v20927_v3  ;;  %v1956_v32 = vadd.f32 %v21002_v39, %v20930_v55  ;;  %v3249_v49 = vmul.f32 0.5, %v21003_v29  ;;  %v17397_v63 = vpop.f32.mrb[196].mxu1  ;;  %v21006_v54 = vld [vmem:[#allocation203_spill] sm:$0xff] }
 0x29a   : > { %21000 = vst [vmem:[#allocation220_spill] sm:$0xff] %v17388_v30  ;;  %21004 = vst [vmem:[#allocation160_spill] sm:$0xff] %v17397_v63  ;;  %v17399_v18 = vadd.f32 0.5, %v3087_v8  ;;  %v17401_v40 = vadd.f32 0.5, %v3086_v15  ;;  %13714 = vtanh.f32 %v2368_v51  ;;  %v3261_v24 = vmul.f32 0.5, %v21006_v54  ;;  %v17404_v31 = vpop.f32.mrb[197].mxu1 }
 0x29b   : > { %21007 = vst [vmem:[#allocation39_spill] sm:$0xff] %v17404_v31  ;;  %v13703_v53 = vpop.eup %13702  ;;  %v17406_v4 = vadd.f32 0.5, %v3088_v35  ;;  %v17408_v5 = vadd.f32 0.5, %v3097_v57  ;;  %v17410_v33 = vadd.f32 0.5, %v3099_v62  ;;  %v3100_v39 = vmul.f32 0.5, %v13691_v20  ;;  %v17412_v29 = vpop.f32.mrb[198].mxu1  ;;  %7876 = vmatpush1.bf16.msra.mxu1 %v12857_v58 }
 0x29c   : > { %21005 = vst [vmem:[#allocation161_spill] sm:$0xff] %v17399_v18  ;;  %21011 = vst [vmem:[#allocation223_spill] sm:$0xff] %v17412_v29  ;;  %v3633_v8 = vadd.f32 0.5, %v3249_v49  ;;  %v3645_v63 = vadd.f32 0.5, %v3261_v24  ;;  %v21012_v15 = vld [vmem:[#allocation209_spill] sm:$0xff]  ;;  %v17416_v54 = vpop.f32.mrb[199].mxu1 }
 0x29d   : > { %21008 = vst [vmem:[#allocation203_spill] sm:$0xff] %v17406_v4  ;;  %21009 = vst [vmem:[#allocation221_spill] sm:$0xff] %v17408_v5  ;;  %v3274_v18 = vmul.f32 0.5, %v21012_v15  ;;  %v21013_v51 = vld [vmem:[#allocation157_spill] sm:$0xff]  ;;  %v13705_v31 = vpop.eup %13704  ;;  %v17418_v30 = vadd.f32 0.5, %v3098_v14  ;;  %v2377_v35 = vmul.f32 0.5, %v1763_v6 }
 0x29e   : > { %21010 = vst [vmem:[#allocation222_spill] sm:$0xff] %v17410_v33  ;;  %v3286_v36 = vmul.f32 0.5, %v21013_v51  ;;  %21014 = vst [vmem:[#allocation209_spill] sm:$0xff] %v17416_v54  ;;  %v2379_v57 = vmul.f32 0.5, %v1956_v32  ;;  %v21015_v62 = vld [vmem:[#allocation62_spill] sm:$0xff]  ;;  %v13707_v20 = vpop.eup %13706  ;;  %v17424_v49 = vpack.c.bf16 %v3645_v63, %v3633_v8  ;;  %7741 = vmatmul.mubr.bf16.gmra.mrb[240].mxu1 %v17003_v56  ;;  %v3109_v51 = vmul.f32 0.5, %v17367_v28 }
 0x29f   : > { %v1765_v33 = vadd.f32 %v21015_v62, %v17060_v19  ;;  %v21016_v29 = vld [vmem:[#allocation162_spill] sm:$0xff]  ;;  %v3658_v24 = vadd.f32 0.5, %v3274_v18  ;;  %v12863_v14 = vld [vmem:[%s20297_s3 + $0x508] ss:$16 sps:$4 sm:$0xff]   ;;  %v12865_v6 = vld [vmem:[%s20297_s3 + $0x50c] ss:$16 sps:$4 sm:$0xff]   ;;  %v13709_v32 = vpop.eup %13708  ;;  %7750 = vmatprep.mubr.bf16.mxu1 %v17016_v37  ;;  %13716 = vtanh.f32 %v2377_v35 }
 0x2a0   : > { %v1958_v58 = vadd.f32 %v21016_v29, %v17031_v59  ;;  %v3670_v15 = vadd.f32 0.5, %v3286_v36  ;;  %v3111_v62 = vmul.f32 0.5, %v13695_v52  ;;  %v3110_v54 = vmul.f32 0.5, %v13697_v50  ;;  %6633 = vmatmul.mubr.bf16.gmra.mrb[196].mxu0 %v17424_v49  ;;  %7877 = vmatprep.subr.bf16.mxu1 %v12865_v6  ;;  %v17440_v5 = vpop.f32.mrb[200].mxu1  ;;  %v21019_v50 = vld [vmem:[#allocation164_spill] sm:$0xff] }
 0x2a1   : > { %v3112_v29 = vmul.f32 0.5, %v13699_v25  ;;  %v17435_v63 = vadd.f32 0.5, %v3100_v39  ;;  %v3121_v36 = vmul.f32 0.5, %v13701_v9  ;;  %v3123_v56 = vmul.f32 0.5, %v13703_v53  ;;  %21018 = vst [vmem:[#allocation62_spill] sm:$0xff] %v17440_v5  ;;  %7878 = vmatpush1.bf16.msra.mxu1 %v12863_v14  ;;  %v17445_v9 = vpop.f32.mrb[201].mxu1 }
 0x2a2   : > { %v17438_v18 = vpack.c.bf16 %v3670_v15, %v3658_v24  ;;  %v3122_v8 = vmul.f32 0.5, %v13705_v31  ;;  %v3124_v4 = vmul.f32 0.5, %v13707_v20  ;;  %v2378_v22 = vmul.f32 0.5, %v1765_v33  ;;  %v13711_v28 = vpop.eup %13710  ;;  %21020 = vst [vmem:[#allocation162_spill] sm:$0xff] %v17445_v9  ;;  %v17455_v20 = vpop.f32.mrb[202].mxu1  ;;  %v21024_v24 = vld [vmem:[#allocation165_spill] sm:$0xff] }
 0x2a3   : > { %21017 = vst [vmem:[#allocation157_spill] sm:$0xff] %v17435_v63  ;;  %v3133_v52 = vmul.f32 0.5, %v13709_v32  ;;  %13718 = vtanh.f32 %v2379_v57  ;;  %v2380_v37 = vmul.f32 0.5, %v1958_v58  ;;  %v1769_v25 = vadd.f32 %v21019_v50, %v20927_v3  ;;  %v13713_v53 = vpop.eup %13712  ;;  %21023 = vst [vmem:[#allocation225_spill] sm:$0xff] %v17455_v20  ;;  %v21025_v14 = vld [vmem:[#allocation167_spill] sm:$0xff]  ;;  %v21026_v32 = vld [vmem:[#allocation168_spill] sm:$0xff] }
 0x2a4   : > { %6642 = vmatprep.mubr.bf16.mxu0 %v17438_v18  ;;  %v17447_v39 = vadd.f32 0.5, %v3109_v51  ;;  %v17449_v31 = vadd.f32 0.5, %v3111_v62  ;;  %v17451_v33 = vadd.f32 0.5, %v3110_v54  ;;  %v17453_v35 = vadd.f32 0.5, %v3112_v29  ;;  %v13715_v57 = vpop.eup %13714  ;;  %v17465_v62 = vpop.f32.mrb[203].mxu1  ;;  %v21031_v20 = vld [vmem:[#allocation206_spill] sm:$0xff] }
 0x2a5   : > { %v17457_v58 = vadd.f32 0.5, %v3121_v36  ;;  %v1962_v15 = vadd.f32 %v21024_v24, %v20930_v55  ;;  %v1771_v6 = vadd.f32 %v21025_v14, %v17060_v19  ;;  %v1964_v51 = vadd.f32 %v21026_v32, %v17031_v59  ;;  %21027 = vst [vmem:[#allocation165_spill] sm:$0xff] %v17465_v62 }
 0x2a6   : > { %21021 = vst [vmem:[#allocation164_spill] sm:$0xff] %v17449_v31  ;;  %21022 = vst [vmem:[#allocation224_spill] sm:$0xff] %v17453_v35  ;;  %v17467_v54 = vadd.f32 0.5, %v3123_v56  ;;  %v17469_v29 = vadd.f32 0.5, %v3122_v8  ;;  %v17471_v50 = vadd.f32 0.5, %v3124_v4  ;;  %13720 = vtanh.f32 %v2378_v22  ;;  %7751 = vmatmul.mubr.bf16.gmra.mrb[244].mxu1 %v17102_v23  ;;  %v21032_v31 = vld [vmem:[#allocation152_spill] sm:$0xff] }
 0x2a7   : > { %v17473_v36 = vadd.f32 0.5, %v3133_v52  ;;  %v3135_v9 = vmul.f32 0.5, %v13711_v28  ;;  %13722 = vtanh.f32 %v2380_v37  ;;  %v2389_v24 = vmul.f32 0.5, %v1769_v25  ;;  %7760 = vmatprep.mubr.bf16.mxu1 %v17117_v45  ;;  %v12869_v4 = vld [vmem:[%s20297_s3 + $0x528] ss:$16 sps:$4 sm:$0xff]  }
 0x2a8   : > { %21028 = vst [vmem:[#allocation167_spill] sm:$0xff] %v17467_v54  ;;  %21029 = vst [vmem:[#allocation168_spill] sm:$0xff] %v17471_v50  ;;  %v3134_v14 = vmul.f32 0.5, %v13713_v53  ;;  %v3136_v5 = vmul.f32 0.5, %v13715_v57  ;;  %v3273_v32 = vmul.f32 0.5, %v21031_v20  ;;  %v3285_v62 = vmul.f32 0.5, %v21032_v31 }
 0x2a9   : > { %21030 = vst [vmem:[#allocation226_spill] sm:$0xff] %v17473_v36  ;;  %v2391_v22 = vmul.f32 0.5, %v1962_v15  ;;  %v2390_v56 = vmul.f32 0.5, %v1771_v6  ;;  %v2392_v8 = vmul.f32 0.5, %v1964_v51  ;;  %v21033_v28 = vld [vmem:[#allocation115_spill] sm:$0xff]  ;;  %v21034_v53 = vld [vmem:[#allocation120_spill] sm:$0xff]  ;;  %13724 = vtanh.f32 %v2389_v24 }
 0x2aa   : > { %v3298_v52 = vmul.f32 0.5, %v21033_v28  ;;  %v12871_v23 = vld [vmem:[%s20297_s3 + $0x52c] ss:$16 sps:$4 sm:$0xff]   ;;  %v3657_v37 = vadd.f32 0.5, %v3273_v32  ;;  %v3669_v25 = vadd.f32 0.5, %v3285_v62  ;;  %v3310_v20 = vmul.f32 0.5, %v21034_v53  ;;  %v13717_v62 = vpop.eup %13716 }
 0x2ab   : > { %v21035_v31 = vld [vmem:[#allocation31_spill] sm:$0xff]  ;;  %v17491_v57 = vpop.f32.mrb[204].mxu1  ;;  %v21038_v15 = vld [vmem:[#allocation66_spill] sm:$0xff]  ;;  %v21039_v51 = vld [vmem:[#allocation169_spill] sm:$0xff]  ;;  %7879 = vmatprep.subr.bf16.mxu1 %v12871_v23  ;;  %13726 = vtanh.f32 %v2391_v22 }
 0x2ac   : > { %v17489_v45 = vrot.slane %v17027_v12, %v21035_v31  ;;  %21037 = vst [vmem:[#allocation152_spill] sm:$0xff] %v17491_v57  ;;  %v1773_v6 = vadd.f32 %v21038_v15, %v20927_v3  ;;  %v1966_v28 = vadd.f32 %v21039_v51, %v20930_v55  ;;  %v3682_v54 = vadd.f32 0.5, %v3298_v52  ;;  %v17497_v50 = vpop.f32.mrb[205].mxu1  ;;  %v21041_v12 = vld [vmem:[#allocation37_spill] sm:$0xff]  ;;  %7880 = vmatpush1.bf16.msra.mxu1 %v12869_v4  ;;  %v21043_v52 = vld [vmem:[#allocation18_spill] sm:$0xff]  ;;  %v21045_v35 = vld [vmem:[#allocation215_spill] sm:$0xff] }
 0x2ad   : > { %21040 = vst [vmem:[#allocation115_spill] sm:$0xff] %v17497_v50  ;;  %v17499_v32 = vpack.c.bf16 %v3669_v25, %v3657_v37  ;;  %v3694_v53 = vadd.f32 0.5, %v3310_v20  ;;  %v17505_v57 = vpop.f32.mrb[206].mxu1  ;;  %v13719_v15 = vpop.eup %13718  ;;  %v1775_v51 = vadd.f32 %v21043_v52, %v17060_v19  ;;  %v21044_v50 = vld [vmem:[#allocation113_spill] sm:$0xff]  ;;  %v3309_v37 = vmul.f32 0.5, %v21045_v35  ;;  %v21048_v22 = vld [vmem:[#allocation170_spill] sm:$0xff] }
 0x2ae   : > { %21036 = vst [vmem:[#allocation206_spill] sm:$0xff] %v17489_v45  ;;  %v2105_v31 = vadd.f32 %v21041_v12, %v17489_v45  ;;  %v2109_v24 = vadd.f32 %v16911_v38, %v17489_v45  ;;  %21042 = vst [vmem:[#allocation120_spill] sm:$0xff] %v17505_v57  ;;  %v3297_v23 = vmul.f32 0.5, %v21044_v50  ;;  %v17511_v25 = vpop.f32.mrb[207].mxu1  ;;  %13728 = vtanh.f32 %v2390_v56  ;;  %7761 = vmatmul.mubr.bf16.gmra.mrb[248].mxu1 %v17185_v11 }
 0x2af   : > { %21046 = vst [vmem:[#allocation66_spill] sm:$0xff] %v17511_v25  ;;  %6643 = vmatmul.mubr.bf16.gmra.mrb[200].mxu0 %v17499_v32  ;;  %v17514_v20 = vpack.c.bf16 %v3694_v53, %v3682_v54  ;;  %v17516_v57 = vadd.f32 0.5, %v3135_v9  ;;  %13730 = vtanh.f32 %v2392_v8  ;;  %v2401_v4 = vmul.f32 0.5, %v1773_v6  ;;  %7770 = vmatprep.mubr.bf16.mxu1 %v17191_v60  ;;  %v12875_v9 = vld [vmem:[%s20297_s3 + $0x548] ss:$16 sps:$4 sm:$0xff]   ;;  %v21049_v8 = vld [vmem:[#allocation20_spill] sm:$0xff] }
 0x2b0   : > { %v2273_v38 = vmul.f32 0.5, %v2105_v31  ;;  %v2285_v12 = vmul.f32 0.5, %v2109_v24  ;;  %v1968_v52 = vadd.f32 %v21048_v22, %v17031_v59  ;;  %v13721_v50 = vpop.eup %13720  ;;  %v3145_v35 = vmul.f32 0.5, %v13717_v62  ;;  %v17536_v24 = vpop.f32.mrb[208].mxu1 }
 0x2b1   : > { %21047 = vst [vmem:[#allocation169_spill] sm:$0xff] %v17516_v57  ;;  %v3147_v45 = vmul.f32 0.5, %v13719_v15  ;;  %v2403_v25 = vmul.f32 0.5, %v1966_v28  ;;  %6652 = vmatprep.mubr.bf16.mxu0 %v17514_v20  ;;  %v13723_v54 = vpop.eup %13722  ;;  %v2402_v56 = vmul.f32 0.5, %v1775_v51  ;;  %v1779_v31 = vadd.f32 %v21049_v8, %v20927_v3  ;;  %v12877_v28 = vld [vmem:[%s20297_s3 + $0x54c] ss:$16 sps:$4 sm:$0xff]  }
 0x2b2   : > { %13732 = vtanh.f32 %v2273_v38  ;;  %v3681_v6 = vadd.f32 0.5, %v3297_v23  ;;  %v3693_v11 = vadd.f32 0.5, %v3309_v37  ;;  %v17531_v62 = vadd.f32 0.5, %v3134_v14  ;;  %21052 = vst [vmem:[#allocation113_spill] sm:$0xff] %v17536_v24  ;;  %v17540_v23 = vpop.f32.mrb[209].mxu1  ;;  %7881 = vmatprep.subr.bf16.mxu1 %v12877_v28  ;;  %v21055_v14 = vld [vmem:[#allocation5_spill] sm:$0xff] }
 0x2b3   : > { %v17533_v53 = vadd.f32 0.5, %v3136_v5  ;;  %13734 = vtanh.f32 %v2285_v12  ;;  %v3322_v60 = vmul.f32 0.5, %v16913_v7  ;;  %v3146_v15 = vmul.f32 0.5, %v13721_v50  ;;  %21053 = vst [vmem:[#allocation215_spill] sm:$0xff] %v17540_v23  ;;  %v17547_v22 = vpop.f32.mrb[210].mxu1  ;;  %7882 = vmatpush1.bf16.msra.mxu1 %v12875_v9  ;;  %v13725_v7 = vpop.eup %13724  ;;  %v21061_v28 = vld [vmem:[#allocation147_spill] sm:$0xff] }
 0x2b4   : > { %21050 = vst [vmem:[#allocation37_spill] sm:$0xff] %v17531_v62  ;;  %13736 = vtanh.f32 %v2401_v4  ;;  %v2404_v51 = vmul.f32 0.5, %v1968_v52  ;;  %v17538_v38 = vpack.c.bf16 %v3693_v11, %v3681_v6  ;;  %v17542_v37 = vadd.f32 0.5, %v3145_v35  ;;  %21056 = vst [vmem:[#allocation20_spill] sm:$0xff] %v17547_v22  ;;  %v21058_v52 = vld [vmem:[#allocation10_spill] sm:$0xff]  ;;  %v17553_v6 = vpop.f32.mrb[211].mxu1 }
 0x2b5   : > { %21051 = vst [vmem:[#allocation18_spill] sm:$0xff] %v17533_v53  ;;  %13738 = vtanh.f32 %v2403_v25  ;;  %v1972_v5 = vadd.f32 %v21055_v14, %v20930_v55  ;;  %v3334_v12 = vmul.f32 0.5, %v16945_v26  ;;  %v17549_v50 = vadd.f32 0.5, %v3147_v45  ;;  %21059 = vst [vmem:[#allocation10_spill] sm:$0xff] %v17553_v6  ;;  %v21060_v25 = vld [vmem:[#allocation27_spill] sm:$0xff]  ;;  %v13727_v9 = vpop.eup %13726 }
 0x2b6   : > { %21054 = vst [vmem:[#allocation170_spill] sm:$0xff] %v17542_v37  ;;  %13740 = vtanh.f32 %v2402_v56  ;;  %v2413_v4 = vmul.f32 0.5, %v1779_v31  ;;  %v1781_v8 = vadd.f32 %v21058_v52, %v17060_v19  ;;  %v1974_v35 = vadd.f32 %v21060_v25, %v17031_v59  ;;  %v21063_v56 = vld [vmem:[#allocation121_spill] sm:$0xff]  ;;  %7771 = vmatmul.mubr.bf16.gmra.mrb[252].mxu1 %v17265_v42  ;;  %v21064_v25 = vld [vmem:[#allocation67_spill] sm:$0xff] }
 0x2b7   : > { %21057 = vst [vmem:[#allocation5_spill] sm:$0xff] %v17549_v50  ;;  %6653 = vmatmul.mubr.bf16.gmra.mrb[204].mxu0 %v17538_v38  ;;  %v3706_v11 = vadd.f32 0.5, %v3322_v60  ;;  %v3718_v26 = vadd.f32 0.5, %v3334_v12  ;;  %v3321_v14 = vmul.f32 0.5, %v21061_v28  ;;  %v17559_v23 = vadd.f32 0.5, %v3146_v15  ;;  %7780 = vmatprep.mubr.bf16.mxu1 %v17272_v27  ;;  %v21065_v27 = vld [vmem:[#allocation68_spill] sm:$0xff] }
 0x2b8   : > { %v3148_v45 = vmul.f32 0.5, %v13723_v54  ;;  %13742 = vtanh.f32 %v2404_v51  ;;  %v3333_v31 = vmul.f32 0.5, %v21063_v56  ;;  %v17563_v52 = vpop.eup %13728  ;;  %v2415_v24 = vmul.f32 0.5, %v1972_v5  ;;  %v12881_v54 = vld [vmem:[%s20297_s3 + $0x568] ss:$16 sps:$4 sm:$0xff]  }
 0x2b9   : > { %21062 = vst [vmem:[#allocation27_spill] sm:$0xff] %v17559_v23  ;;  %v1783_v6 = vadd.f32 %v21064_v25, %v20927_v3  ;;  %v17567_v22 = vpack.c.bf16 %v3718_v26, %v3706_v11  ;;  %v3346_v60 = vmul.f32 0.5, %v16987_v46  ;;  %v17574_v15 = vpop.eup %13730  ;;  %v2414_v51 = vmul.f32 0.5, %v1781_v8  ;;  %v12883_v11 = vld [vmem:[%s20297_s3 + $0x56c] ss:$16 sps:$4 sm:$0xff]   ;;  %v17583_v25 = vpop.f32.mrb[212].mxu1 }
 0x2ba   : > { %v3705_v42 = vadd.f32 0.5, %v3321_v14  ;;  %v3717_v12 = vadd.f32 0.5, %v3333_v31  ;;  %v3358_v5 = vmul.f32 0.5, %v17020_v13  ;;  %v3157_v28 = vmul.f32 0.5, %v13725_v7  ;;  %21066 = vst [vmem:[#allocation147_spill] sm:$0xff] %v17583_v25  ;;  %v17587_v50 = vpop.f32.mrb[213].mxu1  ;;  %7883 = vmatprep.subr.bf16.mxu1 %v12883_v11 }
 0x2bb   : > { %13744 = vtanh.f32 %v2413_v4  ;;  %v2416_v46 = vmul.f32 0.5, %v1974_v35  ;;  %v1976_v56 = vadd.f32 %v21065_v27, %v20930_v55  ;;  %6662 = vmatprep.mubr.bf16.mxu0 %v17567_v22  ;;  %v3730_v31 = vadd.f32 0.5, %v3346_v60  ;;  %21067 = vst [vmem:[#allocation121_spill] sm:$0xff] %v17587_v50  ;;  %v21069_v4 = vld [vmem:[#allocation69_spill] sm:$0xff]  ;;  %v17593_v27 = vpop.f32.mrb[214].mxu1  ;;  %7884 = vmatpush1.bf16.msra.mxu1 %v12881_v54 }
 0x2bc   : > { %v13733_v26 = vpop.eup %13732  ;;  %v17585_v14 = vpack.c.bf16 %v3717_v12, %v3705_v42  ;;  %v3742_v13 = vadd.f32 0.5, %v3358_v5  ;;  %v17589_v53 = vadd.f32 0.5, %v3148_v45  ;;  %v3159_v7 = vmul.f32 0.5, %v13727_v9  ;;  %21070 = vst [vmem:[#allocation68_spill] sm:$0xff] %v17593_v27  ;;  %v17597_v5 = vpop.f32.mrb[215].mxu1 }
 0x2bd   : > { %v3041_v8 = vmul.f32 0.5, %v13733_v26  ;;  %v13735_v57 = vpop.eup %13734  ;;  %13746 = vtanh.f32 %v2415_v24  ;;  %v1785_v35 = vadd.f32 %v21069_v4, %v17060_v19  ;;  %v2425_v42 = vmul.f32 0.5, %v1783_v6  ;;  %21071 = vst [vmem:[#allocation69_spill] sm:$0xff] %v17597_v5  ;;  %v21073_v24 = vld [vmem:[#allocation171_spill] sm:$0xff]  ;;  %v17630_v5 = vpop.f32.mrb[216].mxu1 }
 0x2be   : > { %21068 = vst [vmem:[#allocation67_spill] sm:$0xff] %v17589_v53  ;;  %v13737_v25 = vpop.eup %13736  ;;  %13748 = vtanh.f32 %v2414_v51  ;;  %v3053_v12 = vmul.f32 0.5, %v13735_v57  ;;  %v17595_v60 = vpack.c.bf16 %v3742_v13, %v3730_v31  ;;  %v17599_v26 = vadd.f32 0.5, %v3157_v28  ;;  %7781 = vmatmul.mubr.bf16.gmra.mrb[0].mxu1 %v17348_v41  ;;  %v12887_v51 = vld [vmem:[%s20297_s3 + $0x588] ss:$16 sps:$4 sm:$0xff]  }
 0x2bf   : > { %v13739_v11 = vpop.eup %13738  ;;  %13750 = vtanh.f32 %v2416_v46  ;;  %v2427_v9 = vmul.f32 0.5, %v1976_v56  ;;  %v1978_v45 = vadd.f32 %v21073_v24, %v17031_v59  ;;  %6663 = vmatmul.mubr.bf16.gmra.mrb[208].mxu0 %v17585_v14  ;;  %v3425_v54 = vadd.f32 0.5, %v3041_v8  ;;  %v21074_v46 = vld [vmem:[#allocation17_spill] sm:$0xff]  ;;  %7790 = vmatprep.mubr.bf16.mxu1 %v17363_v34 }
 0x2c0   : > { %21072 = vst [vmem:[#allocation227_spill] sm:$0xff] %v17599_v26  ;;  %v13741_v4 = vpop.eup %13740  ;;  %v3437_v50 = vadd.f32 0.5, %v3053_v12  ;;  %6672 = vmatprep.mubr.bf16.mxu0 %v17595_v60  ;;  %v3345_v57 = vmul.f32 0.5, %v16975_v43  ;;  %v3357_v6 = vmul.f32 0.5, %v17008_v21  ;;  %v2426_v28 = vmul.f32 0.5, %v1785_v35  ;;  %v21075_v31 = vld [vmem:[#allocation173_spill] sm:$0xff] }
 0x2c1   : > { %v1789_v56 = vadd.f32 %v21074_v46, %v20927_v3  ;;  %v1982_v8 = vadd.f32 %v21075_v31, %v20930_v55  ;;  %v3370_v13 = vmul.f32 0.5, %v17066_v2  ;;  %v12889_v43 = vld [vmem:[%s20297_s3 + $0x58c] ss:$16 sps:$4 sm:$0xff]   ;;  %v3382_v24 = vmul.f32 0.5, %v17111_v48  ;;  %21079 = vst [vmem:[#allocation173_spill] sm:$0xff] %v17630_v5 }
 0x2c2   : > { %v17620_v21 = vpop.eup %13742  ;;  %v17622_v41 = vpack.c.bf16 %v3437_v50, %v3425_v54  ;;  %v3729_v12 = vadd.f32 0.5, %v3345_v57  ;;  %v3741_v35 = vadd.f32 0.5, %v3357_v6  ;;  %v17625_v46 = vadd.f32 0.5, %v3159_v7  ;;  %v21078_v2 = vld [vmem:[#allocation23_spill] sm:$0xff]  ;;  %7885 = vmatprep.subr.bf16.mxu1 %v12889_v43  ;;  %v17634_v57 = vpop.f32.mrb[217].mxu1 }
 0x2c3   : > { %v3158_v31 = vmul.f32 0.5, %v17563_v52  ;;  %13752 = vtanh.f32 %v2425_v42  ;;  %v1791_v34 = vadd.f32 %v21078_v2, %v17060_v19  ;;  %v2428_v27 = vmul.f32 0.5, %v1978_v45  ;;  %21080 = vst [vmem:[#allocation23_spill] sm:$0xff] %v17634_v57  ;;  %7886 = vmatpush1.bf16.msra.mxu1 %v12887_v51  ;;  %v17638_v6 = vpop.f32.mrb[218].mxu1  ;;  %v21082_v45 = vld [vmem:[#allocation174_spill] sm:$0xff] }
 0x2c4   : > { %21076 = vst [vmem:[#allocation171_spill] sm:$0xff] %v17622_v41  ;;  %21077 = vst [vmem:[#allocation17_spill] sm:$0xff] %v17625_v46  ;;  %v17632_v53 = vpack.c.bf16 %v3741_v35, %v3729_v12  ;;  %v3754_v50 = vadd.f32 0.5, %v3370_v13  ;;  %v3766_v54 = vadd.f32 0.5, %v3382_v24  ;;  %v3160_v7 = vmul.f32 0.5, %v17574_v15  ;;  %v17644_v13 = vpop.f32.mrb[219].mxu1 }
 0x2c5   : > { %v13745_v48 = vpop.eup %13744  ;;  %13754 = vtanh.f32 %v2427_v9  ;;  %v2437_v52 = vmul.f32 0.5, %v1789_v56  ;;  %v3369_v42 = vmul.f32 0.5, %v17046_v47  ;;  %21081 = vst [vmem:[#allocation228_spill] sm:$0xff] %v17638_v6  ;;  %v2439_v2 = vmul.f32 0.5, %v1982_v8  ;;  %21083 = vst [vmem:[#allocation174_spill] sm:$0xff] %v17644_v13  ;;  %v21085_v15 = vld [vmem:[#allocation175_spill] sm:$0xff] }
 0x2c6   : > { %13756 = vtanh.f32 %v2426_v28  ;;  %v1984_v43 = vadd.f32 %v21082_v45, %v17031_v59  ;;  %v17642_v12 = vpack.c.bf16 %v3766_v54, %v3754_v50  ;;  %v17646_v51 = vadd.f32 0.5, %v3158_v31  ;;  %v21086_v50 = vld [vmem:[#allocation176_spill] sm:$0xff]  ;;  %7791 = vmatmul.mubr.bf16.gmra.mrb[4].mxu1 %v17424_v49  ;;  %v12895_v49 = vld [vmem:[%s20297_s3 + $0x5ac] ss:$16 sps:$4 sm:$0xff]  }
 0x2c7   : > { %v13747_v35 = vpop.eup %13746  ;;  %v2438_v24 = vmul.f32 0.5, %v1791_v34  ;;  %v1793_v9 = vadd.f32 %v21085_v15, %v20927_v3  ;;  %6673 = vmatmul.mubr.bf16.gmra.mrb[212].mxu0 %v17632_v53  ;;  %v3381_v47 = vmul.f32 0.5, %v17109_v10  ;;  %v3169_v56 = vmul.f32 0.5, %v13737_v25  ;;  %v21087_v15 = vld [vmem:[#allocation142_spill] sm:$0xff]  ;;  %7800 = vmatprep.mubr.bf16.mxu1 %v17438_v18  ;;  %v12893_v10 = vld [vmem:[%s20297_s3 + $0x5a8] ss:$16 sps:$4 sm:$0xff]  }
 0x2c8   : > { %21084 = vst [vmem:[#allocation229_spill] sm:$0xff] %v17646_v51  ;;  %v13749_v28 = vpop.eup %13748  ;;  %v3171_v8 = vmul.f32 0.5, %v13739_v11  ;;  %13758 = vtanh.f32 %v2428_v27  ;;  %v1986_v54 = vadd.f32 %v21086_v50, %v20930_v55  ;;  %6682 = vmatprep.mubr.bf16.mxu0 %v17642_v12  ;;  %v3753_v34 = vadd.f32 0.5, %v3369_v42  ;;  %v17669_v18 = vpop.f32.mrb[220].mxu1  ;;  %7887 = vmatprep.subr.bf16.mxu1 %v12895_v49 }
 0x2c9   : > { %v13751_v31 = vpop.eup %13750  ;;  %13760 = vtanh.f32 %v2437_v52  ;;  %v3765_v45 = vadd.f32 0.5, %v3381_v47  ;;  %v3394_v41 = vmul.f32 0.5, %v21087_v15  ;;  %v3170_v25 = vmul.f32 0.5, %v13741_v4  ;;  %21089 = vst [vmem:[#allocation176_spill] sm:$0xff] %v17669_v18  ;;  %v21090_v15 = vld [vmem:[#allocation25_spill] sm:$0xff]  ;;  %v17673_v57 = vpop.f32.mrb[221].mxu1  ;;  %7888 = vmatpush1.bf16.msra.mxu1 %v12893_v10 }
 0x2ca   : > { %13762 = vtanh.f32 %v2439_v2  ;;  %v2440_v27 = vmul.f32 0.5, %v1984_v43  ;;  %v3406_v11 = vmul.f32 0.5, %v17189_v61  ;;  %v17665_v52 = vadd.f32 0.5, %v3160_v7  ;;  %21091 = vst [vmem:[#allocation142_spill] sm:$0xff] %v17673_v57  ;;  %v21099_v10 = vld [vmem:[#allocation30_spill] sm:$0xff] }
 0x2cb   : > { %13764 = vtanh.f32 %v2438_v24  ;;  %v2449_v42 = vmul.f32 0.5, %v1793_v9  ;;  %v17667_v47 = vpack.c.bf16 %v3765_v45, %v3753_v34  ;;  %v2451_v50 = vmul.f32 0.5, %v1986_v54  ;;  %v21094_v9 = vld [vmem:[#allocation177_spill] sm:$0xff]  ;;  %v17682_v45 = vpop.f32.mrb[222].mxu1 }
 0x2cc   : > { %21088 = vst [vmem:[#allocation175_spill] sm:$0xff] %v17665_v52  ;;  %v1795_v4 = vadd.f32 %v21090_v15, %v17060_v19  ;;  %v3778_v2 = vadd.f32 0.5, %v3394_v41  ;;  %v3790_v43 = vadd.f32 0.5, %v3406_v11  ;;  %v17675_v5 = vadd.f32 0.5, %v3169_v56  ;;  %21095 = vst [vmem:[#allocation177_spill] sm:$0xff] %v17682_v45  ;;  %v17688_v49 = vpop.f32.mrb[223].mxu1 }
 0x2cd   : > { %v13753_v61 = vpop.eup %13752  ;;  %v17677_v7 = vadd.f32 0.5, %v3171_v8  ;;  %v3172_v24 = vmul.f32 0.5, %v17620_v21  ;;  %v1988_v34 = vadd.f32 %v21094_v9, %v17031_v59  ;;  %v17684_v54 = vadd.f32 0.5, %v3170_v25  ;;  %21097 = vst [vmem:[#allocation232_spill] sm:$0xff] %v17688_v49  ;;  %v21098_v21 = vld [vmem:[#allocation47_spill] sm:$0xff]  ;;  %v21100_v25 = vld [vmem:[#allocation12_spill] sm:$0xff] }
 0x2ce   : > { %21092 = vst [vmem:[#allocation25_spill] sm:$0xff] %v17675_v5  ;;  %v3181_v41 = vmul.f32 0.5, %v13745_v48  ;;  %13766 = vtanh.f32 %v2440_v27  ;;  %v17686_v11 = vpack.c.bf16 %v3790_v43, %v3778_v2  ;;  %v3183_v15 = vmul.f32 0.5, %v13747_v35  ;;  %v21101_v27 = vld [vmem:[#allocation40_spill] sm:$0xff]  ;;  %7801 = vmatmul.mubr.bf16.gmra.mrb[8].mxu1 %v17499_v32  ;;  %v12899_v35 = vld [vmem:[%s20297_s3 + $0x5c8] ss:$16 sps:$4 sm:$0xff]  }
 0x2cf   : > { %21093 = vst [vmem:[#allocation230_spill] sm:$0xff] %v17677_v7  ;;  %21096 = vst [vmem:[#allocation231_spill] sm:$0xff] %v17684_v54  ;;  %v13755_v56 = vpop.eup %13754  ;;  %v3182_v8 = vmul.f32 0.5, %v13749_v28  ;;  %13768 = vtanh.f32 %v2449_v42  ;;  %6683 = vmatmul.mubr.bf16.gmra.mrb[216].mxu0 %v17667_v47  ;;  %v3393_v57 = vmul.f32 0.5, %v21098_v21  ;;  %v2450_v18 = vmul.f32 0.5, %v1795_v4  ;;  %7810 = vmatprep.mubr.bf16.mxu1 %v17514_v20  ;;  %v21104_v32 = vld [vmem:[#allocation16_spill] sm:$0xff] }
 0x2d0   : > { %v13757_v9 = vpop.eup %13756  ;;  %13770 = vtanh.f32 %v2451_v50  ;;  %6692 = vmatprep.mubr.bf16.mxu0 %v17686_v11  ;;  %v3405_v48 = vmul.f32 0.5, %v21099_v10  ;;  %v17696_v2 = vpack.c.bf16 %v21101_v27, %v21100_v25  ;;  %v17702_v28 = vadd.f32 0.5, %v3172_v24  ;;  %v12901_v4 = vld [vmem:[%s20297_s3 + $0x5cc] ss:$16 sps:$4 sm:$0xff]  }
 0x2d1   : > { %v3184_v42 = vmul.f32 0.5, %v13751_v31  ;;  %v3193_v43 = vmul.f32 0.5, %v13753_v61  ;;  %v2452_v50 = vmul.f32 0.5, %v1988_v34  ;;  %v17708_v10 = vadd.f32 0.5, %v3181_v41  ;;  %v21106_v34 = vld [vmem:[#allocation33_spill] sm:$0xff]  ;;  %7889 = vmatprep.subr.bf16.mxu1 %v12901_v4  ;;  %v21108_v41 = vld [vmem:[#allocation22_spill] sm:$0xff] }
 0x2d2   : > { %21102 = vst [vmem:[#allocation47_spill] sm:$0xff] %v17702_v28  ;;  %v13759_v21 = vpop.eup %13758  ;;  %v1799_v25 = vadd.f32 %v21104_v32, %v20927_v3  ;;  %v3777_v27 = vadd.f32 0.5, %v3393_v57  ;;  %v3789_v49 = vadd.f32 0.5, %v3405_v48  ;;  %v17712_v24 = vadd.f32 0.5, %v3183_v15  ;;  %7890 = vmatpush1.bf16.msra.mxu1 %v12899_v35  ;;  %v21111_v4 = vld [vmem:[#allocation73_spill] sm:$0xff]  ;;  %v21124_v28 = vld [vmem:[#allocation76_spill] sm:$0xff] }
 0x2d3   : > { %21103 = vst [vmem:[#allocation30_spill] sm:$0xff] %v17708_v10  ;;  %v13761_v45 = vpop.eup %13760  ;;  %v3195_v31 = vmul.f32 0.5, %v13755_v56  ;;  %v3194_v61 = vmul.f32 0.5, %v13757_v9  ;;  %v1992_v20 = vadd.f32 %v21106_v34, %v20930_v55  ;;  %v17716_v6 = vadd.f32 0.5, %v3182_v8  ;;  %v21112_v34 = vld [vmem:[#allocation148_spill] sm:$0xff] }
 0x2d4   : > { %21105 = vst [vmem:[#allocation12_spill] sm:$0xff] %v17712_v24  ;;  %v13763_v13 = vpop.eup %13762  ;;  %13772 = vtanh.f32 %v2450_v18  ;;  %v1801_v7 = vadd.f32 %v21108_v41, %v17060_v19  ;;  %v17720_v46 = vpack.c.bf16 %v3789_v49, %v3777_v27  ;;  %v17722_v48 = vadd.f32 0.5, %v3184_v42  ;;  %v21113_v18 = vld [vmem:[#allocation153_spill] sm:$0xff]  ;;  %v21116_v42 = vld [vmem:[#allocation75_spill] sm:$0xff]  ;;  %v21118_v27 = vld [vmem:[#allocation150_spill] sm:$0xff] }
 0x2d5   : > { %21107 = vst [vmem:[#allocation40_spill] sm:$0xff] %v17716_v6  ;;  %v13765_v57 = vpop.eup %13764  ;;  %v17724_v15 = vadd.f32 0.5, %v3193_v43  ;;  %v3196_v56 = vmul.f32 0.5, %v13759_v21  ;;  %13774 = vtanh.f32 %v2452_v50  ;;  %v3205_v9 = vmul.f32 0.5, %v13761_v45 }
 0x2d6   : > { %21109 = vst [vmem:[#allocation16_spill] sm:$0xff] %v17722_v48  ;;  %v2461_v32 = vmul.f32 0.5, %v1799_v25  ;;  %v1994_v8 = vadd.f32 %v21111_v4, %v17031_v59  ;;  %v17730_v24 = vpack.c.bf16 %v21113_v18, %v21112_v34  ;;  %v17732_v41 = vadd.f32 0.5, %v3195_v31  ;;  %v21117_v25 = vld [vmem:[#allocation49_spill] sm:$0xff]  ;;  %7811 = vmatmul.mubr.bf16.gmra.mrb[12].mxu1 %v17538_v38 }
 0x2d7   : > { %21110 = vst [vmem:[#allocation33_spill] sm:$0xff] %v17724_v15  ;;  %v17734_v49 = vadd.f32 0.5, %v3194_v61  ;;  %v2463_v35 = vmul.f32 0.5, %v1992_v20  ;;  %v1803_v43 = vadd.f32 %v21116_v42, %v20927_v3  ;;  %6693 = vmatmul.mubr.bf16.gmra.mrb[220].mxu0 %v17720_v46  ;;  %v3207_v45 = vmul.f32 0.5, %v13763_v13  ;;  %v12905_v31 = vld [vmem:[%s20297_s3 + $0x5e8] ss:$16 sps:$4 sm:$0xff]   ;;  %7820 = vmatprep.mubr.bf16.mxu1 %v17567_v22 }
 0x2d8   : > { %21114 = vst [vmem:[#allocation22_spill] sm:$0xff] %v17732_v41  ;;  %v13767_v50 = vpop.eup %13766  ;;  %v2462_v21 = vmul.f32 0.5, %v1801_v7  ;;  %6735 = vmatprep.mubr.bf16.mxu0 %v17696_v2  ;;  %v17742_v4 = vpack.c.bf16 %v21118_v27, %v21117_v25  ;;  %v12907_v61 = vld [vmem:[%s20297_s3 + $0x5ec] ss:$16 sps:$4 sm:$0xff]   ;;  %v17751_v34 = vadd.f32 0.5, %v3196_v56  ;;  %v3206_v13 = vmul.f32 0.5, %v13765_v57 }
 0x2d9   : > { %21115 = vst [vmem:[#allocation73_spill] sm:$0xff] %v17734_v49  ;;  %v13769_v20 = vpop.eup %13768  ;;  %v21120_v7 = vld [vmem:[#allocation178_spill] sm:$0xff]  ;;  %v21121_v42 = vld [vmem:[#allocation63_spill] sm:$0xff]  ;;  %v21122_v25 = vld [vmem:[#allocation65_spill] sm:$0xff]  ;;  %v17760_v41 = vadd.f32 0.5, %v3205_v9  ;;  %13776 = vtanh.f32 %v2461_v32  ;;  %v2464_v48 = vmul.f32 0.5, %v1994_v8  ;;  %v1805_v52 = vadd.f32 %v21124_v28, %v17060_v19  ;;  %7891 = vmatprep.subr.bf16.mxu1 %v12907_v61 }
 0x2da   : > { %21119 = vst [vmem:[#allocation148_spill] sm:$0xff] %v17751_v34  ;;  %v1996_v18 = vadd.f32 %v21120_v7, %v20930_v55  ;;  %v17757_v27 = vpack.c.bf16 %v21122_v25, %v21121_v42  ;;  %v13771_v38 = vpop.eup %13770  ;;  %v3208_v56 = vmul.f32 0.5, %v13767_v50  ;;  %13778 = vtanh.f32 %v2463_v35  ;;  %v21125_v7 = vld [vmem:[#allocation77_spill] sm:$0xff]  ;;  %7892 = vmatpush1.bf16.msra.mxu1 %v12905_v31  ;;  %v21127_v22 = vld [vmem:[#allocation80_spill] sm:$0xff] }
 0x2db   : > { %21123 = vst [vmem:[#allocation153_spill] sm:$0xff] %v17760_v41  ;;  %v2473_v57 = vmul.f32 0.5, %v1803_v43  ;;  %v1998_v34 = vadd.f32 %v21125_v7, %v17031_v59  ;;  %v17766_v42 = vadd.f32 0.5, %v3207_v45  ;;  %v3217_v25 = vmul.f32 0.5, %v13769_v20  ;;  %v12812_v32 = vld [vmem:[%s20297_s3 + $0x600] ss:$16 sps:$4 sm:$0xff]  }
 0x2dc   : > { %13780 = vtanh.f32 %v2462_v21  ;;  %v1809_v9 = vadd.f32 %v21127_v22, %v20927_v3  ;;  %v17773_v28 = vadd.f32 0.5, %v3206_v13  ;;  %v3219_v8 = vmul.f32 0.5, %v13771_v38  ;;  %v21129_v43 = vld [vmem:[#allocation183_spill] sm:$0xff]  ;;  %v12820_v45 = vld [vmem:[%s20297_s3 + $0x624] ss:$16 sps:$4 sm:$0xff]   ;;  %v21130_v61 = vld [vmem:[#allocation81_spill] sm:$0xff] }
 0x2dd   : > { %21126 = vst [vmem:[#allocation75_spill] sm:$0xff] %v17766_v42  ;;  %v2475_v35 = vmul.f32 0.5, %v1996_v18  ;;  %v2002_v50 = vadd.f32 %v21129_v43, %v20930_v55  ;;  %13782 = vtanh.f32 %v2464_v48  ;;  %v2474_v21 = vmul.f32 0.5, %v1805_v52  ;;  %v21131_v7 = vld [vmem:[#allocation155_spill] sm:$0xff]  ;;  %v21132_v22 = vld [vmem:[#allocation64_spill] sm:$0xff]  ;;  %v21135_v41 = vld [vmem:[#allocation46_spill] sm:$0xff] }
 0x2de   : > { %21128 = vst [vmem:[#allocation49_spill] sm:$0xff] %v17773_v28  ;;  %v13773_v31 = vpop.eup %13772  ;;  %v1811_v20 = vadd.f32 %v21130_v61, %v17060_v19  ;;  %v17784_v42 = vpack.c.bf16 %v21132_v22, %v21131_v7  ;;  %v17786_v38 = vadd.f32 0.5, %v3208_v56  ;;  %v2476_v18 = vmul.f32 0.5, %v1998_v34  ;;  %v21134_v43 = vld [vmem:[#allocation184_spill] sm:$0xff]  ;;  %v21136_v28 = vld [vmem:[#allocation163_spill] sm:$0xff]  ;;  %v21139_v7 = vld [vmem:[#allocation82_spill] sm:$0xff]  ;;  %7821 = vmatmul.mubr.bf16.gmra.mrb[16].mxu1 %v17585_v14 }
 0x2df   : > { %v13775_v13 = vpop.eup %13774  ;;  %v2004_v63 = vadd.f32 %v21134_v43, %v17031_v59  ;;  %6736 = vmatmul.mubr.bf16.vlgmr.msra.gmra.mrb[160].mxu0 %v21135_v41  ;;  %v21137_v15 = vld [vmem:[#allocation172_spill] sm:$0xff]  ;;  %v17795_v52 = vadd.f32 0.5, %v3217_v25  ;;  %13784 = vtanh.f32 %v2473_v57  ;;  %v2485_v61 = vmul.f32 0.5, %v1809_v9  ;;  %v12913_v56 = vld [vmem:[%s20297_s3 + $0x60c] ss:$16 sps:$4 sm:$0xff]   ;;  %7830 = vmatprep.mubr.bf16.mxu1 %v17595_v60  ;;  %v21146_v60 = vld [vmem:[#allocation166_spill] sm:$0xff] }
 0x2e0   : > { %21133 = vst [vmem:[#allocation150_spill] sm:$0xff] %v17786_v38  ;;  %v17793_v48 = vpack.c.bf16 %v21137_v15, %v21136_v28  ;;  %v1813_v22 = vadd.f32 %v21139_v7, %v20927_v3  ;;  %6745 = vmatprep.mubr.bf16.mxu0 %v17730_v24  ;;  %6897 = vmatpush1.bf16.msra.mxu0 %v12812_v32  ;;  %v12818_v34 = vld [vmem:[%s20297_s3 + $0x620] ss:$16 sps:$4 sm:$0xff]   ;;  %v17806_v15 = vadd.f32 0.5, %v3219_v8  ;;  %13786 = vtanh.f32 %v2475_v35  ;;  %v21141_v57 = vld [vmem:[#allocation83_spill] sm:$0xff]  ;;  %v21142_v7 = vld [vmem:[#allocation29_spill] sm:$0xff] }
 0x2e1   : > { %21138 = vst [vmem:[#allocation178_spill] sm:$0xff] %v17795_v52  ;;  %v2487_v25 = vmul.f32 0.5, %v2002_v50  ;;  %v2006_v9 = vadd.f32 %v21141_v57, %v20930_v55  ;;  %6898 = vmatprep.subr.bf16.mxu0 %v12820_v45  ;;  %v12826_v32 = vld [vmem:[%s20297_s3 + $0x644] ss:$16 sps:$4 sm:$0xff]   ;;  %v3218_v28 = vmul.f32 0.5, %v13773_v31  ;;  %13788 = vtanh.f32 %v2474_v21  ;;  %8054 = vmatprep.subr.bf16.mxu1 %v12913_v56 }
 0x2e2   : > { %21140 = vst [vmem:[#allocation63_spill] sm:$0xff] %v17806_v15  ;;  %v2486_v43 = vmul.f32 0.5, %v1811_v20  ;;  %v1815_v38 = vadd.f32 %v21142_v7, %v17060_v19  ;;  %v3220_v8 = vmul.f32 0.5, %v13775_v13  ;;  %13790 = vtanh.f32 %v2476_v18  ;;  %v21143_v50 = vld [vmem:[#allocation32_spill] sm:$0xff]  ;;  %v21145_v20 = vld [vmem:[#allocation6_spill] sm:$0xff]  ;;  %v21147_v18 = vld [vmem:[#allocation85_spill] sm:$0xff] }
 0x2e3   : > { %v2488_v35 = vmul.f32 0.5, %v2004_v63  ;;  %v2008_v45 = vadd.f32 %v21143_v50, %v17031_v59  ;;  %v13777_v57 = vpop.eup %13776  ;;  %13792 = vtanh.f32 %v2485_v61  ;;  %v2497_v15 = vmul.f32 0.5, %v1813_v22  ;;  %v21144_v14 = vld [vmem:[#allocation84_spill] sm:$0xff]  ;;  %v21148_v22 = vld [vmem:[#allocation9_spill] sm:$0xff] }
 0x2e4   : > { %v1819_v31 = vadd.f32 %v21144_v14, %v20927_v3  ;;  %6899 = vmatpush1.bf16.msra.mxu0 %v12818_v34  ;;  %v12824_v21 = vld [vmem:[%s20297_s3 + $0x640] ss:$16 sps:$4 sm:$0xff]   ;;  %v17826_v56 = vpack.c.bf16 %v21146_v60, %v21145_v20  ;;  %v13779_v13 = vpop.eup %13778  ;;  %13794 = vtanh.f32 %v2487_v25  ;;  %v2499_v63 = vmul.f32 0.5, %v2006_v9  ;;  %v12832_v61 = vld [vmem:[%s20297_s3 + $0x664] ss:$16 sps:$4 sm:$0xff]   ;;  %v21151_v25 = vld [vmem:[#allocation185_spill] sm:$0xff] }
 0x2e5   : > { %v2012_v7 = vadd.f32 %v21147_v18, %v20930_v55  ;;  %6900 = vmatprep.subr.bf16.mxu0 %v12826_v32  ;;  %v21149_v34 = vld [vmem:[#allocation78_spill] sm:$0xff]  ;;  %v17837_v52 = vadd.f32 0.5, %v3218_v28  ;;  %13796 = vtanh.f32 %v2486_v43  ;;  %v2498_v20 = vmul.f32 0.5, %v1815_v38  ;;  %v21153_v28 = vld [vmem:[#allocation187_spill] sm:$0xff] }
 0x2e6   : > { %v17835_v50 = vpack.c.bf16 %v21149_v34, %v21148_v22  ;;  %v13781_v14 = vpop.eup %13780  ;;  %v1821_v9 = vadd.f32 %v21151_v25, %v17060_v19  ;;  %v3229_v60 = vmul.f32 0.5, %v13777_v57  ;;  %13798 = vtanh.f32 %v2488_v35  ;;  %v21152_v32 = vld [vmem:[#allocation186_spill] sm:$0xff]  ;;  %7831 = vmatmul.mubr.bf16.gmra.mrb[20].mxu1 %v17632_v53 }
 0x2e7   : > { %21150 = vst [vmem:[#allocation65_spill] sm:$0xff] %v17837_v52  ;;  %v2500_v18 = vmul.f32 0.5, %v2008_v45  ;;  %v2014_v10 = vadd.f32 %v21152_v32, %v17031_v59  ;;  %6746 = vmatmul.mubr.bf16.gmra.mrb[164].mxu0 %v17742_v4  ;;  %v13783_v49 = vpop.eup %13782  ;;  %v3231_v6 = vmul.f32 0.5, %v13779_v13  ;;  %13800 = vtanh.f32 %v2497_v15  ;;  %v12830_v38 = vld [vmem:[%s20297_s3 + $0x660] ss:$16 sps:$4 sm:$0xff]   ;;  %v21156_v32 = vld [vmem:[#allocation71_spill] sm:$0xff]  ;;  %7840 = vmatprep.mubr.bf16.mxu1 %v17642_v12 }
 0x2e8   : > { %v2509_v22 = vmul.f32 0.5, %v1819_v31  ;;  %v1823_v34 = vadd.f32 %v21153_v28, %v20927_v3  ;;  %6755 = vmatprep.mubr.bf16.mxu0 %v17757_v27  ;;  %6901 = vmatpush1.bf16.msra.mxu0 %v12824_v21  ;;  %v3230_v43 = vmul.f32 0.5, %v13781_v14  ;;  %13802 = vtanh.f32 %v2499_v63  ;;  %v21154_v45 = vld [vmem:[#allocation188_spill] sm:$0xff]  ;;  %v21155_v13 = vld [vmem:[#allocation190_spill] sm:$0xff]  ;;  %v21159_v28 = vld [vmem:[#allocation191_spill] sm:$0xff] }
 0x2e9   : > { %v2511_v35 = vmul.f32 0.5, %v2012_v7  ;;  %v2016_v57 = vadd.f32 %v21154_v45, %v20930_v55  ;;  %6902 = vmatprep.subr.bf16.mxu0 %v12832_v61  ;;  %v12838_v15 = vld [vmem:[%s20297_s3 + $0x684] ss:$16 sps:$4 sm:$0xff]   ;;  %v13785_v31 = vpop.eup %13784  ;;  %13804 = vtanh.f32 %v2498_v20  ;;  %v2510_v21 = vmul.f32 0.5, %v1821_v9  ;;  %v12836_v12 = vld [vmem:[%s20297_s3 + $0x680] ss:$16 sps:$4 sm:$0xff]  }
 0x2ea   : > { %v1825_v25 = vadd.f32 %v21155_v13, %v17060_v19  ;;  %v21157_v14 = vld [vmem:[#allocation72_spill] sm:$0xff]  ;;  %v13787_v7 = vpop.eup %13786  ;;  %13806 = vtanh.f32 %v2500_v18  ;;  %v2512_v61 = vmul.f32 0.5, %v2014_v10  ;;  %v2018_v45 = vadd.f32 %v21159_v28, %v17031_v59  ;;  %v21161_v53 = vld [vmem:[#allocation182_spill] sm:$0xff] }
 0x2eb   : > { %v17860_v63 = vpack.c.bf16 %v21157_v14, %v21156_v32  ;;  %v21160_v52 = vld [vmem:[#allocation180_spill] sm:$0xff]  ;;  %v13789_v20 = vpop.eup %13788  ;;  %v17869_v9 = vadd.f32 0.5, %v3220_v8  ;;  %v17871_v13 = vadd.f32 0.5, %v3229_v60  ;;  %13808 = vtanh.f32 %v2509_v22 }
 0x2ec   : > { %v17867_v5 = vpack.c.bf16 %v21161_v53, %v21160_v52  ;;  %v2521_v32 = vmul.f32 0.5, %v1823_v34  ;;  %6903 = vmatpush1.bf16.msra.mxu0 %v12830_v38  ;;  %v13791_v10 = vpop.eup %13790  ;;  %v17876_v18 = vadd.f32 0.5, %v3231_v6  ;;  %v3232_v14 = vmul.f32 0.5, %v13783_v49  ;;  %v12844_v52 = vld [vmem:[%s20297_s3 + $0x6a4] ss:$16 sps:$4 sm:$0xff]   ;;  %v21167_v34 = vld [vmem:[#allocation89_spill] sm:$0xff] }
 0x2ed   : > { %21158 = vst [vmem:[#allocation76_spill] sm:$0xff] %v17860_v63  ;;  %21163 = vst [vmem:[#allocation80_spill] sm:$0xff] %v17869_v9  ;;  %13810 = vtanh.f32 %v2511_v35  ;;  %v2523_v28 = vmul.f32 0.5, %v2016_v57  ;;  %6904 = vmatprep.subr.bf16.mxu0 %v12838_v15  ;;  %v13793_v8 = vpop.eup %13792  ;;  %v17881_v60 = vadd.f32 0.5, %v3230_v43  ;;  %v2522_v22 = vmul.f32 0.5, %v1825_v25  ;;  %v21168_v49 = vld [vmem:[#allocation192_spill] sm:$0xff] }
 0x2ee   : > { %21162 = vst [vmem:[#allocation77_spill] sm:$0xff] %v17867_v5  ;;  %21164 = vst [vmem:[#allocation183_spill] sm:$0xff] %v17871_v13  ;;  %13812 = vtanh.f32 %v2510_v21  ;;  %v1829_v38 = vadd.f32 %v21167_v34, %v20927_v3  ;;  %v13795_v53 = vpop.eup %13794  ;;  %v2524_v6 = vmul.f32 0.5, %v2018_v45  ;;  %v2022_v35 = vadd.f32 %v21168_v49, %v20930_v55  ;;  %v21169_v57 = vld [vmem:[#allocation79_spill] sm:$0xff]  ;;  %v21170_v15 = vld [vmem:[#allocation181_spill] sm:$0xff]  ;;  %7841 = vmatmul.mubr.bf16.gmra.mrb[24].mxu1 %v17667_v47 }
 0x2ef   : > { %21165 = vst [vmem:[#allocation81_spill] sm:$0xff] %v17876_v18  ;;  %21166 = vst [vmem:[#allocation155_spill] sm:$0xff] %v17881_v60  ;;  %13814 = vtanh.f32 %v2512_v61  ;;  %6756 = vmatmul.mubr.bf16.gmra.mrb[168].mxu0 %v17784_v42  ;;  %v17890_v18 = vpack.c.bf16 %v21170_v15, %v21169_v57  ;;  %v13797_v9 = vpop.eup %13796  ;;  %v3241_v43 = vmul.f32 0.5, %v13785_v31  ;;  %v3243_v13 = vmul.f32 0.5, %v13787_v7  ;;  %v21172_v21 = vld [vmem:[#allocation193_spill] sm:$0xff]  ;;  %v21173_v49 = vld [vmem:[#allocation194_spill] sm:$0xff]  ;;  %7850 = vmatprep.mubr.bf16.mxu1 %v17686_v11 }
 0x2f0   : > { %13816 = vtanh.f32 %v2521_v32  ;;  %v1831_v25 = vadd.f32 %v21172_v21, %v17060_v19  ;;  %6765 = vmatprep.mubr.bf16.mxu0 %v17793_v48  ;;  %6905 = vmatpush1.bf16.msra.mxu0 %v12836_v12  ;;  %v12842_v61 = vld [vmem:[%s20297_s3 + $0x6a0] ss:$16 sps:$4 sm:$0xff]   ;;  %v13799_v45 = vpop.eup %13798  ;;  %v3242_v34 = vmul.f32 0.5, %v13789_v20  ;;  %v2024_v57 = vadd.f32 %v21173_v49, %v17031_v59  ;;  %v21174_v31 = vld [vmem:[#allocation189_spill] sm:$0xff]  ;;  %v21175_v7 = vld [vmem:[#allocation87_spill] sm:$0xff] }
 0x2f1   : > { %21171 = vst [vmem:[#allocation64_spill] sm:$0xff] %v17890_v18  ;;  %13818 = vtanh.f32 %v2523_v28  ;;  %6906 = vmatprep.subr.bf16.mxu0 %v12844_v52  ;;  %v17902_v32 = vpack.c.bf16 %v21175_v7, %v21174_v31  ;;  %v12850_v15 = vld [vmem:[%s20297_s3 + $0x6c4] ss:$16 sps:$4 sm:$0xff]   ;;  %v13801_v12 = vpop.eup %13800  ;;  %v3244_v21 = vmul.f32 0.5, %v13791_v10  ;;  %v2533_v60 = vmul.f32 0.5, %v1829_v38  ;;  %v21177_v7 = vld [vmem:[#allocation91_spill] sm:$0xff] }
 0x2f2   : > { %13820 = vtanh.f32 %v2522_v22  ;;  %v21176_v20 = vld [vmem:[#allocation90_spill] sm:$0xff]  ;;  %v13803_v52 = vpop.eup %13802  ;;  %v3253_v49 = vmul.f32 0.5, %v13793_v8  ;;  %v2535_v31 = vmul.f32 0.5, %v2022_v35  ;;  %v2026_v26 = vadd.f32 %v21177_v7, %v20930_v55  ;;  %v21178_v47 = vld [vmem:[#allocation196_spill] sm:$0xff] }
 0x2f3   : > { %v1833_v28 = vadd.f32 %v21176_v20, %v20927_v3  ;;  %13822 = vtanh.f32 %v2524_v6  ;;  %v13805_v54 = vpop.eup %13804  ;;  %v2534_v51 = vmul.f32 0.5, %v1831_v25  ;;  %v1835_v37 = vadd.f32 %v21178_v47, %v17060_v19  ;;  %v21179_v10 = vld [vmem:[#allocation28_spill] sm:$0xff]  ;;  %v21180_v22 = vld [vmem:[#allocation86_spill] sm:$0xff] }
 0x2f4   : > { %6907 = vmatpush1.bf16.msra.mxu0 %v12842_v61  ;;  %v17917_v38 = vpack.c.bf16 %v21180_v22, %v21179_v10  ;;  %v12848_v11 = vld [vmem:[%s20297_s3 + $0x6c0] ss:$16 sps:$4 sm:$0xff]   ;;  %v13807_v20 = vpop.eup %13806  ;;  %v17926_v7 = vadd.f32 0.5, %v3232_v14  ;;  %v17928_v25 = vadd.f32 0.5, %v3241_v43  ;;  %v2536_v36 = vmul.f32 0.5, %v2024_v57  ;;  %v21185_v61 = vld [vmem:[#allocation197_spill] sm:$0xff] }
 0x2f5   : > { %v21181_v8 = vld [vmem:[#allocation38_spill] sm:$0xff]  ;;  %v2028_v47 = vadd.f32 %v21185_v61, %v17031_v59  ;;  %6908 = vmatprep.subr.bf16.mxu0 %v12850_v15  ;;  %v13809_v22 = vpop.eup %13808  ;;  %v17935_v23 = vadd.f32 0.5, %v3243_v13  ;;  %v17937_v62 = vadd.f32 0.5, %v3242_v34  ;;  %13824 = vtanh.f32 %v2533_v60 }
 0x2f6   : > { %v21182_v6 = vld [vmem:[#allocation198_spill] sm:$0xff]  ;;  %21183 = vst [vmem:[#allocation184_spill] sm:$0xff] %v17926_v7  ;;  %21184 = vst [vmem:[#allocation46_spill] sm:$0xff] %v17928_v25  ;;  %v3254_v43 = vmul.f32 0.5, %v13797_v9  ;;  %13826 = vtanh.f32 %v2535_v31  ;;  %v2547_v57 = vmul.f32 0.5, %v2026_v26  ;;  %v17940_v15 = vadd.f32 0.5, %v3244_v21  ;;  %7851 = vmatmul.mubr.bf16.gmra.mrb[28].mxu1 %v17720_v46 }
 0x2f7   : > { %v17924_v35 = vpack.c.bf16 %v21182_v6, %v21181_v8  ;;  %v12856_v10 = vld [vmem:[%s20297_s3 + $0x6e4] ss:$16 sps:$4 sm:$0xff]   ;;  %21186 = vst [vmem:[#allocation163_spill] sm:$0xff] %v17935_v23  ;;  %v2545_v8 = vmul.f32 0.5, %v1833_v28  ;;  %v13811_v14 = vpop.eup %13810  ;;  %v3255_v6 = vmul.f32 0.5, %v13795_v53  ;;  %6766 = vmatmul.mubr.bf16.gmra.mrb[172].mxu0 %v17826_v56  ;;  %v17942_v7 = vadd.f32 0.5, %v3253_v49  ;;  %7893 = vmatprep.mubr.bf16.mxu1 %v17696_v2 }
 0x2f8   : > { %v13813_v61 = vpop.eup %13812  ;;  %13828 = vtanh.f32 %v2534_v51  ;;  %v2546_v25 = vmul.f32 0.5, %v1835_v37  ;;  %6775 = vmatprep.mubr.bf16.mxu0 %v17835_v50  ;;  %6909 = vmatpush1.bf16.msra.mxu0 %v12848_v11  ;;  %v12854_v13 = vld [vmem:[%s20297_s3 + $0x6e0] ss:$16 sps:$4 sm:$0xff]   ;;  %v3256_v9 = vmul.f32 0.5, %v13799_v45  ;;  %v3265_v53 = vmul.f32 0.5, %v13801_v12  ;;  %v21188_v28 = vld [vmem:[#allocation195_spill] sm:$0xff] }
 0x2f9   : > { %v13815_v60 = vpop.eup %13814  ;;  %13830 = vtanh.f32 %v2536_v36  ;;  %v2548_v26 = vmul.f32 0.5, %v2028_v47  ;;  %6910 = vmatprep.subr.bf16.mxu0 %v12856_v10  ;;  %v12862_v34 = vld [vmem:[%s20297_s3 + $0x704] ss:$16 sps:$4 sm:$0xff]   ;;  %v3267_v51 = vmul.f32 0.5, %v13803_v52  ;;  %v21190_v11 = vld [vmem:[#allocation201_spill] sm:$0xff]  ;;  %v17961_v12 = vadd.f32 0.5, %v3255_v6 }
 0x2fa   : > { %v13817_v37 = vpop.eup %13816  ;;  %13832 = vtanh.f32 %v2545_v8  ;;  %v21187_v21 = vld [vmem:[#allocation88_spill] sm:$0xff]  ;;  %v21189_v31 = vld [vmem:[#allocation98_spill] sm:$0xff]  ;;  %v17963_v47 = vadd.f32 0.5, %v3254_v43  ;;  %v3266_v8 = vmul.f32 0.5, %v13805_v54  ;;  %v3268_v23 = vmul.f32 0.5, %v13807_v20 }
 0x2fb   : > { %v17954_v49 = vpack.c.bf16 %v21188_v28, %v21187_v21  ;;  %v17958_v45 = vpack.c.bf16 %v21190_v11, %v21189_v31  ;;  %v13819_v36 = vpop.eup %13818  ;;  %21191 = vst [vmem:[#allocation172_spill] sm:$0xff] %v17961_v12  ;;  %13834 = vtanh.f32 %v2547_v57  ;;  %v21192_v46 = vld [vmem:[#allocation92_spill] sm:$0xff]  ;;  %v21193_v21 = vld [vmem:[#allocation93_spill] sm:$0xff]  ;;  %v17972_v31 = vadd.f32 0.5, %v3256_v9 }
 0x2fc   : > { %v1839_v52 = vadd.f32 %v21192_v46, %v20927_v3  ;;  %v13821_v10 = vpop.eup %13820  ;;  %13836 = vtanh.f32 %v2546_v25  ;;  %v2032_v28 = vadd.f32 %v21193_v21, %v20930_v55  ;;  %6911 = vmatpush1.bf16.msra.mxu0 %v12854_v13  ;;  %v12860_v2 = vld [vmem:[%s20297_s3 + $0x700] ss:$16 sps:$4 sm:$0xff]   ;;  %v17974_v43 = vadd.f32 0.5, %v3265_v53  ;;  %v12868_v54 = vld [vmem:[%s20297_s3 + $0x724] ss:$16 sps:$4 sm:$0xff]  }
 0x2fd   : > { %v13823_v6 = vpop.eup %13822  ;;  %v3277_v57 = vmul.f32 0.5, %v13809_v22  ;;  %13838 = vtanh.f32 %v2548_v26  ;;  %6912 = vmatprep.subr.bf16.mxu0 %v12862_v34  ;;  %v17979_v20 = vadd.f32 0.5, %v3267_v51  ;;  %v3279_v25 = vmul.f32 0.5, %v13811_v14  ;;  %v12911_v46 = vld [vmem:[%s20297_s3 + $0x608] ss:$16 sps:$4 sm:$0xff]   ;;  %v21196_v26 = vld [vmem:[#allocation100_spill] sm:$0xff] }
 0x2fe   : > { %v3278_v13 = vmul.f32 0.5, %v13813_v61  ;;  %v3280_v11 = vmul.f32 0.5, %v13815_v60  ;;  %v3289_v9 = vmul.f32 0.5, %v13817_v37  ;;  %v3291_v21 = vmul.f32 0.5, %v13819_v36  ;;  %v21195_v22 = vld [vmem:[#allocation95_spill] sm:$0xff]  ;;  %7894 = vmatmul.mubr.bf16.vlgmr.msra.gmra.mrb[224].mxu1 %v21135_v41 }
 0x2ff   : > { %21194 = vst [vmem:[#allocation82_spill] sm:$0xff] %v17979_v20  ;;  %v2557_v53 = vmul.f32 0.5, %v1839_v52  ;;  %6776 = vmatmul.mubr.bf16.gmra.mrb[176].mxu0 %v17860_v63  ;;  %v17987_v34 = vpack.c.bf16 %v21196_v26, %v21195_v22  ;;  %v12919_v51 = vld [vmem:[%s20297_s3 + $0x62c] ss:$16 sps:$4 sm:$0xff]   ;;  %v13825_v14 = vpop.eup %13824  ;;  %v17992_v61 = vadd.f32 0.5, %v3266_v8  ;;  %v17994_v60 = vadd.f32 0.5, %v3268_v23  ;;  %7903 = vmatprep.mubr.bf16.mxu1 %v17730_v24 }
 0x300   : > { %v2559_v20 = vmul.f32 0.5, %v2032_v28  ;;  %6785 = vmatprep.mubr.bf16.mxu0 %v17867_v5  ;;  %v21198_v37 = vld [vmem:[#allocation107_spill] sm:$0xff]  ;;  %6913 = vmatpush1.bf16.msra.mxu0 %v12860_v2  ;;  %v12866_v22 = vld [vmem:[%s20297_s3 + $0x720] ss:$16 sps:$4 sm:$0xff]   ;;  %v13827_v26 = vpop.eup %13826  ;;  %v18004_v63 = vadd.f32 0.5, %v3277_v57  ;;  %v3292_v8 = vmul.f32 0.5, %v13823_v6 }
 0x301   : > { %21197 = vst [vmem:[#allocation83_spill] sm:$0xff] %v17987_v34  ;;  %v21199_v36 = vld [vmem:[#allocation15_spill] sm:$0xff]  ;;  %v3290_v34 = vmul.f32 0.5, %v13821_v10  ;;  %v21202_v23 = vld [vmem:[#allocation108_spill] sm:$0xff]  ;;  %6914 = vmatprep.subr.bf16.mxu0 %v12868_v54  ;;  %v18016_v5 = vadd.f32 0.5, %v3280_v11  ;;  %v21206_v10 = vld [vmem:[#allocation94_spill] sm:$0xff]  ;;  %8055 = vmatpush1.bf16.msra.mxu1 %v12911_v46  ;;  %13840 = vtanh.f32 %v2557_v53 }
 0x302   : > { %v17999_v52 = vpack.c.bf16 %v21199_v36, %v21198_v37  ;;  %21201 = vst [vmem:[#allocation32_spill] sm:$0xff] %v18004_v63  ;;  %v1841_v12 = vadd.f32 %v21202_v23, %v17060_v19  ;;  %v12874_v28 = vld [vmem:[%s20297_s3 + $0x744] ss:$16 sps:$4 sm:$0xff]   ;;  %v13829_v2 = vpop.eup %13828  ;;  %v18012_v37 = vadd.f32 0.5, %v3279_v25  ;;  %v18014_v36 = vadd.f32 0.5, %v3278_v13  ;;  %8056 = vmatprep.subr.bf16.mxu1 %v12919_v51  ;;  %v21214_v63 = vld [vmem:[#allocation109_spill] sm:$0xff] }
 0x303   : > { %21205 = vst [vmem:[#allocation166_spill] sm:$0xff] %v18016_v5  ;;  %v2034_v6 = vadd.f32 %v21206_v10, %v17031_v59  ;;  %v12917_v57 = vld [vmem:[%s20297_s3 + $0x628] ss:$16 sps:$4 sm:$0xff]   ;;  %v13831_v54 = vpop.eup %13830  ;;  %v18024_v23 = vadd.f32 0.5, %v3289_v9  ;;  %v18026_v41 = vadd.f32 0.5, %v3291_v21  ;;  %v21209_v25 = vld [vmem:[#allocation96_spill] sm:$0xff]  ;;  %13842 = vtanh.f32 %v2559_v20 }
 0x304   : > { %21200 = vst [vmem:[#allocation29_spill] sm:$0xff] %v17999_v52  ;;  %21203 = vst [vmem:[#allocation84_spill] sm:$0xff] %v18012_v37  ;;  %v1843_v13 = vadd.f32 %v21209_v25, %v20927_v3  ;;  %v12925_v11 = vld [vmem:[%s20297_s3 + $0x64c] ss:$16 sps:$4 sm:$0xff]   ;;  %v13833_v24 = vpop.eup %13832  ;;  %v3301_v46 = vmul.f32 0.5, %v13825_v14  ;;  %v3303_v10 = vmul.f32 0.5, %v13827_v26  ;;  %6915 = vmatpush1.bf16.msra.mxu0 %v12866_v22 }
 0x305   : > { %21204 = vst [vmem:[#allocation6_spill] sm:$0xff] %v18014_v36  ;;  %21207 = vst [vmem:[#allocation85_spill] sm:$0xff] %v18024_v23  ;;  %v21210_v5 = vld [vmem:[#allocation97_spill] sm:$0xff]  ;;  %v12872_v9 = vld [vmem:[%s20297_s3 + $0x740] ss:$16 sps:$4 sm:$0xff]   ;;  %v13835_v21 = vpop.eup %13834  ;;  %v18038_v53 = vadd.f32 0.5, %v3290_v34  ;;  %6916 = vmatprep.subr.bf16.mxu0 %v12874_v28  ;;  %8057 = vmatpush1.bf16.msra.mxu1 %v12917_v57 }
 0x306   : > { %21208 = vst [vmem:[#allocation9_spill] sm:$0xff] %v18026_v41  ;;  %v2036_v36 = vadd.f32 %v21210_v5, %v20930_v55  ;;  %v18040_v51 = vadd.f32 0.5, %v3292_v8  ;;  %v3302_v25 = vmul.f32 0.5, %v13829_v2  ;;  %v2558_v41 = vmul.f32 0.5, %v1841_v12  ;;  %v12880_v20 = vld [vmem:[%s20297_s3 + $0x764] ss:$16 sps:$4 sm:$0xff]   ;;  %v13837_v14 = vpop.eup %13836  ;;  %8058 = vmatprep.subr.bf16.mxu1 %v12925_v11  ;;  %7904 = vmatmul.mubr.bf16.gmra.mrb[228].mxu1 %v17742_v4 }
 0x307   : > { %v3304_v26 = vmul.f32 0.5, %v13831_v54  ;;  %v2560_v5 = vmul.f32 0.5, %v2034_v6  ;;  %v21212_v22 = vld [vmem:[#allocation99_spill] sm:$0xff]  ;;  %v21213_v23 = vld [vmem:[#allocation106_spill] sm:$0xff]  ;;  %v13839_v34 = vpop.eup %13838  ;;  %v3313_v8 = vmul.f32 0.5, %v13833_v24  ;;  %v2569_v28 = vmul.f32 0.5, %v1843_v13  ;;  %6786 = vmatmul.mubr.bf16.gmra.mrb[180].mxu0 %v17890_v18  ;;  %7913 = vmatprep.mubr.bf16.mxu1 %v17757_v27 }
 0x308   : > { %21211 = vst [vmem:[#allocation78_spill] sm:$0xff] %v18040_v51  ;;  %v1845_v37 = vadd.f32 %v21212_v22, %v17060_v19  ;;  %v18049_v52 = vpack.c.bf16 %v21214_v63, %v21213_v23  ;;  %v12923_v12 = vld [vmem:[%s20297_s3 + $0x648] ss:$16 sps:$4 sm:$0xff]   ;;  %v12931_v63 = vld [vmem:[%s20297_s3 + $0x66c] ss:$16 sps:$4 sm:$0xff]   ;;  %v18064_v57 = vadd.f32 0.5, %v3301_v46  ;;  %6795 = vmatprep.mubr.bf16.mxu0 %v17902_v32  ;;  %6917 = vmatpush1.bf16.msra.mxu0 %v12872_v9  ;;  %13844 = vtanh.f32 %v2558_v41 }
 0x309   : > { %v21215_v2 = vld [vmem:[#allocation199_spill] sm:$0xff]  ;;  %v21216_v6 = vld [vmem:[#allocation213_spill] sm:$0xff]  ;;  %v18066_v23 = vadd.f32 0.5, %v3303_v10  ;;  %v3315_v24 = vmul.f32 0.5, %v13835_v21  ;;  %v2571_v13 = vmul.f32 0.5, %v2036_v36  ;;  %v3314_v11 = vmul.f32 0.5, %v13837_v14  ;;  %6918 = vmatprep.subr.bf16.mxu0 %v12880_v20  ;;  %8059 = vmatpush1.bf16.msra.mxu1 %v12923_v12 }
 0x30a   : > { %v2038_v51 = vadd.f32 %v21215_v2, %v17031_v59  ;;  %v21217_v54 = vld [vmem:[#allocation217_spill] sm:$0xff]  ;;  %v12878_v2 = vld [vmem:[%s20297_s3 + $0x760] ss:$16 sps:$4 sm:$0xff]   ;;  %v12886_v36 = vld [vmem:[%s20297_s3 + $0x784] ss:$16 sps:$4 sm:$0xff]   ;;  %v18082_v46 = vadd.f32 0.5, %v3304_v26  ;;  %13846 = vtanh.f32 %v2560_v5  ;;  %8060 = vmatprep.subr.bf16.mxu1 %v12931_v63 }
 0x30b   : > { %v18059_v22 = vpack.c.bf16 %v21217_v54, %v21216_v6  ;;  %v18072_v6 = vadd.f32 0.5, %v3302_v25  ;;  %v21219_v54 = vld [vmem:[#allocation34_spill] sm:$0xff]  ;;  %v21220_v18 = vld [vmem:[#allocation216_spill] sm:$0xff]  ;;  %v3316_v10 = vmul.f32 0.5, %v13839_v34  ;;  %v2570_v9 = vmul.f32 0.5, %v1845_v37  ;;  %v21223_v20 = vld [vmem:[#allocation125_spill] sm:$0xff] }
 0x30c   : > { %v18088_v41 = vadd.f32 0.5, %v3313_v8  ;;  %13848 = vtanh.f32 %v2569_v28  ;;  %v2572_v21 = vmul.f32 0.5, %v2038_v51  ;;  %v21222_v25 = vld [vmem:[#allocation122_spill] sm:$0xff]  ;;  %v12937_v4 = vld [vmem:[%s20297_s3 + $0x68c] ss:$16 sps:$4 sm:$0xff]   ;;  %v18097_v37 = vadd.f32 0.5, %v3315_v24  ;;  %6919 = vmatpush1.bf16.msra.mxu0 %v12878_v2  ;;  %v13841_v8 = vpop.eup %13840 }
 0x30d   : > { %21218 = vst [vmem:[#allocation185_spill] sm:$0xff] %v18059_v22  ;;  %v18076_v22 = vpack.c.bf16 %v21220_v18, %v21219_v54  ;;  %v12929_v18 = vld [vmem:[%s20297_s3 + $0x668] ss:$16 sps:$4 sm:$0xff]   ;;  %v18092_v14 = vpack.c.bf16 %v21223_v20, %v21222_v25  ;;  %13850 = vtanh.f32 %v2571_v13  ;;  %v21226_v5 = vld [vmem:[#allocation218_spill] sm:$0xff]  ;;  %v18108_v28 = vadd.f32 0.5, %v3314_v11  ;;  %6920 = vmatprep.subr.bf16.mxu0 %v12886_v36 }
 0x30e   : > { %v21225_v27 = vld [vmem:[#allocation101_spill] sm:$0xff]  ;;  %v21227_v12 = vld [vmem:[#allocation123_spill] sm:$0xff]  ;;  %v12884_v51 = vld [vmem:[%s20297_s3 + $0x780] ss:$16 sps:$4 sm:$0xff]   ;;  %13852 = vtanh.f32 %v2570_v9  ;;  %8061 = vmatpush1.bf16.msra.mxu1 %v12929_v18  ;;  %v3325_v18 = vmul.f32 0.5, %v13841_v8 }
 0x30f   : > { %21221 = vst [vmem:[#allocation186_spill] sm:$0xff] %v18076_v22  ;;  %21224 = vst [vmem:[#allocation187_spill] sm:$0xff] %v18092_v14  ;;  %v1849_v26 = vadd.f32 %v21225_v27, %v20927_v3  ;;  %v18103_v34 = vpack.c.bf16 %v21227_v12, %v21226_v5  ;;  %v21229_v63 = vld [vmem:[#allocation45_spill] sm:$0xff]  ;;  %v21231_v13 = vld [vmem:[#allocation2_spill] sm:$0xff]  ;;  %v13843_v5 = vpop.eup %13842  ;;  %v18123_v12 = vadd.f32 0.5, %v3316_v10  ;;  %13854 = vtanh.f32 %v2572_v21  ;;  %6796 = vmatmul.mubr.bf16.gmra.mrb[184].mxu0 %v17917_v38 }
 0x310   : > { %v2042_v24 = vadd.f32 %v21229_v63, %v20930_v55  ;;  %v21230_v54 = vld [vmem:[#allocation133_spill] sm:$0xff]  ;;  %v21233_v20 = vld [vmem:[#allocation126_spill] sm:$0xff]  ;;  %v21234_v27 = vld [vmem:[#allocation132_spill] sm:$0xff]  ;;  %8062 = vmatprep.subr.bf16.mxu1 %v12937_v4  ;;  %6805 = vmatprep.mubr.bf16.mxu0 %v17924_v35 }
 0x311   : > { %21228 = vst [vmem:[#allocation188_spill] sm:$0xff] %v18103_v34  ;;  %v18114_v25 = vpack.c.bf16 %v21231_v13, %v21230_v54  ;;  %v18118_v14 = vpack.c.bf16 %v21234_v27, %v21233_v20  ;;  %v12892_v2 = vld [vmem:[%s20297_s3 + $0x7a4] ss:$16 sps:$4 sm:$0xff]   ;;  %v21237_v34 = vld [vmem:[#allocation137_spill] sm:$0xff]  ;;  %v21238_v22 = vld [vmem:[#allocation43_spill] sm:$0xff]  ;;  %v18148_v21 = vmul.f32 0.5, %v1849_v26  ;;  %6921 = vmatpush1.bf16.msra.mxu0 %v12884_v51  ;;  %7914 = vmatmul.mubr.bf16.gmra.mrb[232].mxu1 %v17784_v42 }
 0x312   : > { %v21236_v11 = vld [vmem:[#allocation102_spill] sm:$0xff]  ;;  %v18129_v54 = vpack.c.bf16 %v21238_v22, %v21237_v34  ;;  %v12935_v36 = vld [vmem:[%s20297_s3 + $0x688] ss:$16 sps:$4 sm:$0xff]   ;;  %v12943_v22 = vld [vmem:[%s20297_s3 + $0x6ac] ss:$16 sps:$4 sm:$0xff]   ;;  %v18164_v8 = vmul.f32 0.5, %v2042_v24  ;;  %6922 = vmatprep.subr.bf16.mxu0 %v12892_v2  ;;  %v18184_v2 = vpack.c.bf16 %v17382_v17, %v17352_v0  ;;  %7923 = vmatprep.mubr.bf16.mxu1 %v17793_v48  ;;  %v13845_v42 = vpop.eup %13844 }
 0x313   : > { %21232 = vst [vmem:[#allocation190_spill] sm:$0xff] %v18114_v25  ;;  %21235 = vst [vmem:[#allocation71_spill] sm:$0xff] %v18118_v14  ;;  %v1851_v63 = vadd.f32 %v21236_v11, %v17060_v19  ;;  %v21240_v13 = vld [vmem:[#allocation202_spill] sm:$0xff]  ;;  %v21244_v11 = vld [vmem:[#allocation140_spill] sm:$0xff]  ;;  %8063 = vmatpush1.bf16.msra.mxu1 %v12935_v36  ;;  %13856 = vtanh.f32 %v18148_v21 }
 0x314   : > { %21239 = vst [vmem:[#allocation72_spill] sm:$0xff] %v18129_v54  ;;  %v2044_v20 = vadd.f32 %v21240_v13, %v17031_v59  ;;  %v21241_v10 = vld [vmem:[#allocation134_spill] sm:$0xff]  ;;  %v21245_v14 = vld [vmem:[#allocation145_spill] sm:$0xff]  ;;  %v21247_v13 = vld [vmem:[#allocation44_spill] sm:$0xff]  ;;  %8064 = vmatprep.subr.bf16.mxu1 %v12943_v22  ;;  %v18211_v36 = vpop.eup %13846  ;;  %13858 = vtanh.f32 %v18164_v8 }
 0x315   : > { %v21242_v9 = vld [vmem:[#allocation42_spill] sm:$0xff]  ;;  %v18143_v25 = vpack.c.bf16 %v21245_v14, %v21244_v11  ;;  %v21249_v14 = vld [vmem:[#allocation51_spill] sm:$0xff]  ;;  %v21250_v4 = vld [vmem:[#allocation149_spill] sm:$0xff] }
 0x316   : > { %v18139_v27 = vpack.c.bf16 %v21242_v9, %v21241_v10  ;;  %v12890_v34 = vld [vmem:[%s20297_s3 + $0x7a0] ss:$16 sps:$4 sm:$0xff]   ;;  %v18160_v11 = vpack.c.bf16 %v21250_v4, %v21249_v14  ;;  %v12898_v26 = vld [vmem:[%s20297_s3 + $0x7c4] ss:$16 sps:$4 sm:$0xff]   ;;  %v18178_v14 = vmul.f32 0.5, %v1851_v63  ;;  %v21255_v24 = vld [vmem:[#allocation103_spill] sm:$0xff] }
 0x317   : > { %21246 = vst [vmem:[#allocation180_spill] sm:$0xff] %v18143_v25  ;;  %v21248_v10 = vld [vmem:[#allocation8_spill] sm:$0xff]  ;;  %v18162_v25 = vmul.f32 0.5, %v13843_v5  ;;  %v21252_v51 = vld [vmem:[#allocation50_spill] sm:$0xff]  ;;  %v1853_v5 = vadd.f32 %v21255_v24, %v20927_v3  ;;  %v21259_v0 = vld [vmem:[#allocation221_spill] sm:$0xff]  ;;  %6923 = vmatpush1.bf16.msra.mxu0 %v12890_v34 }
 0x318   : > { %21243 = vst [vmem:[#allocation191_spill] sm:$0xff] %v18139_v27  ;;  %v18156_v9 = vpack.c.bf16 %v21248_v10, %v21247_v13  ;;  %21251 = vst [vmem:[#allocation182_spill] sm:$0xff] %v18160_v11  ;;  %v21253_v27 = vld [vmem:[#allocation219_spill] sm:$0xff]  ;;  %v21254_v13 = vld [vmem:[#allocation56_spill] sm:$0xff]  ;;  %v18202_v17 = vpack.c.bf16 %v21259_v0, %v17390_v44  ;;  %v18220_v44 = vpack.c.bf16 %v17457_v58, %v17447_v39  ;;  %v18230_v0 = vpop.eup %13848  ;;  %6924 = vmatprep.subr.bf16.mxu0 %v12898_v26 }
 0x319   : > { %v18171_v54 = vpack.c.bf16 %v21253_v27, %v21252_v51  ;;  %v18175_v10 = vpack.c.bf16 %v21254_v13, %v17287_v1  ;;  %v21256_v4 = vld [vmem:[#allocation156_spill] sm:$0xff]  ;;  %v12941_v1 = vld [vmem:[%s20297_s3 + $0x6a8] ss:$16 sps:$4 sm:$0xff]   ;;  %v18198_v51 = vpack.c.bf16 %v17418_v30, %v17401_v40  ;;  %v12949_v48 = vld [vmem:[%s20297_s3 + $0x6cc] ss:$16 sps:$4 sm:$0xff]   ;;  %v13851_v26 = vpop.eup %13850  ;;  %6806 = vmatmul.mubr.bf16.gmra.mrb[188].mxu0 %v17954_v49  ;;  %7924 = vmatmul.mubr.bf16.gmra.mrb[236].mxu1 %v17826_v56 }
 0x31a   : > { %v18188_v11 = vpack.c.bf16 %v17371_v16, %v21256_v4  ;;  %v21257_v63 = vld [vmem:[#allocation104_spill] sm:$0xff]  ;;  %21260 = vst [vmem:[#allocation192_spill] sm:$0xff] %v18202_v17  ;;  %v18206_v16 = vpack.c.bf16 %v17469_v29, %v17451_v33  ;;  %v21262_v13 = vld [vmem:[#allocation105_spill] sm:$0xff]  ;;  %21263 = vst [vmem:[#allocation181_spill] sm:$0xff] %v18220_v44  ;;  %8065 = vmatpush1.bf16.msra.mxu1 %v12941_v1  ;;  %v18270_v1 = vmul.f32 0.5, %v2044_v20  ;;  %6815 = vmatprep.mubr.bf16.mxu0 %v17958_v45 }
 0x31b   : > { %v2046_v27 = vadd.f32 %v21257_v63, %v20930_v55  ;;  %21258 = vst [vmem:[#allocation89_spill] sm:$0xff] %v18198_v51  ;;  %v1855_v24 = vadd.f32 %v21262_v13, %v17060_v19  ;;  %v12896_v30 = vld [vmem:[%s20297_s3 + $0x7c0] ss:$16 sps:$4 sm:$0xff]   ;;  %v21264_v40 = vld [vmem:[#allocation37_spill] sm:$0xff]  ;;  %v21265_v33 = vld [vmem:[#allocation27_spill] sm:$0xff]  ;;  %8066 = vmatprep.subr.bf16.mxu1 %v12949_v48  ;;  %v18298_v48 = vpack.c.bf16 %v17974_v43, %v17942_v7 }
 0x31c   : > { %21261 = vst [vmem:[#allocation79_spill] sm:$0xff] %v18206_v16  ;;  %v18224_v29 = vpack.c.bf16 %v21265_v33, %v21264_v40  ;;  %v21267_v22 = vld [vmem:[#allocation226_spill] sm:$0xff]  ;;  %v21270_v13 = vld [vmem:[#allocation229_spill] sm:$0xff]  ;;  %v21271_v16 = vld [vmem:[#allocation231_spill] sm:$0xff]  ;;  %6925 = vmatpush1.bf16.msra.mxu0 %v12896_v30  ;;  %v18317_v7 = vpack.c.bf16 %v17992_v61, %v17963_v47  ;;  %7933 = vmatprep.mubr.bf16.mxu1 %v17835_v50 }
 0x31d   : > { %v21268_v4 = vld [vmem:[#allocation170_spill] sm:$0xff]  ;;  %v18237_v17 = vpack.c.bf16 %v21271_v16, %v21270_v13  ;;  %v21273_v39 = vld [vmem:[#allocation227_spill] sm:$0xff]  ;;  %v21274_v58 = vld [vmem:[#allocation25_spill] sm:$0xff]  ;;  %21301 = vst [vmem:[#allocation88_spill] sm:$0xff] %v18298_v48 }
 0x31e   : > { %21266 = vst [vmem:[#allocation193_spill] sm:$0xff] %v18224_v29  ;;  %v18228_v63 = vpack.c.bf16 %v21268_v4, %v21267_v22  ;;  %v12904_v34 = vld [vmem:[%s20297_s3 + $0x7e4] ss:$16 sps:$4 sm:$0xff]   ;;  %v18241_v44 = vpack.c.bf16 %v21274_v58, %v21273_v39  ;;  %v21277_v33 = vld [vmem:[#allocation73_spill] sm:$0xff]  ;;  %v12902_v20 = vld [vmem:[%s20297_s3 + $0x7e0] ss:$16 sps:$4 sm:$0xff]  }
 0x31f   : > { %21272 = vst [vmem:[#allocation189_spill] sm:$0xff] %v18237_v17  ;;  %v21276_v40 = vld [vmem:[#allocation40_spill] sm:$0xff]  ;;  %v21279_v22 = vld [vmem:[#allocation30_spill] sm:$0xff]  ;;  %v21280_v4 = vld [vmem:[#allocation33_spill] sm:$0xff]  ;;  %6926 = vmatprep.subr.bf16.mxu0 %v12904_v34 }
 0x320   : > { %21269 = vst [vmem:[#allocation194_spill] sm:$0xff] %v18228_v63  ;;  %21275 = vst [vmem:[#allocation87_spill] sm:$0xff] %v18241_v44  ;;  %v18245_v29 = vpack.c.bf16 %v21277_v33, %v21276_v40  ;;  %v18249_v63 = vpack.c.bf16 %v21280_v4, %v21279_v22  ;;  %v12947_v51 = vld [vmem:[%s20297_s3 + $0x6c8] ss:$16 sps:$4 sm:$0xff]   ;;  %v21286_v58 = vld [vmem:[#allocation178_spill] sm:$0xff]  ;;  %6927 = vmatpush1.bf16.msra.mxu0 %v12902_v20 }
 0x321   : > { %v21282_v16 = vld [vmem:[#allocation49_spill] sm:$0xff]  ;;  %v21288_v40 = vld [vmem:[#allocation155_spill] sm:$0xff]  ;;  %v21291_v4 = vld [vmem:[#allocation46_spill] sm:$0xff]  ;;  %8067 = vmatpush1.bf16.msra.mxu1 %v12947_v51 }
 0x322   : > { %21278 = vst [vmem:[#allocation90_spill] sm:$0xff] %v18245_v29  ;;  %21281 = vst [vmem:[#allocation91_spill] sm:$0xff] %v18249_v63  ;;  %v21283_v13 = vld [vmem:[#allocation65_spill] sm:$0xff]  ;;  %v18264_v33 = vpack.c.bf16 %v17937_v62, %v21288_v40  ;;  %v21290_v22 = vld [vmem:[#allocation183_spill] sm:$0xff] }
 0x323   : > { %v18256_v17 = vpack.c.bf16 %v21283_v13, %v21282_v16  ;;  %v21285_v39 = vld [vmem:[#allocation153_spill] sm:$0xff]  ;;  %v18268_v63 = vpack.c.bf16 %v21291_v4, %v21290_v22  ;;  %v21292_v29 = vld [vmem:[#allocation52_spill] sm:$0xff]  ;;  %v18287_v22 = vadd.f32 0.5, %v3325_v18  ;;  %v21313_v34 = vld [vmem:[#allocation167_spill] sm:$0xff] }
 0x324   : > { %v18260_v44 = vpack.c.bf16 %v21286_v58, %v21285_v39  ;;  %21289 = vst [vmem:[#allocation86_spill] sm:$0xff] %v18264_v33  ;;  %v21293_v16 = vld [vmem:[#allocation57_spill] sm:$0xff]  ;;  %v21296_v39 = vld [vmem:[#allocation220_spill] sm:$0xff]  ;;  %v18285_v33 = vpop.eup %13852  ;;  %v21315_v47 = vld [vmem:[#allocation18_spill] sm:$0xff] }
 0x325   : > { %21284 = vst [vmem:[#allocation196_spill] sm:$0xff] %v18256_v17  ;;  %v18275_v13 = vpack.c.bf16 %v21293_v16, %v21292_v29  ;;  %v21295_v17 = vld [vmem:[#allocation60_spill] sm:$0xff]  ;;  %v21299_v62 = vld [vmem:[#allocation61_spill] sm:$0xff]  ;;  %v21306_v16 = vld [vmem:[#allocation222_spill] sm:$0xff]  ;;  %v18308_v30 = vpop.eup %13854 }
 0x326   : > { %21287 = vst [vmem:[#allocation28_spill] sm:$0xff] %v18260_v44  ;;  %v18279_v58 = vpack.c.bf16 %v21296_v39, %v21295_v17  ;;  %v21298_v44 = vld [vmem:[#allocation19_spill] sm:$0xff]  ;;  %v21303_v29 = vld [vmem:[#allocation157_spill] sm:$0xff]  ;;  %v21308_v43 = vld [vmem:[#allocation224_spill] sm:$0xff] }
 0x327   : > { %21294 = vst [vmem:[#allocation38_spill] sm:$0xff] %v18275_v13  ;;  %v18283_v40 = vpack.c.bf16 %v21299_v62, %v21298_v44  ;;  %v12955_v17 = vld [vmem:[%s20297_s3 + $0x6ec] ss:$16 sps:$4 sm:$0xff]   ;;  %v3326_v62 = vmul.f32 0.5, %v13845_v42  ;;  %v12953_v21 = vld [vmem:[%s20297_s3 + $0x6e8] ss:$16 sps:$4 sm:$0xff]  }
 0x328   : > { %21297 = vst [vmem:[#allocation198_spill] sm:$0xff] %v18279_v58  ;;  %v21302_v44 = vld [vmem:[#allocation203_spill] sm:$0xff]  ;;  %v21305_v18 = vld [vmem:[#allocation161_spill] sm:$0xff]  ;;  %v21312_v56 = vld [vmem:[#allocation164_spill] sm:$0xff]  ;;  %8068 = vmatprep.subr.bf16.mxu1 %v12955_v17 }
 0x329   : > { %21300 = vst [vmem:[#allocation197_spill] sm:$0xff] %v18283_v40  ;;  %v18302_v4 = vpack.c.bf16 %v21303_v29, %v21302_v44  ;;  %v18306_v39 = vpack.c.bf16 %v21306_v16, %v21305_v18  ;;  %v12910_v40 = vld [vmem:[%s20297_s3 + $0x804] ss:$16 sps:$4 sm:$0xff]   ;;  %v2593_v18 = vmul.f32 0.5, %v1853_v5  ;;  %v21311_v42 = vld [vmem:[#allocation205_spill] sm:$0xff]  ;;  %v21316_v61 = vld [vmem:[#allocation67_spill] sm:$0xff]  ;;  %8069 = vmatpush1.bf16.msra.mxu1 %v12953_v21 }
 0x32a   : > { %v21309_v44 = vld [vmem:[#allocation168_spill] sm:$0xff]  ;;  %v2048_v16 = vadd.f32 %v21311_v42, %v17031_v59  ;;  %v21317_v5 = vld [vmem:[#allocation169_spill] sm:$0xff]  ;;  %v21320_v50 = vld [vmem:[#allocation175_spill] sm:$0xff]  ;;  %7089 = vmatprep.subr.bf16.mxu0 %v12910_v40 }
 0x32b   : > { %21304 = vst [vmem:[#allocation195_spill] sm:$0xff] %v18302_v4  ;;  %21307 = vst [vmem:[#allocation98_spill] sm:$0xff] %v18306_v39  ;;  %v18321_v29 = vpack.c.bf16 %v21309_v44, %v21308_v43  ;;  %v18331_v39 = vpack.c.bf16 %v21313_v34, %v21312_v56  ;;  %v18335_v4 = vpack.c.bf16 %v21316_v61, %v21315_v47  ;;  %v2595_v43 = vmul.f32 0.5, %v2046_v27  ;;  %v21318_v44 = vld [vmem:[#allocation5_spill] sm:$0xff]  ;;  %v21321_v51 = vld [vmem:[#allocation47_spill] sm:$0xff] }
 0x32c   : > { %v18339_v42 = vpack.c.bf16 %v21318_v44, %v21317_v5  ;;  %v21323_v58 = vld [vmem:[#allocation17_spill] sm:$0xff]  ;;  %v21324_v13 = vld [vmem:[#allocation230_spill] sm:$0xff]  ;;  %v2594_v56 = vmul.f32 0.5, %v1855_v24  ;;  %v21325_v34 = vld [vmem:[#allocation16_spill] sm:$0xff]  ;;  %13860 = vtanh.f32 %v2593_v18 }
 0x32d   : > { %21310 = vst [vmem:[#allocation201_spill] sm:$0xff] %v18321_v29  ;;  %21314 = vst [vmem:[#allocation92_spill] sm:$0xff] %v18331_v39  ;;  %v18343_v29 = vpack.c.bf16 %v21321_v51, %v21320_v50  ;;  %v18347_v48 = vpack.c.bf16 %v21324_v13, %v21323_v58  ;;  %v21326_v39 = vld [vmem:[#allocation148_spill] sm:$0xff]  ;;  %v21328_v17 = vld [vmem:[#allocation22_spill] sm:$0xff]  ;;  %13862 = vtanh.f32 %v2595_v43 }
 0x32e   : > { %21319 = vst [vmem:[#allocation93_spill] sm:$0xff] %v18339_v42  ;;  %v18351_v47 = vpack.c.bf16 %v21326_v39, %v21325_v34  ;;  %v21327_v27 = vld [vmem:[#allocation12_spill] sm:$0xff]  ;;  %v21329_v5 = vld [vmem:[#allocation150_spill] sm:$0xff]  ;;  %v21332_v50 = vld [vmem:[#allocation75_spill] sm:$0xff]  ;;  %v18375_v34 = vpack.c.bf16 %v17994_v60, %v17972_v31  ;;  %13864 = vtanh.f32 %v2594_v56 }
 0x32f   : > { %21322 = vst [vmem:[#allocation95_spill] sm:$0xff] %v18343_v29  ;;  %v18355_v61 = vpack.c.bf16 %v21328_v17, %v21327_v27  ;;  %v21330_v44 = vld [vmem:[#allocation80_spill] sm:$0xff]  ;;  %v21333_v51 = vld [vmem:[#allocation63_spill] sm:$0xff]  ;;  %v21337_v58 = vld [vmem:[#allocation81_spill] sm:$0xff]  ;;  %v2596_v27 = vmul.f32 0.5, %v2048_v16  ;;  %v3339_v16 = vmul.f32 0.5, %v13851_v26 }
 0x330   : > { %v18359_v42 = vpack.c.bf16 %v21330_v44, %v21329_v5  ;;  %v18363_v29 = vpack.c.bf16 %v21333_v51, %v21332_v50  ;;  %v21335_v13 = vld [vmem:[#allocation184_spill] sm:$0xff]  ;;  %v21338_v20 = vld [vmem:[#allocation163_spill] sm:$0xff]  ;;  %21340 = vst [vmem:[#allocation94_spill] sm:$0xff] %v18375_v34  ;;  %v21343_v44 = vld [vmem:[#allocation82_spill] sm:$0xff]  ;;  %v3337_v51 = vmul.f32 0.5, %v18230_v0 }
 0x331   : > { %v18367_v24 = vpack.c.bf16 %v17940_v15, %v21335_v13  ;;  %v18371_v39 = vpack.c.bf16 %v21338_v20, %v21337_v58  ;;  %v21341_v40 = vld [vmem:[#allocation207_spill] sm:$0xff]  ;;  %v21342_v5 = vld [vmem:[#allocation172_spill] sm:$0xff]  ;;  %v3328_v15 = vmul.f32 0.5, %v18211_v36  ;;  %v21347_v21 = vld [vmem:[#allocation29_spill] sm:$0xff]  ;;  %13866 = vtanh.f32 %v2596_v27 }
 0x332   : > { %21331 = vst [vmem:[#allocation100_spill] sm:$0xff] %v18359_v42  ;;  %21334 = vst [vmem:[#allocation107_spill] sm:$0xff] %v18363_v29  ;;  %v1859_v17 = vadd.f32 %v21341_v40, %v20927_v3  ;;  %v18382_v50 = vpack.c.bf16 %v21343_v44, %v21342_v5  ;;  %v21345_v13 = vld [vmem:[#allocation208_spill] sm:$0xff]  ;;  %v21346_v60 = vld [vmem:[#allocation83_spill] sm:$0xff]  ;;  %13868 = vtanh.f32 %v18178_v14  ;;  %v18435_v14 = vadd.f32 0.5, %v3339_v16 }
 0x333   : > { %21336 = vst [vmem:[#allocation15_spill] sm:$0xff] %v18367_v24  ;;  %21339 = vst [vmem:[#allocation108_spill] sm:$0xff] %v18371_v39  ;;  %v2052_v31 = vadd.f32 %v21345_v13, %v20930_v55  ;;  %6816 = vmatmul.mubr.bf16.gmra.mrb[192].mxu0 %v21346_v60  ;;  %v12959_v8 = vld [vmem:[%s20297_s3 + $0x708] ss:$16 sps:$4 sm:$0xff]   ;;  %v12961_v36 = vld [vmem:[%s20297_s3 + $0x70c] ss:$16 sps:$4 sm:$0xff]   ;;  %13870 = vtanh.f32 %v18270_v1 }
 0x334   : > { %21344 = vst [vmem:[#allocation96_spill] sm:$0xff] %v18382_v50  ;;  %6825 = vmatprep.mubr.bf16.mxu0 %v21347_v21  ;;  %v21348_v58 = vld [vmem:[#allocation32_spill] sm:$0xff]  ;;  %v21349_v0 = vld [vmem:[#allocation85_spill] sm:$0xff]  ;;  %v21353_v44 = vld [vmem:[#allocation110_spill] sm:$0xff]  ;;  %8070 = vmatprep.subr.bf16.mxu1 %v12961_v36  ;;  %v18428_v27 = vadd.f32 0.5, %v3328_v15 }
 0x335   : > { %v18398_v18 = vpack.c.bf16 %v21349_v0, %v21348_v58  ;;  %v21350_v20 = vld [vmem:[#allocation84_spill] sm:$0xff]  ;;  %v21351_v40 = vld [vmem:[#allocation9_spill] sm:$0xff]  ;;  %v1863_v13 = vadd.f32 %v21353_v44, %v20927_v3  ;;  %v21355_v43 = vld [vmem:[#allocation6_spill] sm:$0xff]  ;;  %v18416_v58 = vadd.f32 0.5, %v18162_v25  ;;  %v2605_v0 = vmul.f32 0.5, %v1859_v17  ;;  %v13857_v44 = vpop.eup %13856  ;;  %8071 = vmatpush1.bf16.msra.mxu1 %v12959_v8 }
 0x336   : > { %v18402_v5 = vpack.c.bf16 %v21351_v40, %v21350_v20  ;;  %v21354_v26 = vld [vmem:[#allocation76_spill] sm:$0xff]  ;;  %v18409_v50 = vpack.c.bf16 %v18038_v53, %v21355_v43  ;;  %v21356_v34 = vld [vmem:[#allocation166_spill] sm:$0xff]  ;;  %v21360_v40 = vld [vmem:[#allocation77_spill] sm:$0xff]  ;;  %v2607_v53 = vmul.f32 0.5, %v2052_v31  ;;  %v18426_v25 = vadd.f32 0.5, %v3326_v62 }
 0x337   : > { %7934 = vmatmul.mubr.bf16.gmra.mrb[240].mxu1 %v21354_v26  ;;  %v21357_v39 = vld [vmem:[#allocation78_spill] sm:$0xff]  ;;  %v21359_v56 = vld [vmem:[#allocation36_spill] sm:$0xff]  ;;  %v3338_v31 = vmul.f32 0.5, %v18285_v33  ;;  %13872 = vtanh.f32 %v2605_v0  ;;  %v21364_v62 = vld [vmem:[#allocation211_spill] sm:$0xff] }
 0x338   : > { %21352 = vst [vmem:[#allocation97_spill] sm:$0xff] %v18402_v5  ;;  %v18413_v24 = vpack.c.bf16 %v21357_v39, %v21356_v34  ;;  %v2056_v20 = vadd.f32 %v21359_v56, %v20930_v55  ;;  %7943 = vmatprep.mubr.bf16.mxu1 %v21360_v40  ;;  %v21361_v26 = vld [vmem:[#allocation210_spill] sm:$0xff]  ;;  %v21363_v17 = vld [vmem:[#allocation112_spill] sm:$0xff]  ;;  %v18433_v56 = vadd.f32 0.5, %v3337_v51  ;;  %v2617_v40 = vmul.f32 0.5, %v1863_v13  ;;  %v13859_v51 = vpop.eup %13858  ;;  %v21367_v0 = vld [vmem:[#allocation185_spill] sm:$0xff] }
 0x339   : > { %v1861_v43 = vadd.f32 %v21361_v26, %v17060_v19  ;;  %v21362_v39 = vld [vmem:[#allocation146_spill] sm:$0xff]  ;;  %v2058_v36 = vadd.f32 %v21363_v17, %v17031_v59  ;;  %v3340_v26 = vmul.f32 0.5, %v18308_v30  ;;  %v2054_v8 = vadd.f32 %v21364_v62, %v17031_v59  ;;  %v12965_v33 = vld [vmem:[%s20297_s3 + $0x728] ss:$16 sps:$4 sm:$0xff]   ;;  %v21370_v62 = vld [vmem:[#allocation64_spill] sm:$0xff] }
 0x33a   : > { %21358 = vst [vmem:[#allocation99_spill] sm:$0xff] %v18413_v24  ;;  %v1865_v34 = vadd.f32 %v21362_v39, %v17060_v19  ;;  %v2619_v15 = vmul.f32 0.5, %v2056_v20  ;;  %13874 = vtanh.f32 %v2607_v53  ;;  %v21365_v5 = vld [vmem:[#allocation114_spill] sm:$0xff]  ;;  %v12967_v20 = vld [vmem:[%s20297_s3 + $0x72c] ss:$16 sps:$4 sm:$0xff]   ;;  %v18459_v53 = vpack.c.bf16 %v18097_v37, %v18066_v23 }
 0x33b   : > { %v2606_v39 = vmul.f32 0.5, %v1861_v43  ;;  %v1869_v17 = vadd.f32 %v21365_v5, %v20927_v3  ;;  %6826 = vmatmul.mubr.bf16.gmra.mrb[196].mxu0 %v18049_v52  ;;  %v2620_v16 = vmul.f32 0.5, %v2058_v36  ;;  %v21366_v30 = vld [vmem:[#allocation26_spill] sm:$0xff]  ;;  %v18455_v5 = vpack.c.bf16 %v18088_v41, %v18064_v57  ;;  %v13861_v43 = vpop.eup %13860  ;;  %8072 = vmatprep.subr.bf16.mxu1 %v12967_v20 }
 0x33c   : > { %v2618_v1 = vmul.f32 0.5, %v1865_v34  ;;  %v2062_v13 = vadd.f32 %v21366_v30, %v20930_v55  ;;  %6835 = vmatprep.mubr.bf16.mxu0 %v21367_v0  ;;  %21368 = vst [vmem:[#allocation106_spill] sm:$0xff] %v18459_v53  ;;  %13876 = vtanh.f32 %v2617_v40  ;;  %v21369_v34 = vld [vmem:[#allocation117_spill] sm:$0xff]  ;;  %v18466_v30 = vpack.c.bf16 %v18108_v28, %v18072_v6  ;;  %v13863_v57 = vpop.eup %13862  ;;  %v21372_v23 = vld [vmem:[#allocation214_spill] sm:$0xff]  ;;  %8073 = vmatpush1.bf16.msra.mxu1 %v12965_v33 }
 0x33d   : > { %v1873_v36 = vadd.f32 %v21369_v34, %v20927_v3  ;;  %v18470_v24 = vpack.c.bf16 %v18123_v12, %v18082_v46  ;;  %v3722_v41 = vadd.f32 0.5, %v3338_v31  ;;  %v2608_v29 = vmul.f32 0.5, %v2054_v8  ;;  %v13865_v3 = vpop.eup %13864  ;;  %v21373_v6 = vld [vmem:[#allocation118_spill] sm:$0xff]  ;;  %v21374_v8 = vld [vmem:[#allocation119_spill] sm:$0xff] }
 0x33e   : > { %13878 = vtanh.f32 %v2619_v15  ;;  %v2066_v37 = vadd.f32 %v21372_v23, %v20930_v55  ;;  %v3724_v40 = vadd.f32 0.5, %v3340_v26  ;;  %v2629_v34 = vmul.f32 0.5, %v1869_v17  ;;  %v13867_v46 = vpop.eup %13866  ;;  %v21376_v23 = vld [vmem:[#allocation212_spill] sm:$0xff]  ;;  %v21377_v53 = vld [vmem:[#allocation186_spill] sm:$0xff] }
 0x33f   : > { %7944 = vmatmul.mubr.bf16.gmra.mrb[244].mxu1 %v21370_v62  ;;  %21371 = vst [vmem:[#allocation109_spill] sm:$0xff] %v18470_v24  ;;  %13880 = vtanh.f32 %v2618_v1  ;;  %v1875_v28 = vadd.f32 %v21373_v6, %v17060_v19  ;;  %v3349_v12 = vmul.f32 0.5, %v13857_v44  ;;  %v2631_v31 = vmul.f32 0.5, %v2062_v13  ;;  %v13869_v62 = vpop.eup %13868 }
 0x340   : > { %7953 = vmatprep.mubr.bf16.mxu1 %v17902_v32  ;;  %13882 = vtanh.f32 %v2620_v16  ;;  %v2068_v15 = vadd.f32 %v21374_v8, %v17031_v59  ;;  %v3361_v55 = vmul.f32 0.5, %v13861_v43  ;;  %v21375_v32 = vld [vmem:[#allocation116_spill] sm:$0xff]  ;;  %v2641_v26 = vmul.f32 0.5, %v1873_v36  ;;  %v13871_v1 = vpop.eup %13870  ;;  %v21378_v36 = vld [vmem:[#allocation187_spill] sm:$0xff] }
 0x341   : > { %13884 = vtanh.f32 %v2606_v39  ;;  %v1871_v20 = vadd.f32 %v21375_v32, %v17060_v19  ;;  %v3363_v17 = vmul.f32 0.5, %v13863_v57  ;;  %v2064_v33 = vadd.f32 %v21376_v23, %v17031_v59  ;;  %v12971_v39 = vld [vmem:[%s20297_s3 + $0x748] ss:$16 sps:$4 sm:$0xff]   ;;  %v13873_v43 = vpop.eup %13872  ;;  %v12973_v59 = vld [vmem:[%s20297_s3 + $0x74c] ss:$16 sps:$4 sm:$0xff]  }
 0x342   : > { %13886 = vtanh.f32 %v2608_v29  ;;  %v2643_v6 = vmul.f32 0.5, %v2066_v37  ;;  %v3362_v44 = vmul.f32 0.5, %v13865_v3  ;;  %v3364_v16 = vmul.f32 0.5, %v13867_v46  ;;  %8074 = vmatprep.subr.bf16.mxu1 %v12973_v59 }
 0x343   : > { %13888 = vtanh.f32 %v2629_v34  ;;  %v2642_v13 = vmul.f32 0.5, %v1875_v28  ;;  %6836 = vmatmul.mubr.bf16.gmra.mrb[200].mxu0 %v21377_v53  ;;  %v2644_v19 = vmul.f32 0.5, %v2068_v15  ;;  %v18493_v29 = vpack.c.bf16 %v18433_v56, %v18287_v22  ;;  %v14506_v22 = vld [vmem:[%s20296_s2 + $0x8] sm:$0xf]  ;;  %8075 = vmatpush1.bf16.msra.mxu1 %v12971_v39  ;;  %v21384_v39 = vld [vmem:[#allocation188_spill] sm:$0xff] }
 0x344   : > { %13890 = vtanh.f32 %v2631_v31  ;;  %6845 = vmatprep.mubr.bf16.mxu0 %v21378_v36  ;;  %v18497_v57 = vpack.c.bf16 %v18435_v14, %v18416_v58  ;;  %v13875_v37 = vpop.eup %13874  ;;  %v2630_v3 = vmul.f32 0.5, %v1871_v20  ;;  %v18501_v34 = vpack.c.bf16 %v3722_v41, %v18426_v25  ;;  %v21381_v58 = vld [vmem:[#allocation111_spill] sm:$0xff] }
 0x345   : > { %13892 = vtanh.f32 %v2641_v26  ;;  %v18504_v28 = vpack.c.bf16 %v3724_v40, %v18428_v27  ;;  %v3351_v46 = vmul.f32 0.5, %v13859_v51  ;;  %v2632_v31 = vmul.f32 0.5, %v2064_v33  ;;  %v21382_v40 = vld [vmem:[#allocation7_spill] sm:$0xff] }
 0x346   : > { %21379 = vst [vmem:[#allocation199_spill] sm:$0xff] %v18497_v57  ;;  %13894 = vtanh.f32 %v2643_v6  ;;  %v18510_v56 = vrot.slane %v14506_v22, %v21381_v58  ;;  %v3350_v14 = vmul.f32 0.5, %v13869_v62  ;;  %v3352_v25 = vmul.f32 0.5, %v13871_v1  ;;  %v21383_v62 = vld [vmem:[#allocation54_spill] sm:$0xff] }
 0x347   : > { %7954 = vmatmul.mubr.bf16.gmra.mrb[248].mxu1 %v17917_v38  ;;  %21380 = vst [vmem:[#allocation213_spill] sm:$0xff] %v18504_v28  ;;  %v13877_v38 = vpop.eup %13876  ;;  %13896 = vtanh.f32 %v2642_v13  ;;  %v3745_v41 = vadd.f32 0.5, %v3361_v55  ;;  %v3747_v51 = vadd.f32 0.5, %v3363_v17  ;;  %v3746_v32 = vadd.f32 0.5, %v3362_v44  ;;  %v12977_v44 = vld [vmem:[%s20297_s3 + $0x768] ss:$16 sps:$4 sm:$0xff]  }
 0x348   : > { %7963 = vmatprep.mubr.bf16.mxu1 %v17924_v35  ;;  %v13879_v27 = vpop.eup %13878  ;;  %13898 = vtanh.f32 %v2644_v19  ;;  %v2111_v8 = vadd.f32 %v21382_v40, %v18510_v56  ;;  %v3748_v20 = vadd.f32 0.5, %v3364_v16  ;;  %v3733_v23 = vadd.f32 0.5, %v3349_v12  ;;  %v21385_v12 = vld [vmem:[#allocation190_spill] sm:$0xff] }
 0x349   : > { %v13881_v15 = vpop.eup %13880  ;;  %13900 = vtanh.f32 %v2630_v3  ;;  %v3735_v35 = vadd.f32 0.5, %v3351_v46  ;;  %v2107_v1 = vadd.f32 %v21383_v62, %v18510_v56  ;;  %v3734_v6 = vadd.f32 0.5, %v3350_v14  ;;  %v12979_v3 = vld [vmem:[%s20297_s3 + $0x76c] ss:$16 sps:$4 sm:$0xff]  }
 0x34a   : > { %v13883_v26 = vpop.eup %13882  ;;  %13902 = vtanh.f32 %v2632_v31  ;;  %v3736_v13 = vadd.f32 0.5, %v3352_v25  ;;  %v3373_v55 = vmul.f32 0.5, %v13873_v43  ;;  %v3385_v17 = vmul.f32 0.5, %v13877_v38  ;;  %8076 = vmatprep.subr.bf16.mxu1 %v12979_v3 }
 0x34b   : > { %v13885_v33 = vpop.eup %13884  ;;  %6846 = vmatmul.mubr.bf16.gmra.mrb[204].mxu0 %v21384_v39  ;;  %v3387_v19 = vmul.f32 0.5, %v13879_v27  ;;  %v2286_v59 = vmul.f32 0.5, %v2111_v8  ;;  %v18525_v46 = vpack.c.bf16 %v3745_v41, %v3733_v23  ;;  %v18527_v31 = vpack.c.bf16 %v3747_v51, %v3735_v35  ;;  %v21388_v51 = vld [vmem:[#allocation206_spill] sm:$0xff]  ;;  %v21389_v35 = vld [vmem:[#allocation128_spill] sm:$0xff]  ;;  %8077 = vmatpush1.bf16.msra.mxu1 %v12977_v44  ;;  %v21392_v44 = vld [vmem:[#allocation127_spill] sm:$0xff] }
 0x34c   : > { %v13887_v16 = vpop.eup %13886  ;;  %6855 = vmatprep.mubr.bf16.mxu0 %v21385_v12  ;;  %v3386_v22 = vmul.f32 0.5, %v13881_v15  ;;  %v3388_v38 = vmul.f32 0.5, %v13883_v26  ;;  %v18530_v14 = vpack.c.bf16 %v3746_v32, %v3734_v6  ;;  %v18532_v25 = vpack.c.bf16 %v3748_v20, %v3736_v13  ;;  %v21390_v32 = vld [vmem:[#allocation129_spill] sm:$0xff] }
 0x34d   : > { %21386 = vst [vmem:[#allocation217_spill] sm:$0xff] %v18527_v31  ;;  %v13889_v43 = vpop.eup %13888  ;;  %v3375_v40 = vmul.f32 0.5, %v13875_v37  ;;  %v3374_v8 = vmul.f32 0.5, %v13885_v33  ;;  %v2274_v62 = vmul.f32 0.5, %v2107_v1  ;;  %v3376_v23 = vmul.f32 0.5, %v13887_v16 }
 0x34e   : > { %21387 = vst [vmem:[#allocation34_spill] sm:$0xff] %v18532_v25  ;;  %v13891_v27 = vpop.eup %13890  ;;  %v2119_v58 = vadd.f32 %v21389_v35, %v21388_v51  ;;  %v3769_v26 = vadd.f32 0.5, %v3385_v17  ;;  %13904 = vtanh.f32 %v2286_v59  ;;  %v2121_v20 = vadd.f32 %v21390_v32, %v18510_v56  ;;  %v21393_v32 = vld [vmem:[#allocation71_spill] sm:$0xff] }
 0x34f   : > { %7964 = vmatmul.mubr.bf16.gmra.mrb[252].mxu1 %v17954_v49  ;;  %v13893_v41 = vpop.eup %13892  ;;  %v3771_v49 = vadd.f32 0.5, %v3387_v19  ;;  %v3757_v37 = vadd.f32 0.5, %v3373_v55  ;;  %v3770_v33 = vadd.f32 0.5, %v3386_v22  ;;  %v3772_v1 = vadd.f32 0.5, %v3388_v38  ;;  %v12983_v55 = vld [vmem:[%s20297_s3 + $0x788] ss:$16 sps:$4 sm:$0xff]  }
 0x350   : > { %7973 = vmatprep.mubr.bf16.mxu1 %v17958_v45  ;;  %v13895_v15 = vpop.eup %13894  ;;  %v21391_v45 = vld [vmem:[#allocation124_spill] sm:$0xff]  ;;  %v3759_v16 = vadd.f32 0.5, %v3375_v40  ;;  %v3758_v31 = vadd.f32 0.5, %v3374_v8  ;;  %13906 = vtanh.f32 %v2274_v62  ;;  %v2117_v35 = vadd.f32 %v21392_v44, %v18510_v56  ;;  %v12985_v8 = vld [vmem:[%s20297_s3 + $0x78c] ss:$16 sps:$4 sm:$0xff]  }
 0x351   : > { %v13897_v6 = vpop.eup %13896  ;;  %v2115_v13 = vadd.f32 %v21391_v45, %v21388_v51  ;;  %v3760_v19 = vadd.f32 0.5, %v3376_v23  ;;  %v3409_v59 = vmul.f32 0.5, %v13893_v41  ;;  %v3411_v25 = vmul.f32 0.5, %v13895_v15  ;;  %v21394_v40 = vld [vmem:[#allocation72_spill] sm:$0xff]  ;;  %8078 = vmatprep.subr.bf16.mxu1 %v12985_v8 }
 0x352   : > { %v13899_v3 = vpop.eup %13898  ;;  %v2309_v57 = vmul.f32 0.5, %v2119_v58  ;;  %v3410_v38 = vmul.f32 0.5, %v13897_v6  ;;  %v2310_v45 = vmul.f32 0.5, %v2121_v20  ;;  %v18551_v62 = vpack.c.bf16 %v3769_v26, %v3757_v37  ;;  %v21395_v26 = vld [vmem:[#allocation135_spill] sm:$0xff]  ;;  %8079 = vmatpush1.bf16.msra.mxu1 %v12983_v55 }
 0x353   : > { %v13901_v17 = vpop.eup %13900  ;;  %6856 = vmatmul.mubr.bf16.gmra.mrb[208].mxu0 %v21393_v32  ;;  %v18553_v41 = vpack.c.bf16 %v3771_v49, %v3759_v16  ;;  %v3412_v58 = vmul.f32 0.5, %v13899_v3  ;;  %v2297_v23 = vmul.f32 0.5, %v2115_v13  ;;  %v18556_v15 = vpack.c.bf16 %v3770_v33, %v3758_v31  ;;  %v12989_v55 = vld [vmem:[%s20297_s3 + $0x7a8] ss:$16 sps:$4 sm:$0xff]  }
 0x354   : > { %v13903_v22 = vpop.eup %13902  ;;  %6865 = vmatprep.mubr.bf16.mxu0 %v21394_v40  ;;  %v18558_v44 = vpack.c.bf16 %v3772_v1, %v3760_v19  ;;  %v3397_v6 = vmul.f32 0.5, %v13889_v43  ;;  %v3399_v20 = vmul.f32 0.5, %v13891_v27  ;;  %v2298_v28 = vmul.f32 0.5, %v2117_v35  ;;  %v21397_v27 = vld [vmem:[#allocation130_spill] sm:$0xff] }
 0x355   : > { %v3398_v24 = vmul.f32 0.5, %v13901_v17  ;;  %v3400_v42 = vmul.f32 0.5, %v13903_v22  ;;  %13908 = vtanh.f32 %v2309_v57  ;;  %v2129_v49 = vadd.f32 %v21395_v26, %v21388_v51  ;;  %v21398_v57 = vld [vmem:[#allocation131_spill] sm:$0xff] }
 0x356   : > { %v3793_v37 = vadd.f32 0.5, %v3409_v59  ;;  %v3795_v13 = vadd.f32 0.5, %v3411_v25  ;;  %13910 = vtanh.f32 %v2310_v45  ;;  %v3794_v33 = vadd.f32 0.5, %v3410_v38  ;;  %v21399_v59 = vld [vmem:[#allocation191_spill] sm:$0xff]  ;;  %v21400_v45 = vld [vmem:[#allocation180_spill] sm:$0xff] }
 0x357   : > { %7974 = vmatmul.mubr.bf16.gmra.mrb[0].mxu1 %v21346_v60  ;;  %v21396_v60 = vld [vmem:[#allocation136_spill] sm:$0xff]  ;;  %v3796_v43 = vadd.f32 0.5, %v3412_v58  ;;  %13912 = vtanh.f32 %v2297_v23  ;;  %v3781_v3 = vadd.f32 0.5, %v3397_v6  ;;  %v3783_v16 = vadd.f32 0.5, %v3399_v20 }
 0x358   : > { %7983 = vmatprep.mubr.bf16.mxu1 %v21347_v21  ;;  %v2131_v31 = vadd.f32 %v21396_v60, %v18510_v56  ;;  %v2125_v21 = vadd.f32 %v21397_v27, %v21388_v51  ;;  %v13905_v1 = vpop.eup %13904  ;;  %13914 = vtanh.f32 %v2298_v28  ;;  %v2127_v35 = vadd.f32 %v21398_v57, %v18510_v56  ;;  %v12991_v28 = vld [vmem:[%s20297_s3 + $0x7ac] ss:$16 sps:$4 sm:$0xff]   ;;  %v12995_v57 = vld [vmem:[%s20297_s3 + $0x7c8] ss:$16 sps:$4 sm:$0xff]  }
 0x359   : > { %v3782_v17 = vadd.f32 0.5, %v3398_v24  ;;  %v3784_v19 = vadd.f32 0.5, %v3400_v42  ;;  %v2333_v25 = vmul.f32 0.5, %v2129_v49  ;;  %v18577_v8 = vpack.c.bf16 %v3793_v37, %v3781_v3  ;;  %8080 = vmatprep.subr.bf16.mxu1 %v12991_v28  ;;  %v21401_v49 = vld [vmem:[#allocation24_spill] sm:$0xff] }
 0x35a   : > { %v13907_v22 = vpop.eup %13906  ;;  %v2334_v38 = vmul.f32 0.5, %v2131_v31  ;;  %v18579_v58 = vpack.c.bf16 %v3795_v13, %v3783_v16  ;;  %v3054_v42 = vmul.f32 0.5, %v13905_v1  ;;  %v2321_v24 = vmul.f32 0.5, %v2125_v21  ;;  %8081 = vmatpush1.bf16.msra.mxu1 %v12989_v55  ;;  %v21402_v13 = vld [vmem:[#allocation70_spill] sm:$0xff]  ;;  %v12997_v55 = vld [vmem:[%s20297_s3 + $0x7cc] ss:$16 sps:$4 sm:$0xff]  }
 0x35b   : > { %6866 = vmatmul.mubr.bf16.gmra.mrb[212].mxu0 %v21399_v59  ;;  %v18582_v23 = vpack.c.bf16 %v3794_v33, %v3782_v17  ;;  %v18584_v6 = vpack.c.bf16 %v3796_v43, %v3784_v19  ;;  %v2322_v20 = vmul.f32 0.5, %v2127_v35  ;;  %v3042_v26 = vmul.f32 0.5, %v13907_v22  ;;  %v21403_v33 = vld [vmem:[#allocation41_spill] sm:$0xff]  ;;  %8082 = vmatprep.subr.bf16.mxu1 %v12997_v55 }
 0x35c   : > { %6875 = vmatprep.mubr.bf16.mxu0 %v21400_v45  ;;  %13916 = vtanh.f32 %v2333_v25  ;;  %v2139_v37 = vadd.f32 %v21401_v49, %v21388_v51  ;;  %v2141_v60 = vadd.f32 %v21402_v13, %v18510_v56  ;;  %v2135_v43 = vadd.f32 %v21403_v33, %v21388_v51  ;;  %v21405_v25 = vld [vmem:[#allocation182_spill] sm:$0xff]  ;;  %v21407_v13 = vld [vmem:[#allocation141_spill] sm:$0xff] }
 0x35d   : > { %13918 = vtanh.f32 %v2334_v38  ;;  %v3426_v3 = vadd.f32 0.5, %v3042_v26  ;;  %v21406_v26 = vld [vmem:[#allocation48_spill] sm:$0xff] }
 0x35e   : > { %13920 = vtanh.f32 %v2321_v24  ;;  %v2357_v16 = vmul.f32 0.5, %v2139_v37  ;;  %v2358_v19 = vmul.f32 0.5, %v2141_v60  ;;  %v2345_v38 = vmul.f32 0.5, %v2135_v43  ;;  %8083 = vmatpush1.bf16.msra.mxu1 %v12995_v57 }
 0x35f   : > { %7984 = vmatmul.mubr.bf16.gmra.mrb[4].mxu1 %v18049_v52  ;;  %v13909_v31 = vpop.eup %13908  ;;  %v3438_v52 = vadd.f32 0.5, %v3054_v42  ;;  %13922 = vtanh.f32 %v2322_v20  ;;  %v2149_v49 = vadd.f32 %v21406_v26, %v21388_v51  ;;  %v2151_v60 = vadd.f32 %v21407_v13, %v18510_v56 }
 0x360   : > { %7993 = vmatprep.mubr.bf16.mxu1 %v21367_v0  ;;  %v13911_v27 = vpop.eup %13910  ;;  %v21404_v0 = vld [vmem:[#allocation35_spill] sm:$0xff]  ;;  %v3077_v17 = vmul.f32 0.5, %v13909_v31  ;;  %13924 = vtanh.f32 %v2357_v16 }
 0x361   : > { %v2137_v21 = vadd.f32 %v21404_v0, %v18510_v56  ;;  %v13913_v1 = vpop.eup %13912  ;;  %v3078_v22 = vmul.f32 0.5, %v13911_v27  ;;  %v18604_v28 = vpack.c.bf16 %v3438_v52, %v3426_v3  ;;  %13926 = vtanh.f32 %v2358_v19  ;;  %v21408_v52 = vld [vmem:[#allocation138_spill] sm:$0xff]  ;;  %v21409_v27 = vld [vmem:[#allocation139_spill] sm:$0xff] }
 0x362   : > { %v13915_v35 = vpop.eup %13914  ;;  %v3065_v42 = vmul.f32 0.5, %v13913_v1  ;;  %v3461_v37 = vadd.f32 0.5, %v3077_v17  ;;  %13928 = vtanh.f32 %v2345_v38  ;;  %v2145_v33 = vadd.f32 %v21408_v52, %v21388_v51  ;;  %v13001_v16 = vld [vmem:[%s20297_s3 + $0x7e8] ss:$16 sps:$4 sm:$0xff]   ;;  %v13003_v19 = vld [vmem:[%s20297_s3 + $0x7ec] ss:$16 sps:$4 sm:$0xff]  }
 0x363   : > { %6876 = vmatmul.mubr.bf16.gmra.mrb[216].mxu0 %v18156_v9  ;;  %v2346_v24 = vmul.f32 0.5, %v2137_v21  ;;  %v3066_v20 = vmul.f32 0.5, %v13915_v35  ;;  %v2147_v0 = vadd.f32 %v21409_v27, %v18510_v56  ;;  %v2381_v3 = vmul.f32 0.5, %v2149_v49  ;;  %8084 = vmatprep.subr.bf16.mxu1 %v13003_v19  ;;  %v21410_v49 = vld [vmem:[#allocation74_spill] sm:$0xff] }
 0x364   : > { %6885 = vmatprep.mubr.bf16.mxu0 %v21405_v25  ;;  %v2382_v17 = vmul.f32 0.5, %v2151_v60  ;;  %v2369_v38 = vmul.f32 0.5, %v2145_v33  ;;  %v2159_v13 = vadd.f32 %v21410_v49, %v21388_v51  ;;  %8085 = vmatpush1.bf16.msra.mxu1 %v13001_v16  ;;  %v12922_v49 = vld [vmem:[%s20297_s3 + $0x844] ss:$16 sps:$4 sm:$0xff]  }
 0x365   : > { %13930 = vtanh.f32 %v2346_v24  ;;  %v3450_v1 = vadd.f32 0.5, %v3066_v20  ;;  %v2370_v20 = vmul.f32 0.5, %v2147_v0  ;;  %v21413_v0 = vld [vmem:[#allocation144_spill] sm:$0xff] }
 0x366   : > { %v13917_v31 = vpop.eup %13916  ;;  %13932 = vtanh.f32 %v2381_v3  ;;  %v2405_v16 = vmul.f32 0.5, %v2159_v13 }
 0x367   : > { %7994 = vmatmul.mubr.bf16.gmra.mrb[8].mxu1 %v21377_v53  ;;  %v3462_v53 = vadd.f32 0.5, %v3078_v22  ;;  %v13919_v43 = vpop.eup %13918  ;;  %v3101_v35 = vmul.f32 0.5, %v13917_v31  ;;  %13934 = vtanh.f32 %v2382_v17 }
 0x368   : > { %8003 = vmatprep.mubr.bf16.mxu1 %v21378_v36  ;;  %v3449_v36 = vadd.f32 0.5, %v3065_v42  ;;  %v13921_v21 = vpop.eup %13920  ;;  %v3102_v22 = vmul.f32 0.5, %v13919_v43  ;;  %13936 = vtanh.f32 %v2369_v38  ;;  %v12916_v43 = vld [vmem:[%s20297_s3 + $0x824] ss:$16 sps:$4 sm:$0xff]   ;;  %v13009_v38 = vld [vmem:[%s20297_s3 + $0x80c] ss:$16 sps:$4 sm:$0xff]  }
 0x369   : > { %v13923_v57 = vpop.eup %13922  ;;  %v18626_v42 = vpack.c.bf16 %v3462_v53, %v3450_v1  ;;  %v3089_v24 = vmul.f32 0.5, %v13921_v21  ;;  %v3485_v60 = vadd.f32 0.5, %v3101_v35  ;;  %13938 = vtanh.f32 %v2370_v20  ;;  %8247 = vmatprep.subr.bf16.mxu1 %v13009_v38 }
 0x36a   : > { %v18623_v55 = vpack.c.bf16 %v3461_v37, %v3449_v36  ;;  %v3090_v26 = vmul.f32 0.5, %v13923_v57  ;;  %v21411_v37 = vld [vmem:[#allocation14_spill] sm:$0xff]  ;;  %v13925_v53 = vpop.eup %13924  ;;  %v3486_v52 = vadd.f32 0.5, %v3102_v22  ;;  %v2157_v21 = vadd.f32 %v21413_v0, %v18510_v56  ;;  %v21414_v57 = vld [vmem:[#allocation159_spill] sm:$0xff] }
 0x36b   : > { %6886 = vmatmul.mubr.bf16.gmra.mrb[220].mxu0 %v18171_v54  ;;  %v2161_v31 = vadd.f32 %v21411_v37, %v18510_v56  ;;  %v13927_v36 = vpop.eup %13926  ;;  %v3473_v27 = vadd.f32 0.5, %v3089_v24  ;;  %v3125_v17 = vmul.f32 0.5, %v13925_v53  ;;  %v12914_v22 = vld [vmem:[%s20297_s3 + $0x820] ss:$16 sps:$4 sm:$0xff]   ;;  %13940 = vtanh.f32 %v2405_v16  ;;  %v12928_v0 = vld [vmem:[%s20297_s3 + $0x864] ss:$16 sps:$4 sm:$0xff]  }
 0x36c   : > { %6928 = vmatprep.mubr.bf16.mxu0 %v18175_v10  ;;  %v13929_v1 = vpop.eup %13928  ;;  %v3474_v3 = vadd.f32 0.5, %v3090_v26  ;;  %v3126_v20 = vmul.f32 0.5, %v13927_v36 }
 0x36d   : > { %v2406_v19 = vmul.f32 0.5, %v2161_v31  ;;  %v18651_v24 = vpack.c.bf16 %v3485_v60, %v3473_v27  ;;  %v3113_v37 = vmul.f32 0.5, %v13929_v1  ;;  %v2394_v31 = vmul.f32 0.5, %v2157_v21  ;;  %v21415_v60 = vld [vmem:[#allocation179_spill] sm:$0xff] }
 0x36e   : > { %v18657_v13 = vpack.c.bf16 %v3486_v52, %v3474_v3  ;;  %v2169_v53 = vadd.f32 %v21415_v60, %v21388_v51  ;;  %v3510_v36 = vadd.f32 0.5, %v3126_v20  ;;  %v21418_v3 = vld [vmem:[#allocation53_spill] sm:$0xff] }
 0x36f   : > { %8004 = vmatmul.mubr.bf16.gmra.mrb[12].mxu1 %v21384_v39  ;;  %v12908_v39 = vld [vmem:[%s20297_s3 + $0x800] ss:$16 sps:$4 sm:$0xff]   ;;  %v13931_v35 = vpop.eup %13930  ;;  %13942 = vtanh.f32 %v2406_v19  ;;  %v3497_v1 = vadd.f32 0.5, %v3113_v37  ;;  %v2167_v16 = vadd.f32 %v21418_v3, %v18510_v56  ;;  %v12940_v3 = vld [vmem:[%s20297_s3 + $0x8a4] ss:$16 sps:$4 sm:$0xff]  }
 0x370   : > { %8013 = vmatprep.mubr.bf16.mxu1 %v21385_v12  ;;  %v21412_v12 = vld [vmem:[#allocation143_spill] sm:$0xff]  ;;  %v13933_v52 = vpop.eup %13932  ;;  %v2429_v19 = vmul.f32 0.5, %v2169_v53 }
 0x371   : > { %v2155_v33 = vadd.f32 %v21412_v12, %v21388_v51  ;;  %v3509_v12 = vadd.f32 0.5, %v3125_v17  ;;  %v13935_v21 = vpop.eup %13934  ;;  %v3149_v38 = vmul.f32 0.5, %v13933_v52 }
 0x373   : > { %6929 = vmatmul.mubr.bf16.vlgmr.msra.gmra.mrb[160].mxu0 %v21414_v57  ;;  %v2393_v26 = vmul.f32 0.5, %v2155_v33  ;;  %v21416_v33 = vld [vmem:[#allocation154_spill] sm:$0xff]  ;;  %v18679_v37 = vpack.c.bf16 %v3509_v12, %v3497_v1  ;;  %v21421_v12 = vld [vmem:[#allocation13_spill] sm:$0xff] }
 0x374   : > { %6938 = vmatprep.mubr.bf16.mxu0 %v18184_v2  ;;  %7090 = vmatpush1.bf16.msra.mxu0 %v12908_v39  ;;  %v3114_v39 = vmul.f32 0.5, %v13931_v35  ;;  %v13937_v35 = vpop.eup %13936  ;;  %v2179_v52 = vadd.f32 %v21421_v12, %v21388_v51 }
 0x375   : > { %7091 = vmatprep.subr.bf16.mxu0 %v12916_v43  ;;  %v2171_v43 = vadd.f32 %v21416_v33, %v18510_v56  ;;  %13944 = vtanh.f32 %v2393_v26  ;;  %v21419_v26 = vld [vmem:[#allocation89_spill] sm:$0xff]  ;;  %21420 = vst [vmem:[#allocation216_spill] sm:$0xff] %v18679_v37  ;;  %v3137_v33 = vmul.f32 0.5, %v13937_v35 }
 0x376   : > { %13946 = vtanh.f32 %v2394_v31  ;;  %v3498_v17 = vadd.f32 0.5, %v3114_v39  ;;  %v3150_v31 = vmul.f32 0.5, %v13935_v21  ;;  %v12934_v39 = vld [vmem:[%s20297_s3 + $0x884] ss:$16 sps:$4 sm:$0xff]  }
 0x377   : > { %8014 = vmatmul.mubr.bf16.gmra.mrb[16].mxu1 %v21393_v32  ;;  %v12920_v32 = vld [vmem:[%s20297_s3 + $0x840] ss:$16 sps:$4 sm:$0xff]   ;;  %v2430_v20 = vmul.f32 0.5, %v2171_v43  ;;  %v2418_v43 = vmul.f32 0.5, %v2167_v16  ;;  %13948 = vtanh.f32 %v2429_v19  ;;  %v3521_v35 = vadd.f32 0.5, %v3137_v33 }
 0x378   : > { %8023 = vmatprep.mubr.bf16.mxu1 %v21394_v40  ;;  %7092 = vmatpush1.bf16.msra.mxu0 %v12914_v22  ;;  %v21417_v40 = vld [vmem:[#allocation151_spill] sm:$0xff]  ;;  %v13939_v22 = vpop.eup %13938  ;;  %v18685_v53 = vpack.c.bf16 %v3510_v36, %v3498_v17  ;;  %v3534_v21 = vadd.f32 0.5, %v3150_v31 }
 0x379   : > { %v2165_v27 = vadd.f32 %v21417_v40, %v21388_v51  ;;  %7093 = vmatprep.subr.bf16.mxu0 %v12922_v49  ;;  %v12926_v49 = vld [vmem:[%s20297_s3 + $0x860] ss:$16 sps:$4 sm:$0xff]   ;;  %v3533_v40 = vadd.f32 0.5, %v3149_v38  ;;  %13950 = vtanh.f32 %v2430_v20  ;;  %v13941_v36 = vpop.eup %13940  ;;  %v21424_v17 = vld [vmem:[#allocation11_spill] sm:$0xff]  ;;  %v2453_v20 = vmul.f32 0.5, %v2179_v52 }
 0x37a   : > { %v13943_v16 = vpop.eup %13942  ;;  %v2177_v19 = vadd.f32 %v21424_v17, %v18510_v56 }
 0x37b   : > { %6939 = vmatmul.mubr.bf16.gmra.mrb[164].mxu0 %v18188_v11  ;;  %v2417_v60 = vmul.f32 0.5, %v2165_v27  ;;  %v21422_v27 = vld [vmem:[#allocation158_spill] sm:$0xff]  ;;  %v18707_v33 = vpack.c.bf16 %v3533_v40, %v3521_v35  ;;  %v21429_v40 = vld [vmem:[#allocation59_spill] sm:$0xff] }
 0x37c   : > { %6948 = vmatprep.mubr.bf16.mxu0 %v21419_v26  ;;  %7094 = vmatpush1.bf16.msra.mxu0 %v12920_v32  ;;  %v3138_v32 = vmul.f32 0.5, %v13939_v22  ;;  %v2189_v35 = vadd.f32 %v21429_v40, %v21388_v51 }
 0x37d   : > { %7095 = vmatprep.subr.bf16.mxu0 %v12928_v0  ;;  %v2181_v0 = vadd.f32 %v21422_v27, %v18510_v56  ;;  %13952 = vtanh.f32 %v2417_v60  ;;  %v3173_v60 = vmul.f32 0.5, %v13941_v36  ;;  %v21426_v27 = vld [vmem:[#allocation79_spill] sm:$0xff]  ;;  %21427 = vst [vmem:[#allocation122_spill] sm:$0xff] %v18707_v33  ;;  %v2442_v36 = vmul.f32 0.5, %v2177_v19 }
 0x37e   : > { %13954 = vtanh.f32 %v2418_v43  ;;  %v3522_v38 = vadd.f32 0.5, %v3138_v32  ;;  %v3174_v43 = vmul.f32 0.5, %v13943_v16  ;;  %v12946_v32 = vld [vmem:[%s20297_s3 + $0x8c4] ss:$16 sps:$4 sm:$0xff]   ;;  %v2477_v40 = vmul.f32 0.5, %v2189_v35 }
 0x37f   : > { %8024 = vmatmul.mubr.bf16.gmra.mrb[20].mxu1 %v21399_v59  ;;  %v12932_v59 = vld [vmem:[%s20297_s3 + $0x880] ss:$16 sps:$4 sm:$0xff]   ;;  %v13945_v22 = vpop.eup %13944  ;;  %v2454_v12 = vmul.f32 0.5, %v2181_v0  ;;  %13956 = vtanh.f32 %v2453_v20  ;;  %v3557_v16 = vadd.f32 0.5, %v3173_v60 }
 0x380   : > { %8033 = vmatprep.mubr.bf16.mxu1 %v21400_v45  ;;  %7096 = vmatpush1.bf16.msra.mxu0 %v12926_v49  ;;  %v21423_v45 = vld [vmem:[#allocation55_spill] sm:$0xff]  ;;  %v21425_v49 = vld [vmem:[#allocation192_spill] sm:$0xff]  ;;  %v13947_v31 = vpop.eup %13946  ;;  %v18713_v52 = vpack.c.bf16 %v3534_v21, %v3522_v38  ;;  %v3161_v0 = vmul.f32 0.5, %v13945_v22  ;;  %v3558_v17 = vadd.f32 0.5, %v3174_v43 }
 0x381   : > { %v2175_v1 = vadd.f32 %v21423_v45, %v21388_v51  ;;  %7097 = vmatprep.subr.bf16.mxu0 %v12934_v39  ;;  %v12938_v39 = vld [vmem:[%s20297_s3 + $0x8a0] ss:$16 sps:$4 sm:$0xff]   ;;  %13958 = vtanh.f32 %v2454_v12  ;;  %v13949_v21 = vpop.eup %13948  ;;  %v12952_v22 = vld [vmem:[%s20297_s3 + $0x8e4] ss:$16 sps:$4 sm:$0xff]  }
 0x382   : > { %21428 = vst [vmem:[#allocation125_spill] sm:$0xff] %v18713_v52  ;;  %v3545_v20 = vadd.f32 0.5, %v3161_v0 }
 0x383   : > { %6949 = vmatmul.mubr.bf16.gmra.mrb[168].mxu0 %v21425_v49  ;;  %v2441_v45 = vmul.f32 0.5, %v2175_v1  ;;  %v21430_v1 = vld [vmem:[#allocation204_spill] sm:$0xff]  ;;  %v13951_v38 = vpop.eup %13950 }
 0x384   : > { %6958 = vmatprep.mubr.bf16.mxu0 %v21426_v27  ;;  %7098 = vmatpush1.bf16.msra.mxu0 %v12932_v59  ;;  %v3162_v59 = vmul.f32 0.5, %v13947_v31  ;;  %v21432_v31 = vld [vmem:[#allocation200_spill] sm:$0xff]  ;;  %v18735_v0 = vpack.c.bf16 %v3557_v16, %v3545_v20  ;;  %v21437_v16 = vld [vmem:[#allocation223_spill] sm:$0xff] }
 0x385   : > { %7099 = vmatprep.subr.bf16.mxu0 %v12940_v3  ;;  %v2191_v3 = vadd.f32 %v21430_v1, %v18510_v56  ;;  %13960 = vtanh.f32 %v2441_v45  ;;  %v2187_v60 = vadd.f32 %v21432_v31, %v18510_v56  ;;  %v21433_v1 = vld [vmem:[#allocation181_spill] sm:$0xff]  ;;  %v3197_v45 = vmul.f32 0.5, %v13949_v21 }
 0x386   : > { %13962 = vtanh.f32 %v2442_v36  ;;  %21435 = vst [vmem:[#allocation101_spill] sm:$0xff] %v18735_v0  ;;  %v3198_v36 = vmul.f32 0.5, %v13951_v38  ;;  %v2199_v20 = vadd.f32 %v21437_v16, %v21388_v51  ;;  %v21441_v16 = vld [vmem:[#allocation194_spill] sm:$0xff] }
 0x387   : > { %8034 = vmatmul.mubr.bf16.gmra.mrb[24].mxu1 %v18156_v9  ;;  %v12944_v9 = vld [vmem:[%s20297_s3 + $0x8c0] ss:$16 sps:$4 sm:$0xff]   ;;  %v13953_v12 = vpop.eup %13952  ;;  %v2478_v33 = vmul.f32 0.5, %v2191_v3  ;;  %v2466_v21 = vmul.f32 0.5, %v2187_v60  ;;  %13964 = vtanh.f32 %v2477_v40  ;;  %v3581_v38 = vadd.f32 0.5, %v3197_v45  ;;  %v21440_v40 = vld [vmem:[#allocation39_spill] sm:$0xff] }
 0x388   : > { %8043 = vmatprep.mubr.bf16.mxu1 %v21405_v25  ;;  %7100 = vmatpush1.bf16.msra.mxu0 %v12938_v39  ;;  %v21431_v25 = vld [vmem:[#allocation21_spill] sm:$0xff]  ;;  %v3546_v39 = vadd.f32 0.5, %v3162_v59  ;;  %v13955_v43 = vpop.eup %13954  ;;  %v12958_v59 = vld [vmem:[%s20297_s3 + $0x904] ss:$16 sps:$4 sm:$0xff]   ;;  %v3185_v3 = vmul.f32 0.5, %v13953_v12  ;;  %v3582_v31 = vadd.f32 0.5, %v3198_v36 }
 0x389   : > { %v2185_v19 = vadd.f32 %v21431_v25, %v21388_v51  ;;  %7101 = vmatprep.subr.bf16.mxu0 %v12946_v32  ;;  %v21434_v25 = vld [vmem:[#allocation193_spill] sm:$0xff]  ;;  %v12950_v32 = vld [vmem:[%s20297_s3 + $0x8e0] ss:$16 sps:$4 sm:$0xff]   ;;  %13966 = vtanh.f32 %v2478_v33  ;;  %v12964_v12 = vld [vmem:[%s20297_s3 + $0x924] ss:$16 sps:$4 sm:$0xff]   ;;  %v2501_v36 = vmul.f32 0.5, %v2199_v20 }
 0x38a   : > { %v18741_v35 = vpack.c.bf16 %v3558_v17, %v3546_v39  ;;  %v13957_v17 = vpop.eup %13956  ;;  %v3569_v39 = vadd.f32 0.5, %v3185_v3  ;;  %v13007_v45 = vld [vmem:[%s20297_s3 + $0x808] ss:$16 sps:$4 sm:$0xff]  }
 0x38b   : > { %6959 = vmatmul.mubr.bf16.gmra.mrb[172].mxu0 %v21433_v1  ;;  %v2465_v52 = vmul.f32 0.5, %v2185_v19  ;;  %v21438_v19 = vld [vmem:[#allocation209_spill] sm:$0xff]  ;;  %v13959_v33 = vpop.eup %13958 }
 0x38c   : > { %6968 = vmatprep.mubr.bf16.mxu0 %v21434_v25  ;;  %7102 = vmatpush1.bf16.msra.mxu0 %v12944_v9  ;;  %21436 = vst [vmem:[#allocation218_spill] sm:$0xff] %v18741_v35  ;;  %v3186_v9 = vmul.f32 0.5, %v13955_v43  ;;  %v2197_v43 = vadd.f32 %v21440_v40, %v18510_v56  ;;  %v12962_v40 = vld [vmem:[%s20297_s3 + $0x920] ss:$16 sps:$4 sm:$0xff]   ;;  %v18769_v0 = vpack.c.bf16 %v3581_v38, %v3569_v39  ;;  %v12970_v35 = vld [vmem:[%s20297_s3 + $0x944] ss:$16 sps:$4 sm:$0xff]  }
 0x38d   : > { %7103 = vmatprep.subr.bf16.mxu0 %v12952_v22  ;;  %v2201_v22 = vadd.f32 %v21438_v19, %v18510_v56  ;;  %13968 = vtanh.f32 %v2465_v52  ;;  %v13013_v38 = vld [vmem:[%s20297_s3 + $0x828] ss:$16 sps:$4 sm:$0xff]   ;;  %v12968_v39 = vld [vmem:[%s20297_s3 + $0x940] ss:$16 sps:$4 sm:$0xff]  }
 0x38e   : > { %13970 = vtanh.f32 %v2466_v21  ;;  %v3570_v52 = vadd.f32 0.5, %v3186_v9  ;;  %v21442_v21 = vld [vmem:[#allocation189_spill] sm:$0xff]  ;;  %21443 = vst [vmem:[#allocation123_spill] sm:$0xff] %v18769_v0  ;;  %v3222_v9 = vmul.f32 0.5, %v13959_v33  ;;  %v2490_v37 = vmul.f32 0.5, %v2197_v43  ;;  %v21450_v0 = vld [vmem:[#allocation90_spill] sm:$0xff] }
 0x38f   : > { %8044 = vmatmul.mubr.bf16.gmra.mrb[28].mxu1 %v18171_v54  ;;  %v12956_v54 = vld [vmem:[%s20297_s3 + $0x900] ss:$16 sps:$4 sm:$0xff]   ;;  %v2502_v3 = vmul.f32 0.5, %v2201_v22  ;;  %13972 = vtanh.f32 %v2501_v36  ;;  %v21446_v33 = vld [vmem:[#allocation165_spill] sm:$0xff]  ;;  %v12976_v36 = vld [vmem:[%s20297_s3 + $0x964] ss:$16 sps:$4 sm:$0xff]  }
 0x390   : > { %8086 = vmatprep.mubr.bf16.mxu1 %v18175_v10  ;;  %7104 = vmatpush1.bf16.msra.mxu0 %v12950_v32  ;;  %v21439_v10 = vld [vmem:[#allocation160_spill] sm:$0xff]  ;;  %v13961_v32 = vpop.eup %13960 }
 0x391   : > { %v2195_v60 = vadd.f32 %v21439_v10, %v21388_v51  ;;  %7105 = vmatprep.subr.bf16.mxu0 %v12958_v59  ;;  %v13015_v59 = vld [vmem:[%s20297_s3 + $0x82c] ss:$16 sps:$4 sm:$0xff]   ;;  %v13963_v19 = vpop.eup %13962  ;;  %v3221_v10 = vmul.f32 0.5, %v13957_v17  ;;  %v18775_v17 = vpack.c.bf16 %v3582_v31, %v3570_v52  ;;  %v3209_v22 = vmul.f32 0.5, %v13961_v32  ;;  %v21447_v32 = vld [vmem:[#allocation62_spill] sm:$0xff] }
 0x392   : > { %13974 = vtanh.f32 %v2502_v3  ;;  %v13965_v43 = vpop.eup %13964  ;;  %v2205_v52 = vadd.f32 %v21447_v32, %v21388_v51 }
 0x393   : > { %6969 = vmatmul.mubr.bf16.gmra.mrb[176].mxu0 %v21441_v16  ;;  %v2489_v20 = vmul.f32 0.5, %v2195_v60  ;;  %21444 = vst [vmem:[#allocation45_spill] sm:$0xff] %v18775_v17  ;;  %v21445_v60 = vld [vmem:[#allocation225_spill] sm:$0xff]  ;;  %v3605_v31 = vadd.f32 0.5, %v3221_v10  ;;  %v21448_v10 = vld [vmem:[#allocation162_spill] sm:$0xff] }
 0x394   : > { %6978 = vmatprep.mubr.bf16.mxu0 %v21442_v21  ;;  %7106 = vmatpush1.bf16.msra.mxu0 %v12956_v54  ;;  %v3210_v54 = vmul.f32 0.5, %v13963_v19  ;;  %v3593_v19 = vadd.f32 0.5, %v3209_v22  ;;  %v2207_v3 = vadd.f32 %v21448_v10, %v18510_v56 }
 0x395   : > { %7107 = vmatprep.subr.bf16.mxu0 %v12964_v12  ;;  %v2209_v12 = vadd.f32 %v21445_v60, %v21388_v51  ;;  %13976 = vtanh.f32 %v2489_v20 }
 0x396   : > { %13978 = vtanh.f32 %v2490_v37  ;;  %v3594_v20 = vadd.f32 0.5, %v3210_v54  ;;  %v3245_v37 = vmul.f32 0.5, %v13965_v43  ;;  %v18809_v10 = vpack.c.bf16 %v3605_v31, %v3593_v19  ;;  %v13025_v31 = vld [vmem:[%s20297_s3 + $0x868] ss:$16 sps:$4 sm:$0xff]   ;;  %v12980_v19 = vld [vmem:[%s20297_s3 + $0x980] ss:$16 sps:$4 sm:$0xff]  }
 0x397   : > { %8087 = vmatmul.mubr.bf16.vlgmr.msra.gmra.mrb[224].mxu1 %v21414_v57  ;;  %v13021_v57 = vld [vmem:[%s20297_s3 + $0x84c] ss:$16 sps:$4 sm:$0xff]   ;;  %v2525_v60 = vmul.f32 0.5, %v2209_v12  ;;  %v2513_v12 = vmul.f32 0.5, %v2205_v52  ;;  %v2514_v17 = vmul.f32 0.5, %v2207_v3  ;;  %v21453_v52 = vld [vmem:[#allocation120_spill] sm:$0xff] }
 0x398   : > { %8096 = vmatprep.mubr.bf16.mxu1 %v18184_v2  ;;  %8248 = vmatpush1.bf16.msra.mxu1 %v13007_v45  ;;  %v2211_v2 = vadd.f32 %v21446_v33, %v18510_v56  ;;  %v3606_v45 = vadd.f32 0.5, %v3222_v9  ;;  %v21449_v33 = vld [vmem:[#allocation87_spill] sm:$0xff]  ;;  %21451 = vst [vmem:[#allocation133_spill] sm:$0xff] %v18809_v10  ;;  %v21458_v10 = vld [vmem:[#allocation196_spill] sm:$0xff] }
 0x399   : > { %8249 = vmatprep.subr.bf16.mxu1 %v13015_v59  ;;  %7108 = vmatpush1.bf16.msra.mxu0 %v12962_v40  ;;  %v13967_v59 = vpop.eup %13966  ;;  %v13019_v40 = vld [vmem:[%s20297_s3 + $0x848] ss:$16 sps:$4 sm:$0xff]   ;;  %13980 = vtanh.f32 %v2525_v60  ;;  %v12988_v60 = vld [vmem:[%s20297_s3 + $0x9a4] ss:$16 sps:$4 sm:$0xff]  }
 0x39a   : > { %7109 = vmatprep.subr.bf16.mxu0 %v12970_v35  ;;  %v13969_v9 = vpop.eup %13968  ;;  %v13027_v35 = vld [vmem:[%s20297_s3 + $0x86c] ss:$16 sps:$4 sm:$0xff]   ;;  %v2526_v32 = vmul.f32 0.5, %v2211_v2  ;;  %v3246_v54 = vmul.f32 0.5, %v13967_v59  ;;  %v18815_v43 = vpack.c.bf16 %v3606_v45, %v3594_v20  ;;  %v3629_v45 = vadd.f32 0.5, %v3245_v37  ;;  %v21454_v59 = vld [vmem:[#allocation66_spill] sm:$0xff] }
 0x39b   : > { %6979 = vmatmul.mubr.bf16.gmra.mrb[180].mxu0 %v21449_v33  ;;  %v13971_v22 = vpop.eup %13970  ;;  %v3233_v2 = vmul.f32 0.5, %v13969_v9  ;;  %v21455_v9 = vld [vmem:[#allocation152_spill] sm:$0xff]  ;;  %v21456_v37 = vld [vmem:[#allocation115_spill] sm:$0xff] }
 0x39c   : > { %8250 = vmatpush1.bf16.msra.mxu1 %v13013_v38  ;;  %6988 = vmatprep.mubr.bf16.mxu0 %v21450_v0  ;;  %v12974_v38 = vld [vmem:[%s20297_s3 + $0x960] ss:$16 sps:$4 sm:$0xff]   ;;  %21452 = vst [vmem:[#allocation2_spill] sm:$0xff] %v18815_v43  ;;  %13982 = vtanh.f32 %v2526_v32  ;;  %v13973_v3 = vpop.eup %13972  ;;  %v2215_v20 = vadd.f32 %v21455_v9, %v21388_v51  ;;  %v2217_v32 = vadd.f32 %v21456_v37, %v18510_v56 }
 0x39d   : > { %8251 = vmatprep.subr.bf16.mxu1 %v13021_v57  ;;  %7110 = vmatpush1.bf16.msra.mxu0 %v12968_v39  ;;  %v12982_v57 = vld [vmem:[%s20297_s3 + $0x984] ss:$16 sps:$4 sm:$0xff]   ;;  %v3234_v39 = vmul.f32 0.5, %v13971_v22  ;;  %13984 = vtanh.f32 %v2513_v12  ;;  %v3617_v22 = vadd.f32 0.5, %v3233_v2 }
 0x39e   : > { %7111 = vmatprep.subr.bf16.mxu0 %v12976_v36  ;;  %v2219_v36 = vadd.f32 %v21453_v52, %v21388_v51  ;;  %13986 = vtanh.f32 %v2514_v17  ;;  %v3269_v17 = vmul.f32 0.5, %v13973_v3  ;;  %v2538_v43 = vmul.f32 0.5, %v2217_v32 }
 0x39f   : > { %8097 = vmatmul.mubr.bf16.gmra.mrb[228].mxu1 %v18188_v11  ;;  %v13033_v11 = vld [vmem:[%s20297_s3 + $0x88c] ss:$16 sps:$4 sm:$0xff]   ;;  %v3618_v12 = vadd.f32 0.5, %v3234_v39  ;;  %v18849_v37 = vpack.c.bf16 %v3629_v45, %v3617_v22  ;;  %v13037_v45 = vld [vmem:[%s20297_s3 + $0x8a8] ss:$16 sps:$4 sm:$0xff]  }
 0x3a0   : > { %8106 = vmatprep.mubr.bf16.mxu1 %v21419_v26  ;;  %8252 = vmatpush1.bf16.msra.mxu1 %v13019_v40  ;;  %v2221_v26 = vadd.f32 %v21454_v59, %v18510_v56  ;;  %v3630_v40 = vadd.f32 0.5, %v3246_v54  ;;  %v2549_v52 = vmul.f32 0.5, %v2219_v36  ;;  %v21457_v59 = vld [vmem:[#allocation91_spill] sm:$0xff]  ;;  %v2537_v36 = vmul.f32 0.5, %v2215_v20  ;;  %v21461_v20 = vld [vmem:[#allocation20_spill] sm:$0xff] }
 0x3a1   : > { %8253 = vmatprep.subr.bf16.mxu1 %v13027_v35  ;;  %7112 = vmatpush1.bf16.msra.mxu0 %v12974_v38  ;;  %v13975_v35 = vpop.eup %13974  ;;  %v13031_v38 = vld [vmem:[%s20297_s3 + $0x888] ss:$16 sps:$4 sm:$0xff]   ;;  %21459 = vst [vmem:[#allocation126_spill] sm:$0xff] %v18849_v37  ;;  %v12992_v22 = vld [vmem:[%s20297_s3 + $0x9c0] ss:$16 sps:$4 sm:$0xff]  }
 0x3a2   : > { %7113 = vmatprep.subr.bf16.mxu0 %v12982_v57  ;;  %v13977_v54 = vpop.eup %13976  ;;  %v13039_v57 = vld [vmem:[%s20297_s3 + $0x8ac] ss:$16 sps:$4 sm:$0xff]   ;;  %v2550_v9 = vmul.f32 0.5, %v2221_v26  ;;  %v3270_v39 = vmul.f32 0.5, %v13975_v35  ;;  %v18855_v3 = vpack.c.bf16 %v3630_v40, %v3618_v12  ;;  %13988 = vtanh.f32 %v2549_v52  ;;  %v21462_v35 = vld [vmem:[#allocation10_spill] sm:$0xff] }
 0x3a3   : > { %6989 = vmatmul.mubr.bf16.gmra.mrb[184].mxu0 %v21457_v59  ;;  %v13979_v2 = vpop.eup %13978  ;;  %v3257_v26 = vmul.f32 0.5, %v13977_v54  ;;  %v3653_v40 = vadd.f32 0.5, %v3269_v17  ;;  %v21463_v54 = vld [vmem:[#allocation113_spill] sm:$0xff]  ;;  %v13000_v52 = vld [vmem:[%s20297_s3 + $0x9e4] ss:$16 sps:$4 sm:$0xff]   ;;  %v21464_v17 = vld [vmem:[#allocation215_spill] sm:$0xff] }
 0x3a4   : > { %8254 = vmatpush1.bf16.msra.mxu1 %v13025_v31  ;;  %6998 = vmatprep.mubr.bf16.mxu0 %v21458_v10  ;;  %v12986_v31 = vld [vmem:[%s20297_s3 + $0x9a0] ss:$16 sps:$4 sm:$0xff]   ;;  %21460 = vst [vmem:[#allocation132_spill] sm:$0xff] %v18855_v3  ;;  %13990 = vtanh.f32 %v2550_v9  ;;  %v13981_v32 = vpop.eup %13980  ;;  %v2225_v12 = vadd.f32 %v21463_v54, %v21388_v51  ;;  %v2227_v9 = vadd.f32 %v21464_v17, %v18510_v56 }
 0x3a5   : > { %8255 = vmatprep.subr.bf16.mxu1 %v13033_v11  ;;  %7114 = vmatpush1.bf16.msra.mxu0 %v12980_v19  ;;  %v12994_v11 = vld [vmem:[%s20297_s3 + $0x9c4] ss:$16 sps:$4 sm:$0xff]   ;;  %v3258_v19 = vmul.f32 0.5, %v13979_v2  ;;  %13992 = vtanh.f32 %v2537_v36  ;;  %v3641_v2 = vadd.f32 0.5, %v3257_v26  ;;  %v3293_v54 = vmul.f32 0.5, %v13981_v32 }
 0x3a6   : > { %7115 = vmatprep.subr.bf16.mxu0 %v12988_v60  ;;  %v2229_v60 = vadd.f32 %v21461_v20, %v21388_v51  ;;  %13994 = vtanh.f32 %v2538_v43  ;;  %v21466_v3 = vld [vmem:[#allocation86_spill] sm:$0xff]  ;;  %v13051_v26 = vld [vmem:[%s20297_s3 + $0x8ec] ss:$16 sps:$4 sm:$0xff]   ;;  %v2562_v32 = vmul.f32 0.5, %v2227_v9 }
 0x3a7   : > { %8107 = vmatmul.mubr.bf16.gmra.mrb[232].mxu1 %v21425_v49  ;;  %v13045_v49 = vld [vmem:[%s20297_s3 + $0x8cc] ss:$16 sps:$4 sm:$0xff]   ;;  %v3642_v36 = vadd.f32 0.5, %v3258_v19  ;;  %v12998_v43 = vld [vmem:[%s20297_s3 + $0x9e0] ss:$16 sps:$4 sm:$0xff]  }
 0x3a8   : > { %8116 = vmatprep.mubr.bf16.mxu1 %v21426_v27  ;;  %8256 = vmatpush1.bf16.msra.mxu1 %v13031_v38  ;;  %v2231_v27 = vadd.f32 %v21462_v35, %v18510_v56  ;;  %v3654_v38 = vadd.f32 0.5, %v3270_v39  ;;  %v2573_v20 = vmul.f32 0.5, %v2229_v60  ;;  %v21465_v35 = vld [vmem:[#allocation28_spill] sm:$0xff]  ;;  %v2561_v60 = vmul.f32 0.5, %v2225_v12 }
 0x3a9   : > { %8257 = vmatprep.subr.bf16.mxu1 %v13039_v57  ;;  %7116 = vmatpush1.bf16.msra.mxu0 %v12986_v31  ;;  %v13983_v57 = vpop.eup %13982  ;;  %v13043_v31 = vld [vmem:[%s20297_s3 + $0x8c8] ss:$16 sps:$4 sm:$0xff]   ;;  %v21467_v12 = vld [vmem:[#allocation68_spill] sm:$0xff] }
 0x3aa   : > { %7117 = vmatprep.subr.bf16.mxu0 %v12994_v11  ;;  %v13985_v39 = vpop.eup %13984  ;;  %v2574_v37 = vmul.f32 0.5, %v2231_v27  ;;  %v3294_v19 = vmul.f32 0.5, %v13983_v57  ;;  %v18895_v27 = vpack.c.bf16 %v3654_v38, %v3642_v36  ;;  %13996 = vtanh.f32 %v2573_v20  ;;  %v21470_v20 = vld [vmem:[#allocation121_spill] sm:$0xff] }
 0x3ab   : > { %6999 = vmatmul.mubr.bf16.gmra.mrb[188].mxu0 %v21465_v35  ;;  %v13987_v11 = vpop.eup %13986 }
 0x3ac   : > { %8258 = vmatpush1.bf16.msra.mxu1 %v13037_v45  ;;  %7008 = vmatprep.mubr.bf16.mxu0 %v21466_v3  ;;  %v18889_v45 = vpack.c.bf16 %v3653_v40, %v3641_v2  ;;  %v13049_v40 = vld [vmem:[%s20297_s3 + $0x8e8] ss:$16 sps:$4 sm:$0xff]   ;;  %v3282_v57 = vmul.f32 0.5, %v13987_v11  ;;  %v3677_v2 = vadd.f32 0.5, %v3293_v54  ;;  %13998 = vtanh.f32 %v2574_v37  ;;  %v13989_v17 = vpop.eup %13988 }
 0x3ad   : > { %8259 = vmatprep.subr.bf16.mxu1 %v13045_v49  ;;  %7118 = vmatpush1.bf16.msra.mxu0 %v12992_v22  ;;  %v13006_v49 = vld [vmem:[%s20297_s3 + $0xa04] ss:$16 sps:$4 sm:$0xff]   ;;  %v3281_v22 = vmul.f32 0.5, %v13985_v39  ;;  %v3678_v9 = vadd.f32 0.5, %v3294_v19  ;;  %14000 = vtanh.f32 %v2561_v60  ;;  %v2237_v11 = vadd.f32 %v21470_v20, %v18510_v56 }
 0x3ae   : > { %7119 = vmatprep.subr.bf16.mxu0 %v13000_v52  ;;  %v2239_v52 = vadd.f32 %v21467_v12, %v21388_v51  ;;  %v13991_v39 = vpop.eup %13990  ;;  %14002 = vtanh.f32 %v2562_v32  ;;  %v3666_v37 = vadd.f32 0.5, %v3282_v57  ;;  %v3317_v60 = vmul.f32 0.5, %v13989_v17  ;;  %v21472_v17 = vld [vmem:[#allocation228_spill] sm:$0xff] }
 0x3af   : > { %8117 = vmatmul.mubr.bf16.gmra.mrb[236].mxu1 %v21433_v1  ;;  %v21468_v1 = vld [vmem:[#allocation69_spill] sm:$0xff]  ;;  %v3665_v36 = vadd.f32 0.5, %v3281_v22  ;;  %v13993_v54 = vpop.eup %13992  ;;  %v3318_v32 = vmul.f32 0.5, %v13991_v39 }
 0x3b0   : > { %8126 = vmatprep.mubr.bf16.mxu1 %v21434_v25  ;;  %8260 = vmatpush1.bf16.msra.mxu1 %v13043_v31  ;;  %v2241_v38 = vadd.f32 %v21468_v1, %v18510_v56  ;;  %v21469_v25 = vld [vmem:[#allocation147_spill] sm:$0xff]  ;;  %v13995_v19 = vpop.eup %13994  ;;  %v18920_v57 = vpack.c.bf16 %v3678_v9, %v3666_v37  ;;  %v2586_v1 = vmul.f32 0.5, %v2237_v11  ;;  %v3701_v20 = vadd.f32 0.5, %v3317_v60  ;;  %v21474_v9 = vld [vmem:[#allocation173_spill] sm:$0xff]  ;;  %v21476_v60 = vld [vmem:[#allocation88_spill] sm:$0xff] }
 0x3b1   : > { %8261 = vmatprep.subr.bf16.mxu1 %v13051_v26  ;;  %7120 = vmatpush1.bf16.msra.mxu0 %v12998_v43  ;;  %v2235_v31 = vadd.f32 %v21469_v25, %v21388_v51  ;;  %v2597_v26 = vmul.f32 0.5, %v2239_v52  ;;  %v13055_v43 = vld [vmem:[%s20297_s3 + $0x908] ss:$16 sps:$4 sm:$0xff]   ;;  %v18917_v22 = vpack.c.bf16 %v3677_v2, %v3665_v36  ;;  %v3305_v52 = vmul.f32 0.5, %v13993_v54  ;;  %v21473_v2 = vld [vmem:[#allocation174_spill] sm:$0xff] }
 0x3b2   : > { %7282 = vmatprep.subr.bf16.mxu0 %v13006_v49  ;;  %v2598_v12 = vmul.f32 0.5, %v2241_v38  ;;  %v13057_v49 = vld [vmem:[%s20297_s3 + $0x90c] ss:$16 sps:$4 sm:$0xff]   ;;  %v3306_v38 = vmul.f32 0.5, %v13995_v19  ;;  %v2249_v25 = vadd.f32 %v21472_v17, %v21388_v51  ;;  %v2245_v36 = vadd.f32 %v21474_v9, %v21388_v51 }
 0x3b3   : > { %7009 = vmatmul.mubr.bf16.gmra.mrb[192].mxu0 %v18268_v63  ;;  %21471 = vst [vmem:[#allocation102_spill] sm:$0xff] %v18917_v22  ;;  %14004 = vtanh.f32 %v2597_v26  ;;  %v21475_v54 = vld [vmem:[#allocation23_spill] sm:$0xff] }
 0x3b4   : > { %8262 = vmatpush1.bf16.msra.mxu1 %v13049_v40  ;;  %7018 = vmatprep.mubr.bf16.mxu0 %v18317_v7  ;;  %v2585_v40 = vmul.f32 0.5, %v2235_v31  ;;  %14006 = vtanh.f32 %v2598_v12  ;;  %v2251_v31 = vadd.f32 %v21473_v2, %v18510_v56  ;;  %v13997_v39 = vpop.eup %13996  ;;  %v2247_v37 = vadd.f32 %v21475_v54, %v18510_v56  ;;  %v13061_v12 = vld [vmem:[%s20297_s3 + $0x928] ss:$16 sps:$4 sm:$0xff]  }
 0x3b5   : > { %8263 = vmatprep.subr.bf16.mxu1 %v13057_v49  ;;  %v3690_v19 = vadd.f32 0.5, %v3306_v38  ;;  %v2609_v38 = vmul.f32 0.5, %v2245_v36 }
 0x3b6   : > { %14008 = vtanh.f32 %v2585_v40  ;;  %v13999_v11 = vpop.eup %13998  ;;  %v2622_v40 = vmul.f32 0.5, %v2251_v31  ;;  %v2610_v9 = vmul.f32 0.5, %v2247_v37 }
 0x3b7   : > { %8127 = vmatmul.mubr.bf16.gmra.mrb[240].mxu1 %v21441_v16  ;;  %v3702_v16 = vadd.f32 0.5, %v3318_v32  ;;  %14010 = vtanh.f32 %v2586_v1  ;;  %v14001_v26 = vpop.eup %14000  ;;  %v3341_v32 = vmul.f32 0.5, %v13997_v39  ;;  %v3342_v17 = vmul.f32 0.5, %v13999_v11  ;;  %v21477_v39 = vld [vmem:[#allocation177_spill] sm:$0xff] }
 0x3b8   : > { %8136 = vmatprep.mubr.bf16.mxu1 %v21442_v21  ;;  %8264 = vmatpush1.bf16.msra.mxu1 %v13055_v43  ;;  %v3689_v21 = vadd.f32 0.5, %v3305_v52  ;;  %v2621_v43 = vmul.f32 0.5, %v2249_v25  ;;  %v14003_v49 = vpop.eup %14002  ;;  %v13063_v52 = vld [vmem:[%s20297_s3 + $0x92c] ss:$16 sps:$4 sm:$0xff]   ;;  %v3329_v2 = vmul.f32 0.5, %v14001_v26  ;;  %v2259_v54 = vadd.f32 %v21477_v39, %v21388_v51  ;;  %v21480_v26 = vld [vmem:[#allocation142_spill] sm:$0xff] }
 0x3b9   : > { %v18942_v25 = vpack.c.bf16 %v3702_v16, %v3690_v19  ;;  %8265 = vmatprep.subr.bf16.mxu1 %v13063_v52  ;;  %v3330_v31 = vmul.f32 0.5, %v14003_v49  ;;  %v3725_v22 = vadd.f32 0.5, %v3341_v32  ;;  %v21479_v16 = vld [vmem:[#allocation176_spill] sm:$0xff]  ;;  %v2257_v19 = vadd.f32 %v21480_v26, %v18510_v56  ;;  %v13067_v32 = vld [vmem:[%s20297_s3 + $0x948] ss:$16 sps:$4 sm:$0xff]  }
 0x3ba   : > { %v18939_v1 = vpack.c.bf16 %v3701_v20, %v3689_v21  ;;  %14012 = vtanh.f32 %v2621_v43  ;;  %v21478_v20 = vld [vmem:[#allocation232_spill] sm:$0xff]  ;;  %v2255_v21 = vadd.f32 %v21479_v16, %v21388_v51  ;;  %v13069_v51 = vld [vmem:[%s20297_s3 + $0x94c] ss:$16 sps:$4 sm:$0xff]  }
 0x3bb   : > { %7019 = vmatmul.mubr.bf16.gmra.mrb[196].mxu0 %v21476_v60  ;;  %14014 = vtanh.f32 %v2622_v40  ;;  %v2261_v36 = vadd.f32 %v21478_v20, %v18510_v56  ;;  %v3714_v49 = vadd.f32 0.5, %v3330_v31  ;;  %v2634_v39 = vmul.f32 0.5, %v2257_v19 }
 0x3bc   : > { %7028 = vmatprep.mubr.bf16.mxu0 %v18409_v50  ;;  %8266 = vmatpush1.bf16.msra.mxu1 %v13061_v12  ;;  %14016 = vtanh.f32 %v2609_v38  ;;  %v2645_v12 = vmul.f32 0.5, %v2259_v54 }
 0x3bd   : > { %v14005_v11 = vpop.eup %14004  ;;  %14018 = vtanh.f32 %v2610_v9  ;;  %8267 = vmatprep.subr.bf16.mxu1 %v13069_v51 }
 0x3be   : > { %v14007_v37 = vpop.eup %14006  ;;  %v3365_v52 = vmul.f32 0.5, %v14005_v11  ;;  %14020 = vtanh.f32 %v2645_v12 }
 0x3bf   : > { %8137 = vmatmul.mubr.bf16.gmra.mrb[244].mxu1 %v21449_v33  ;;  %v3726_v33 = vadd.f32 0.5, %v3342_v17  ;;  %v2646_v17 = vmul.f32 0.5, %v2261_v36  ;;  %v3366_v56 = vmul.f32 0.5, %v14007_v37 }
 0x3c0   : > { %8146 = vmatprep.mubr.bf16.mxu1 %v21450_v0  ;;  %v3713_v0 = vadd.f32 0.5, %v3329_v2  ;;  %v14009_v43 = vpop.eup %14008  ;;  %v2633_v2 = vmul.f32 0.5, %v2255_v21  ;;  %8268 = vmatpush1.bf16.msra.mxu1 %v13067_v32  ;;  %v3749_v20 = vadd.f32 0.5, %v3365_v52 }
 0x3c1   : > { %v14011_v40 = vpop.eup %14010  ;;  %v18964_v9 = vpack.c.bf16 %v3726_v33, %v3714_v49  ;;  %v3353_v31 = vmul.f32 0.5, %v14009_v43  ;;  %14022 = vtanh.f32 %v2646_v17  ;;  %v3750_v11 = vadd.f32 0.5, %v3366_v56 }
 0x3c2   : > { %v18961_v38 = vpack.c.bf16 %v3725_v22, %v3713_v0  ;;  %v3354_v54 = vmul.f32 0.5, %v14011_v40  ;;  %14024 = vtanh.f32 %v2633_v2  ;;  %v13075_v0 = vld [vmem:[%s20297_s3 + $0x96c] ss:$16 sps:$4 sm:$0xff]  }
 0x3c3   : > { %7029 = vmatmul.mubr.bf16.gmra.mrb[200].mxu0 %v18398_v18  ;;  %v3737_v16 = vadd.f32 0.5, %v3353_v31  ;;  %14026 = vtanh.f32 %v2634_v39  ;;  %8269 = vmatprep.subr.bf16.mxu1 %v13075_v0  ;;  %v13091_v0 = vld [vmem:[%s20297_s3 + $0x9c8] ss:$16 sps:$4 sm:$0xff]  }
 0x3c4   : > { %7038 = vmatprep.mubr.bf16.mxu0 %v18466_v30  ;;  %v14013_v36 = vpop.eup %14012 }
 0x3c5   : > { %v14015_v22 = vpop.eup %14014  ;;  %v3389_v37 = vmul.f32 0.5, %v14013_v36  ;;  %v18975_v26 = vpack.c.bf16 %v3749_v20, %v3737_v16 }
 0x3c6   : > { %v14017_v21 = vpop.eup %14016  ;;  %v3390_v19 = vmul.f32 0.5, %v14015_v22 }
 0x3c7   : > { %8147 = vmatmul.mubr.bf16.gmra.mrb[248].mxu1 %v21457_v59  ;;  %v3738_v59 = vadd.f32 0.5, %v3354_v54  ;;  %v14019_v33 = vpop.eup %14018  ;;  %v3377_v49 = vmul.f32 0.5, %v14017_v21  ;;  %v3773_v32 = vadd.f32 0.5, %v3389_v37 }
 0x3c8   : > { %8156 = vmatprep.mubr.bf16.mxu1 %v21458_v10  ;;  %v13073_v10 = vld [vmem:[%s20297_s3 + $0x968] ss:$16 sps:$4 sm:$0xff]   ;;  %v3378_v12 = vmul.f32 0.5, %v14019_v33  ;;  %v14021_v40 = vpop.eup %14020  ;;  %v3774_v52 = vadd.f32 0.5, %v3390_v19  ;;  %v13093_v19 = vld [vmem:[%s20297_s3 + $0x9cc] ss:$16 sps:$4 sm:$0xff]  }
 0x3c9   : > { %v18978_v43 = vpack.c.bf16 %v3750_v11, %v3738_v59  ;;  %8270 = vmatpush1.bf16.msra.mxu1 %v13073_v10  ;;  %v3761_v51 = vadd.f32 0.5, %v3377_v49  ;;  %v3413_v39 = vmul.f32 0.5, %v14021_v40  ;;  %v13085_v33 = vld [vmem:[%s20297_s3 + $0x9a8] ss:$16 sps:$4 sm:$0xff]   ;;  %v13099_v49 = vld [vmem:[%s20297_s3 + $0x9ec] ss:$16 sps:$4 sm:$0xff]  }
 0x3ca   : > { %v3762_v2 = vadd.f32 0.5, %v3378_v12  ;;  %v21482_v12 = vld [vmem:[#allocation58_spill] sm:$0xff] }
 0x3cb   : > { %7039 = vmatmul.mubr.bf16.gmra.mrb[204].mxu0 %v18455_v5  ;;  %v14023_v17 = vpop.eup %14022  ;;  %v18989_v54 = vpack.c.bf16 %v3773_v32, %v3761_v51  ;;  %v3797_v16 = vadd.f32 0.5, %v3413_v39  ;;  %v13102_v32 = vld [vmem:[%s20297_s3 + $0xa0c] ss:$16 sps:$4 sm:$0xff]   ;;  %v21483_v40 = vld [vmem:[#allocation198_spill] sm:$0xff] }
 0x3cc   : > { %7048 = vmatprep.mubr.bf16.mxu0 %v18501_v34  ;;  %v14025_v56 = vpop.eup %14024  ;;  %v3414_v20 = vmul.f32 0.5, %v14023_v17  ;;  %v18992_v36 = vpack.c.bf16 %v3774_v52, %v3762_v2  ;;  %v13016_v52 = vld [vmem:[%s20297_s3 + $0xa40] ss:$16 sps:$4 sm:$0xff]   ;;  %v13024_v17 = vld [vmem:[%s20297_s3 + $0xa64] ss:$16 sps:$4 sm:$0xff]   ;;  %v21484_v51 = vld [vmem:[#allocation197_spill] sm:$0xff] }
 0x3cd   : > { %v14027_v31 = vpop.eup %14026  ;;  %v3401_v11 = vmul.f32 0.5, %v14025_v56  ;;  %v21485_v56 = vld [vmem:[#allocation195_spill] sm:$0xff]  ;;  %v13028_v2 = vld [vmem:[%s20297_s3 + $0xa80] ss:$16 sps:$4 sm:$0xff]   ;;  %v21487_v39 = vld [vmem:[#allocation201_spill] sm:$0xff] }
 0x3ce   : > { %v3402_v22 = vmul.f32 0.5, %v14027_v31  ;;  %v3798_v21 = vadd.f32 0.5, %v3414_v20  ;;  %v21486_v31 = vld [vmem:[#allocation98_spill] sm:$0xff] }
 0x3cf   : > { %8157 = vmatmul.mubr.bf16.gmra.mrb[252].mxu1 %v21465_v35  ;;  %v13079_v35 = vld [vmem:[%s20297_s3 + $0x988] ss:$16 sps:$4 sm:$0xff]   ;;  %v3785_v59 = vadd.f32 0.5, %v3401_v11  ;;  %v13048_v20 = vld [vmem:[%s20297_s3 + $0xae4] ss:$16 sps:$4 sm:$0xff]  }
 0x3d0   : > { %8166 = vmatprep.mubr.bf16.mxu1 %v21466_v3  ;;  %v13081_v3 = vld [vmem:[%s20297_s3 + $0x98c] ss:$16 sps:$4 sm:$0xff]   ;;  %v3786_v10 = vadd.f32 0.5, %v3402_v22  ;;  %v21488_v11 = vld [vmem:[#allocation92_spill] sm:$0xff] }
 0x3d1   : > { %8271 = vmatprep.subr.bf16.mxu1 %v13081_v3  ;;  %v13040_v3 = vld [vmem:[%s20297_s3 + $0xac0] ss:$16 sps:$4 sm:$0xff]  }
 0x3d2   : > { %8272 = vmatpush1.bf16.msra.mxu1 %v13079_v35  ;;  %v19006_v37 = vpack.c.bf16 %v3798_v21, %v3786_v10  ;;  %v13036_v35 = vld [vmem:[%s20297_s3 + $0xaa4] ss:$16 sps:$4 sm:$0xff]   ;;  %v13052_v22 = vld [vmem:[%s20297_s3 + $0xb00] ss:$16 sps:$4 sm:$0xff]   ;;  %v13100_v21 = vld [vmem:[%s20297_s3 + $0xa08] ss:$16 sps:$4 sm:$0xff]  }
 0x3d3   : > { %7049 = vmatmul.mubr.bf16.gmra.mrb[208].mxu0 %v18493_v29  ;;  %v21490_v10 = vld [vmem:[#allocation95_spill] sm:$0xff] }
 0x3d4   : > { %7058 = vmatprep.mubr.bf16.mxu0 %v18530_v14 }
 0x3d7   : > { %8167 = vmatmul.mubr.bf16.gmra.mrb[0].mxu1 %v18268_v63  ;;  %v13087_v63 = vld [vmem:[%s20297_s3 + $0x9ac] ss:$16 sps:$4 sm:$0xff]  }
 0x3d8   : > { %8176 = vmatprep.mubr.bf16.mxu1 %v18317_v7  ;;  %v19003_v7 = vpack.c.bf16 %v3797_v16, %v3785_v59  ;;  %8273 = vmatprep.subr.bf16.mxu1 %v13087_v63  ;;  %v13060_v16 = vld [vmem:[%s20297_s3 + $0xb24] ss:$16 sps:$4 sm:$0xff]   ;;  %v21489_v59 = vld [vmem:[#allocation93_spill] sm:$0xff] }
 0x3d9   : > { %8274 = vmatpush1.bf16.msra.mxu1 %v13085_v33  ;;  %v13058_v33 = vld [vmem:[%s20297_s3 + $0xb20] ss:$16 sps:$4 sm:$0xff]   ;;  %v13066_v63 = vld [vmem:[%s20297_s3 + $0xb44] ss:$16 sps:$4 sm:$0xff]  }
 0x3da   : > { %8275 = vmatprep.subr.bf16.mxu1 %v13093_v19  ;;  %v13108_v19 = vld [vmem:[%s20297_s3 + $0xa4c] ss:$16 sps:$4 sm:$0xff]  }
 0x3db   : > { %7059 = vmatmul.mubr.bf16.gmra.mrb[212].mxu0 %v18525_v46 }
 0x3dc   : > { %7068 = vmatprep.mubr.bf16.mxu0 %v18556_v15 }
 0x3dd   : > { %8276 = vmatpush1.bf16.msra.mxu1 %v13091_v0  ;;  %v13103_v0 = vld [vmem:[%s20297_s3 + $0xa28] ss:$16 sps:$4 sm:$0xff]  }
 0x3de   : > { %8277 = vmatprep.subr.bf16.mxu1 %v13099_v49  ;;  %v13106_v49 = vld [vmem:[%s20297_s3 + $0xa48] ss:$16 sps:$4 sm:$0xff]  }
 0x3df   : > { %8177 = vmatmul.mubr.bf16.gmra.mrb[4].mxu1 %v21476_v60  ;;  %v21481_v60 = vld [vmem:[#allocation38_spill] sm:$0xff] }
 0x3e0   : > { %8186 = vmatprep.mubr.bf16.mxu1 %v18409_v50  ;;  %v13097_v50 = vld [vmem:[%s20297_s3 + $0x9e8] ss:$16 sps:$4 sm:$0xff]  }
 0x3e1   : > { %8278 = vmatpush1.bf16.msra.mxu1 %v13097_v50  ;;  %v13064_v50 = vld [vmem:[%s20297_s3 + $0xb40] ss:$16 sps:$4 sm:$0xff]  }
 0x3e2   : > { %8440 = vmatprep.subr.bf16.mxu1 %v13102_v32  ;;  %v13109_v32 = vld [vmem:[%s20297_s3 + $0xa68] ss:$16 sps:$4 sm:$0xff]  }
 0x3e3   : > { %7069 = vmatmul.mubr.bf16.gmra.mrb[216].mxu0 %v18551_v62 }
 0x3e4   : > { %7078 = vmatprep.mubr.bf16.mxu0 %v18582_v23 }
 0x3e7   : > { %8187 = vmatmul.mubr.bf16.gmra.mrb[8].mxu1 %v18398_v18  ;;  %v13004_v18 = vld [vmem:[%s20297_s3 + $0xa00] ss:$16 sps:$4 sm:$0xff]  }
 0x3e8   : > { %8196 = vmatprep.mubr.bf16.mxu1 %v18466_v30  ;;  %v13012_v30 = vld [vmem:[%s20297_s3 + $0xa24] ss:$16 sps:$4 sm:$0xff]  }
 0x3eb   : > { %7079 = vmatmul.mubr.bf16.gmra.mrb[220].mxu0 %v18577_v8 }
 0x3ec   : > { %7121 = vmatprep.mubr.bf16.mxu0 %v21481_v60 }
 0x3ef   : > { %8197 = vmatmul.mubr.bf16.gmra.mrb[12].mxu1 %v18455_v5  ;;  %v13010_v5 = vld [vmem:[%s20297_s3 + $0xa20] ss:$16 sps:$4 sm:$0xff]  }
 0x3f0   : > { %8206 = vmatprep.mubr.bf16.mxu1 %v18501_v34  ;;  %v13018_v34 = vld [vmem:[%s20297_s3 + $0xa44] ss:$16 sps:$4 sm:$0xff]  }
 0x3f3   : > { %7122 = vmatmul.mubr.bf16.vlgmr.msra.gmra.mrb[160].mxu0 %v21482_v12 }
 0x3f4   : > { %7131 = vmatprep.mubr.bf16.mxu0 %v21483_v40  ;;  %7283 = vmatpush1.bf16.msra.mxu0 %v13004_v18  ;;  %v13111_v18 = vld [vmem:[%s20297_s3 + $0xa6c] ss:$16 sps:$4 sm:$0xff]  }
 0x3f5   : > { %7284 = vmatprep.subr.bf16.mxu0 %v13012_v30  ;;  %v13070_v30 = vld [vmem:[%s20297_s3 + $0xb60] ss:$16 sps:$4 sm:$0xff]  }
 0x3f7   : > { %8207 = vmatmul.mubr.bf16.gmra.mrb[16].mxu1 %v18493_v29  ;;  %v13022_v29 = vld [vmem:[%s20297_s3 + $0xa60] ss:$16 sps:$4 sm:$0xff]  }
 0x3f8   : > { %8216 = vmatprep.mubr.bf16.mxu1 %v18530_v14  ;;  %7285 = vmatpush1.bf16.msra.mxu0 %v13010_v5  ;;  %v13030_v14 = vld [vmem:[%s20297_s3 + $0xa84] ss:$16 sps:$4 sm:$0xff]   ;;  %v13076_v5 = vld [vmem:[%s20297_s3 + $0xb80] ss:$16 sps:$4 sm:$0xff]  }
 0x3f9   : > { %7286 = vmatprep.subr.bf16.mxu0 %v13018_v34  ;;  %v13084_v34 = vld [vmem:[%s20297_s3 + $0xba4] ss:$16 sps:$4 sm:$0xff]  }
 0x3fb   : > { %7132 = vmatmul.mubr.bf16.gmra.mrb[164].mxu0 %v21484_v51 }
 0x3fc   : > { %7141 = vmatprep.mubr.bf16.mxu0 %v21485_v56  ;;  %7287 = vmatpush1.bf16.msra.mxu0 %v13016_v52  ;;  %v13112_v52 = vld [vmem:[%s20297_s3 + $0xa88] ss:$16 sps:$4 sm:$0xff]  }
 0x3fd   : > { %7288 = vmatprep.subr.bf16.mxu0 %v13024_v17  ;;  %v13117_v17 = vld [vmem:[%s20297_s3 + $0xaac] ss:$16 sps:$4 sm:$0xff]  }
 0x3ff   : > { %8217 = vmatmul.mubr.bf16.gmra.mrb[20].mxu1 %v18525_v46  ;;  %v13034_v46 = vld [vmem:[%s20297_s3 + $0xaa0] ss:$16 sps:$4 sm:$0xff]  }
 0x400   : > { %8226 = vmatprep.mubr.bf16.mxu1 %v18556_v15  ;;  %7289 = vmatpush1.bf16.msra.mxu0 %v13022_v29  ;;  %v13042_v15 = vld [vmem:[%s20297_s3 + $0xac4] ss:$16 sps:$4 sm:$0xff]  }
 0x401   : > { %7290 = vmatprep.subr.bf16.mxu0 %v13030_v14  ;;  %v13090_v29 = vld [vmem:[%s20297_s3 + $0xbc4] ss:$16 sps:$4 sm:$0xff]   ;;  %v13115_v14 = vld [vmem:[%s20297_s3 + $0xaa8] ss:$16 sps:$4 sm:$0xff]  }
 0x403   : > { %7142 = vmatmul.mubr.bf16.gmra.mrb[168].mxu0 %v21486_v31 }
 0x404   : > { %7151 = vmatprep.mubr.bf16.mxu0 %v21487_v39  ;;  %7291 = vmatpush1.bf16.msra.mxu0 %v13028_v2  ;;  %v13120_v2 = vld [vmem:[%s20297_s3 + $0xacc] ss:$16 sps:$4 sm:$0xff]  }
 0x405   : > { %7292 = vmatprep.subr.bf16.mxu0 %v13036_v35  ;;  %v13088_v35 = vld [vmem:[%s20297_s3 + $0xbc0] ss:$16 sps:$4 sm:$0xff]  }
 0x407   : > { %8227 = vmatmul.mubr.bf16.gmra.mrb[24].mxu1 %v18551_v62  ;;  %v13046_v62 = vld [vmem:[%s20297_s3 + $0xae0] ss:$16 sps:$4 sm:$0xff]  }
 0x408   : > { %8236 = vmatprep.mubr.bf16.mxu1 %v18582_v23  ;;  %7293 = vmatpush1.bf16.msra.mxu0 %v13034_v46  ;;  %v13054_v23 = vld [vmem:[%s20297_s3 + $0xb04] ss:$16 sps:$4 sm:$0xff]   ;;  %v21492_v46 = vld [vmem:[#allocation107_spill] sm:$0xff] }
 0x409   : > { %7294 = vmatprep.subr.bf16.mxu0 %v13042_v15  ;;  %v13123_v15 = vld [vmem:[%s20297_s3 + $0xaec] ss:$16 sps:$4 sm:$0xff]  }
 0x40b   : > { %7152 = vmatmul.mubr.bf16.gmra.mrb[172].mxu0 %v21488_v11 }
 0x40c   : > { %7161 = vmatprep.mubr.bf16.mxu0 %v18335_v4  ;;  %7295 = vmatpush1.bf16.msra.mxu0 %v13040_v3  ;;  %v21493_v3 = vld [vmem:[#allocation15_spill] sm:$0xff] }
 0x40d   : > { %7296 = vmatprep.subr.bf16.mxu0 %v13048_v20  ;;  %v13094_v20 = vld [vmem:[%s20297_s3 + $0xbe0] ss:$16 sps:$4 sm:$0xff]  }
 0x40f   : > { %8237 = vmatmul.mubr.bf16.gmra.mrb[28].mxu1 %v18577_v8  ;;  %v13105_v8 = vld [vmem:[%s20297_s3 + $0xa2c] ss:$16 sps:$4 sm:$0xff]  }
 0x410   : > { %8279 = vmatprep.mubr.bf16.mxu1 %v21481_v60  ;;  %7297 = vmatpush1.bf16.msra.mxu0 %v13046_v62  ;;  %v13072_v60 = vld [vmem:[%s20297_s3 + $0xb64] ss:$16 sps:$4 sm:$0xff]   ;;  %v13121_v62 = vld [vmem:[%s20297_s3 + $0xae8] ss:$16 sps:$4 sm:$0xff]  }
 0x411   : > { %7298 = vmatprep.subr.bf16.mxu0 %v13054_v23  ;;  %v21494_v23 = vld [vmem:[#allocation108_spill] sm:$0xff] }
 0x413   : > { %7162 = vmatmul.mubr.bf16.gmra.mrb[176].mxu0 %v21489_v59 }
 0x414   : > { %7171 = vmatprep.mubr.bf16.mxu0 %v21490_v10  ;;  %7299 = vmatpush1.bf16.msra.mxu0 %v13052_v22  ;;  %v13124_v22 = vld [vmem:[%s20297_s3 + $0xb08] ss:$16 sps:$4 sm:$0xff]  }
 0x415   : > { %7300 = vmatprep.subr.bf16.mxu0 %v13060_v16  ;;  %v21495_v16 = vld [vmem:[#allocation94_spill] sm:$0xff] }
 0x417   : > { %8280 = vmatmul.mubr.bf16.vlgmr.msra.gmra.mrb[224].mxu1 %v21482_v12  ;;  %v13078_v12 = vld [vmem:[%s20297_s3 + $0xb84] ss:$16 sps:$4 sm:$0xff]  }
 0x418   : > { %8289 = vmatprep.mubr.bf16.mxu1 %v21483_v40  ;;  %8441 = vmatpush1.bf16.msra.mxu1 %v13100_v21  ;;  %v13114_v40 = vld [vmem:[%s20297_s3 + $0xa8c] ss:$16 sps:$4 sm:$0xff]   ;;  %v13127_v21 = vld [vmem:[%s20297_s3 + $0xb28] ss:$16 sps:$4 sm:$0xff]  }
 0x419   : > { %8442 = vmatprep.subr.bf16.mxu1 %v13105_v8  ;;  %7301 = vmatpush1.bf16.msra.mxu0 %v13058_v33  ;;  %v13129_v8 = vld [vmem:[%s20297_s3 + $0xb2c] ss:$16 sps:$4 sm:$0xff]  }
 0x41a   : > { %7302 = vmatprep.subr.bf16.mxu0 %v13066_v63  ;;  %v21497_v33 = vld [vmem:[#allocation99_spill] sm:$0xff] }
 0x41b   : > { %7172 = vmatmul.mubr.bf16.gmra.mrb[180].mxu0 %v18347_v48  ;;  %v13132_v63 = vld [vmem:[%s20297_s3 + $0xb4c] ss:$16 sps:$4 sm:$0xff]  }
 0x41c   : > { %8443 = vmatpush1.bf16.msra.mxu1 %v13103_v0  ;;  %7181 = vmatprep.mubr.bf16.mxu0 %v18351_v47  ;;  %v21499_v0 = vld [vmem:[#allocation109_spill] sm:$0xff] }
 0x41d   : > { %8444 = vmatprep.subr.bf16.mxu1 %v13108_v19  ;;  %7303 = vmatpush1.bf16.msra.mxu0 %v13064_v50  ;;  %v13135_v19 = vld [vmem:[%s20297_s3 + $0xb6c] ss:$16 sps:$4 sm:$0xff]  }
 0x41e   : > { %7304 = vmatprep.subr.bf16.mxu0 %v13072_v60  ;;  %v21501_v50 = vld [vmem:[#allocation213_spill] sm:$0xff] }
 0x41f   : > { %8290 = vmatmul.mubr.bf16.gmra.mrb[228].mxu1 %v21484_v51  ;;  %v21491_v51 = vld [vmem:[#allocation100_spill] sm:$0xff]  ;;  %v13136_v60 = vld [vmem:[%s20297_s3 + $0xb88] ss:$16 sps:$4 sm:$0xff]  }
 0x420   : > { %8299 = vmatprep.mubr.bf16.mxu1 %v21485_v56  ;;  %8445 = vmatpush1.bf16.msra.mxu1 %v13106_v49  ;;  %v13082_v56 = vld [vmem:[%s20297_s3 + $0xba0] ss:$16 sps:$4 sm:$0xff]   ;;  %v13138_v49 = vld [vmem:[%s20297_s3 + $0xb8c] ss:$16 sps:$4 sm:$0xff]  }
 0x421   : > { %8446 = vmatprep.subr.bf16.mxu1 %v13111_v18  ;;  %7305 = vmatpush1.bf16.msra.mxu0 %v13070_v30  ;;  %v21503_v18 = vld [vmem:[#allocation34_spill] sm:$0xff]  ;;  %v21504_v30 = vld [vmem:[#allocation217_spill] sm:$0xff] }
 0x422   : > { %7306 = vmatprep.subr.bf16.mxu0 %v13078_v12  ;;  %v13139_v12 = vld [vmem:[%s20297_s3 + $0xba8] ss:$16 sps:$4 sm:$0xff]  }
 0x423   : > { %7182 = vmatmul.mubr.bf16.gmra.mrb[184].mxu0 %v18355_v61 }
 0x424   : > { %8447 = vmatpush1.bf16.msra.mxu1 %v13109_v32  ;;  %7191 = vmatprep.mubr.bf16.mxu0 %v21491_v51  ;;  %v13141_v32 = vld [vmem:[%s20297_s3 + $0xbac] ss:$16 sps:$4 sm:$0xff]  }
 0x425   : > { %8448 = vmatprep.subr.bf16.mxu1 %v13114_v40  ;;  %7307 = vmatpush1.bf16.msra.mxu0 %v13076_v5  ;;  %v13144_v40 = vld [vmem:[%s20299_s5 + $0x4] ss:$8 sps:$4 sm:$0xff]   ;;  %v13145_v5 = vld [vmem:[%s20297_s3 + $0xbc8] ss:$16 sps:$4 sm:$0xff]  }
 0x426   : > { %7308 = vmatprep.subr.bf16.mxu0 %v13084_v34  ;;  %v13147_v34 = vld [vmem:[%s20297_s3 + $0xbcc] ss:$16 sps:$4 sm:$0xff]  }
 0x427   : > { %8300 = vmatmul.mubr.bf16.gmra.mrb[232].mxu1 %v21486_v31  ;;  %v13096_v31 = vld [vmem:[%s20297_s3 + $0xbe4] ss:$16 sps:$4 sm:$0xff]  }
 0x428   : > { %8309 = vmatprep.mubr.bf16.mxu1 %v21487_v39  ;;  %8449 = vmatpush1.bf16.msra.mxu1 %v13112_v52  ;;  %v13118_v39 = vld [vmem:[%s20297_s3 + $0xac8] ss:$16 sps:$4 sm:$0xff]  }
 0x429   : > { %8450 = vmatprep.subr.bf16.mxu1 %v13117_v17  ;;  %7309 = vmatpush1.bf16.msra.mxu0 %v13082_v56  ;;  %v13151_v52 = vld [vmem:[%s20297_s3 + $0xbe8] ss:$16 sps:$4 sm:$0xff]   ;;  %v13153_v17 = vld [vmem:[%s20297_s3 + $0xbec] ss:$16 sps:$4 sm:$0xff]  }
 0x42a   : > { %7310 = vmatprep.subr.bf16.mxu0 %v13090_v29  ;;  %v13150_v56 = vld [vmem:[%s20299_s5 + $0x14] ss:$8 sps:$4 sm:$0xff]   ;;  %v21505_v29 = vld [vmem:[#allocation171_spill] sm:$0xff] }
 0x42b   : > { %7192 = vmatmul.mubr.bf16.gmra.mrb[188].mxu0 %v21492_v46 }
 0x42c   : > { %8451 = vmatpush1.bf16.msra.mxu1 %v13115_v14  ;;  %7201 = vmatprep.mubr.bf16.mxu0 %v21493_v3  ;;  %v13148_v14 = vld [vmem:[%s20299_s5 + $0x10] ss:$8 sps:$4 sm:$0xff]  }
 0x42d   : > { %8452 = vmatprep.subr.bf16.mxu1 %v13120_v2  ;;  %7311 = vmatpush1.bf16.msra.mxu0 %v13088_v35  ;;  %v13156_v2 = vld [vmem:[%s20299_s5 + $0x24] ss:$8 sps:$4 sm:$0xff]   ;;  %v13154_v35 = vld [vmem:[%s20299_s5 + $0x20] ss:$8 sps:$4 sm:$0xff]  }
 0x42e   : > { %7312 = vmatprep.subr.bf16.mxu0 %v13096_v31  ;;  %v13159_v31 = vld [vmem:[%s20299_s5 + $0x34] ss:$8 sps:$4 sm:$0xff]  }
 0x42f   : > { %8310 = vmatmul.mubr.bf16.gmra.mrb[236].mxu1 %v21488_v11  ;;  %v13126_v11 = vld [vmem:[%s20297_s3 + $0xb0c] ss:$16 sps:$4 sm:$0xff]  }
 0x430   : > { %8319 = vmatprep.mubr.bf16.mxu1 %v18335_v4  ;;  %8453 = vmatpush1.bf16.msra.mxu1 %v13118_v39  ;;  %v21496_v4 = vld [vmem:[#allocation96_spill] sm:$0xff] }
 0x431   : > { %8454 = vmatprep.subr.bf16.mxu1 %v13123_v15  ;;  %7313 = vmatpush1.bf16.msra.mxu0 %v13094_v20  ;;  %v13157_v39 = vld [vmem:[%s20299_s5 + $0x30] ss:$8 sps:$4 sm:$0xff]   ;;  %v13160_v15 = vld [vmem:[%s20299_s5 + $0x40] ss:$8 sps:$4 sm:$0xff]  }
 0x432   : > { %9605 = vmatprep.subr.bf16.mxu0 %v13144_v40  ;;  %v13163_v20 = vld [vmem:[%s20299_s5 + $0x50] ss:$8 sps:$4 sm:$0xff]  }
 0x433   : > { %7202 = vmatmul.mubr.bf16.gmra.mrb[192].mxu0 %v21494_v23 }
 0x434   : > { %8455 = vmatpush1.bf16.msra.mxu1 %v13121_v62  ;;  %7211 = vmatprep.mubr.bf16.mxu0 %v21495_v16  ;;  %v13166_v62 = vld [vmem:[%s20299_s5 + $0x60] ss:$8 sps:$4 sm:$0xff]  }
 0x435   : > { %8456 = vmatprep.subr.bf16.mxu1 %v13126_v11  ;;  %v13169_v11 = vld [vmem:[%s20299_s5 + $0x70] ss:$8 sps:$4 sm:$0xff]  }
 0x437   : > { %8320 = vmatmul.mubr.bf16.gmra.mrb[240].mxu1 %v21489_v59  ;;  %v21498_v59 = vld [vmem:[#allocation97_spill] sm:$0xff] }
 0x438   : > { %8329 = vmatprep.mubr.bf16.mxu1 %v21490_v10  ;;  %8457 = vmatpush1.bf16.msra.mxu1 %v13124_v22  ;;  %v13130_v10 = vld [vmem:[%s20297_s3 + $0xb48] ss:$16 sps:$4 sm:$0xff]   ;;  %v21506_v22 = vld [vmem:[#allocation216_spill] sm:$0xff] }
 0x439   : > { %8458 = vmatprep.subr.bf16.mxu1 %v13129_v8  ;;  %v13175_v8 = vld [vmem:[%s20299_s5 + $0x90] ss:$8 sps:$4 sm:$0xff]  }
 0x43b   : > { %7212 = vmatmul.mubr.bf16.gmra.mrb[196].mxu0 %v21496_v4 }
 0x43c   : > { %7221 = vmatprep.mubr.bf16.mxu0 %v21497_v33  ;;  %8459 = vmatpush1.bf16.msra.mxu1 %v13127_v21  ;;  %v21508_v21 = vld [vmem:[#allocation122_spill] sm:$0xff] }
 0x43d   : > { %8460 = vmatprep.subr.bf16.mxu1 %v13132_v63  ;;  %v21511_v63 = vld [vmem:[#allocation45_spill] sm:$0xff] }
 0x43f   : > { %8330 = vmatmul.mubr.bf16.gmra.mrb[244].mxu1 %v18347_v48  ;;  %v21500_v48 = vld [vmem:[#allocation106_spill] sm:$0xff] }
 0x440   : > { %8339 = vmatprep.mubr.bf16.mxu1 %v18351_v47  ;;  %8461 = vmatpush1.bf16.msra.mxu1 %v13130_v10  ;;  %v13133_v47 = vld [vmem:[%s20297_s3 + $0xb68] ss:$16 sps:$4 sm:$0xff]  }
 0x441   : > { %8462 = vmatprep.subr.bf16.mxu1 %v13135_v19  ;;  %v21510_v10 = vld [vmem:[#allocation101_spill] sm:$0xff]  ;;  %v21513_v19 = vld [vmem:[#allocation2_spill] sm:$0xff] }
 0x443   : > { %7222 = vmatmul.mubr.bf16.gmra.mrb[200].mxu0 %v21498_v59 }
 0x444   : > { %7231 = vmatprep.mubr.bf16.mxu0 %v21499_v0  ;;  %8463 = vmatpush1.bf16.msra.mxu1 %v13133_v47  ;;  %v21512_v47 = vld [vmem:[#allocation123_spill] sm:$0xff] }
 0x445   : > { %8464 = vmatprep.subr.bf16.mxu1 %v13138_v49 }
 0x447   : > { %8340 = vmatmul.mubr.bf16.gmra.mrb[248].mxu1 %v18355_v61  ;;  %v21502_v61 = vld [vmem:[#allocation199_spill] sm:$0xff] }
 0x448   : > { %8349 = vmatprep.mubr.bf16.mxu1 %v21491_v51  ;;  %8465 = vmatpush1.bf16.msra.mxu1 %v13136_v60  ;;  %v13142_v51 = vld [vmem:[%s20299_s5] ss:$8 sps:$4 sm:$0xff]   ;;  %v13192_v60 = vld [vmem:[%s20299_s5 + $0xe4] ss:$8 sps:$4 sm:$0xff]  }
 0x449   : > { %8466 = vmatprep.subr.bf16.mxu1 %v13141_v32 }
 0x44b   : > { %7232 = vmatmul.mubr.bf16.gmra.mrb[204].mxu0 %v21500_v48 }
 0x44c   : > { %7241 = vmatprep.mubr.bf16.mxu0 %v21501_v50  ;;  %8467 = vmatpush1.bf16.msra.mxu1 %v13139_v12 }
 0x44d   : > { %8468 = vmatprep.subr.bf16.mxu1 %v13147_v34 }
 0x44f   : > { %8350 = vmatmul.mubr.bf16.gmra.mrb[252].mxu1 %v21492_v46  ;;  %v13162_v46 = vld [vmem:[%s20299_s5 + $0x44] ss:$8 sps:$4 sm:$0xff]  }
 0x450   : > { %8359 = vmatprep.mubr.bf16.mxu1 %v21493_v3  ;;  %8469 = vmatpush1.bf16.msra.mxu1 %v13145_v5  ;;  %v13165_v3 = vld [vmem:[%s20299_s5 + $0x54] ss:$8 sps:$4 sm:$0xff]  }
 0x451   : > { %8470 = vmatprep.subr.bf16.mxu1 %v13153_v17 }
 0x453   : > { %7242 = vmatmul.mubr.bf16.gmra.mrb[208].mxu0 %v21502_v61 }
 0x454   : > { %7251 = vmatprep.mubr.bf16.mxu0 %v21503_v18  ;;  %8471 = vmatpush1.bf16.msra.mxu1 %v13151_v52 }
 0x457   : > { %8360 = vmatmul.mubr.bf16.gmra.mrb[0].mxu1 %v21494_v23  ;;  %v13171_v23 = vld [vmem:[%s20299_s5 + $0x74] ss:$8 sps:$4 sm:$0xff]  }
 0x458   : > { %8369 = vmatprep.mubr.bf16.mxu1 %v21495_v16  ;;  %v13172_v16 = vld [vmem:[%s20299_s5 + $0x80] ss:$8 sps:$4 sm:$0xff]  }
 0x45b   : > { %7252 = vmatmul.mubr.bf16.gmra.mrb[212].mxu0 %v21504_v30 }
 0x45c   : > { %7261 = vmatprep.mubr.bf16.mxu0 %v18558_v44 }
 0x45f   : > { %8370 = vmatmul.mubr.bf16.gmra.mrb[4].mxu1 %v21496_v4  ;;  %v13177_v4 = vld [vmem:[%s20299_s5 + $0x94] ss:$8 sps:$4 sm:$0xff]  }
 0x460   : > { %8379 = vmatprep.mubr.bf16.mxu1 %v21497_v33  ;;  %v13178_v33 = vld [vmem:[%s20299_s5 + $0xa0] ss:$8 sps:$4 sm:$0xff]  }
 0x463   : > { %7262 = vmatmul.mubr.bf16.gmra.mrb[216].mxu0 %v18553_v41 }
 0x464   : > { %7271 = vmatprep.mubr.bf16.mxu0 %v18584_v6 }
 0x467   : > { %8380 = vmatmul.mubr.bf16.gmra.mrb[8].mxu1 %v21498_v59  ;;  %v13183_v59 = vld [vmem:[%s20299_s5 + $0xb4] ss:$8 sps:$4 sm:$0xff]  }
 0x468   : > { %8389 = vmatprep.mubr.bf16.mxu1 %v21499_v0  ;;  %v13181_v0 = vld [vmem:[%s20299_s5 + $0xb0] ss:$8 sps:$4 sm:$0xff]  }
 0x46b   : > { %7272 = vmatmul.mubr.bf16.gmra.mrb[220].mxu0 %v18579_v58 }
 0x46c   : > { %7314 = vmatprep.mubr.bf16.mxu0 %v18604_v28 }
 0x46f   : > { %8390 = vmatmul.mubr.bf16.gmra.mrb[12].mxu1 %v21500_v48  ;;  %v13184_v48 = vld [vmem:[%s20299_s5 + $0xc0] ss:$8 sps:$4 sm:$0xff]  }
 0x470   : > { %8399 = vmatprep.mubr.bf16.mxu1 %v21501_v50  ;;  %v21515_v50 = vld [vmem:[#allocation132_spill] sm:$0xff] }
 0x473   : > { %7315 = vmatmul.mubr.bf16.vlgmr.msra.gmra.mrb[160].mxu0 %v21505_v29 }
 0x474   : > { %7324 = vmatprep.mubr.bf16.mxu0 %v18626_v42  ;;  %9606 = vmatpush1.bf16.msra.mxu0 %v13142_v51 }
 0x475   : > { %9607 = vmatprep.subr.bf16.mxu0 %v13150_v56 }
 0x477   : > { %8400 = vmatmul.mubr.bf16.gmra.mrb[16].mxu1 %v21502_v61  ;;  %v13189_v61 = vld [vmem:[%s20299_s5 + $0xd4] ss:$8 sps:$4 sm:$0xff]  }
 0x478   : > { %8409 = vmatprep.mubr.bf16.mxu1 %v21503_v18  ;;  %9608 = vmatpush1.bf16.msra.mxu0 %v13148_v14 }
 0x479   : > { %9609 = vmatprep.subr.bf16.mxu0 %v13156_v2 }
 0x47b   : > { %7325 = vmatmul.mubr.bf16.gmra.mrb[164].mxu0 %v18623_v55 }
 0x47c   : > { %7334 = vmatprep.mubr.bf16.mxu0 %v18657_v13  ;;  %9610 = vmatpush1.bf16.msra.mxu0 %v13154_v35 }
 0x47d   : > { %9611 = vmatprep.subr.bf16.mxu0 %v13159_v31 }
 0x47f   : > { %8410 = vmatmul.mubr.bf16.gmra.mrb[20].mxu1 %v21504_v30 }
 0x480   : > { %8419 = vmatprep.mubr.bf16.mxu1 %v18558_v44  ;;  %9612 = vmatpush1.bf16.msra.mxu0 %v13157_v39  ;;  %v13168_v44 = vld [vmem:[%s20299_s5 + $0x64] ss:$8 sps:$4 sm:$0xff]  }
 0x481   : > { %9613 = vmatprep.subr.bf16.mxu0 %v13162_v46 }
 0x483   : > { %7335 = vmatmul.mubr.bf16.gmra.mrb[168].mxu0 %v18651_v24 }
 0x484   : > { %7344 = vmatprep.mubr.bf16.mxu0 %v18685_v53  ;;  %9614 = vmatpush1.bf16.msra.mxu0 %v13160_v15 }
 0x485   : > { %9615 = vmatprep.subr.bf16.mxu0 %v13165_v3 }
 0x487   : > { %8420 = vmatmul.mubr.bf16.gmra.mrb[24].mxu1 %v18553_v41  ;;  %v21507_v41 = vld [vmem:[#allocation125_spill] sm:$0xff] }
 0x488   : > { %8429 = vmatprep.mubr.bf16.mxu1 %v18584_v6  ;;  %9616 = vmatpush1.bf16.msra.mxu0 %v13163_v20  ;;  %v13174_v6 = vld [vmem:[%s20299_s5 + $0x84] ss:$8 sps:$4 sm:$0xff]  }
 0x489   : > { %9617 = vmatprep.subr.bf16.mxu0 %v13168_v44 }
 0x48b   : > { %7345 = vmatmul.mubr.bf16.gmra.mrb[172].mxu0 %v21506_v22 }
 0x48c   : > { %7354 = vmatprep.mubr.bf16.mxu0 %v21507_v41  ;;  %9618 = vmatpush1.bf16.msra.mxu0 %v13166_v62 }
 0x48d   : > { %9619 = vmatprep.subr.bf16.mxu0 %v13171_v23 }
 0x48f   : > { %8430 = vmatmul.mubr.bf16.gmra.mrb[28].mxu1 %v18579_v58  ;;  %v21509_v58 = vld [vmem:[#allocation218_spill] sm:$0xff] }
 0x490   : > { %8472 = vmatprep.mubr.bf16.mxu1 %v18604_v28  ;;  %9620 = vmatpush1.bf16.msra.mxu0 %v13169_v11  ;;  %v13180_v28 = vld [vmem:[%s20299_s5 + $0xa4] ss:$8 sps:$4 sm:$0xff]  }
 0x491   : > { %9621 = vmatprep.subr.bf16.mxu0 %v13174_v6 }
 0x493   : > { %7355 = vmatmul.mubr.bf16.gmra.mrb[176].mxu0 %v21508_v21 }
 0x494   : > { %7364 = vmatprep.mubr.bf16.mxu0 %v21509_v58  ;;  %9622 = vmatpush1.bf16.msra.mxu0 %v13172_v16 }
 0x495   : > { %9623 = vmatprep.subr.bf16.mxu0 %v13177_v4 }
 0x497   : > { %8473 = vmatmul.mubr.bf16.vlgmr.msra.gmra.mrb[224].mxu1 %v21505_v29 }
 0x498   : > { %8482 = vmatprep.mubr.bf16.mxu1 %v18626_v42  ;;  %9624 = vmatpush1.bf16.msra.mxu0 %v13175_v8  ;;  %v13186_v42 = vld [vmem:[%s20299_s5 + $0xc4] ss:$8 sps:$4 sm:$0xff]  }
 0x499   : > { %9625 = vmatprep.subr.bf16.mxu0 %v13180_v28 }
 0x49b   : > { %7365 = vmatmul.mubr.bf16.gmra.mrb[180].mxu0 %v21510_v10 }
 0x49c   : > { %7374 = vmatprep.mubr.bf16.mxu0 %v21511_v63  ;;  %9626 = vmatpush1.bf16.msra.mxu0 %v13178_v33 }
 0x49d   : > { %9627 = vmatprep.subr.bf16.mxu0 %v13183_v59 }
 0x49f   : > { %8483 = vmatmul.mubr.bf16.gmra.mrb[228].mxu1 %v18623_v55  ;;  %v21514_v55 = vld [vmem:[#allocation133_spill] sm:$0xff] }
 0x4a0   : > { %8492 = vmatprep.mubr.bf16.mxu1 %v18657_v13  ;;  %9628 = vmatpush1.bf16.msra.mxu0 %v13181_v0  ;;  %v21516_v13 = vld [vmem:[#allocation126_spill] sm:$0xff] }
 0x4a1   : > { %9629 = vmatprep.subr.bf16.mxu0 %v13186_v42 }
 0x4a3   : > { %7375 = vmatmul.mubr.bf16.gmra.mrb[184].mxu0 %v21512_v47 }
 0x4a4   : > { %7384 = vmatprep.mubr.bf16.mxu0 %v21513_v19  ;;  %9630 = vmatpush1.bf16.msra.mxu0 %v13184_v48 }
 0x4a5   : > { %9631 = vmatprep.subr.bf16.mxu0 %v13189_v61 }
 0x4a7   : > { %8493 = vmatmul.mubr.bf16.gmra.mrb[232].mxu1 %v18651_v24  ;;  %v21517_v24 = vld [vmem:[#allocation102_spill] sm:$0xff] }
 0x4a8   : > { %8502 = vmatprep.mubr.bf16.mxu1 %v18685_v53  ;;  %v13187_v53 = vld [vmem:[%s20299_s5 + $0xd0] ss:$8 sps:$4 sm:$0xff]  }
 0x4a9   : > { %9632 = vmatpush1.bf16.msra.mxu0 %v13187_v53 }
 0x4aa   : > { %9633 = vmatprep.subr.bf16.mxu0 %v13192_v60  ;;  %v13201_v60 = vld [vmem:[%s20299_s5 + $0x114] ss:$8 sps:$4 sm:$0xff]  }
 0x4ab   : > { %7385 = vmatmul.mubr.bf16.gmra.mrb[188].mxu0 %v21514_v55 }
 0x4ac   : > { %7394 = vmatprep.mubr.bf16.mxu0 %v21515_v50 }
 0x4af   : > { %8503 = vmatmul.mubr.bf16.gmra.mrb[236].mxu1 %v21506_v22 }
 0x4b0   : > { %8512 = vmatprep.mubr.bf16.mxu1 %v21507_v41 }
 0x4b3   : > { %7395 = vmatmul.mubr.bf16.gmra.mrb[192].mxu0 %v21516_v13 }
 0x4b4   : > { %7404 = vmatprep.mubr.bf16.mxu0 %v18895_v27 }
 0x4b7   : > { %8513 = vmatmul.mubr.bf16.gmra.mrb[240].mxu1 %v21508_v21 }
 0x4b8   : > { %8522 = vmatprep.mubr.bf16.mxu1 %v21509_v58 }
 0x4bb   : > { %7405 = vmatmul.mubr.bf16.gmra.mrb[196].mxu0 %v18889_v45 }
 0x4bc   : > { %7414 = vmatprep.mubr.bf16.mxu0 %v18920_v57 }
 0x4bf   : > { %8523 = vmatmul.mubr.bf16.gmra.mrb[244].mxu1 %v21510_v10 }
 0x4c0   : > { %8532 = vmatprep.mubr.bf16.mxu1 %v21511_v63 }
 0x4c3   : > { %7415 = vmatmul.mubr.bf16.gmra.mrb[200].mxu0 %v21517_v24 }
 0x4c4   : > { %7424 = vmatprep.mubr.bf16.mxu0 %v18942_v25 }
 0x4c7   : > { %8533 = vmatmul.mubr.bf16.gmra.mrb[248].mxu1 %v21512_v47 }
 0x4c8   : > { %8542 = vmatprep.mubr.bf16.mxu1 %v21513_v19 }
 0x4cb   : > { %7425 = vmatmul.mubr.bf16.gmra.mrb[204].mxu0 %v18939_v1 }
 0x4cc   : > { %7434 = vmatprep.mubr.bf16.mxu0 %v18964_v9 }
 0x4cf   : > { %8543 = vmatmul.mubr.bf16.gmra.mrb[252].mxu1 %v21514_v55 }
 0x4d0   : > { %8552 = vmatprep.mubr.bf16.mxu1 %v21515_v50 }
 0x4d3   : > { %7435 = vmatmul.mubr.bf16.gmra.mrb[208].mxu0 %v18961_v38 }
 0x4d4   : > { %7444 = vmatprep.mubr.bf16.mxu0 %v18978_v43 }
 0x4d7   : > { %8553 = vmatmul.mubr.bf16.gmra.mrb[0].mxu1 %v21516_v13 }
 0x4d8   : > { %8562 = vmatprep.mubr.bf16.mxu1 %v18895_v27  ;;  %v13190_v27 = vld [vmem:[%s20299_s5 + $0xe0] ss:$8 sps:$4 sm:$0xff]  }
 0x4d9   : > { %9634 = vmatpush1.bf16.msra.mxu0 %v13190_v27 }
 0x4db   : > { %7445 = vmatmul.mubr.bf16.gmra.mrb[212].mxu0 %v18975_v26 }
 0x4dc   : > { %7454 = vmatprep.mubr.bf16.mxu0 %v18992_v36 }
 0x4df   : > { %8563 = vmatmul.mubr.bf16.gmra.mrb[4].mxu1 %v18889_v45  ;;  %v13193_v45 = vld [vmem:[%s20299_s5 + $0xf0] ss:$8 sps:$4 sm:$0xff]  }
 0x4e0   : > { %8572 = vmatprep.mubr.bf16.mxu1 %v18920_v57  ;;  %v13195_v57 = vld [vmem:[%s20299_s5 + $0xf4] ss:$8 sps:$4 sm:$0xff]  }
 0x4e1   : > { %9635 = vmatprep.subr.bf16.mxu0 %v13195_v57 }
 0x4e2   : > { %9636 = vmatpush1.bf16.msra.mxu0 %v13193_v45 }
 0x4e3   : > { %7455 = vmatmul.mubr.bf16.gmra.mrb[216].mxu0 %v18989_v54 }
 0x4e4   : > { %7464 = vmatprep.mubr.bf16.mxu0 %v19006_v37 }
 0x4e7   : > { %8573 = vmatmul.mubr.bf16.gmra.mrb[8].mxu1 %v21517_v24  ;;  %v13196_v24 = vld [vmem:[%s20299_s5 + $0x100] ss:$8 sps:$4 sm:$0xff]  }
 0x4e8   : > { %8582 = vmatprep.mubr.bf16.mxu1 %v18942_v25  ;;  %v13198_v25 = vld [vmem:[%s20299_s5 + $0x104] ss:$8 sps:$4 sm:$0xff]  }
 0x4e9   : > { %9798 = vmatprep.subr.bf16.mxu0 %v13198_v25 }
 0x4eb   : > { %7465 = vmatmul.mubr.bf16.gmra.mrb[220].mxu0 %v19003_v7 }
 0x4ef   : > { %8583 = vmatmul.mubr.bf16.gmra.mrb[12].mxu1 %v18939_v1  ;;  %v19454_v1 = vld [vmem:[%s20298_s4] sm:$0xf] }
 0x4f0   : > { %8592 = vmatprep.mubr.bf16.mxu1 %v18964_v9  ;;  %v21518_v9 = vld [vmem:[#allocation3_spill] sm:$0xff] }
 0x4f7   : > { %8593 = vmatmul.mubr.bf16.gmra.mrb[16].mxu1 %v18961_v38  ;;  %v19458_v38 = vrot.slane %v19454_v1, %v21518_v9 }
 0x4f8   : > { %8602 = vmatprep.mubr.bf16.mxu1 %v18978_v43  ;;  %v21519_v43 = vld [vmem:[#allocation4_spill] sm:$0xff] }
 0x4ff   : > { %8603 = vmatmul.mubr.bf16.gmra.mrb[20].mxu1 %v18975_v26  ;;  %v19462_v26 = vrot.slane %v19454_v1, %v21519_v43 }
 0x500   : > { %8612 = vmatprep.mubr.bf16.mxu1 %v18992_v36 }
 0x507   : > { %8613 = vmatmul.mubr.bf16.gmra.mrb[24].mxu1 %v18989_v54 }
 0x508   : > { %8622 = vmatprep.mubr.bf16.mxu1 %v19006_v37 }
 0x50f   : > { %8623 = vmatmul.mubr.bf16.gmra.mrb[28].mxu1 %v19003_v7 }
 0x546   : > { %v7316_v36 = vpop.f32.mrb[160].mxu0 }
 0x547   : > { %v11507_v54 = vadd.f32 %v7316_v36, %v19458_v38  ;;  %v7318_v49 = vpop.f32.mrb[161].mxu0 }
 0x548   : > { %v11508_v37 = vadd.f32 %v7318_v49, %v19462_v26  ;;  %v7320_v7 = vpop.f32.mrb[162].mxu0 }
 0x549   : > { %v8633_v18 = vmul.f32 0.5, %v11507_v54  ;;  %v11509_v30 = vadd.f32 %v7320_v7, %v19458_v38  ;;  %v7322_v12 = vpop.f32.mrb[163].mxu0 }
 0x54a   : > { %v8634_v32 = vmul.f32 0.5, %v11508_v37  ;;  %v11510_v40 = vadd.f32 %v7322_v12, %v19462_v26 }
 0x54b   : > { %14028 = vtanh.f32 %v8633_v18  ;;  %v8637_v5 = vmul.f32 0.5, %v11509_v30 }
 0x54c   : > { %14030 = vtanh.f32 %v8634_v32  ;;  %v8638_v34 = vmul.f32 0.5, %v11510_v40  ;;  %v13199_v40 = vld [vmem:[%s20299_s5 + $0x110] ss:$8 sps:$4 sm:$0xff]  }
 0x54d   : > { %14032 = vtanh.f32 %v8637_v5 }
 0x54e   : > { %14034 = vtanh.f32 %v8638_v34  ;;  %v7326_v52 = vpop.f32.mrb[164].mxu0 }
 0x54f   : > { %v11511_v17 = vadd.f32 %v7326_v52, %v19458_v38  ;;  %v7328_v51 = vpop.f32.mrb[165].mxu0 }
 0x550   : > { %v11512_v56 = vadd.f32 %v7328_v51, %v19462_v26  ;;  %v7330_v29 = vpop.f32.mrb[166].mxu0  ;;  %v13204_v51 = vld [vmem:[%s20299_s5 + $0x124] ss:$8 sps:$4 sm:$0xff]  }
 0x551   : > { %v8641_v14 = vmul.f32 0.5, %v11511_v17  ;;  %v11513_v2 = vadd.f32 %v7330_v29, %v19458_v38  ;;  %v7332_v35 = vpop.f32.mrb[167].mxu0 }
 0x552   : > { %v8642_v31 = vmul.f32 0.5, %v11512_v56  ;;  %v11514_v39 = vadd.f32 %v7332_v35, %v19462_v26 }
 0x553   : > { %14036 = vtanh.f32 %v8641_v14  ;;  %v8645_v46 = vmul.f32 0.5, %v11513_v2 }
 0x554   : > { %14038 = vtanh.f32 %v8642_v31  ;;  %v8646_v15 = vmul.f32 0.5, %v11514_v39 }
 0x555   : > { %v14029_v3 = vpop.eup %14028  ;;  %14040 = vtanh.f32 %v8645_v46  ;;  %v13202_v46 = vld [vmem:[%s20299_s5 + $0x120] ss:$8 sps:$4 sm:$0xff]  }
 0x556   : > { %v14031_v20 = vpop.eup %14030  ;;  %v8889_v44 = vmul.f32 0.5, %v14029_v3  ;;  %14042 = vtanh.f32 %v8646_v15  ;;  %v7336_v62 = vpop.f32.mrb[168].mxu0 }
 0x557   : > { %v14033_v23 = vpop.eup %14032  ;;  %v8890_v22 = vmul.f32 0.5, %v14031_v20  ;;  %v11515_v41 = vadd.f32 %v7336_v62, %v19458_v38  ;;  %v7338_v11 = vpop.f32.mrb[169].mxu0  ;;  %v21520_v62 = vld [vmem:[#allocation31_spill] sm:$0xff] }
 0x558   : > { %v14035_v6 = vpop.eup %14034  ;;  %v8893_v16 = vmul.f32 0.5, %v14033_v23  ;;  %v11516_v4 = vadd.f32 %v7338_v11, %v19462_v26  ;;  %v7340_v21 = vpop.f32.mrb[170].mxu0  ;;  %v9017_v59 = vadd.f32 0.5, %v8889_v44  ;;  %v13207_v44 = vld [vmem:[%s20299_s5 + $0x134] ss:$8 sps:$4 sm:$0xff]   ;;  %v19500_v23 = vrot.slane %v19454_v1, %v21520_v62 }
 0x559   : > { %v8894_v58 = vmul.f32 0.5, %v14035_v6  ;;  %v8649_v8 = vmul.f32 0.5, %v11515_v41  ;;  %v11517_v28 = vadd.f32 %v7340_v21, %v19458_v38  ;;  %v7342_v33 = vpop.f32.mrb[171].mxu0  ;;  %v9018_v42 = vadd.f32 0.5, %v8890_v22 }
 0x55a   : > { %v9021_v10 = vadd.f32 0.5, %v8893_v16  ;;  %v8650_v63 = vmul.f32 0.5, %v11516_v4  ;;  %v11518_v0 = vadd.f32 %v7342_v33, %v19462_v26  ;;  %v21521_v16 = vld [vmem:[#allocation111_spill] sm:$0xff] }
 0x55b   : > { %v9022_v48 = vadd.f32 0.5, %v8894_v58  ;;  %14044 = vtanh.f32 %v8649_v8  ;;  %v8653_v47 = vmul.f32 0.5, %v11517_v28  ;;  %v19505_v4 = vrot.slane %v19454_v1, %v21521_v16  ;;  %v13216_v16 = vld [vmem:[%s20299_s5 + $0x164] ss:$8 sps:$4 sm:$0xff]  }
 0x55c   : > { %v9145_v19 = vpack.c.bf16 %v9021_v10, %v9017_v59  ;;  %14046 = vtanh.f32 %v8650_v63  ;;  %v8654_v55 = vmul.f32 0.5, %v11518_v0  ;;  %v13205_v59 = vld [vmem:[%s20299_s5 + $0x130] ss:$8 sps:$4 sm:$0xff]  }
 0x55d   : > { %v14037_v50 = vpop.eup %14036  ;;  %14048 = vtanh.f32 %v8653_v47  ;;  %v9146_v13 = vpack.c.bf16 %v9022_v48, %v9018_v42 }
 0x55e   : > { %v14039_v53 = vpop.eup %14038  ;;  %v8897_v61 = vmul.f32 0.5, %v14037_v50  ;;  %14050 = vtanh.f32 %v8654_v55  ;;  %v7346_v27 = vpop.f32.mrb[172].mxu0 }
 0x55f   : > { %v14041_v45 = vpop.eup %14040  ;;  %v8898_v57 = vmul.f32 0.5, %v14039_v53  ;;  %v11519_v25 = vadd.f32 %v7346_v27, %v19458_v38  ;;  %v7348_v36 = vpop.f32.mrb[173].mxu0  ;;  %9637 = vmatprep.mubr.bf16.mxu0 %v9146_v13  ;;  %v13210_v13 = vld [vmem:[%s20299_s5 + $0x144] ss:$8 sps:$4 sm:$0xff]  }
 0x560   : > { %v14043_v54 = vpop.eup %14042  ;;  %v8901_v49 = vmul.f32 0.5, %v14041_v45  ;;  %v11520_v37 = vadd.f32 %v7348_v36, %v19462_v26  ;;  %v7350_v7 = vpop.f32.mrb[174].mxu0  ;;  %9638 = vmatmul.mubr.bf16.vlgmr.msra.gmra.mrb[224].mxu0 %v9145_v19  ;;  %v9025_v5 = vadd.f32 0.5, %v8897_v61 }
 0x561   : > { %v8902_v18 = vmul.f32 0.5, %v14043_v54  ;;  %v8657_v30 = vmul.f32 0.5, %v11519_v25  ;;  %v11521_v12 = vadd.f32 %v7350_v7, %v19458_v38  ;;  %v7352_v32 = vpop.f32.mrb[175].mxu0  ;;  %9799 = vmatpush1.bf16.msra.mxu0 %v13196_v24  ;;  %v9026_v56 = vadd.f32 0.5, %v8898_v57 }
 0x562   : > { %v9029_v34 = vadd.f32 0.5, %v8901_v49  ;;  %v8658_v52 = vmul.f32 0.5, %v11520_v37  ;;  %v11522_v17 = vadd.f32 %v7352_v32, %v19462_v26  ;;  %9800 = vmatprep.subr.bf16.mxu0 %v13201_v60  ;;  %v13208_v37 = vld [vmem:[%s20299_s5 + $0x140] ss:$8 sps:$4 sm:$0xff]  }
 0x563   : > { %v9030_v29 = vadd.f32 0.5, %v8902_v18  ;;  %14052 = vtanh.f32 %v8657_v30  ;;  %v8661_v14 = vmul.f32 0.5, %v11521_v12 }
 0x564   : > { %14054 = vtanh.f32 %v8658_v52  ;;  %v8662_v2 = vmul.f32 0.5, %v11522_v17  ;;  %v9149_v35 = vpack.c.bf16 %v9029_v34, %v9025_v5 }
 0x565   : > { %v14045_v31 = vpop.eup %14044  ;;  %14056 = vtanh.f32 %v8661_v14  ;;  %v9150_v39 = vpack.c.bf16 %v9030_v29, %v9026_v56  ;;  %9801 = vmatpush1.bf16.msra.mxu0 %v13199_v40  ;;  %v13213_v40 = vld [vmem:[%s20299_s5 + $0x154] ss:$8 sps:$4 sm:$0xff]  }
 0x566   : > { %v14047_v15 = vpop.eup %14046  ;;  %v8905_v3 = vmul.f32 0.5, %v14045_v31  ;;  %14058 = vtanh.f32 %v8662_v2  ;;  %v7356_v20 = vpop.f32.mrb[176].mxu0  ;;  %9802 = vmatprep.subr.bf16.mxu0 %v13204_v51 }
 0x567   : > { %v14049_v22 = vpop.eup %14048  ;;  %v8906_v41 = vmul.f32 0.5, %v14047_v15  ;;  %v11523_v11 = vadd.f32 %v7356_v20, %v19458_v38  ;;  %v7358_v6 = vpop.f32.mrb[177].mxu0  ;;  %9647 = vmatprep.mubr.bf16.mxu0 %v9150_v39  ;;  %v13211_v39 = vld [vmem:[%s20299_s5 + $0x150] ss:$8 sps:$4 sm:$0xff]  }
 0x568   : > { %v14051_v21 = vpop.eup %14050  ;;  %v9033_v58 = vadd.f32 0.5, %v8905_v3  ;;  %v8909_v8 = vmul.f32 0.5, %v14049_v22  ;;  %v11524_v28 = vadd.f32 %v7358_v6, %v19462_v26  ;;  %v7360_v33 = vpop.f32.mrb[178].mxu0  ;;  %9648 = vmatmul.mubr.bf16.gmra.mrb[228].mxu0 %v9149_v35 }
 0x569   : > { %v9034_v63 = vadd.f32 0.5, %v8906_v41  ;;  %v8910_v0 = vmul.f32 0.5, %v14051_v21  ;;  %v8665_v42 = vmul.f32 0.5, %v11523_v11  ;;  %v11525_v48 = vadd.f32 %v7360_v33, %v19458_v38  ;;  %v7362_v47 = vpop.f32.mrb[179].mxu0  ;;  %9803 = vmatpush1.bf16.msra.mxu0 %v13202_v46 }
 0x56a   : > { %v8474_v10 = vpop.f32.mrb[224].mxu1  ;;  %v9037_v19 = vadd.f32 0.5, %v8909_v8  ;;  %v8666_v55 = vmul.f32 0.5, %v11524_v28  ;;  %v11526_v50 = vadd.f32 %v7362_v47, %v19462_v26  ;;  %9804 = vmatprep.subr.bf16.mxu0 %v13207_v44 }
 0x56b   : > { %v8476_v1 = vpop.f32.mrb[225].mxu1  ;;  %v11571_v24 = vadd.f32 %v8474_v10, %v19500_v23  ;;  %v9038_v61 = vadd.f32 0.5, %v8910_v0  ;;  %14060 = vtanh.f32 %v8665_v42  ;;  %v8669_v27 = vmul.f32 0.5, %v11525_v48  ;;  %v13214_v48 = vld [vmem:[%s20299_s5 + $0x160] ss:$8 sps:$4 sm:$0xff]  }
 0x56c   : > { %v8478_v53 = vpop.f32.mrb[226].mxu1  ;;  %v11572_v60 = vadd.f32 %v8476_v1, %v19505_v4  ;;  %14062 = vtanh.f32 %v8666_v55  ;;  %v8670_v57 = vmul.f32 0.5, %v11526_v50  ;;  %v9153_v25 = vpack.c.bf16 %v9037_v19, %v9033_v58 }
 0x56d   : > { %v8480_v45 = vpop.f32.mrb[227].mxu1  ;;  %v8635_v36 = vmul.f32 0.5, %v11571_v24  ;;  %v14053_v54 = vpop.eup %14052  ;;  %14064 = vtanh.f32 %v8669_v27  ;;  %v9154_v49 = vpack.c.bf16 %v9038_v61, %v9034_v63  ;;  %9805 = vmatpush1.bf16.msra.mxu0 %v13205_v59  ;;  %v11573_v18 = vadd.f32 %v8478_v53, %v19500_v23 }
 0x56e   : > { %v8636_v7 = vmul.f32 0.5, %v11572_v60  ;;  %v14055_v30 = vpop.eup %14054  ;;  %v8913_v12 = vmul.f32 0.5, %v14053_v54  ;;  %14066 = vtanh.f32 %v8670_v57  ;;  %v7366_v32 = vpop.f32.mrb[180].mxu0  ;;  %9806 = vmatprep.subr.bf16.mxu0 %v13210_v13  ;;  %v11574_v5 = vadd.f32 %v8480_v45, %v19505_v4  ;;  %v13219_v13 = vld [vmem:[%s20299_s5 + $0x174] ss:$8 sps:$4 sm:$0xff]  }
 0x56f   : > { %v14057_v34 = vpop.eup %14056  ;;  %v8914_v52 = vmul.f32 0.5, %v14055_v30  ;;  %v11527_v17 = vadd.f32 %v7366_v32, %v19458_v38  ;;  %v7368_v51 = vpop.f32.mrb[181].mxu0  ;;  %9657 = vmatprep.mubr.bf16.mxu0 %v9154_v49  ;;  %14068 = vtanh.f32 %v8635_v36  ;;  %v8639_v56 = vmul.f32 0.5, %v11573_v18 }
 0x570   : > { %v14059_v29 = vpop.eup %14058  ;;  %v9041_v14 = vadd.f32 0.5, %v8913_v12  ;;  %v8917_v2 = vmul.f32 0.5, %v14057_v34  ;;  %v11528_v35 = vadd.f32 %v7368_v51, %v19462_v26  ;;  %v7370_v31 = vpop.f32.mrb[182].mxu0  ;;  %9658 = vmatmul.mubr.bf16.gmra.mrb[232].mxu0 %v9153_v25  ;;  %14070 = vtanh.f32 %v8636_v7  ;;  %v13217_v7 = vld [vmem:[%s20299_s5 + $0x170] ss:$8 sps:$4 sm:$0xff]  }
 0x571   : > { %v9042_v15 = vadd.f32 0.5, %v8914_v52  ;;  %v8918_v3 = vmul.f32 0.5, %v14059_v29  ;;  %v8673_v20 = vmul.f32 0.5, %v11527_v17  ;;  %v11529_v44 = vadd.f32 %v7370_v31, %v19458_v38  ;;  %v7372_v62 = vpop.f32.mrb[183].mxu0  ;;  %9807 = vmatpush1.bf16.msra.mxu0 %v13208_v37 }
 0x572   : > { %v8484_v46 = vpop.f32.mrb[228].mxu1  ;;  %v9045_v41 = vadd.f32 0.5, %v8917_v2  ;;  %v8674_v11 = vmul.f32 0.5, %v11528_v35  ;;  %v11530_v6 = vadd.f32 %v7372_v62, %v19462_v26  ;;  %9808 = vmatprep.subr.bf16.mxu0 %v13213_v40  ;;  %14072 = vtanh.f32 %v8639_v56 }
 0x573   : > { %v8486_v22 = vpop.f32.mrb[229].mxu1  ;;  %v9046_v58 = vadd.f32 0.5, %v8918_v3  ;;  %14074 = vtanh.f32 %v8673_v20  ;;  %v8677_v8 = vmul.f32 0.5, %v11529_v44  ;;  %v8640_v28 = vmul.f32 0.5, %v11574_v5 }
 0x574   : > { %v8488_v21 = vpop.f32.mrb[230].mxu1  ;;  %14076 = vtanh.f32 %v8674_v11  ;;  %v8678_v59 = vmul.f32 0.5, %v11530_v6  ;;  %v9157_v10 = vpack.c.bf16 %v9045_v41, %v9041_v14  ;;  %v11575_v63 = vadd.f32 %v8484_v46, %v19500_v23  ;;  %v13222_v14 = vld [vmem:[%s20299_s5 + $0x184] ss:$8 sps:$4 sm:$0xff]   ;;  %v13220_v11 = vld [vmem:[%s20299_s5 + $0x180] ss:$8 sps:$4 sm:$0xff]  }
 0x575   : > { %v8490_v33 = vpop.f32.mrb[231].mxu1  ;;  %v14061_v0 = vpop.eup %14060  ;;  %14078 = vtanh.f32 %v8677_v8  ;;  %v9158_v42 = vpack.c.bf16 %v9046_v58, %v9042_v15  ;;  %9809 = vmatpush1.bf16.msra.mxu0 %v13211_v39  ;;  %v11576_v47 = vadd.f32 %v8486_v22, %v19505_v4  ;;  %v19542_v1 = vadd.f32 %v8488_v21, %v19500_v23 }
 0x576   : > { %v14063_v19 = vpop.eup %14062  ;;  %v8921_v55 = vmul.f32 0.5, %v14061_v0  ;;  %14080 = vtanh.f32 %v8678_v59  ;;  %v7376_v50 = vpop.f32.mrb[184].mxu0  ;;  %9810 = vmatprep.subr.bf16.mxu0 %v13216_v16  ;;  %v8643_v24 = vmul.f32 0.5, %v11575_v63  ;;  %v11578_v53 = vadd.f32 %v8490_v33, %v19505_v4 }
 0x577   : > { %v14065_v61 = vpop.eup %14064  ;;  %v8922_v27 = vmul.f32 0.5, %v14063_v19  ;;  %v11531_v60 = vadd.f32 %v7376_v50, %v19458_v38  ;;  %v7378_v45 = vpop.f32.mrb[185].mxu0  ;;  %9667 = vmatprep.mubr.bf16.mxu0 %v9158_v42  ;;  %14082 = vtanh.f32 %v8640_v28  ;;  %v8644_v57 = vmul.f32 0.5, %v11576_v47  ;;  %v13225_v28 = vld [vmem:[%s20299_s5 + $0x194] ss:$8 sps:$4 sm:$0xff]  }
 0x578   : > { %v14067_v25 = vpop.eup %14066  ;;  %v9049_v36 = vadd.f32 0.5, %v8921_v55  ;;  %v8925_v54 = vmul.f32 0.5, %v14065_v61  ;;  %v11532_v49 = vadd.f32 %v7378_v45, %v19462_v26  ;;  %v7380_v37 = vpop.f32.mrb[186].mxu0  ;;  %9668 = vmatmul.mubr.bf16.gmra.mrb[236].mxu0 %v9157_v10  ;;  %14084 = vtanh.f32 %v8643_v24 }
 0x579   : > { %v14069_v30 = vpop.eup %14068  ;;  %v9050_v12 = vadd.f32 0.5, %v8922_v27  ;;  %v8926_v32 = vmul.f32 0.5, %v14067_v25  ;;  %v8681_v40 = vmul.f32 0.5, %v11531_v60  ;;  %v11533_v5 = vadd.f32 %v7380_v37, %v19458_v38  ;;  %v7382_v34 = vpop.f32.mrb[187].mxu0  ;;  %9811 = vmatpush1.bf16.msra.mxu0 %v13214_v48 }
 0x57a   : > { %v19553_v18 = vpop.f32.mrb[232].mxu1  ;;  %v14071_v17 = vpop.eup %14070  ;;  %v9053_v51 = vadd.f32 0.5, %v8925_v54  ;;  %v8682_v56 = vmul.f32 0.5, %v11532_v49  ;;  %v11534_v29 = vadd.f32 %v7382_v34, %v19462_v26  ;;  %9812 = vmatprep.subr.bf16.mxu0 %v13219_v13  ;;  %v8891_v2 = vmul.f32 0.5, %v14069_v30 }
 0x57b   : > { %v19556_v52 = vpop.f32.mrb[233].mxu1  ;;  %v9054_v31 = vadd.f32 0.5, %v8926_v32  ;;  %14086 = vtanh.f32 %v8681_v40  ;;  %v8685_v39 = vmul.f32 0.5, %v11533_v5  ;;  %v8892_v46 = vmul.f32 0.5, %v14071_v17 }
 0x57c   : > { %v19562_v35 = vpop.f32.mrb[234].mxu1  ;;  %v14073_v3 = vpop.eup %14072  ;;  %14088 = vtanh.f32 %v8682_v56  ;;  %v8686_v20 = vmul.f32 0.5, %v11534_v29  ;;  %v9161_v44 = vpack.c.bf16 %v9053_v51, %v9049_v36  ;;  %v19566_v62 = vadd.f32 0.5, %v8891_v2  ;;  %v13226_v2 = vld [vmem:[%s20299_s5 + $0x1a0] ss:$8 sps:$4 sm:$0xff]  }
 0x57d   : > { %v19564_v15 = vpop.f32.mrb[235].mxu1  ;;  %v14075_v22 = vpop.eup %14074  ;;  %14090 = vtanh.f32 %v8685_v39  ;;  %v9162_v41 = vpack.c.bf16 %v9054_v31, %v9050_v12  ;;  %9813 = vmatpush1.bf16.msra.mxu0 %v13217_v7  ;;  %v19571_v6 = vadd.f32 0.5, %v8892_v46  ;;  %v8895_v16 = vmul.f32 0.5, %v14073_v3  ;;  %v13228_v7 = vld [vmem:[%s20299_s5 + $0x1a4] ss:$8 sps:$4 sm:$0xff]  }
 0x57e   : > { %v14077_v21 = vpop.eup %14076  ;;  %v8929_v58 = vmul.f32 0.5, %v14075_v22  ;;  %14092 = vtanh.f32 %v8686_v20  ;;  %v7386_v8 = vpop.f32.mrb[188].mxu0  ;;  %9814 = vmatprep.subr.bf16.mxu0 %v13222_v14  ;;  %v8647_v33 = vmul.f32 0.5, %v19542_v1  ;;  %v8648_v59 = vmul.f32 0.5, %v11578_v53  ;;  %v13223_v1 = vld [vmem:[%s20299_s5 + $0x190] ss:$8 sps:$4 sm:$0xff]  }
 0x57f   : > { %v14079_v10 = vpop.eup %14078  ;;  %v8930_v63 = vmul.f32 0.5, %v14077_v21  ;;  %v11535_v0 = vadd.f32 %v7386_v8, %v19458_v38  ;;  %v7388_v42 = vpop.f32.mrb[189].mxu0  ;;  %9677 = vmatprep.mubr.bf16.mxu0 %v9162_v41  ;;  %v19578_v48 = vadd.f32 0.5, %v8895_v16  ;;  %14094 = vtanh.f32 %v8644_v57 }
 0x580   : > { %v14081_v47 = vpop.eup %14080  ;;  %v9057_v19 = vadd.f32 0.5, %v8929_v58  ;;  %v8933_v55 = vmul.f32 0.5, %v14079_v10  ;;  %v11536_v50 = vadd.f32 %v7388_v42, %v19462_v26  ;;  %v7390_v13 = vpop.f32.mrb[190].mxu0  ;;  %9678 = vmatmul.mubr.bf16.gmra.mrb[240].mxu0 %v9161_v44  ;;  %14096 = vtanh.f32 %v8647_v33  ;;  %v13231_v44 = vld [vmem:[%s20299_s5 + $0x1b4] ss:$8 sps:$4 sm:$0xff]  }
 0x581   : > { %v14083_v53 = vpop.eup %14082  ;;  %v9058_v61 = vadd.f32 0.5, %v8930_v63  ;;  %v8934_v27 = vmul.f32 0.5, %v14081_v47  ;;  %v8689_v60 = vmul.f32 0.5, %v11535_v0  ;;  %v11537_v45 = vadd.f32 %v7390_v13, %v19458_v38  ;;  %v7392_v57 = vpop.f32.mrb[191].mxu0  ;;  %9815 = vmatpush1.bf16.msra.mxu0 %v13220_v11 }
 0x582   : > { %v19584_v24 = vpop.f32.mrb[236].mxu1  ;;  %v14085_v36 = vpop.eup %14084  ;;  %v9061_v54 = vadd.f32 0.5, %v8933_v55  ;;  %v8690_v49 = vmul.f32 0.5, %v11536_v50  ;;  %v11538_v37 = vadd.f32 %v7392_v57, %v19462_v26  ;;  %9816 = vmatprep.subr.bf16.mxu0 %v13225_v28  ;;  %v8896_v5 = vmul.f32 0.5, %v14083_v53 }
 0x583   : > { %v19587_v25 = vpop.f32.mrb[237].mxu1  ;;  %v9062_v32 = vadd.f32 0.5, %v8934_v27  ;;  %14098 = vtanh.f32 %v8689_v60  ;;  %v8693_v40 = vmul.f32 0.5, %v11537_v45  ;;  %v8899_v56 = vmul.f32 0.5, %v14085_v36  ;;  %v13234_v45 = vld [vmem:[%s20299_s5 + $0x1c4] ss:$8 sps:$4 sm:$0xff]  }
 0x584   : > { %v19595_v12 = vpop.f32.mrb[238].mxu1  ;;  %14100 = vtanh.f32 %v8690_v49  ;;  %v8694_v17 = vmul.f32 0.5, %v11538_v37  ;;  %v9165_v51 = vpack.c.bf16 %v9061_v54, %v9057_v19  ;;  %v19602_v31 = vadd.f32 0.5, %v8896_v5 }
 0x585   : > { %v19597_v34 = vpop.f32.mrb[239].mxu1  ;;  %v14087_v29 = vpop.eup %14086  ;;  %14102 = vtanh.f32 %v8693_v40  ;;  %v9166_v14 = vpack.c.bf16 %v9062_v32, %v9058_v61  ;;  %9817 = vmatpush1.bf16.msra.mxu0 %v13223_v1  ;;  %v11579_v39 = vadd.f32 %v19553_v18, %v19500_v23  ;;  %v19609_v22 = vadd.f32 0.5, %v8899_v56  ;;  %v13229_v18 = vld [vmem:[%s20299_s5 + $0x1b0] ss:$8 sps:$4 sm:$0xff]   ;;  %v13232_v56 = vld [vmem:[%s20299_s5 + $0x1c0] ss:$8 sps:$4 sm:$0xff]  }
 0x586   : > { %v14089_v46 = vpop.eup %14088  ;;  %v8937_v3 = vmul.f32 0.5, %v14087_v29  ;;  %14104 = vtanh.f32 %v8694_v17  ;;  %v7396_v20 = vpop.f32.mrb[192].mxu0  ;;  %9818 = vmatprep.subr.bf16.mxu0 %v13228_v7  ;;  %v11580_v41 = vadd.f32 %v19556_v52, %v19505_v4 }
 0x587   : > { %v14091_v11 = vpop.eup %14090  ;;  %v8938_v16 = vmul.f32 0.5, %v14089_v46  ;;  %v11539_v21 = vadd.f32 %v7396_v20, %v19458_v38  ;;  %v7398_v58 = vpop.f32.mrb[193].mxu0  ;;  %9687 = vmatprep.mubr.bf16.mxu0 %v9166_v14  ;;  %14106 = vtanh.f32 %v8648_v59  ;;  %v8651_v8 = vmul.f32 0.5, %v11579_v39 }
 0x588   : > { %v14093_v28 = vpop.eup %14092  ;;  %v9065_v33 = vadd.f32 0.5, %v8937_v3  ;;  %v8941_v10 = vmul.f32 0.5, %v14091_v11  ;;  %v11540_v63 = vadd.f32 %v7398_v58, %v19462_v26  ;;  %v7400_v0 = vpop.f32.mrb[194].mxu0  ;;  %9688 = vmatmul.mubr.bf16.gmra.mrb[244].mxu0 %v9165_v51  ;;  %v8652_v52 = vmul.f32 0.5, %v11580_v41  ;;  %v13237_v3 = vld [vmem:[%s20299_s5 + $0x1d4] ss:$8 sps:$4 sm:$0xff]  }
 0x589   : > { %v14095_v47 = vpop.eup %14094  ;;  %v9066_v19 = vadd.f32 0.5, %v8938_v16  ;;  %v8942_v55 = vmul.f32 0.5, %v14093_v28  ;;  %v8697_v50 = vmul.f32 0.5, %v11539_v21  ;;  %v11541_v13 = vadd.f32 %v7400_v0, %v19458_v38  ;;  %v7402_v1 = vpop.f32.mrb[195].mxu0  ;;  %9819 = vmatpush1.bf16.msra.mxu0 %v13226_v2 }
 0x58a   : > { %v19618_v42 = vpop.f32.mrb[240].mxu1  ;;  %v14097_v53 = vpop.eup %14096  ;;  %v9069_v61 = vadd.f32 0.5, %v8941_v10  ;;  %v8698_v27 = vmul.f32 0.5, %v11540_v63  ;;  %v11542_v60 = vadd.f32 %v7402_v1, %v19462_v26  ;;  %9820 = vmatprep.subr.bf16.mxu0 %v13231_v44  ;;  %v8900_v57 = vmul.f32 0.5, %v14095_v47 }
 0x58b   : > { %v19621_v59 = vpop.f32.mrb[241].mxu1  ;;  %v9070_v54 = vadd.f32 0.5, %v8942_v55  ;;  %14108 = vtanh.f32 %v8697_v50  ;;  %v8701_v49 = vmul.f32 0.5, %v11541_v13  ;;  %v8903_v37 = vmul.f32 0.5, %v14097_v53 }
 0x58c   : > { %v19627_v36 = vpop.f32.mrb[242].mxu1  ;;  %14110 = vtanh.f32 %v8698_v27  ;;  %v8702_v32 = vmul.f32 0.5, %v11542_v60  ;;  %v9169_v40 = vpack.c.bf16 %v9069_v61, %v9065_v33  ;;  %v19631_v5 = vadd.f32 0.5, %v8900_v57 }
 0x58d   : > { %v19629_v7 = vpop.f32.mrb[243].mxu1  ;;  %v14099_v17 = vpop.eup %14098  ;;  %14112 = vtanh.f32 %v8701_v49  ;;  %v9170_v51 = vpack.c.bf16 %v9070_v54, %v9066_v19  ;;  %9821 = vmatpush1.bf16.msra.mxu0 %v13229_v18  ;;  %v19636_v29 = vadd.f32 0.5, %v8903_v37  ;;  %v11581_v14 = vadd.f32 %v19562_v35, %v19500_v23 }
 0x58e   : > { %v14101_v2 = vpop.eup %14100  ;;  %v8945_v39 = vmul.f32 0.5, %v14099_v17  ;;  %14114 = vtanh.f32 %v8702_v32  ;;  %v7406_v46 = vpop.f32.mrb[196].mxu0  ;;  %9822 = vmatprep.subr.bf16.mxu0 %v13234_v45  ;;  %v11582_v20 = vadd.f32 %v19564_v15, %v19505_v4  ;;  %v11583_v44 = vadd.f32 %v19584_v24, %v19500_v23  ;;  %v13235_v15 = vld [vmem:[%s20299_s5 + $0x1d0] ss:$8 sps:$4 sm:$0xff]  }
 0x58f   : > { %v14103_v41 = vpop.eup %14102  ;;  %v8946_v11 = vmul.f32 0.5, %v14101_v2  ;;  %v11543_v16 = vadd.f32 %v7406_v46, %v19458_v38  ;;  %v7408_v35 = vpop.f32.mrb[197].mxu0  ;;  %9697 = vmatprep.mubr.bf16.mxu0 %v9170_v51  ;;  %14116 = vtanh.f32 %v8651_v8  ;;  %v8655_v21 = vmul.f32 0.5, %v11581_v14  ;;  %v13238_v51 = vld [vmem:[%s20299_s5 + $0x1e0] ss:$8 sps:$4 sm:$0xff]  }
 0x590   : > { %v14105_v58 = vpop.eup %14104  ;;  %v9073_v18 = vadd.f32 0.5, %v8945_v39  ;;  %v8949_v28 = vmul.f32 0.5, %v14103_v41  ;;  %v11544_v33 = vadd.f32 %v7408_v35, %v19462_v26  ;;  %v7410_v10 = vpop.f32.mrb[198].mxu0  ;;  %9698 = vmatmul.mubr.bf16.gmra.mrb[248].mxu0 %v9169_v40  ;;  %14118 = vtanh.f32 %v8652_v52  ;;  %v13240_v52 = vld [vmem:[%s20299_s5 + $0x1e4] ss:$8 sps:$4 sm:$0xff]  }
 0x591   : > { %v14107_v63 = vpop.eup %14106  ;;  %v9074_v0 = vadd.f32 0.5, %v8946_v11  ;;  %v8950_v47 = vmul.f32 0.5, %v14105_v58  ;;  %v8705_v19 = vmul.f32 0.5, %v11543_v16  ;;  %v11545_v8 = vadd.f32 %v7410_v10, %v19458_v38  ;;  %v7412_v55 = vpop.f32.mrb[199].mxu0  ;;  %9823 = vmatpush1.bf16.msra.mxu0 %v13232_v56 }
 0x592   : > { %v19652_v24 = vpop.f32.mrb[244].mxu1  ;;  %v9077_v13 = vadd.f32 0.5, %v8949_v28  ;;  %v8706_v1 = vmul.f32 0.5, %v11544_v33  ;;  %v11546_v53 = vadd.f32 %v7412_v55, %v19462_v26  ;;  %9824 = vmatprep.subr.bf16.mxu0 %v13237_v3  ;;  %v8904_v61 = vmul.f32 0.5, %v14107_v63  ;;  %v13243_v3 = vld [vmem:[%s20299_s5 + $0x1f4] ss:$8 sps:$4 sm:$0xff]  }
 0x593   : > { %v19655_v50 = vpop.f32.mrb[245].mxu1  ;;  %v9078_v60 = vadd.f32 0.5, %v8950_v47  ;;  %14120 = vtanh.f32 %v8705_v19  ;;  %v8709_v45 = vmul.f32 0.5, %v11545_v8  ;;  %v8656_v57 = vmul.f32 0.5, %v11582_v20 }
 0x594   : > { %v19661_v27 = vpop.f32.mrb[246].mxu1  ;;  %14122 = vtanh.f32 %v8706_v1  ;;  %v8710_v49 = vmul.f32 0.5, %v11546_v53  ;;  %v9173_v37 = vpack.c.bf16 %v9077_v13, %v9073_v18  ;;  %v19665_v32 = vadd.f32 0.5, %v8904_v61 }
 0x595   : > { %v19663_v54 = vpop.f32.mrb[247].mxu1  ;;  %v14109_v40 = vpop.eup %14108  ;;  %14124 = vtanh.f32 %v8709_v45  ;;  %v9174_v17 = vpack.c.bf16 %v9078_v60, %v9074_v0  ;;  %9825 = vmatpush1.bf16.msra.mxu0 %v13235_v15  ;;  %v19670_v56 = vmul.f32 0.5, %v11583_v44  ;;  %v11584_v14 = vadd.f32 %v19587_v25, %v19505_v4  ;;  %v13241_v15 = vld [vmem:[%s20299_s5 + $0x1f0] ss:$8 sps:$4 sm:$0xff]  }
 0x596   : > { %v14111_v2 = vpop.eup %14110  ;;  %v8953_v39 = vmul.f32 0.5, %v14109_v40  ;;  %14126 = vtanh.f32 %v8710_v49  ;;  %v7416_v46 = vpop.f32.mrb[200].mxu0  ;;  %9826 = vmatprep.subr.bf16.mxu0 %v13240_v52  ;;  %v11585_v41 = vadd.f32 %v19595_v12, %v19500_v23 }
 0x597   : > { %v14113_v44 = vpop.eup %14112  ;;  %v8954_v11 = vmul.f32 0.5, %v14111_v2  ;;  %v11547_v16 = vadd.f32 %v7416_v46, %v19458_v38  ;;  %v7418_v25 = vpop.f32.mrb[201].mxu0  ;;  %9707 = vmatprep.mubr.bf16.mxu0 %v9174_v17  ;;  %14128 = vtanh.f32 %v8655_v21  ;;  %v8660_v35 = vmul.f32 0.5, %v11584_v14 }
 0x598   : > { %v14115_v58 = vpop.eup %14114  ;;  %v9081_v18 = vadd.f32 0.5, %v8953_v39  ;;  %v8957_v28 = vmul.f32 0.5, %v14113_v44  ;;  %v11548_v33 = vadd.f32 %v7418_v25, %v19462_v26  ;;  %v7420_v10 = vpop.f32.mrb[202].mxu0  ;;  %9708 = vmatmul.mubr.bf16.gmra.mrb[252].mxu0 %v9173_v37  ;;  %14130 = vtanh.f32 %v8656_v57 }
 0x599   : > { %v14117_v63 = vpop.eup %14116  ;;  %v9082_v0 = vadd.f32 0.5, %v8954_v11  ;;  %v8958_v47 = vmul.f32 0.5, %v14115_v58  ;;  %v8713_v19 = vmul.f32 0.5, %v11547_v16  ;;  %v11549_v21 = vadd.f32 %v7420_v10, %v19458_v38  ;;  %v7422_v8 = vpop.f32.mrb[203].mxu0  ;;  %9827 = vmatpush1.bf16.msra.mxu0 %v13238_v51 }
 0x59a   : > { %v19686_v12 = vpop.f32.mrb[248].mxu1  ;;  %v14119_v13 = vpop.eup %14118  ;;  %v9085_v1 = vadd.f32 0.5, %v8957_v28  ;;  %v8714_v53 = vmul.f32 0.5, %v11548_v33  ;;  %v11550_v52 = vadd.f32 %v7422_v8, %v19462_v26  ;;  %v8907_v61 = vmul.f32 0.5, %v14117_v63  ;;  %9828 = vmatprep.subr.bf16.mxu0 %v13243_v3 }
 0x59b   : > { %v19689_v55 = vpop.f32.mrb[249].mxu1  ;;  %v9086_v45 = vadd.f32 0.5, %v8958_v47  ;;  %14132 = vtanh.f32 %v8713_v19  ;;  %v8717_v57 = vmul.f32 0.5, %v11549_v21  ;;  %v8908_v49 = vmul.f32 0.5, %v14119_v13 }
 0x59c   : > { %v19692_v60 = vpop.f32.mrb[250].mxu1  ;;  %v9177_v40 = vpack.c.bf16 %v9085_v1, %v9081_v18  ;;  %14134 = vtanh.f32 %v8714_v53  ;;  %v8718_v17 = vmul.f32 0.5, %v11550_v52  ;;  %v19696_v51 = vadd.f32 0.5, %v8907_v61 }
 0x59d   : > { %v19694_v37 = vpop.f32.mrb[251].mxu1  ;;  %v14121_v14 = vpop.eup %14120  ;;  %14136 = vtanh.f32 %v8717_v57  ;;  %v9178_v2 = vpack.c.bf16 %v9086_v45, %v9082_v0  ;;  %v19698_v39 = vadd.f32 0.5, %v8908_v49  ;;  %9829 = vmatpush1.bf16.msra.mxu0 %v13241_v15  ;;  %v8663_v46 = vmul.f32 0.5, %v11585_v41 }
 0x59e   : > { %21522 = vst [vmem:[#allocation137_spill] sm:$0xff] %v19696_v51  ;;  %v14123_v3 = vpop.eup %14122  ;;  %v8961_v44 = vmul.f32 0.5, %v14121_v14  ;;  %14138 = vtanh.f32 %v8718_v17  ;;  %v7426_v11 = vpop.f32.mrb[204].mxu0  ;;  %v11586_v16 = vadd.f32 %v19597_v34, %v19505_v4  ;;  %v11587_v25 = vadd.f32 %v19618_v42, %v19500_v23 }
 0x59f   : > { %21523 = vst [vmem:[#allocation43_spill] sm:$0xff] %v19698_v39  ;;  %v14125_v58 = vpop.eup %14124  ;;  %v8962_v18 = vmul.f32 0.5, %v14123_v3  ;;  %v11551_v28 = vadd.f32 %v7426_v11, %v19458_v38  ;;  %v7428_v33 = vpop.f32.mrb[205].mxu0  ;;  %9717 = vmatprep.mubr.bf16.mxu0 %v9178_v2  ;;  %14140 = vtanh.f32 %v19670_v56  ;;  %v11588_v41 = vadd.f32 %v19621_v59, %v19505_v4 }
 0x5a0   : > { %v14127_v10 = vpop.eup %14126  ;;  %v9089_v15 = vadd.f32 0.5, %v8961_v44  ;;  %v8965_v63 = vmul.f32 0.5, %v14125_v58  ;;  %v11552_v0 = vadd.f32 %v7428_v33, %v19462_v26  ;;  %v7430_v34 = vpop.f32.mrb[206].mxu0  ;;  %9718 = vmatmul.mubr.bf16.gmra.mrb[0].mxu0 %v9177_v40  ;;  %14142 = vtanh.f32 %v8660_v35 }
 0x5a1   : > { %v14129_v47 = vpop.eup %14128  ;;  %v9090_v19 = vadd.f32 0.5, %v8962_v18  ;;  %v8966_v21 = vmul.f32 0.5, %v14127_v10  ;;  %v8721_v8 = vmul.f32 0.5, %v11551_v28  ;;  %v11553_v13 = vadd.f32 %v7430_v34, %v19458_v38  ;;  %v7432_v56 = vpop.f32.mrb[207].mxu0 }
 0x5a2   : > { %v19709_v42 = vpop.f32.mrb[252].mxu1  ;;  %v14131_v59 = vpop.eup %14130  ;;  %v9093_v53 = vadd.f32 0.5, %v8965_v63  ;;  %v8722_v52 = vmul.f32 0.5, %v11552_v0  ;;  %v11554_v61 = vadd.f32 %v7432_v56, %v19462_v26  ;;  %v8911_v45 = vmul.f32 0.5, %v14129_v47 }
 0x5a3   : > { %v19712_v1 = vpop.f32.mrb[253].mxu1  ;;  %v9094_v35 = vadd.f32 0.5, %v8966_v21  ;;  %14144 = vtanh.f32 %v8721_v8  ;;  %v8725_v49 = vmul.f32 0.5, %v11553_v13  ;;  %v8912_v40 = vmul.f32 0.5, %v14131_v59 }
 0x5a4   : > { %v19715_v57 = vpop.f32.mrb[254].mxu1  ;;  %v9181_v14 = vpack.c.bf16 %v9093_v53, %v9089_v15  ;;  %14146 = vtanh.f32 %v8722_v52  ;;  %v8726_v2 = vmul.f32 0.5, %v11554_v61  ;;  %v19719_v3 = vadd.f32 0.5, %v8911_v45 }
 0x5a5   : > { %v19717_v17 = vpop.f32.mrb[255].mxu1  ;;  %v14133_v44 = vpop.eup %14132  ;;  %14148 = vtanh.f32 %v8725_v49  ;;  %v9182_v11 = vpack.c.bf16 %v9094_v35, %v9090_v19  ;;  %v19721_v58 = vadd.f32 0.5, %v8912_v40  ;;  %v8664_v18 = vmul.f32 0.5, %v11586_v16 }
 0x5a6   : > { %21524 = vst [vmem:[#allocation202_spill] sm:$0xff] %v19719_v3  ;;  %v14135_v28 = vpop.eup %14134  ;;  %v8969_v33 = vmul.f32 0.5, %v14133_v44  ;;  %14150 = vtanh.f32 %v8726_v2  ;;  %v7436_v10 = vpop.f32.mrb[208].mxu0  ;;  %v8667_v63 = vmul.f32 0.5, %v11587_v25  ;;  %v8668_v0 = vmul.f32 0.5, %v11588_v41 }
 0x5a7   : > { %21525 = vst [vmem:[#allocation134_spill] sm:$0xff] %v19721_v58  ;;  %v14137_v34 = vpop.eup %14136  ;;  %v8970_v47 = vmul.f32 0.5, %v14135_v28  ;;  %v11555_v15 = vadd.f32 %v7436_v10, %v19458_v38  ;;  %v7438_v21 = vpop.f32.mrb[209].mxu0  ;;  %9727 = vmatprep.mubr.bf16.mxu0 %v9182_v11  ;;  %14152 = vtanh.f32 %v8663_v46 }
 0x5a8   : > { %v14139_v19 = vpop.eup %14138  ;;  %v9097_v13 = vadd.f32 0.5, %v8969_v33  ;;  %v8973_v56 = vmul.f32 0.5, %v14137_v34  ;;  %v11556_v16 = vadd.f32 %v7438_v21, %v19462_v26  ;;  %v7440_v59 = vpop.f32.mrb[210].mxu0  ;;  %9728 = vmatmul.mubr.bf16.gmra.mrb[4].mxu0 %v9181_v14  ;;  %14154 = vtanh.f32 %v8664_v18 }
 0x5a9   : > { %v14141_v41 = vpop.eup %14140  ;;  %v9098_v53 = vadd.f32 0.5, %v8970_v47  ;;  %v8974_v52 = vmul.f32 0.5, %v14139_v19  ;;  %v8729_v61 = vmul.f32 0.5, %v11555_v15  ;;  %v11557_v45 = vadd.f32 %v7440_v59, %v19458_v38  ;;  %v7442_v46 = vpop.f32.mrb[211].mxu0 }
 0x5aa   : > { %v19727_v25 = vpop.f32.mrb[0].mxu1  ;;  %v14143_v49 = vpop.eup %14142  ;;  %v9101_v40 = vadd.f32 0.5, %v8973_v56  ;;  %v8730_v2 = vmul.f32 0.5, %v11556_v16  ;;  %v11558_v44 = vadd.f32 %v7442_v46, %v19462_v26  ;;  %v8915_v11 = vmul.f32 0.5, %v14141_v41 }
 0x5ab   : > { %v19730_v35 = vpop.f32.mrb[1].mxu1  ;;  %v9102_v14 = vadd.f32 0.5, %v8974_v52  ;;  %14156 = vtanh.f32 %v8729_v61  ;;  %v8733_v18 = vmul.f32 0.5, %v11557_v45  ;;  %v8916_v33 = vmul.f32 0.5, %v14143_v49 }
 0x5ac   : > { %v19733_v28 = vpop.f32.mrb[2].mxu1  ;;  %v9185_v34 = vpack.c.bf16 %v9101_v40, %v9097_v13  ;;  %14158 = vtanh.f32 %v8730_v2  ;;  %v8734_v47 = vmul.f32 0.5, %v11558_v44  ;;  %v19737_v15 = vadd.f32 0.5, %v8915_v11 }
 0x5ad   : > { %v19735_v10 = vpop.f32.mrb[3].mxu1  ;;  %v14145_v21 = vpop.eup %14144  ;;  %14160 = vtanh.f32 %v8733_v18  ;;  %v9186_v19 = vpack.c.bf16 %v9102_v14, %v9098_v53  ;;  %v19739_v56 = vadd.f32 0.5, %v8916_v33  ;;  %v11589_v16 = vadd.f32 %v19627_v36, %v19500_v23 }
 0x5ae   : > { %v14147_v59 = vpop.eup %14146  ;;  %v8977_v41 = vmul.f32 0.5, %v14145_v21  ;;  %14162 = vtanh.f32 %v8734_v47  ;;  %v7446_v52 = vpop.f32.mrb[212].mxu0  ;;  %v11590_v13 = vadd.f32 %v19629_v7, %v19505_v4 }
 0x5af   : > { %v14149_v45 = vpop.eup %14148  ;;  %v8978_v46 = vmul.f32 0.5, %v14147_v59  ;;  %v11559_v49 = vadd.f32 %v7446_v52, %v19458_v38  ;;  %v7448_v53 = vpop.f32.mrb[213].mxu0  ;;  %9737 = vmatprep.mubr.bf16.mxu0 %v9186_v19  ;;  %14164 = vtanh.f32 %v8667_v63  ;;  %v8671_v40 = vmul.f32 0.5, %v11589_v16 }
 0x5b0   : > { %v14151_v2 = vpop.eup %14150  ;;  %v9105_v36 = vadd.f32 0.5, %v8977_v41  ;;  %v8981_v44 = vmul.f32 0.5, %v14149_v45  ;;  %v11560_v11 = vadd.f32 %v7448_v53, %v19462_v26  ;;  %v7450_v14 = vpop.f32.mrb[214].mxu0  ;;  %9738 = vmatmul.mubr.bf16.gmra.mrb[8].mxu0 %v9185_v34  ;;  %14166 = vtanh.f32 %v8668_v0 }
 0x5b1   : > { %v14153_v33 = vpop.eup %14152  ;;  %v9106_v7 = vadd.f32 0.5, %v8978_v46  ;;  %v8982_v47 = vmul.f32 0.5, %v14151_v2  ;;  %v8737_v21 = vmul.f32 0.5, %v11559_v49  ;;  %v11561_v59 = vadd.f32 %v7450_v14, %v19458_v38  ;;  %v7452_v52 = vpop.f32.mrb[215].mxu0 }
 0x5b2   : > { %v19749_v18 = vpop.f32.mrb[4].mxu1  ;;  %v14155_v63 = vpop.eup %14154  ;;  %v9109_v16 = vadd.f32 0.5, %v8981_v44  ;;  %v8738_v41 = vmul.f32 0.5, %v11560_v11  ;;  %v11562_v45 = vadd.f32 %v7452_v52, %v19462_v26  ;;  %v8919_v53 = vmul.f32 0.5, %v14153_v33 }
 0x5b3   : > { %v19752_v19 = vpop.f32.mrb[5].mxu1  ;;  %v9110_v0 = vadd.f32 0.5, %v8982_v47  ;;  %14168 = vtanh.f32 %v8737_v21  ;;  %v8741_v34 = vmul.f32 0.5, %v11561_v59  ;;  %v8920_v8 = vmul.f32 0.5, %v14155_v63 }
 0x5b4   : > { %v19755_v61 = vpop.f32.mrb[6].mxu1  ;;  %v9189_v49 = vpack.c.bf16 %v9109_v16, %v9105_v36  ;;  %14170 = vtanh.f32 %v8738_v41  ;;  %v8742_v2 = vmul.f32 0.5, %v11562_v45  ;;  %v19759_v14 = vadd.f32 0.5, %v8919_v53 }
 0x5b5   : > { %v19757_v46 = vpop.f32.mrb[7].mxu1  ;;  %v14157_v30 = vpop.eup %14156  ;;  %14172 = vtanh.f32 %v8741_v34  ;;  %v9190_v44 = vpack.c.bf16 %v9110_v0, %v9106_v7  ;;  %v19761_v11 = vadd.f32 0.5, %v8920_v8  ;;  %v8672_v52 = vmul.f32 0.5, %v11590_v13 }
 0x5b6   : > { %v14159_v33 = vpop.eup %14158  ;;  %v8985_v20 = vmul.f32 0.5, %v14157_v30  ;;  %14174 = vtanh.f32 %v8742_v2  ;;  %v7456_v47 = vpop.f32.mrb[216].mxu0  ;;  %v11591_v21 = vadd.f32 %v19652_v24, %v19500_v23  ;;  %v11592_v36 = vadd.f32 %v19655_v50, %v19505_v4 }
 0x5b7   : > { %v14161_v59 = vpop.eup %14160  ;;  %v8986_v63 = vmul.f32 0.5, %v14159_v33  ;;  %v11563_v16 = vadd.f32 %v7456_v47, %v19458_v38  ;;  %v7458_v41 = vpop.f32.mrb[217].mxu0  ;;  %9747 = vmatprep.mubr.bf16.mxu0 %v9190_v44  ;;  %14176 = vtanh.f32 %v8671_v40 }
 0x5b8   : > { %v14163_v13 = vpop.eup %14162  ;;  %v9113_v30 = vadd.f32 0.5, %v8985_v20  ;;  %v8989_v7 = vmul.f32 0.5, %v14161_v59  ;;  %v11564_v45 = vadd.f32 %v7458_v41, %v19462_v26  ;;  %v7460_v53 = vpop.f32.mrb[218].mxu0  ;;  %9748 = vmatmul.mubr.bf16.gmra.mrb[12].mxu0 %v9189_v49  ;;  %14178 = vtanh.f32 %v8672_v52 }
 0x5b9   : > { %v14165_v50 = vpop.eup %14164  ;;  %v9114_v0 = vadd.f32 0.5, %v8986_v63  ;;  %v8990_v34 = vmul.f32 0.5, %v14163_v13  ;;  %v8745_v2 = vmul.f32 0.5, %v11563_v16  ;;  %v11565_v44 = vadd.f32 %v7460_v53, %v19458_v38  ;;  %v7462_v40 = vpop.f32.mrb[219].mxu0 }
 0x5ba   : > { %v19771_v24 = vpop.f32.mrb[8].mxu1  ;;  %v14167_v47 = vpop.eup %14166  ;;  %v9117_v8 = vadd.f32 0.5, %v8989_v7  ;;  %v8746_v20 = vmul.f32 0.5, %v11564_v45  ;;  %v11566_v59 = vadd.f32 %v7462_v40, %v19462_v26  ;;  %v8923_v41 = vmul.f32 0.5, %v14165_v50 }
 0x5bb   : > { %v19774_v33 = vpop.f32.mrb[9].mxu1  ;;  %v9118_v49 = vadd.f32 0.5, %v8990_v34  ;;  %14180 = vtanh.f32 %v8745_v2  ;;  %v8749_v52 = vmul.f32 0.5, %v11565_v44  ;;  %v8924_v9 = vmul.f32 0.5, %v14167_v47 }
 0x5bc   : > { %v19777_v43 = vpop.f32.mrb[10].mxu1  ;;  %v9193_v16 = vpack.c.bf16 %v9117_v8, %v9113_v30  ;;  %14182 = vtanh.f32 %v8746_v20  ;;  %v8750_v13 = vmul.f32 0.5, %v11566_v59  ;;  %v19781_v53 = vadd.f32 0.5, %v8923_v41 }
 0x5bd   : > { %v19779_v63 = vpop.f32.mrb[11].mxu1  ;;  %v14169_v39 = vpop.eup %14168  ;;  %14184 = vtanh.f32 %v8749_v52  ;;  %v9194_v7 = vpack.c.bf16 %v9118_v49, %v9114_v0  ;;  %v19783_v45 = vadd.f32 0.5, %v8924_v9  ;;  %v8675_v40 = vmul.f32 0.5, %v11591_v21 }
 0x5be   : > { %21526 = vst [vmem:[#allocation42_spill] sm:$0xff] %v19781_v53  ;;  %v14171_v50 = vpop.eup %14170  ;;  %v8993_v58 = vmul.f32 0.5, %v14169_v39  ;;  %14186 = vtanh.f32 %v8750_v13  ;;  %v7466_v34 = vpop.f32.mrb[220].mxu0  ;;  %v8676_v2 = vmul.f32 0.5, %v11592_v36  ;;  %v11593_v44 = vadd.f32 %v19661_v27, %v19500_v23 }
 0x5bf   : > { %v14173_v47 = vpop.eup %14172  ;;  %v8994_v8 = vmul.f32 0.5, %v14171_v50  ;;  %v11567_v30 = vadd.f32 %v7466_v34, %v19458_v38  ;;  %v7468_v20 = vpop.f32.mrb[221].mxu0  ;;  %9757 = vmatprep.mubr.bf16.mxu0 %v9194_v7  ;;  %14188 = vtanh.f32 %v8675_v40 }
 0x5c0   : > { %v14175_v0 = vpop.eup %14174  ;;  %v9121_v21 = vadd.f32 0.5, %v8993_v58  ;;  %v8997_v59 = vmul.f32 0.5, %v14173_v47  ;;  %v11568_v39 = vadd.f32 %v7468_v20, %v19462_v26  ;;  %v7470_v41 = vpop.f32.mrb[222].mxu0  ;;  %9758 = vmatmul.mubr.bf16.gmra.mrb[16].mxu0 %v9193_v16  ;;  %14190 = vtanh.f32 %v8676_v2 }
 0x5c1   : > { %v14177_v27 = vpop.eup %14176  ;;  %v9122_v49 = vadd.f32 0.5, %v8994_v8  ;;  %v8998_v52 = vmul.f32 0.5, %v14175_v0  ;;  %v8753_v13 = vmul.f32 0.5, %v11567_v30  ;;  %v11569_v7 = vadd.f32 %v7470_v41, %v19458_v38  ;;  %v7472_v40 = vpop.f32.mrb[223].mxu0 }
 0x5c2   : > { %v19791_v36 = vpop.f32.mrb[12].mxu1  ;;  %v14179_v34 = vpop.eup %14178  ;;  %v9125_v9 = vadd.f32 0.5, %v8997_v59  ;;  %v8754_v58 = vmul.f32 0.5, %v11568_v39  ;;  %v11570_v47 = vadd.f32 %v7472_v40, %v19462_v26  ;;  %v8927_v20 = vmul.f32 0.5, %v14177_v27 }
 0x5c3   : > { %v19794_v50 = vpop.f32.mrb[13].mxu1  ;;  %v9126_v16 = vadd.f32 0.5, %v8998_v52  ;;  %14192 = vtanh.f32 %v8753_v13  ;;  %v8757_v2 = vmul.f32 0.5, %v11569_v7  ;;  %v8928_v3 = vmul.f32 0.5, %v14179_v34 }
 0x5c4   : > { %v19797_v51 = vpop.f32.mrb[14].mxu1  ;;  %v9197_v30 = vpack.c.bf16 %v9125_v9, %v9121_v21  ;;  %14194 = vtanh.f32 %v8754_v58  ;;  %v8758_v38 = vmul.f32 0.5, %v11570_v47  ;;  %v19801_v0 = vadd.f32 0.5, %v8927_v20 }
 0x5c5   : > { %v19799_v8 = vpop.f32.mrb[15].mxu1  ;;  %v14181_v41 = vpop.eup %14180  ;;  %14196 = vtanh.f32 %v8757_v2  ;;  %v9198_v59 = vpack.c.bf16 %v9126_v16, %v9122_v49  ;;  %v19803_v39 = vadd.f32 0.5, %v8928_v3  ;;  %v8679_v26 = vmul.f32 0.5, %v11593_v44 }
 0x5c6   : > { %v14183_v27 = vpop.eup %14182  ;;  %v9001_v40 = vmul.f32 0.5, %v14181_v41  ;;  %14198 = vtanh.f32 %v8758_v38  ;;  %v11594_v52 = vadd.f32 %v19663_v54, %v19505_v4  ;;  %v11595_v13 = vadd.f32 %v19686_v12, %v19500_v23  ;;  %v13244_v12 = vld [vmem:[%s20301_s7 + $0x40] sm:$0xff]  }
 0x5c7   : > { %v14185_v9 = vpop.eup %14184  ;;  %v9002_v21 = vmul.f32 0.5, %v14183_v27  ;;  %9767 = vmatprep.mubr.bf16.mxu0 %v9198_v59  ;;  %14200 = vtanh.f32 %v8679_v26  ;;  %v11596_v7 = vadd.f32 %v19689_v55, %v19505_v4  ;;  %v11597_v55 = vadd.f32 %v19692_v60, %v19500_v23  ;;  %11379 = vmatprep.subr.bf16.mxu1 %v13244_v12 }
 0x5c8   : > { %v14187_v44 = vpop.eup %14186  ;;  %v9129_v49 = vadd.f32 0.5, %v9001_v40  ;;  %v9005_v34 = vmul.f32 0.5, %v14185_v9  ;;  %9768 = vmatmul.mubr.bf16.gmra.mrb[20].mxu0 %v9197_v30  ;;  %v8680_v58 = vmul.f32 0.5, %v11594_v52  ;;  %v8683_v47 = vmul.f32 0.5, %v11595_v13  ;;  %v13245_v30 = vld [vmem:[%s20301_s7] sm:$0xff]  }
 0x5c9   : > { %v14189_v20 = vpop.eup %14188  ;;  %v9130_v16 = vadd.f32 0.5, %v9002_v21  ;;  %v9006_v2 = vmul.f32 0.5, %v14187_v44  ;;  %v8684_v38 = vmul.f32 0.5, %v11596_v7  ;;  %v8687_v60 = vmul.f32 0.5, %v11597_v55  ;;  %11380 = vmatpush3.bf16.msra.mxu1 %v13245_v30 }
 0x5ca   : > { %v19813_v54 = vpop.f32.mrb[16].mxu1  ;;  %v14191_v59 = vpop.eup %14190  ;;  %v9133_v26 = vadd.f32 0.5, %v9005_v34  ;;  %v8931_v27 = vmul.f32 0.5, %v14189_v20  ;;  %14202 = vtanh.f32 %v8680_v58  ;;  %v11598_v34 = vadd.f32 %v19694_v37, %v19505_v4 }
 0x5cb   : > { %v19820_v41 = vpop.f32.mrb[17].mxu1  ;;  %v9134_v13 = vadd.f32 0.5, %v9006_v2  ;;  %v8932_v9 = vmul.f32 0.5, %v14191_v59  ;;  %14204 = vtanh.f32 %v8683_v47  ;;  %v11599_v12 = vadd.f32 %v19709_v42, %v19500_v23 }
 0x5cc   : > { %v19827_v52 = vpop.f32.mrb[18].mxu1  ;;  %v9201_v7 = vpack.c.bf16 %v9133_v26, %v9129_v49  ;;  %v19831_v44 = vadd.f32 0.5, %v8931_v27  ;;  %14206 = vtanh.f32 %v8684_v38  ;;  %v8688_v55 = vmul.f32 0.5, %v11598_v34 }
 0x5cd   : > { %v19829_v21 = vpop.f32.mrb[19].mxu1  ;;  %v14193_v58 = vpop.eup %14192  ;;  %v9202_v20 = vpack.c.bf16 %v9134_v13, %v9130_v16  ;;  %v19835_v40 = vadd.f32 0.5, %v8932_v9  ;;  %14208 = vtanh.f32 %v8687_v60  ;;  %v11600_v49 = vadd.f32 %v19712_v1, %v19505_v4 }
 0x5ce   : > { %v14195_v47 = vpop.eup %14194  ;;  %v9009_v2 = vmul.f32 0.5, %v14193_v58  ;;  %v8691_v37 = vmul.f32 0.5, %v11599_v12  ;;  %v11601_v16 = vadd.f32 %v19715_v57, %v19500_v23  ;;  %14210 = vtanh.f32 %v8688_v55 }
 0x5cf   : > { %v14197_v30 = vpop.eup %14196  ;;  %v9010_v59 = vmul.f32 0.5, %v14195_v47  ;;  %9777 = vmatprep.mubr.bf16.mxu0 %v9202_v20  ;;  %v8692_v9 = vmul.f32 0.5, %v11600_v49  ;;  %v11602_v26 = vadd.f32 %v19717_v17, %v19505_v4  ;;  %v11603_v55 = vadd.f32 %v19727_v25, %v19500_v23 }
 0x5d0   : > { %v14199_v42 = vpop.eup %14198  ;;  %v9137_v27 = vadd.f32 0.5, %v9009_v2  ;;  %v9013_v13 = vmul.f32 0.5, %v14197_v30  ;;  %9778 = vmatmul.mubr.bf16.gmra.mrb[24].mxu0 %v9201_v7  ;;  %14212 = vtanh.f32 %v8691_v37  ;;  %v8695_v20 = vmul.f32 0.5, %v11601_v16 }
 0x5d1   : > { %v14201_v60 = vpop.eup %14200  ;;  %v9138_v34 = vadd.f32 0.5, %v9010_v59  ;;  %v9014_v58 = vmul.f32 0.5, %v14199_v42  ;;  %14214 = vtanh.f32 %v8692_v9  ;;  %v11604_v49 = vadd.f32 %v19730_v35, %v19505_v4 }
 0x5d2   : > { %v19847_v1 = vpop.f32.mrb[20].mxu1  ;;  %v9141_v47 = vadd.f32 0.5, %v9013_v13  ;;  %v8935_v57 = vmul.f32 0.5, %v14201_v60  ;;  %14216 = vtanh.f32 %v8695_v20  ;;  %v8696_v42 = vmul.f32 0.5, %v11602_v26 }
 0x5d3   : > { %v19849_v12 = vpop.f32.mrb[21].mxu1  ;;  %v9142_v7 = vadd.f32 0.5, %v9014_v58  ;;  %v11605_v17 = vadd.f32 %v19733_v28, %v19500_v23  ;;  %v8699_v58 = vmul.f32 0.5, %v11603_v55  ;;  %v8700_v20 = vmul.f32 0.5, %v11604_v49  ;;  %v13246_v55 = vld [vmem:[%s20301_s7 + $0x48] sm:$0xff]  }
 0x5d4   : > { %v19853_v2 = vpop.f32.mrb[22].mxu1  ;;  %v14203_v59 = vpop.eup %14202  ;;  %v9205_v37 = vpack.c.bf16 %v9141_v47, %v9137_v27  ;;  %v19861_v16 = vadd.f32 0.5, %v8935_v57  ;;  %14218 = vtanh.f32 %v8696_v42  ;;  %v11606_v28 = vadd.f32 %v19735_v10, %v19505_v4  ;;  %v13248_v10 = vld [vmem:[%s20301_s7 + $0x50] sm:$0xff]   ;;  %11381 = vmatprep.subr.bf16.mxu1 %v13246_v55 }
 0x5d5   : > { %v19859_v30 = vpop.f32.mrb[23].mxu1  ;;  %v14205_v13 = vpop.eup %14204  ;;  %v9206_v9 = vpack.c.bf16 %v9142_v7, %v9138_v34  ;;  %v8936_v60 = vmul.f32 0.5, %v14203_v59  ;;  %v8703_v3 = vmul.f32 0.5, %v11605_v17  ;;  %14220 = vtanh.f32 %v8699_v58 }
 0x5d6   : > { %v14207_v38 = vpop.eup %14206  ;;  %v8939_v25 = vmul.f32 0.5, %v14205_v13  ;;  %v9167_v35 = vpack.c.bf16 %v19861_v16, %v19831_v44  ;;  %14222 = vtanh.f32 %v8700_v20  ;;  %v11607_v57 = vadd.f32 %v19749_v18, %v19500_v23 }
 0x5d7   : > { %v14209_v53 = vpop.eup %14208  ;;  %9787 = vmatprep.mubr.bf16.mxu0 %v9206_v9  ;;  %v19867_v27 = vadd.f32 0.5, %v8936_v60  ;;  %v8940_v26 = vmul.f32 0.5, %v14207_v38  ;;  %v13247_v38 = vld [vmem:[%s20301_s7 + $0x8] sm:$0xff]   ;;  %14224 = vtanh.f32 %v8703_v3  ;;  %v8704_v59 = vmul.f32 0.5, %v11606_v28 }
 0x5d8   : > { %9788 = vmatmul.mubr.bf16.gmra.mrb[28].mxu0 %v9205_v37  ;;  %v19871_v34 = vadd.f32 0.5, %v8939_v25  ;;  %v8943_v47 = vmul.f32 0.5, %v14209_v53  ;;  %v21527_v53 = vpack.c.bf16 %v19602_v31, %v19571_v6  ;;  %v14211_v42 = vpop.eup %14210  ;;  %v8707_v13 = vmul.f32 0.5, %v11607_v57  ;;  %11382 = vmatpush3.bf16.msra.mxu1 %v13247_v38 }
 0x5d9   : > { %v19889_v49 = vadd.f32 0.5, %v8940_v26  ;;  %v9168_v18 = vpack.c.bf16 %v19867_v27, %v19835_v40  ;;  %v11608_v9 = vadd.f32 %v19752_v19, %v19505_v4  ;;  %v11609_v6 = vadd.f32 %v19755_v61, %v19500_v23  ;;  %v13249_v19 = vld [vmem:[%s20301_s7 + $0x10] sm:$0xff]   ;;  %11383 = vmatprep.subr.bf16.mxu1 %v13248_v10 }
 0x5da   : > { %v19875_v7 = vpop.f32.mrb[24].mxu1  ;;  %9830 = vmatprep.mubr.bf16.mxu0 %v21527_v53  ;;  %v19895_v17 = vadd.f32 0.5, %v8943_v47  ;;  %v14213_v60 = vpop.eup %14212  ;;  %v8944_v58 = vmul.f32 0.5, %v14211_v42  ;;  %14226 = vtanh.f32 %v8704_v59  ;;  %v11610_v3 = vadd.f32 %v19757_v46, %v19505_v4  ;;  %v13250_v46 = vld [vmem:[%s20301_s7 + $0x58] sm:$0xff]  }
 0x5db   : > { %v19893_v37 = vpop.f32.mrb[25].mxu1  ;;  %v11611_v20 = vadd.f32 %v19771_v24, %v19500_v23  ;;  %v14215_v61 = vpop.eup %14214  ;;  %v8947_v26 = vmul.f32 0.5, %v14213_v60  ;;  %14228 = vtanh.f32 %v8707_v13  ;;  %v8708_v28 = vmul.f32 0.5, %v11608_v9  ;;  %v13251_v60 = vld [vmem:[%s20301_s7 + $0x18] sm:$0xff]  }
 0x5dc   : > { %v19901_v31 = vpop.f32.mrb[26].mxu1  ;;  %v8711_v47 = vmul.f32 0.5, %v11609_v6  ;;  %v14217_v57 = vpop.eup %14216  ;;  %v19915_v55 = vadd.f32 0.5, %v8944_v58  ;;  %v8948_v24 = vmul.f32 0.5, %v14215_v61  ;;  %v8712_v53 = vmul.f32 0.5, %v11610_v3  ;;  %11384 = vmatpush3.bf16.msra.mxu1 %v13249_v19  ;;  %v13252_v19 = vld [vmem:[%s20301_s7 + $0x60] sm:$0xff]  }
 0x5dd   : > { %v19907_v25 = vpop.f32.mrb[27].mxu1  ;;  %v19919_v59 = vadd.f32 0.5, %v8947_v26  ;;  %v8951_v42 = vmul.f32 0.5, %v14217_v57  ;;  %14230 = vtanh.f32 %v8708_v28  ;;  %v8715_v13 = vmul.f32 0.5, %v11611_v20  ;;  %11385 = vmatprep.subr.bf16.mxu1 %v13250_v46 }
 0x5de   : > { %v19921_v9 = vadd.f32 0.5, %v8948_v24  ;;  %14232 = vtanh.f32 %v8711_v47  ;;  %v11612_v6 = vadd.f32 %v19774_v33, %v19505_v4  ;;  %v14219_v58 = vpop.eup %14218  ;;  %v21528_v3 = vpack.c.bf16 %v19578_v48, %v19566_v62 }
 0x5df   : > { %v19933_v20 = vadd.f32 0.5, %v8951_v42  ;;  %14234 = vtanh.f32 %v8712_v53  ;;  %v11613_v61 = vadd.f32 %v19777_v43, %v19500_v23  ;;  %v11614_v26 = vadd.f32 %v19779_v63, %v19505_v4  ;;  %v14221_v28 = vpop.eup %14220 }
 0x5e0   : > { %9831 = vmatmul.mubr.bf16.vlgmr.msra.gmra.mrb[224].mxu0 %v21528_v3  ;;  %v21529_v62 = vpack.c.bf16 %v19665_v32, %v19631_v5  ;;  %v8952_v48 = vmul.f32 0.5, %v14219_v58  ;;  %14236 = vtanh.f32 %v8715_v13  ;;  %v8716_v47 = vmul.f32 0.5, %v11612_v6  ;;  %v14223_v63 = vpop.eup %14222  ;;  %11386 = vmatpush3.bf16.msra.mxu1 %v13251_v60 }
 0x5e1   : > { %v11615_v43 = vadd.f32 %v19791_v36, %v19500_v23  ;;  %v8955_v24 = vmul.f32 0.5, %v14221_v28  ;;  %v8719_v46 = vmul.f32 0.5, %v11613_v61  ;;  %v8720_v42 = vmul.f32 0.5, %v11614_v26  ;;  %v14225_v38 = vpop.eup %14224  ;;  %v13253_v36 = vld [vmem:[%s20301_s7 + $0x20] sm:$0xff]   ;;  %11387 = vmatprep.subr.bf16.mxu1 %v13252_v19  ;;  %v13254_v28 = vld [vmem:[%s20301_s7 + $0x68] sm:$0xff]  }
 0x5e2   : > { %v19939_v33 = vpop.f32.mrb[28].mxu1  ;;  %9840 = vmatprep.mubr.bf16.mxu0 %v21529_v62  ;;  %v19955_v5 = vadd.f32 0.5, %v8952_v48  ;;  %v8956_v32 = vmul.f32 0.5, %v14223_v63  ;;  %14238 = vtanh.f32 %v8716_v47  ;;  %v8959_v61 = vmul.f32 0.5, %v14225_v38 }
 0x5e3   : > { %v19949_v57 = vpop.f32.mrb[29].mxu1  ;;  %v8723_v13 = vmul.f32 0.5, %v11615_v43  ;;  %v19962_v58 = vadd.f32 0.5, %v8955_v24  ;;  %14240 = vtanh.f32 %v8719_v46  ;;  %v11616_v26 = vadd.f32 %v19794_v50, %v19505_v4 }
 0x5e4   : > { %v19953_v3 = vpop.f32.mrb[30].mxu1  ;;  %v14227_v62 = vpop.eup %14226  ;;  %v19969_v48 = vadd.f32 0.5, %v8956_v32  ;;  %14242 = vtanh.f32 %v8720_v42  ;;  %v11617_v47 = vadd.f32 %v19797_v51, %v19500_v23  ;;  %v19975_v43 = vadd.f32 0.5, %v8959_v61  ;;  %11388 = vmatpush3.bf16.msra.mxu1 %v13253_v36  ;;  %v13255_v42 = vld [vmem:[%s20301_s7 + $0x28] sm:$0xff]  }
 0x5e5   : > { %v19957_v6 = vpop.f32.mrb[31].mxu1  ;;  %v14229_v38 = vpop.eup %14228  ;;  %v8960_v63 = vmul.f32 0.5, %v14227_v62  ;;  %14244 = vtanh.f32 %v8723_v13  ;;  %v8724_v50 = vmul.f32 0.5, %v11616_v26  ;;  %v11618_v46 = vadd.f32 %v19799_v8, %v19505_v4  ;;  %11389 = vmatprep.subr.bf16.mxu1 %v13254_v28  ;;  %v21531_v62 = vld [vmem:[#allocation134_spill] sm:$0xff] }
 0x5e6   : > { %v8963_v19 = vmul.f32 0.5, %v14229_v38  ;;  %v8727_v24 = vmul.f32 0.5, %v11617_v47  ;;  %v11619_v32 = vadd.f32 %v19813_v54, %v19500_v23  ;;  %v21530_v61 = vpack.c.bf16 %v19636_v29, %v19609_v22  ;;  %v13256_v54 = vld [vmem:[%s20301_s7 + $0x70] sm:$0xff]   ;;  %v21532_v47 = vld [vmem:[#allocation43_spill] sm:$0xff] }
 0x5e7   : > { %v14231_v51 = vpop.eup %14230  ;;  %v19989_v26 = vadd.f32 0.5, %v8960_v63  ;;  %14246 = vtanh.f32 %v8724_v50  ;;  %v11620_v8 = vadd.f32 %v19820_v41, %v19505_v4  ;;  %v21533_v38 = vpack.c.bf16 %v21531_v62, %v21532_v47 }
 0x5e8   : > { %9841 = vmatmul.mubr.bf16.gmra.mrb[228].mxu0 %v21530_v61  ;;  %v14233_v36 = vpop.eup %14232  ;;  %v19999_v22 = vadd.f32 0.5, %v8963_v19  ;;  %v8964_v29 = vmul.f32 0.5, %v14231_v51  ;;  %14248 = vtanh.f32 %v8727_v24  ;;  %v8728_v63 = vmul.f32 0.5, %v11618_v46  ;;  %11390 = vmatpush3.bf16.msra.mxu1 %v13255_v42  ;;  %v13257_v19 = vld [vmem:[%s20301_s7 + $0x30] sm:$0xff]  }
 0x5e9   : > { %9850 = vmatprep.mubr.bf16.mxu0 %v21533_v38  ;;  %v14235_v61 = vpop.eup %14234  ;;  %v8967_v50 = vmul.f32 0.5, %v14233_v36  ;;  %v9180_v41 = vpack.c.bf16 %v19989_v26, %v19969_v48  ;;  %v8731_v28 = vmul.f32 0.5, %v11619_v32  ;;  %v8732_v13 = vmul.f32 0.5, %v11620_v8  ;;  %11391 = vmatprep.subr.bf16.mxu1 %v13256_v54  ;;  %v21534_v54 = vld [vmem:[#allocation202_spill] sm:$0xff] }
 0x5ea   : > { %v14237_v53 = vpop.eup %14236  ;;  %v20003_v60 = vadd.f32 0.5, %v8964_v29  ;;  %v8968_v10 = vmul.f32 0.5, %v14235_v61  ;;  %14250 = vtanh.f32 %v8728_v63  ;;  %v11621_v62 = vadd.f32 %v19827_v52, %v19500_v23 }
 0x5eb   : > { %v20010_v24 = vadd.f32 0.5, %v8967_v50  ;;  %v8971_v46 = vmul.f32 0.5, %v14237_v53  ;;  %14252 = vtanh.f32 %v8731_v28  ;;  %v11622_v32 = vadd.f32 %v19829_v21, %v19505_v4  ;;  %v21535_v50 = vld [vmem:[#allocation137_spill] sm:$0xff] }
 0x5ec   : > { %v14239_v51 = vpop.eup %14238  ;;  %v20014_v8 = vadd.f32 0.5, %v8968_v10  ;;  %14254 = vtanh.f32 %v8732_v13  ;;  %v8735_v36 = vmul.f32 0.5, %v11621_v62  ;;  %v11623_v52 = vadd.f32 %v19847_v1, %v19500_v23  ;;  %11392 = vmatpush3.bf16.msra.mxu1 %v13257_v19 }
 0x5ed   : > { %v14241_v42 = vpop.eup %14240  ;;  %v9183_v47 = vpack.c.bf16 %v20010_v24, %v19999_v22  ;;  %v20020_v38 = vadd.f32 0.5, %v8971_v46  ;;  %v8972_v53 = vmul.f32 0.5, %v14239_v51  ;;  %v8736_v29 = vmul.f32 0.5, %v11622_v32 }
 0x5ee   : > { %v14243_v63 = vpop.eup %14242  ;;  %v8975_v61 = vmul.f32 0.5, %v14241_v42  ;;  %v9184_v21 = vpack.c.bf16 %v20014_v8, %v20003_v60  ;;  %14256 = vtanh.f32 %v8735_v36  ;;  %v8739_v10 = vmul.f32 0.5, %v11623_v52 }
 0x5ef   : > { %v14245_v13 = vpop.eup %14244  ;;  %v21536_v1 = vpack.c.bf16 %v21534_v54, %v21535_v50  ;;  %v20027_v28 = vadd.f32 0.5, %v8972_v53  ;;  %v8976_v62 = vmul.f32 0.5, %v14243_v63  ;;  %14258 = vtanh.f32 %v8736_v29 }
 0x5f0   : > { %v11624_v46 = vadd.f32 %v19849_v12, %v19505_v4  ;;  %v21537_v32 = vpack.c.bf16 %v19761_v11, %v19739_v56  ;;  %v20034_v51 = vadd.f32 0.5, %v8975_v61  ;;  %v8979_v36 = vmul.f32 0.5, %v14245_v13 }
 0x5f1   : > { %9851 = vmatmul.mubr.bf16.gmra.mrb[232].mxu0 %v21536_v1  ;;  %14260 = vtanh.f32 %v8739_v10  ;;  %v11625_v19 = vadd.f32 %v19853_v2, %v19500_v23  ;;  %v14247_v52 = vpop.eup %14246  ;;  %v20038_v42 = vadd.f32 0.5, %v8976_v62  ;;  %v11626_v29 = vadd.f32 %v19859_v30, %v19505_v4 }
 0x5f2   : > { %9860 = vmatprep.mubr.bf16.mxu0 %v21537_v32  ;;  %v8740_v53 = vmul.f32 0.5, %v11624_v46  ;;  %v11627_v12 = vadd.f32 %v19875_v7, %v19500_v23  ;;  %v14249_v63 = vpop.eup %14248  ;;  %v9187_v56 = vpack.c.bf16 %v20034_v51, %v20020_v38  ;;  %v8980_v11 = vmul.f32 0.5, %v14247_v52 }
 0x5f3   : > { %v8743_v61 = vmul.f32 0.5, %v11625_v19  ;;  %v8983_v10 = vmul.f32 0.5, %v14249_v63  ;;  %v9188_v2 = vpack.c.bf16 %v20038_v42, %v20027_v28  ;;  %v8744_v13 = vmul.f32 0.5, %v11626_v29 }
 0x5f4   : > { %14262 = vtanh.f32 %v8740_v53  ;;  %v14251_v54 = vpop.eup %14250  ;;  %v20048_v50 = vadd.f32 0.5, %v8979_v36  ;;  %v8747_v30 = vmul.f32 0.5, %v11627_v12  ;;  %v11628_v7 = vadd.f32 %v19893_v37, %v19505_v4 }
 0x5f5   : > { %14264 = vtanh.f32 %v8743_v61  ;;  %v14253_v1 = vpop.eup %14252  ;;  %v20052_v62 = vadd.f32 0.5, %v8983_v10  ;;  %v8984_v46 = vmul.f32 0.5, %v14251_v54  ;;  %v11629_v32 = vadd.f32 %v19901_v31, %v19500_v23 }
 0x5f6   : > { %14266 = vtanh.f32 %v8744_v13  ;;  %v14255_v19 = vpop.eup %14254  ;;  %v20056_v52 = vadd.f32 0.5, %v8980_v11  ;;  %v8748_v53 = vmul.f32 0.5, %v11628_v7  ;;  %v11630_v36 = vadd.f32 %v19907_v25, %v19505_v4 }
 0x5f7   : > { %14268 = vtanh.f32 %v8747_v30  ;;  %v21538_v29 = vpack.c.bf16 %v19759_v14, %v19737_v15  ;;  %v9191_v37 = vpack.c.bf16 %v20052_v62, %v20048_v50  ;;  %v20065_v12 = vadd.f32 0.5, %v8984_v46 }
 0x5f8   : > { %v8987_v63 = vmul.f32 0.5, %v14253_v1  ;;  %v8751_v61 = vmul.f32 0.5, %v11629_v32  ;;  %v14257_v31 = vpop.eup %14256  ;;  %v21539_v11 = vpack.c.bf16 %v19803_v39, %v19783_v45  ;;  %v8988_v10 = vmul.f32 0.5, %v14255_v19 }
 0x5f9   : > { %9861 = vmatmul.mubr.bf16.gmra.mrb[236].mxu0 %v21538_v29  ;;  %14270 = vtanh.f32 %v8748_v53  ;;  %v8752_v13 = vmul.f32 0.5, %v11630_v36  ;;  %v11631_v25 = vadd.f32 %v19939_v33, %v19500_v23  ;;  %v14259_v15 = vpop.eup %14258  ;;  %v8991_v14 = vmul.f32 0.5, %v14257_v31 }
 0x5fa   : > { %9870 = vmatprep.mubr.bf16.mxu0 %v21539_v11  ;;  %v9192_v54 = vpack.c.bf16 %v20065_v12, %v20056_v52  ;;  %14272 = vtanh.f32 %v8751_v61  ;;  %v8992_v7 = vmul.f32 0.5, %v14259_v15  ;;  %v11632_v45 = vadd.f32 %v19949_v57, %v19505_v4 }
 0x5fb   : > { %v14261_v30 = vpop.eup %14260  ;;  %14274 = vtanh.f32 %v8752_v13  ;;  %v8755_v1 = vmul.f32 0.5, %v11631_v25  ;;  %v20076_v39 = vadd.f32 0.5, %v8987_v63  ;;  %v20078_v46 = vadd.f32 0.5, %v8991_v14 }
 0x5fc   : > { %v11633_v33 = vadd.f32 %v19953_v3, %v19500_v23  ;;  %v11634_v32 = vadd.f32 %v19957_v6, %v19505_v4  ;;  %v20084_v19 = vadd.f32 0.5, %v8988_v10  ;;  %v20086_v53 = vadd.f32 0.5, %v8992_v7  ;;  %v21540_v3 = vld [vmem:[#allocation42_spill] sm:$0xff] }
 0x5fd   : > { %14276 = vtanh.f32 %v8755_v1  ;;  %v8756_v36 = vmul.f32 0.5, %v11632_v45  ;;  %v9195_v57 = vpack.c.bf16 %v20078_v46, %v20076_v39  ;;  %v8995_v63 = vmul.f32 0.5, %v14261_v30 }
 0x5fe   : > { %v14263_v29 = vpop.eup %14262  ;;  %v8759_v61 = vmul.f32 0.5, %v11633_v33  ;;  %v8760_v31 = vmul.f32 0.5, %v11634_v32  ;;  %v9196_v23 = vpack.c.bf16 %v20086_v53, %v20084_v19  ;;  %v21541_v6 = vpack.c.bf16 %v19801_v0, %v21540_v3 }
 0x5ff   : > { %v14265_v11 = vpop.eup %14264  ;;  %v8996_v13 = vmul.f32 0.5, %v14263_v29  ;;  %14278 = vtanh.f32 %v8756_v36  ;;  %v9123_v14 = vadd.f32 0.5, %v8995_v63  ;;  %v21542_v63 = vpack.c.bf16 %v19915_v55, %v19889_v49 }
 0x600   : > { %v14267_v4 = vpop.eup %14266  ;;  %v8999_v10 = vmul.f32 0.5, %v14265_v11  ;;  %14280 = vtanh.f32 %v8759_v61  ;;  %v21544_v49 = vpack.c.bf16 %v19955_v5, %v19921_v9  ;;  %v21545_v55 = vpack.c.bf16 %v19933_v20, %v19919_v59  ;;  %v9273_v59 = vld [vmem:[%s20300_s6] sm:$0x3]  ;;  %v21547_v9 = vld [vmem:[#allocation3_spill] sm:$0xff]  ;;  %v21548_v5 = vld [vmem:[#allocation4_spill] sm:$0xff] }
 0x601   : > { %9871 = vmatmul.mubr.bf16.gmra.mrb[240].mxu0 %v21541_v6  ;;  %v14269_v25 = vpop.eup %14268  ;;  %v9000_v15 = vmul.f32 0.5, %v14267_v4  ;;  %14282 = vtanh.f32 %v8760_v31  ;;  %v9124_v1 = vadd.f32 0.5, %v8996_v13  ;;  %v20147_v20 = vrot.slane %v9273_v59, %v21547_v9 }
 0x602   : > { %9880 = vmatprep.mubr.bf16.mxu0 %v9168_v18  ;;  %v9127_v30 = vadd.f32 0.5, %v8999_v10  ;;  %v9003_v39 = vmul.f32 0.5, %v14269_v25 }
 0x603   : > { %v14271_v7 = vpop.eup %14270  ;;  %v9128_v45 = vadd.f32 0.5, %v9000_v15 }
 0x604   : > { %v14273_v46 = vpop.eup %14272  ;;  %v9199_v33 = vpack.c.bf16 %v9127_v30, %v9123_v14  ;;  %v9004_v32 = vmul.f32 0.5, %v14271_v7  ;;  %v9131_v61 = vadd.f32 0.5, %v9003_v39 }
 0x605   : > { %v14275_v0 = vpop.eup %14274  ;;  %v9007_v19 = vmul.f32 0.5, %v14273_v46  ;;  %v9200_v53 = vpack.c.bf16 %v9128_v45, %v9124_v1  ;;  %v21546_v45 = vpack.c.bf16 %v19975_v43, %v19962_v58  ;;  %v20150_v58 = vrot.slane %v9273_v59, %v21548_v5 }
 0x606   : > { %v9008_v36 = vmul.f32 0.5, %v14275_v0  ;;  %v9132_v40 = vadd.f32 0.5, %v9004_v32 }
 0x607   : > { %v14277_v29 = vpop.eup %14276  ;;  %v9135_v11 = vadd.f32 0.5, %v9007_v19 }
 0x608   : > { %v9136_v27 = vadd.f32 0.5, %v9008_v36  ;;  %v9011_v13 = vmul.f32 0.5, %v14277_v29 }
 0x609   : > { %9881 = vmatmul.mubr.bf16.gmra.mrb[244].mxu0 %v9167_v35  ;;  %v14279_v18 = vpop.eup %14278  ;;  %v9203_v31 = vpack.c.bf16 %v9135_v11, %v9131_v61  ;;  %v21543_v35 = vpack.c.bf16 %v19895_v17, %v19871_v34  ;;  %v13258_v34 = vld [vmem:[%s20301_s7 + $0x78] sm:$0xff]  }
 0x60a   : > { %9890 = vmatprep.mubr.bf16.mxu0 %v21542_v63  ;;  %v14281_v4 = vpop.eup %14280  ;;  %v9012_v3 = vmul.f32 0.5, %v14279_v18  ;;  %v9204_v6 = vpack.c.bf16 %v9136_v27, %v9132_v40  ;;  %v9139_v14 = vadd.f32 0.5, %v9011_v13  ;;  %v13259_v17 = vld [vmem:[%s20301_s7 + $0x38] sm:$0xff]   ;;  %11393 = vmatprep.subr.bf16.mxu1 %v13258_v34 }
 0x60b   : > { %v14283_v10 = vpop.eup %14282  ;;  %v9015_v25 = vmul.f32 0.5, %v14281_v4  ;;  %11394 = vmatpush3.bf16.msra.mxu1 %v13259_v17 }
 0x60c   : > { %v9016_v15 = vmul.f32 0.5, %v14283_v10  ;;  %v9140_v7 = vadd.f32 0.5, %v9012_v3 }
 0x60d   : > { %v9143_v30 = vadd.f32 0.5, %v9015_v25 }
 0x60e   : > { %v9144_v44 = vadd.f32 0.5, %v9016_v15 }
 0x60f   : > { %v9207_v16 = vpack.c.bf16 %v9143_v30, %v9139_v14 }
 0x610   : > { %v9208_v1 = vpack.c.bf16 %v9144_v44, %v9140_v7 }
 0x611   : > { %9891 = vmatmul.mubr.bf16.gmra.mrb[248].mxu0 %v21543_v35 }
 0x612   : > { %9900 = vmatprep.mubr.bf16.mxu0 %v21544_v49 }
 0x619   : > { %9901 = vmatmul.mubr.bf16.gmra.mrb[252].mxu0 %v21545_v55 }
 0x61a   : > { %9910 = vmatprep.mubr.bf16.mxu0 %v9180_v41 }
 0x621   : > { %9911 = vmatmul.mubr.bf16.gmra.mrb[0].mxu0 %v21546_v45 }
 0x622   : > { %9920 = vmatprep.mubr.bf16.mxu0 %v9184_v21 }
 0x629   : > { %9921 = vmatmul.mubr.bf16.gmra.mrb[4].mxu0 %v9183_v47 }
 0x62a   : > { %9930 = vmatprep.mubr.bf16.mxu0 %v9188_v2 }
 0x631   : > { %9931 = vmatmul.mubr.bf16.gmra.mrb[8].mxu0 %v9187_v56 }
 0x632   : > { %9940 = vmatprep.mubr.bf16.mxu0 %v9192_v54 }
 0x639   : > { %9941 = vmatmul.mubr.bf16.gmra.mrb[12].mxu0 %v9191_v37 }
 0x63a   : > { %9950 = vmatprep.mubr.bf16.mxu0 %v9196_v23 }
 0x641   : > { %9951 = vmatmul.mubr.bf16.gmra.mrb[16].mxu0 %v9195_v57 }
 0x642   : > { %9960 = vmatprep.mubr.bf16.mxu0 %v9200_v53 }
 0x649   : > { %9961 = vmatmul.mubr.bf16.gmra.mrb[20].mxu0 %v9199_v33 }
 0x64a   : > { %9970 = vmatprep.mubr.bf16.mxu0 %v9204_v6 }
 0x651   : > { %9971 = vmatmul.mubr.bf16.gmra.mrb[24].mxu0 %v9203_v31 }
 0x652   : > { %9980 = vmatprep.mubr.bf16.mxu0 %v9208_v1 }
 0x659   : > { %9981 = vmatmul.mubr.bf16.gmra.mrb[28].mxu0 %v9207_v16 }
 0x6b3   : > { %v9832_v48 = vpop.f32.mrb[224].mxu0 }
 0x6b4   : > { %v11635_v60 = vadd.f32 %v9832_v48, %v20147_v20  ;;  %v9834_v43 = vpop.f32.mrb[225].mxu0 }
 0x6b5   : > { %v11636_v26 = vadd.f32 %v9834_v43, %v20150_v58  ;;  %v9836_v22 = vpop.f32.mrb[226].mxu0 }
 0x6b6   : > { %v9991_v41 = vmul.f32 0.5, %v11635_v60  ;;  %v11637_v24 = vadd.f32 %v9836_v22, %v20147_v20  ;;  %v9838_v8 = vpop.f32.mrb[227].mxu0 }
 0x6b7   : > { %v9992_v47 = vmul.f32 0.5, %v11636_v26  ;;  %v11638_v38 = vadd.f32 %v9838_v8, %v20150_v58 }
 0x6b8   : > { %14284 = vtanh.f32 %v9991_v41  ;;  %v9993_v21 = vmul.f32 0.5, %v11637_v24 }
 0x6b9   : > { %14286 = vtanh.f32 %v9992_v47  ;;  %v9994_v28 = vmul.f32 0.5, %v11638_v38 }
 0x6ba   : > { %14288 = vtanh.f32 %v9993_v21 }
 0x6bb   : > { %14290 = vtanh.f32 %v9994_v28  ;;  %v9842_v51 = vpop.f32.mrb[228].mxu0 }
 0x6bc   : > { %v11639_v42 = vadd.f32 %v9842_v51, %v20147_v20  ;;  %v9844_v56 = vpop.f32.mrb[229].mxu0 }
 0x6bd   : > { %v11640_v2 = vadd.f32 %v9844_v56, %v20150_v58  ;;  %v9846_v50 = vpop.f32.mrb[230].mxu0 }
 0x6be   : > { %v9995_v62 = vmul.f32 0.5, %v11639_v42  ;;  %v11641_v52 = vadd.f32 %v9846_v50, %v20147_v20  ;;  %v9848_v37 = vpop.f32.mrb[231].mxu0 }
 0x6bf   : > { %v9996_v12 = vmul.f32 0.5, %v11640_v2  ;;  %v11642_v54 = vadd.f32 %v9848_v37, %v20150_v58 }
 0x6c0   : > { %14292 = vtanh.f32 %v9995_v62  ;;  %v9997_v57 = vmul.f32 0.5, %v11641_v52 }
 0x6c1   : > { %14294 = vtanh.f32 %v9996_v12  ;;  %v9998_v23 = vmul.f32 0.5, %v11642_v54 }
 0x6c2   : > { %v14285_v39 = vpop.eup %14284  ;;  %14296 = vtanh.f32 %v9997_v57 }
 0x6c3   : > { %v14287_v46 = vpop.eup %14286  ;;  %v10119_v33 = vmul.f32 0.5, %v14285_v39  ;;  %14298 = vtanh.f32 %v9998_v23 }
 0x6c4   : > { %v9852_v32 = vpop.f32.mrb[232].mxu0  ;;  %v14289_v0 = vpop.eup %14288  ;;  %v10120_v19 = vmul.f32 0.5, %v14287_v46 }
 0x6c5   : > { %v11643_v53 = vadd.f32 %v9852_v32, %v20147_v20  ;;  %v9854_v36 = vpop.f32.mrb[233].mxu0  ;;  %v14291_v29 = vpop.eup %14290  ;;  %v10121_v61 = vmul.f32 0.5, %v14289_v0  ;;  %v10183_v13 = vadd.f32 0.5, %v10119_v33 }
 0x6c6   : > { %v11644_v11 = vadd.f32 %v9854_v36, %v20150_v58  ;;  %v9856_v40 = vpop.f32.mrb[234].mxu0  ;;  %v10122_v27 = vmul.f32 0.5, %v14291_v29  ;;  %v10184_v10 = vadd.f32 0.5, %v10120_v19 }
 0x6c7   : > { %v9999_v18 = vmul.f32 0.5, %v11643_v53  ;;  %v11645_v63 = vadd.f32 %v9856_v40, %v20147_v20  ;;  %v9858_v31 = vpop.f32.mrb[235].mxu0  ;;  %v10185_v4 = vadd.f32 0.5, %v10121_v61 }
 0x6c8   : > { %v10000_v3 = vmul.f32 0.5, %v11644_v11  ;;  %v11646_v6 = vadd.f32 %v9858_v31, %v20150_v58  ;;  %v10186_v25 = vadd.f32 0.5, %v10122_v27 }
 0x6c9   : > { %14300 = vtanh.f32 %v9999_v18  ;;  %v10001_v15 = vmul.f32 0.5, %v11645_v63  ;;  %v10247_v14 = vpack.c.bf16 %v10185_v4, %v10183_v13 }
 0x6ca   : > { %14302 = vtanh.f32 %v10000_v3  ;;  %v10002_v30 = vmul.f32 0.5, %v11646_v6  ;;  %v14293_v7 = vpop.eup %14292  ;;  %v10248_v44 = vpack.c.bf16 %v10186_v25, %v10184_v10 }
 0x6cb   : > { %14304 = vtanh.f32 %v10001_v15  ;;  %v14295_v16 = vpop.eup %14294  ;;  %v10123_v35 = vmul.f32 0.5, %v14293_v7 }
 0x6cc   : > { %14306 = vtanh.f32 %v10002_v30  ;;  %v9862_v1 = vpop.f32.mrb[236].mxu0  ;;  %v14297_v49 = vpop.eup %14296  ;;  %v10124_v55 = vmul.f32 0.5, %v14295_v16  ;;  %10446 = vmatprep.mubr.bf16.mxu1 %v10248_v44 }
 0x6cd   : > { %v11647_v45 = vadd.f32 %v9862_v1, %v20147_v20  ;;  %v9864_v34 = vpop.f32.mrb[237].mxu0  ;;  %v14299_v17 = vpop.eup %14298  ;;  %v10125_v59 = vmul.f32 0.5, %v14297_v49  ;;  %10447 = vmatmul.mubr.bf16.vlgmr.msra.gmra.mrb[32].mxu1 %v10247_v14  ;;  %v10187_v22 = vadd.f32 0.5, %v10123_v35 }
 0x6ce   : > { %v11648_v9 = vadd.f32 %v9864_v34, %v20150_v58  ;;  %v9866_v5 = vpop.f32.mrb[238].mxu0  ;;  %v10126_v48 = vmul.f32 0.5, %v14299_v17  ;;  %v10188_v47 = vadd.f32 0.5, %v10124_v55 }
 0x6cf   : > { %v10003_v60 = vmul.f32 0.5, %v11647_v45  ;;  %v11649_v43 = vadd.f32 %v9866_v5, %v20147_v20  ;;  %v9868_v26 = vpop.f32.mrb[239].mxu0  ;;  %v10189_v41 = vadd.f32 0.5, %v10125_v59 }
 0x6d0   : > { %v10004_v24 = vmul.f32 0.5, %v11648_v9  ;;  %v11650_v8 = vadd.f32 %v9868_v26, %v20150_v58  ;;  %v10190_v38 = vadd.f32 0.5, %v10126_v48 }
 0x6d1   : > { %14308 = vtanh.f32 %v10003_v60  ;;  %v10005_v21 = vmul.f32 0.5, %v11649_v43  ;;  %v10249_v28 = vpack.c.bf16 %v10189_v41, %v10187_v22 }
 0x6d2   : > { %14310 = vtanh.f32 %v10004_v24  ;;  %v10006_v51 = vmul.f32 0.5, %v11650_v8  ;;  %v10250_v56 = vpack.c.bf16 %v10190_v38, %v10188_v47 }
 0x6d3   : > { %v14301_v42 = vpop.eup %14300  ;;  %14312 = vtanh.f32 %v10005_v21 }
 0x6d4   : > { %v14303_v2 = vpop.eup %14302  ;;  %v10127_v50 = vmul.f32 0.5, %v14301_v42  ;;  %14314 = vtanh.f32 %v10006_v51  ;;  %v9872_v62 = vpop.f32.mrb[240].mxu0  ;;  %10454 = vmatprep.mubr.bf16.mxu1 %v10250_v56 }
 0x6d5   : > { %v14305_v52 = vpop.eup %14304  ;;  %v10128_v37 = vmul.f32 0.5, %v14303_v2  ;;  %v11651_v12 = vadd.f32 %v9872_v62, %v20147_v20  ;;  %v9874_v54 = vpop.f32.mrb[241].mxu0  ;;  %10455 = vmatmul.mubr.bf16.gmra.mrb[36].mxu1 %v10249_v28 }
 0x6d6   : > { %v14307_v57 = vpop.eup %14306  ;;  %v10129_v23 = vmul.f32 0.5, %v14305_v52  ;;  %v11652_v39 = vadd.f32 %v9874_v54, %v20150_v58  ;;  %v9876_v46 = vpop.f32.mrb[242].mxu0  ;;  %v10191_v53 = vadd.f32 0.5, %v10127_v50 }
 0x6d7   : > { %v10130_v33 = vmul.f32 0.5, %v14307_v57  ;;  %v10007_v32 = vmul.f32 0.5, %v11651_v12  ;;  %v11653_v0 = vadd.f32 %v9876_v46, %v20147_v20  ;;  %v9878_v19 = vpop.f32.mrb[243].mxu0  ;;  %v10192_v11 = vadd.f32 0.5, %v10128_v37 }
 0x6d8   : > { %v10193_v36 = vadd.f32 0.5, %v10129_v23  ;;  %v10008_v29 = vmul.f32 0.5, %v11652_v39  ;;  %v11654_v61 = vadd.f32 %v9878_v19, %v20150_v58 }
 0x6d9   : > { %v10194_v40 = vadd.f32 0.5, %v10130_v33  ;;  %14316 = vtanh.f32 %v10007_v32  ;;  %v10009_v27 = vmul.f32 0.5, %v11653_v0 }
 0x6da   : > { %v10251_v18 = vpack.c.bf16 %v10193_v36, %v10191_v53  ;;  %14318 = vtanh.f32 %v10008_v29  ;;  %v10010_v63 = vmul.f32 0.5, %v11654_v61 }
 0x6db   : > { %v14309_v31 = vpop.eup %14308  ;;  %14320 = vtanh.f32 %v10009_v27  ;;  %v10252_v13 = vpack.c.bf16 %v10194_v40, %v10192_v11 }
 0x6dc   : > { %v14311_v4 = vpop.eup %14310  ;;  %v10131_v3 = vmul.f32 0.5, %v14309_v31  ;;  %14322 = vtanh.f32 %v10010_v63  ;;  %v9882_v6 = vpop.f32.mrb[244].mxu0 }
 0x6dd   : > { %v14313_v10 = vpop.eup %14312  ;;  %v10132_v25 = vmul.f32 0.5, %v14311_v4  ;;  %v11655_v15 = vadd.f32 %v9882_v6, %v20147_v20  ;;  %v9884_v14 = vpop.f32.mrb[245].mxu0  ;;  %10462 = vmatprep.mubr.bf16.mxu1 %v10252_v13 }
 0x6de   : > { %v14315_v30 = vpop.eup %14314  ;;  %v10133_v7 = vmul.f32 0.5, %v14313_v10  ;;  %v11656_v44 = vadd.f32 %v9884_v14, %v20150_v58  ;;  %v9886_v16 = vpop.f32.mrb[246].mxu0  ;;  %10463 = vmatmul.mubr.bf16.gmra.mrb[40].mxu1 %v10251_v18  ;;  %v10195_v45 = vadd.f32 0.5, %v10131_v3 }
 0x6df   : > { %v10134_v35 = vmul.f32 0.5, %v14315_v30  ;;  %v10011_v1 = vmul.f32 0.5, %v11655_v15  ;;  %v11657_v49 = vadd.f32 %v9886_v16, %v20147_v20  ;;  %v9888_v55 = vpop.f32.mrb[247].mxu0  ;;  %v10196_v9 = vadd.f32 0.5, %v10132_v25 }
 0x6e0   : > { %v10197_v34 = vadd.f32 0.5, %v10133_v7  ;;  %v10012_v17 = vmul.f32 0.5, %v11656_v44  ;;  %v11658_v59 = vadd.f32 %v9888_v55, %v20150_v58 }
 0x6e1   : > { %v10198_v5 = vadd.f32 0.5, %v10134_v35  ;;  %14324 = vtanh.f32 %v10011_v1  ;;  %v10013_v48 = vmul.f32 0.5, %v11657_v49 }
 0x6e2   : > { %v10253_v60 = vpack.c.bf16 %v10197_v34, %v10195_v45  ;;  %14326 = vtanh.f32 %v10012_v17  ;;  %v10014_v43 = vmul.f32 0.5, %v11658_v59 }
 0x6e3   : > { %v14317_v26 = vpop.eup %14316  ;;  %14328 = vtanh.f32 %v10013_v48  ;;  %v10254_v22 = vpack.c.bf16 %v10198_v5, %v10196_v9 }
 0x6e4   : > { %v14319_v41 = vpop.eup %14318  ;;  %v10135_v24 = vmul.f32 0.5, %v14317_v26  ;;  %14330 = vtanh.f32 %v10014_v43  ;;  %v9892_v8 = vpop.f32.mrb[248].mxu0 }
 0x6e5   : > { %v14321_v47 = vpop.eup %14320  ;;  %v10136_v38 = vmul.f32 0.5, %v14319_v41  ;;  %v11659_v21 = vadd.f32 %v9892_v8, %v20147_v20  ;;  %v9894_v28 = vpop.f32.mrb[249].mxu0  ;;  %10470 = vmatprep.mubr.bf16.mxu1 %v10254_v22 }
 0x6e6   : > { %v14323_v51 = vpop.eup %14322  ;;  %v10137_v42 = vmul.f32 0.5, %v14321_v47  ;;  %v11660_v56 = vadd.f32 %v9894_v28, %v20150_v58  ;;  %v9896_v2 = vpop.f32.mrb[250].mxu0  ;;  %10471 = vmatmul.mubr.bf16.gmra.mrb[44].mxu1 %v10253_v60  ;;  %v10199_v12 = vadd.f32 0.5, %v10135_v24 }
 0x6e7   : > { %v10138_v50 = vmul.f32 0.5, %v14323_v51  ;;  %v10015_v62 = vmul.f32 0.5, %v11659_v21  ;;  %v11661_v52 = vadd.f32 %v9896_v2, %v20147_v20  ;;  %v9898_v37 = vpop.f32.mrb[251].mxu0  ;;  %v10200_v39 = vadd.f32 0.5, %v10136_v38 }
 0x6e8   : > { %v10201_v54 = vadd.f32 0.5, %v10137_v42  ;;  %v10016_v57 = vmul.f32 0.5, %v11660_v56  ;;  %v11662_v23 = vadd.f32 %v9898_v37, %v20150_v58 }
 0x6e9   : > { %v10202_v46 = vadd.f32 0.5, %v10138_v50  ;;  %14332 = vtanh.f32 %v10015_v62  ;;  %v10017_v33 = vmul.f32 0.5, %v11661_v52 }
 0x6ea   : > { %v10255_v32 = vpack.c.bf16 %v10201_v54, %v10199_v12  ;;  %14334 = vtanh.f32 %v10016_v57  ;;  %v10018_v0 = vmul.f32 0.5, %v11662_v23 }
 0x6eb   : > { %v14325_v19 = vpop.eup %14324  ;;  %14336 = vtanh.f32 %v10017_v33  ;;  %v10256_v53 = vpack.c.bf16 %v10202_v46, %v10200_v39 }
 0x6ec   : > { %v14327_v36 = vpop.eup %14326  ;;  %v10139_v29 = vmul.f32 0.5, %v14325_v19  ;;  %14338 = vtanh.f32 %v10018_v0  ;;  %v9902_v61 = vpop.f32.mrb[252].mxu0 }
 0x6ed   : > { %v14329_v11 = vpop.eup %14328  ;;  %v10140_v40 = vmul.f32 0.5, %v14327_v36  ;;  %v11663_v27 = vadd.f32 %v9902_v61, %v20147_v20  ;;  %v9904_v18 = vpop.f32.mrb[253].mxu0  ;;  %10478 = vmatprep.mubr.bf16.mxu1 %v10256_v53 }
 0x6ee   : > { %v14331_v63 = vpop.eup %14330  ;;  %v10141_v31 = vmul.f32 0.5, %v14329_v11  ;;  %v11664_v13 = vadd.f32 %v9904_v18, %v20150_v58  ;;  %v9906_v4 = vpop.f32.mrb[254].mxu0  ;;  %10479 = vmatmul.mubr.bf16.gmra.mrb[48].mxu1 %v10255_v32  ;;  %v10203_v15 = vadd.f32 0.5, %v10139_v29 }
 0x6ef   : > { %v10142_v3 = vmul.f32 0.5, %v14331_v63  ;;  %v10019_v6 = vmul.f32 0.5, %v11663_v27  ;;  %v11665_v10 = vadd.f32 %v9906_v4, %v20147_v20  ;;  %v9908_v25 = vpop.f32.mrb[255].mxu0  ;;  %v10204_v44 = vadd.f32 0.5, %v10140_v40 }
 0x6f0   : > { %v10205_v14 = vadd.f32 0.5, %v10141_v31  ;;  %v10020_v30 = vmul.f32 0.5, %v11664_v13  ;;  %v11666_v7 = vadd.f32 %v9908_v25, %v20150_v58 }
 0x6f1   : > { %v10206_v16 = vadd.f32 0.5, %v10142_v3  ;;  %14340 = vtanh.f32 %v10019_v6  ;;  %v10021_v35 = vmul.f32 0.5, %v11665_v10 }
 0x6f2   : > { %v10257_v1 = vpack.c.bf16 %v10205_v14, %v10203_v15  ;;  %14342 = vtanh.f32 %v10020_v30  ;;  %v10022_v49 = vmul.f32 0.5, %v11666_v7 }
 0x6f3   : > { %v14333_v55 = vpop.eup %14332  ;;  %14344 = vtanh.f32 %v10021_v35  ;;  %v10258_v45 = vpack.c.bf16 %v10206_v16, %v10204_v44 }
 0x6f4   : > { %v14335_v34 = vpop.eup %14334  ;;  %v10143_v17 = vmul.f32 0.5, %v14333_v55  ;;  %14346 = vtanh.f32 %v10022_v49  ;;  %v9912_v59 = vpop.f32.mrb[0].mxu0 }
 0x6f5   : > { %v14337_v9 = vpop.eup %14336  ;;  %v10144_v5 = vmul.f32 0.5, %v14335_v34  ;;  %v11667_v48 = vadd.f32 %v9912_v59, %v20147_v20  ;;  %v9914_v60 = vpop.f32.mrb[1].mxu0  ;;  %10486 = vmatprep.mubr.bf16.mxu1 %v10258_v45 }
 0x6f6   : > { %v14339_v43 = vpop.eup %14338  ;;  %v10145_v26 = vmul.f32 0.5, %v14337_v9  ;;  %v11668_v22 = vadd.f32 %v9914_v60, %v20150_v58  ;;  %v9916_v41 = vpop.f32.mrb[2].mxu0  ;;  %10487 = vmatmul.mubr.bf16.gmra.mrb[52].mxu1 %v10257_v1  ;;  %v10207_v21 = vadd.f32 0.5, %v10143_v17 }
 0x6f7   : > { %v10146_v24 = vmul.f32 0.5, %v14339_v43  ;;  %v10023_v8 = vmul.f32 0.5, %v11667_v48  ;;  %v11669_v47 = vadd.f32 %v9916_v41, %v20147_v20  ;;  %v9918_v38 = vpop.f32.mrb[3].mxu0  ;;  %v10208_v56 = vadd.f32 0.5, %v10144_v5 }
 0x6f8   : > { %v10209_v28 = vadd.f32 0.5, %v10145_v26  ;;  %v10024_v51 = vmul.f32 0.5, %v11668_v22  ;;  %v11670_v42 = vadd.f32 %v9918_v38, %v20150_v58 }
 0x6f9   : > { %v10210_v2 = vadd.f32 0.5, %v10146_v24  ;;  %14348 = vtanh.f32 %v10023_v8  ;;  %v10025_v50 = vmul.f32 0.5, %v11669_v47 }
 0x6fa   : > { %v10259_v62 = vpack.c.bf16 %v10209_v28, %v10207_v21  ;;  %14350 = vtanh.f32 %v10024_v51  ;;  %v10026_v52 = vmul.f32 0.5, %v11670_v42 }
 0x6fb   : > { %v14341_v37 = vpop.eup %14340  ;;  %14352 = vtanh.f32 %v10025_v50  ;;  %v10260_v12 = vpack.c.bf16 %v10210_v2, %v10208_v56 }
 0x6fc   : > { %v14343_v54 = vpop.eup %14342  ;;  %v10147_v57 = vmul.f32 0.5, %v14341_v37  ;;  %14354 = vtanh.f32 %v10026_v52  ;;  %v9922_v23 = vpop.f32.mrb[4].mxu0 }
 0x6fd   : > { %v14345_v39 = vpop.eup %14344  ;;  %v10148_v46 = vmul.f32 0.5, %v14343_v54  ;;  %v11671_v33 = vadd.f32 %v9922_v23, %v20147_v20  ;;  %v9924_v32 = vpop.f32.mrb[5].mxu0  ;;  %10494 = vmatprep.mubr.bf16.mxu1 %v10260_v12 }
 0x6fe   : > { %v14347_v0 = vpop.eup %14346  ;;  %v10149_v19 = vmul.f32 0.5, %v14345_v39  ;;  %v11672_v53 = vadd.f32 %v9924_v32, %v20150_v58  ;;  %v9926_v36 = vpop.f32.mrb[6].mxu0  ;;  %10495 = vmatmul.mubr.bf16.gmra.mrb[56].mxu1 %v10259_v62  ;;  %v10211_v27 = vadd.f32 0.5, %v10147_v57 }
 0x6ff   : > { %v10150_v29 = vmul.f32 0.5, %v14347_v0  ;;  %v10027_v61 = vmul.f32 0.5, %v11671_v33  ;;  %v11673_v11 = vadd.f32 %v9926_v36, %v20147_v20  ;;  %v9928_v40 = vpop.f32.mrb[7].mxu0  ;;  %v10212_v13 = vadd.f32 0.5, %v10148_v46 }
 0x700   : > { %v10213_v18 = vadd.f32 0.5, %v10149_v19  ;;  %v10028_v63 = vmul.f32 0.5, %v11672_v53  ;;  %v11674_v31 = vadd.f32 %v9928_v40, %v20150_v58 }
 0x701   : > { %v10214_v4 = vadd.f32 0.5, %v10150_v29  ;;  %14356 = vtanh.f32 %v10027_v61  ;;  %v10029_v3 = vmul.f32 0.5, %v11673_v11 }
 0x702   : > { %v10261_v6 = vpack.c.bf16 %v10213_v18, %v10211_v27  ;;  %14358 = vtanh.f32 %v10028_v63  ;;  %v10030_v10 = vmul.f32 0.5, %v11674_v31 }
 0x703   : > { %v14349_v25 = vpop.eup %14348  ;;  %14360 = vtanh.f32 %v10029_v3  ;;  %v10262_v15 = vpack.c.bf16 %v10214_v4, %v10212_v13 }
 0x704   : > { %v14351_v14 = vpop.eup %14350  ;;  %v10151_v30 = vmul.f32 0.5, %v14349_v25  ;;  %14362 = vtanh.f32 %v10030_v10  ;;  %v9932_v7 = vpop.f32.mrb[8].mxu0 }
 0x705   : > { %v14353_v44 = vpop.eup %14352  ;;  %v10152_v16 = vmul.f32 0.5, %v14351_v14  ;;  %v11675_v35 = vadd.f32 %v9932_v7, %v20147_v20  ;;  %v9934_v1 = vpop.f32.mrb[9].mxu0  ;;  %10502 = vmatprep.mubr.bf16.mxu1 %v10262_v15 }
 0x706   : > { %v14355_v49 = vpop.eup %14354  ;;  %v10153_v55 = vmul.f32 0.5, %v14353_v44  ;;  %v11676_v45 = vadd.f32 %v9934_v1, %v20150_v58  ;;  %v9936_v34 = vpop.f32.mrb[10].mxu0  ;;  %10503 = vmatmul.mubr.bf16.gmra.mrb[60].mxu1 %v10261_v6  ;;  %v10215_v48 = vadd.f32 0.5, %v10151_v30 }
 0x707   : > { %v10154_v17 = vmul.f32 0.5, %v14355_v49  ;;  %v10031_v59 = vmul.f32 0.5, %v11675_v35  ;;  %v11677_v9 = vadd.f32 %v9936_v34, %v20147_v20  ;;  %v9938_v5 = vpop.f32.mrb[11].mxu0  ;;  %v10216_v22 = vadd.f32 0.5, %v10152_v16 }
 0x708   : > { %v10217_v60 = vadd.f32 0.5, %v10153_v55  ;;  %v10032_v43 = vmul.f32 0.5, %v11676_v45  ;;  %v11678_v26 = vadd.f32 %v9938_v5, %v20150_v58 }
 0x709   : > { %v10218_v41 = vadd.f32 0.5, %v10154_v17  ;;  %14364 = vtanh.f32 %v10031_v59  ;;  %v10033_v24 = vmul.f32 0.5, %v11677_v9 }
 0x70a   : > { %v10263_v8 = vpack.c.bf16 %v10217_v60, %v10215_v48  ;;  %14366 = vtanh.f32 %v10032_v43  ;;  %v10034_v47 = vmul.f32 0.5, %v11678_v26 }
 0x70b   : > { %v14357_v38 = vpop.eup %14356  ;;  %14368 = vtanh.f32 %v10033_v24  ;;  %v10264_v21 = vpack.c.bf16 %v10218_v41, %v10216_v22 }
 0x70c   : > { %v14359_v28 = vpop.eup %14358  ;;  %v10155_v51 = vmul.f32 0.5, %v14357_v38  ;;  %14370 = vtanh.f32 %v10034_v47  ;;  %v9942_v42 = vpop.f32.mrb[12].mxu0 }
 0x70d   : > { %v14361_v56 = vpop.eup %14360  ;;  %v10156_v2 = vmul.f32 0.5, %v14359_v28  ;;  %v11679_v50 = vadd.f32 %v9942_v42, %v20147_v20  ;;  %v9944_v62 = vpop.f32.mrb[13].mxu0  ;;  %10510 = vmatprep.mubr.bf16.mxu1 %v10264_v21 }
 0x70e   : > { %v14363_v52 = vpop.eup %14362  ;;  %v10157_v37 = vmul.f32 0.5, %v14361_v56  ;;  %v11680_v12 = vadd.f32 %v9944_v62, %v20150_v58  ;;  %v9946_v54 = vpop.f32.mrb[14].mxu0  ;;  %10511 = vmatmul.mubr.bf16.gmra.mrb[64].mxu1 %v10263_v8  ;;  %v10219_v33 = vadd.f32 0.5, %v10155_v51 }
 0x70f   : > { %v10158_v57 = vmul.f32 0.5, %v14363_v52  ;;  %v10035_v23 = vmul.f32 0.5, %v11679_v50  ;;  %v11681_v39 = vadd.f32 %v9946_v54, %v20147_v20  ;;  %v9948_v46 = vpop.f32.mrb[15].mxu0  ;;  %v10220_v53 = vadd.f32 0.5, %v10156_v2 }
 0x710   : > { %v10221_v32 = vadd.f32 0.5, %v10157_v37  ;;  %v10036_v0 = vmul.f32 0.5, %v11680_v12  ;;  %v11682_v19 = vadd.f32 %v9948_v46, %v20150_v58 }
 0x711   : > { %v10222_v36 = vadd.f32 0.5, %v10158_v57  ;;  %14372 = vtanh.f32 %v10035_v23  ;;  %v10037_v29 = vmul.f32 0.5, %v11681_v39 }
 0x712   : > { %v10265_v61 = vpack.c.bf16 %v10221_v32, %v10219_v33  ;;  %14374 = vtanh.f32 %v10036_v0  ;;  %v10038_v11 = vmul.f32 0.5, %v11682_v19 }
 0x713   : > { %v14365_v40 = vpop.eup %14364  ;;  %14376 = vtanh.f32 %v10037_v29  ;;  %v10266_v27 = vpack.c.bf16 %v10222_v36, %v10220_v53 }
 0x714   : > { %v14367_v18 = vpop.eup %14366  ;;  %v10159_v63 = vmul.f32 0.5, %v14365_v40  ;;  %14378 = vtanh.f32 %v10038_v11  ;;  %v9952_v31 = vpop.f32.mrb[16].mxu0 }
 0x715   : > { %v14369_v13 = vpop.eup %14368  ;;  %v10160_v4 = vmul.f32 0.5, %v14367_v18  ;;  %v11683_v3 = vadd.f32 %v9952_v31, %v20147_v20  ;;  %v9954_v6 = vpop.f32.mrb[17].mxu0  ;;  %10518 = vmatprep.mubr.bf16.mxu1 %v10266_v27 }
 0x716   : > { %v14371_v10 = vpop.eup %14370  ;;  %v10161_v25 = vmul.f32 0.5, %v14369_v13  ;;  %v11684_v15 = vadd.f32 %v9954_v6, %v20150_v58  ;;  %v9956_v14 = vpop.f32.mrb[18].mxu0  ;;  %10519 = vmatmul.mubr.bf16.gmra.mrb[68].mxu1 %v10265_v61  ;;  %v10223_v35 = vadd.f32 0.5, %v10159_v63 }
 0x717   : > { %v10162_v30 = vmul.f32 0.5, %v14371_v10  ;;  %v10039_v7 = vmul.f32 0.5, %v11683_v3  ;;  %v11685_v44 = vadd.f32 %v9956_v14, %v20147_v20  ;;  %v9958_v16 = vpop.f32.mrb[19].mxu0  ;;  %v10224_v45 = vadd.f32 0.5, %v10160_v4 }
 0x718   : > { %v10225_v1 = vadd.f32 0.5, %v10161_v25  ;;  %v10040_v49 = vmul.f32 0.5, %v11684_v15  ;;  %v11686_v55 = vadd.f32 %v9958_v16, %v20150_v58 }
 0x719   : > { %v10226_v34 = vadd.f32 0.5, %v10162_v30  ;;  %14380 = vtanh.f32 %v10039_v7  ;;  %v10041_v17 = vmul.f32 0.5, %v11685_v44 }
 0x71a   : > { %v10267_v59 = vpack.c.bf16 %v10225_v1, %v10223_v35  ;;  %14382 = vtanh.f32 %v10040_v49  ;;  %v10042_v9 = vmul.f32 0.5, %v11686_v55 }
 0x71b   : > { %v14373_v5 = vpop.eup %14372  ;;  %14384 = vtanh.f32 %v10041_v17  ;;  %v10268_v48 = vpack.c.bf16 %v10226_v34, %v10224_v45 }
 0x71c   : > { %v14375_v60 = vpop.eup %14374  ;;  %v10163_v43 = vmul.f32 0.5, %v14373_v5  ;;  %14386 = vtanh.f32 %v10042_v9  ;;  %v9962_v26 = vpop.f32.mrb[20].mxu0 }
 0x71d   : > { %v14377_v22 = vpop.eup %14376  ;;  %v10164_v41 = vmul.f32 0.5, %v14375_v60  ;;  %v11687_v24 = vadd.f32 %v9962_v26, %v20147_v20  ;;  %v9964_v8 = vpop.f32.mrb[21].mxu0  ;;  %10526 = vmatprep.mubr.bf16.mxu1 %v10268_v48 }
 0x71e   : > { %v14379_v47 = vpop.eup %14378  ;;  %v10165_v38 = vmul.f32 0.5, %v14377_v22  ;;  %v11688_v21 = vadd.f32 %v9964_v8, %v20150_v58  ;;  %v9966_v28 = vpop.f32.mrb[22].mxu0  ;;  %10527 = vmatmul.mubr.bf16.gmra.mrb[72].mxu1 %v10267_v59  ;;  %v10227_v50 = vadd.f32 0.5, %v10163_v43 }
 0x71f   : > { %v10166_v51 = vmul.f32 0.5, %v14379_v47  ;;  %v10043_v42 = vmul.f32 0.5, %v11687_v24  ;;  %v11689_v56 = vadd.f32 %v9966_v28, %v20147_v20  ;;  %v9968_v2 = vpop.f32.mrb[23].mxu0  ;;  %v10228_v12 = vadd.f32 0.5, %v10164_v41 }
 0x720   : > { %v10229_v62 = vadd.f32 0.5, %v10165_v38  ;;  %v10044_v52 = vmul.f32 0.5, %v11688_v21  ;;  %v11690_v37 = vadd.f32 %v9968_v2, %v20150_v58 }
 0x721   : > { %v10230_v54 = vadd.f32 0.5, %v10166_v51  ;;  %14388 = vtanh.f32 %v10043_v42  ;;  %v10045_v57 = vmul.f32 0.5, %v11689_v56 }
 0x722   : > { %v10269_v23 = vpack.c.bf16 %v10229_v62, %v10227_v50  ;;  %14390 = vtanh.f32 %v10044_v52  ;;  %v10046_v39 = vmul.f32 0.5, %v11690_v37 }
 0x723   : > { %v14381_v46 = vpop.eup %14380  ;;  %14392 = vtanh.f32 %v10045_v57  ;;  %v10270_v33 = vpack.c.bf16 %v10230_v54, %v10228_v12 }
 0x724   : > { %v14383_v32 = vpop.eup %14382  ;;  %v10167_v0 = vmul.f32 0.5, %v14381_v46  ;;  %14394 = vtanh.f32 %v10046_v39  ;;  %v9972_v19 = vpop.f32.mrb[24].mxu0 }
 0x725   : > { %v14385_v53 = vpop.eup %14384  ;;  %v10168_v36 = vmul.f32 0.5, %v14383_v32  ;;  %v11691_v29 = vadd.f32 %v9972_v19, %v20147_v20  ;;  %v9974_v61 = vpop.f32.mrb[25].mxu0  ;;  %10534 = vmatprep.mubr.bf16.mxu1 %v10270_v33 }
 0x726   : > { %v14387_v11 = vpop.eup %14386  ;;  %v10169_v40 = vmul.f32 0.5, %v14385_v53  ;;  %v11692_v27 = vadd.f32 %v9974_v61, %v20150_v58  ;;  %v9976_v18 = vpop.f32.mrb[26].mxu0  ;;  %10535 = vmatmul.mubr.bf16.gmra.mrb[76].mxu1 %v10269_v23  ;;  %v10231_v3 = vadd.f32 0.5, %v10167_v0 }
 0x727   : > { %v10170_v63 = vmul.f32 0.5, %v14387_v11  ;;  %v10047_v31 = vmul.f32 0.5, %v11691_v29  ;;  %v11693_v13 = vadd.f32 %v9976_v18, %v20147_v20  ;;  %v9978_v4 = vpop.f32.mrb[27].mxu0  ;;  %v10232_v15 = vadd.f32 0.5, %v10168_v36 }
 0x728   : > { %v10233_v6 = vadd.f32 0.5, %v10169_v40  ;;  %v10048_v10 = vmul.f32 0.5, %v11692_v27  ;;  %v11694_v25 = vadd.f32 %v9978_v4, %v20150_v58 }
 0x729   : > { %v10234_v14 = vadd.f32 0.5, %v10170_v63  ;;  %14396 = vtanh.f32 %v10047_v31  ;;  %v10049_v30 = vmul.f32 0.5, %v11693_v13 }
 0x72a   : > { %v10271_v7 = vpack.c.bf16 %v10233_v6, %v10231_v3  ;;  %14398 = vtanh.f32 %v10048_v10  ;;  %v10050_v44 = vmul.f32 0.5, %v11694_v25  ;;  %v20219_v6 = vld [vmem:[%s20302_s8] ss:$0 sm:$0xff] }
 0x72b   : > { %v14389_v16 = vpop.eup %14388  ;;  %14400 = vtanh.f32 %v10049_v30  ;;  %v10272_v35 = vpack.c.bf16 %v10234_v14, %v10232_v15 }
 0x72c   : > { %v14391_v1 = vpop.eup %14390  ;;  %v10171_v49 = vmul.f32 0.5, %v14389_v16  ;;  %14402 = vtanh.f32 %v10050_v44  ;;  %v9982_v55 = vpop.f32.mrb[28].mxu0 }
 0x72d   : > { %v14393_v45 = vpop.eup %14392  ;;  %v10172_v34 = vmul.f32 0.5, %v14391_v1  ;;  %v11695_v17 = vadd.f32 %v9982_v55, %v20147_v20  ;;  %v9984_v59 = vpop.f32.mrb[29].mxu0  ;;  %10542 = vmatprep.mubr.bf16.mxu1 %v10272_v35 }
 0x72e   : > { %v14395_v9 = vpop.eup %14394  ;;  %v10173_v5 = vmul.f32 0.5, %v14393_v45  ;;  %v11696_v48 = vadd.f32 %v9984_v59, %v20150_v58  ;;  %v9986_v60 = vpop.f32.mrb[30].mxu0  ;;  %10543 = vmatmul.mubr.bf16.gmra.mrb[80].mxu1 %v10271_v7  ;;  %v10235_v24 = vadd.f32 0.5, %v10171_v49 }
 0x72f   : > { %v10174_v43 = vmul.f32 0.5, %v14395_v9  ;;  %v10051_v26 = vmul.f32 0.5, %v11695_v17  ;;  %v11697_v22 = vadd.f32 %v9986_v60, %v20147_v20  ;;  %v9988_v41 = vpop.f32.mrb[31].mxu0  ;;  %v10236_v21 = vadd.f32 0.5, %v10172_v34 }
 0x730   : > { %v10237_v8 = vadd.f32 0.5, %v10173_v5  ;;  %v10052_v47 = vmul.f32 0.5, %v11696_v48  ;;  %v11698_v38 = vadd.f32 %v9988_v41, %v20150_v58 }
 0x731   : > { %v10238_v28 = vadd.f32 0.5, %v10174_v43  ;;  %14404 = vtanh.f32 %v10051_v26  ;;  %v10053_v51 = vmul.f32 0.5, %v11697_v22 }
 0x732   : > { %v10273_v42 = vpack.c.bf16 %v10237_v8, %v10235_v24  ;;  %14406 = vtanh.f32 %v10052_v47  ;;  %v10054_v56 = vmul.f32 0.5, %v11698_v38 }
 0x733   : > { %v14397_v2 = vpop.eup %14396  ;;  %14408 = vtanh.f32 %v10053_v51  ;;  %v10274_v50 = vpack.c.bf16 %v10238_v28, %v10236_v21 }
 0x734   : > { %v14399_v62 = vpop.eup %14398  ;;  %v10175_v52 = vmul.f32 0.5, %v14397_v2  ;;  %14410 = vtanh.f32 %v10054_v56 }
 0x735   : > { %v14401_v20 = vpop.eup %14400  ;;  %v10176_v37 = vmul.f32 0.5, %v14399_v62  ;;  %10550 = vmatprep.mubr.bf16.mxu1 %v10274_v50 }
 0x736   : > { %v14403_v12 = vpop.eup %14402  ;;  %v10177_v54 = vmul.f32 0.5, %v14401_v20  ;;  %10551 = vmatmul.mubr.bf16.gmra.mrb[84].mxu1 %v10273_v42  ;;  %v10239_v57 = vadd.f32 0.5, %v10175_v52 }
 0x737   : > { %v10178_v58 = vmul.f32 0.5, %v14403_v12  ;;  %v10240_v39 = vadd.f32 0.5, %v10176_v37 }
 0x738   : > { %v10241_v23 = vadd.f32 0.5, %v10177_v54 }
 0x739   : > { %v10242_v46 = vadd.f32 0.5, %v10178_v58 }
 0x73a   : > { %v10275_v33 = vpack.c.bf16 %v10241_v23, %v10239_v57 }
 0x73b   : > { %v14405_v32 = vpop.eup %14404  ;;  %v10276_v0 = vpack.c.bf16 %v10242_v46, %v10240_v39 }
 0x73c   : > { %v14407_v19 = vpop.eup %14406  ;;  %v10179_v53 = vmul.f32 0.5, %v14405_v32 }
 0x73d   : > { %v14409_v36 = vpop.eup %14408  ;;  %v10180_v29 = vmul.f32 0.5, %v14407_v19  ;;  %10558 = vmatprep.mubr.bf16.mxu1 %v10276_v0 }
 0x73e   : > { %v14411_v61 = vpop.eup %14410  ;;  %v10181_v11 = vmul.f32 0.5, %v14409_v36  ;;  %10559 = vmatmul.mubr.bf16.gmra.mrb[88].mxu1 %v10275_v33  ;;  %v10243_v27 = vadd.f32 0.5, %v10179_v53 }
 0x73f   : > { %v10182_v40 = vmul.f32 0.5, %v14411_v61  ;;  %v10244_v63 = vadd.f32 0.5, %v10180_v29 }
 0x740   : > { %v10245_v18 = vadd.f32 0.5, %v10181_v11 }
 0x741   : > { %v10246_v31 = vadd.f32 0.5, %v10182_v40 }
 0x742   : > { %v10277_v13 = vpack.c.bf16 %v10245_v18, %v10243_v27 }
 0x743   : > { %v10278_v4 = vpack.c.bf16 %v10246_v31, %v10244_v63 }
 0x745   : > { %10566 = vmatprep.mubr.bf16.mxu1 %v10278_v4 }
 0x746   : > { %10567 = vmatmul.mubr.bf16.gmra.mrb[92].mxu1 %v10277_v13 }
 0x7a0   : > { %v11395_v3 = vpop.f32.mrb[32].mxu1 }
 0x7a1   : > { %v11396_v10 = vpop.f32.mrb[33].mxu1 }
 0x7a2   : > { %v11397_v25 = vadd.f32 %v11396_v10, %v11395_v3  ;;  %v11398_v15 = vpop.f32.mrb[34].mxu1 }
 0x7a3   : > { %v11399_v14 = vpop.f32.mrb[35].mxu1 }
 0x7a4   : > { %v10449_v30 = vadd.f32 %v11397_v25, %v20219_v6  ;;  %v11400_v7 = vadd.f32 %v11399_v14, %v11398_v15 }
 0x7a6   : > { %v10575_v44 = vmul.f32 0.5, %v10449_v30  ;;  %v10452_v16 = vadd.f32 %v11400_v7, %v20219_v6 }
 0x7a8   : > { %14412 = vtanh.f32 %v10575_v44  ;;  %v10576_v35 = vmul.f32 0.5, %v10452_v16  ;;  %v11401_v1 = vpop.f32.mrb[36].mxu1 }
 0x7a9   : > { %v11402_v49 = vpop.f32.mrb[37].mxu1 }
 0x7aa   : > { %14414 = vtanh.f32 %v10576_v35  ;;  %v11403_v55 = vadd.f32 %v11402_v49, %v11401_v1  ;;  %v11404_v45 = vpop.f32.mrb[38].mxu1 }
 0x7ab   : > { %v11405_v34 = vpop.f32.mrb[39].mxu1 }
 0x7ac   : > { %v10457_v17 = vadd.f32 %v11403_v55, %v20219_v6  ;;  %v11406_v59 = vadd.f32 %v11405_v34, %v11404_v45 }
 0x7ae   : > { %v10577_v9 = vmul.f32 0.5, %v10457_v17  ;;  %v10460_v5 = vadd.f32 %v11406_v59, %v20219_v6 }
 0x7b0   : > { %14416 = vtanh.f32 %v10577_v9  ;;  %v10578_v48 = vmul.f32 0.5, %v10460_v5 }
 0x7b1   : > { %v11407_v60 = vpop.f32.mrb[40].mxu1 }
 0x7b2   : > { %v11408_v43 = vpop.f32.mrb[41].mxu1  ;;  %v14413_v26 = vpop.eup %14412  ;;  %14418 = vtanh.f32 %v10578_v48 }
 0x7b3   : > { %v11409_v22 = vadd.f32 %v11408_v43, %v11407_v60  ;;  %v11410_v41 = vpop.f32.mrb[42].mxu1  ;;  %v10639_v24 = vmul.f32 0.5, %v14413_v26 }
 0x7b4   : > { %v11411_v8 = vpop.f32.mrb[43].mxu1  ;;  %v14415_v47 = vpop.eup %14414 }
 0x7b5   : > { %v10465_v38 = vadd.f32 %v11409_v22, %v20219_v6  ;;  %v11412_v21 = vadd.f32 %v11411_v8, %v11410_v41  ;;  %v10671_v28 = vadd.f32 0.5, %v10639_v24  ;;  %v10640_v51 = vmul.f32 0.5, %v14415_v47 }
 0x7b7   : > { %v10579_v42 = vmul.f32 0.5, %v10465_v38  ;;  %v10468_v56 = vadd.f32 %v11412_v21, %v20219_v6  ;;  %10703 = vst [vmem:[%s20229_s18] sm:$0xff] %v10671_v28  ;;  %v10672_v2 = vadd.f32 0.5, %v10640_v51 }
 0x7b9   : > { %14420 = vtanh.f32 %v10579_v42  ;;  %v10580_v50 = vmul.f32 0.5, %v10468_v56  ;;  %v11413_v62 = vpop.f32.mrb[44].mxu1  ;;  %10704 = vst [vmem:[%s20229_s18 + $0x8] sm:$0xff] %v10672_v2 }
 0x7ba   : > { %v11414_v52 = vpop.f32.mrb[45].mxu1  ;;  %v14417_v20 = vpop.eup %14416 }
 0x7bb   : > { %14422 = vtanh.f32 %v10580_v50  ;;  %v11415_v37 = vadd.f32 %v11414_v52, %v11413_v62  ;;  %v11416_v12 = vpop.f32.mrb[46].mxu1  ;;  %v10641_v54 = vmul.f32 0.5, %v14417_v20 }
 0x7bc   : > { %v11417_v58 = vpop.f32.mrb[47].mxu1  ;;  %v14419_v57 = vpop.eup %14418 }
 0x7bd   : > { %v10473_v23 = vadd.f32 %v11415_v37, %v20219_v6  ;;  %v11418_v39 = vadd.f32 %v11417_v58, %v11416_v12  ;;  %v10673_v46 = vadd.f32 0.5, %v10641_v54  ;;  %v10642_v33 = vmul.f32 0.5, %v14419_v57 }
 0x7bf   : > { %v10581_v32 = vmul.f32 0.5, %v10473_v23  ;;  %v10476_v0 = vadd.f32 %v11418_v39, %v20219_v6  ;;  %10705 = vst [vmem:[%s20229_s18 + $0x10] sm:$0xff] %v10673_v46  ;;  %v10674_v19 = vadd.f32 0.5, %v10642_v33 }
 0x7c1   : > { %14424 = vtanh.f32 %v10581_v32  ;;  %v10582_v53 = vmul.f32 0.5, %v10476_v0  ;;  %v11419_v36 = vpop.f32.mrb[48].mxu1  ;;  %10706 = vst [vmem:[%s20229_s18 + $0x18] sm:$0xff] %v10674_v19 }
 0x7c2   : > { %v11420_v29 = vpop.f32.mrb[49].mxu1 }
 0x7c3   : > { %v14421_v61 = vpop.eup %14420  ;;  %14426 = vtanh.f32 %v10582_v53  ;;  %v11421_v11 = vadd.f32 %v11420_v29, %v11419_v36  ;;  %v11422_v40 = vpop.f32.mrb[50].mxu1 }
 0x7c4   : > { %v10643_v27 = vmul.f32 0.5, %v14421_v61  ;;  %v11423_v18 = vpop.f32.mrb[51].mxu1 }
 0x7c5   : > { %v14423_v63 = vpop.eup %14422  ;;  %v10481_v31 = vadd.f32 %v11421_v11, %v20219_v6  ;;  %v11424_v13 = vadd.f32 %v11423_v18, %v11422_v40 }
 0x7c6   : > { %v10675_v4 = vadd.f32 0.5, %v10643_v27  ;;  %v10644_v3 = vmul.f32 0.5, %v14423_v63 }
 0x7c7   : > { %v10583_v10 = vmul.f32 0.5, %v10481_v31  ;;  %v10484_v25 = vadd.f32 %v11424_v13, %v20219_v6 }
 0x7c8   : > { %10707 = vst [vmem:[%s20229_s18 + $0x20] sm:$0xff] %v10675_v4  ;;  %v10676_v15 = vadd.f32 0.5, %v10644_v3 }
 0x7c9   : > { %14428 = vtanh.f32 %v10583_v10  ;;  %v10584_v14 = vmul.f32 0.5, %v10484_v25  ;;  %v11425_v30 = vpop.f32.mrb[52].mxu1 }
 0x7ca   : > { %10708 = vst [vmem:[%s20229_s18 + $0x28] sm:$0xff] %v10676_v15  ;;  %v11426_v7 = vpop.f32.mrb[53].mxu1 }
 0x7cb   : > { %v14425_v44 = vpop.eup %14424  ;;  %14430 = vtanh.f32 %v10584_v14  ;;  %v11427_v16 = vadd.f32 %v11426_v7, %v11425_v30  ;;  %v11428_v35 = vpop.f32.mrb[54].mxu1 }
 0x7cc   : > { %v10645_v1 = vmul.f32 0.5, %v14425_v44  ;;  %v11429_v49 = vpop.f32.mrb[55].mxu1 }
 0x7cd   : > { %v14427_v55 = vpop.eup %14426  ;;  %v10489_v45 = vadd.f32 %v11427_v16, %v20219_v6  ;;  %v11430_v34 = vadd.f32 %v11429_v49, %v11428_v35 }
 0x7ce   : > { %v10677_v17 = vadd.f32 0.5, %v10645_v1  ;;  %v10646_v59 = vmul.f32 0.5, %v14427_v55 }
 0x7cf   : > { %v10585_v9 = vmul.f32 0.5, %v10489_v45  ;;  %v10492_v5 = vadd.f32 %v11430_v34, %v20219_v6 }
 0x7d0   : > { %10709 = vst [vmem:[%s20229_s18 + $0x30] sm:$0xff] %v10677_v17  ;;  %v10678_v48 = vadd.f32 0.5, %v10646_v59 }
 0x7d1   : > { %14432 = vtanh.f32 %v10585_v9  ;;  %v10586_v60 = vmul.f32 0.5, %v10492_v5  ;;  %v11431_v43 = vpop.f32.mrb[56].mxu1 }
 0x7d2   : > { %10710 = vst [vmem:[%s20229_s18 + $0x38] sm:$0xff] %v10678_v48  ;;  %v11432_v26 = vpop.f32.mrb[57].mxu1 }
 0x7d3   : > { %v14429_v22 = vpop.eup %14428  ;;  %14434 = vtanh.f32 %v10586_v60  ;;  %v11433_v41 = vadd.f32 %v11432_v26, %v11431_v43  ;;  %v11434_v24 = vpop.f32.mrb[58].mxu1 }
 0x7d4   : > { %v10647_v8 = vmul.f32 0.5, %v14429_v22  ;;  %v11435_v47 = vpop.f32.mrb[59].mxu1 }
 0x7d5   : > { %v14431_v38 = vpop.eup %14430  ;;  %v10497_v21 = vadd.f32 %v11433_v41, %v20219_v6  ;;  %v11436_v28 = vadd.f32 %v11435_v47, %v11434_v24 }
 0x7d6   : > { %v10679_v51 = vadd.f32 0.5, %v10647_v8  ;;  %v10648_v42 = vmul.f32 0.5, %v14431_v38 }
 0x7d7   : > { %v10587_v56 = vmul.f32 0.5, %v10497_v21  ;;  %v10500_v2 = vadd.f32 %v11436_v28, %v20219_v6 }
 0x7d8   : > { %10711 = vst [vmem:[%s20229_s18 + $0x40] sm:$0xff] %v10679_v51  ;;  %v10680_v50 = vadd.f32 0.5, %v10648_v42 }
 0x7d9   : > { %14436 = vtanh.f32 %v10587_v56  ;;  %v10588_v62 = vmul.f32 0.5, %v10500_v2  ;;  %v11437_v52 = vpop.f32.mrb[60].mxu1 }
 0x7da   : > { %10712 = vst [vmem:[%s20229_s18 + $0x48] sm:$0xff] %v10680_v50  ;;  %v11438_v20 = vpop.f32.mrb[61].mxu1 }
 0x7db   : > { %v14433_v37 = vpop.eup %14432  ;;  %14438 = vtanh.f32 %v10588_v62  ;;  %v11439_v12 = vadd.f32 %v11438_v20, %v11437_v52  ;;  %v11440_v54 = vpop.f32.mrb[62].mxu1 }
 0x7dc   : > { %v10649_v58 = vmul.f32 0.5, %v14433_v37  ;;  %v11441_v57 = vpop.f32.mrb[63].mxu1 }
 0x7dd   : > { %v14435_v23 = vpop.eup %14434  ;;  %v10505_v39 = vadd.f32 %v11439_v12, %v20219_v6  ;;  %v11442_v46 = vadd.f32 %v11441_v57, %v11440_v54 }
 0x7de   : > { %v10681_v33 = vadd.f32 0.5, %v10649_v58  ;;  %v10650_v32 = vmul.f32 0.5, %v14435_v23 }
 0x7df   : > { %v10589_v0 = vmul.f32 0.5, %v10505_v39  ;;  %v10508_v19 = vadd.f32 %v11442_v46, %v20219_v6 }
 0x7e0   : > { %10713 = vst [vmem:[%s20229_s18 + $0x50] sm:$0xff] %v10681_v33  ;;  %v10682_v53 = vadd.f32 0.5, %v10650_v32 }
 0x7e1   : > { %14440 = vtanh.f32 %v10589_v0  ;;  %v10590_v36 = vmul.f32 0.5, %v10508_v19  ;;  %v11443_v29 = vpop.f32.mrb[64].mxu1 }
 0x7e2   : > { %10714 = vst [vmem:[%s20229_s18 + $0x58] sm:$0xff] %v10682_v53  ;;  %v11444_v61 = vpop.f32.mrb[65].mxu1 }
 0x7e3   : > { %v14437_v11 = vpop.eup %14436  ;;  %14442 = vtanh.f32 %v10590_v36  ;;  %v11445_v40 = vadd.f32 %v11444_v61, %v11443_v29  ;;  %v11446_v27 = vpop.f32.mrb[66].mxu1 }
 0x7e4   : > { %v10651_v18 = vmul.f32 0.5, %v14437_v11  ;;  %v11447_v63 = vpop.f32.mrb[67].mxu1 }
 0x7e5   : > { %v14439_v31 = vpop.eup %14438  ;;  %v10513_v13 = vadd.f32 %v11445_v40, %v20219_v6  ;;  %v11448_v4 = vadd.f32 %v11447_v63, %v11446_v27 }
 0x7e6   : > { %v10683_v3 = vadd.f32 0.5, %v10651_v18  ;;  %v10652_v10 = vmul.f32 0.5, %v14439_v31 }
 0x7e7   : > { %v10591_v25 = vmul.f32 0.5, %v10513_v13  ;;  %v10516_v15 = vadd.f32 %v11448_v4, %v20219_v6 }
 0x7e8   : > { %10715 = vst [vmem:[%s20229_s18 + $0x60] sm:$0xff] %v10683_v3  ;;  %v10684_v14 = vadd.f32 0.5, %v10652_v10 }
 0x7e9   : > { %14444 = vtanh.f32 %v10591_v25  ;;  %v10592_v30 = vmul.f32 0.5, %v10516_v15  ;;  %v11449_v7 = vpop.f32.mrb[68].mxu1 }
 0x7ea   : > { %10716 = vst [vmem:[%s20229_s18 + $0x68] sm:$0xff] %v10684_v14  ;;  %v11450_v44 = vpop.f32.mrb[69].mxu1 }
 0x7eb   : > { %v14441_v16 = vpop.eup %14440  ;;  %14446 = vtanh.f32 %v10592_v30  ;;  %v11451_v35 = vadd.f32 %v11450_v44, %v11449_v7  ;;  %v11452_v1 = vpop.f32.mrb[70].mxu1 }
 0x7ec   : > { %v10653_v49 = vmul.f32 0.5, %v14441_v16  ;;  %v11453_v55 = vpop.f32.mrb[71].mxu1 }
 0x7ed   : > { %v14443_v45 = vpop.eup %14442  ;;  %v10521_v34 = vadd.f32 %v11451_v35, %v20219_v6  ;;  %v11454_v17 = vadd.f32 %v11453_v55, %v11452_v1 }
 0x7ee   : > { %v10685_v59 = vadd.f32 0.5, %v10653_v49  ;;  %v10654_v9 = vmul.f32 0.5, %v14443_v45 }
 0x7ef   : > { %v10593_v5 = vmul.f32 0.5, %v10521_v34  ;;  %v10524_v48 = vadd.f32 %v11454_v17, %v20219_v6 }
 0x7f0   : > { %10717 = vst [vmem:[%s20229_s18 + $0x70] sm:$0xff] %v10685_v59  ;;  %v10686_v60 = vadd.f32 0.5, %v10654_v9 }
 0x7f1   : > { %14448 = vtanh.f32 %v10593_v5  ;;  %v10594_v43 = vmul.f32 0.5, %v10524_v48  ;;  %v11455_v26 = vpop.f32.mrb[72].mxu1 }
 0x7f2   : > { %10718 = vst [vmem:[%s20229_s18 + $0x78] sm:$0xff] %v10686_v60  ;;  %v11456_v22 = vpop.f32.mrb[73].mxu1 }
 0x7f3   : > { %v14445_v41 = vpop.eup %14444  ;;  %14450 = vtanh.f32 %v10594_v43  ;;  %v11457_v24 = vadd.f32 %v11456_v22, %v11455_v26  ;;  %v11458_v8 = vpop.f32.mrb[74].mxu1 }
 0x7f4   : > { %v10655_v47 = vmul.f32 0.5, %v14445_v41  ;;  %v11459_v38 = vpop.f32.mrb[75].mxu1 }
 0x7f5   : > { %v14447_v21 = vpop.eup %14446  ;;  %v10529_v28 = vadd.f32 %v11457_v24, %v20219_v6  ;;  %v11460_v51 = vadd.f32 %v11459_v38, %v11458_v8 }
 0x7f6   : > { %v10687_v42 = vadd.f32 0.5, %v10655_v47  ;;  %v10656_v56 = vmul.f32 0.5, %v14447_v21 }
 0x7f7   : > { %v10595_v2 = vmul.f32 0.5, %v10529_v28  ;;  %v10532_v50 = vadd.f32 %v11460_v51, %v20219_v6 }
 0x7f8   : > { %10719 = vst [vmem:[%s20229_s18 + $0x80] sm:$0xff] %v10687_v42  ;;  %v10688_v62 = vadd.f32 0.5, %v10656_v56 }
 0x7f9   : > { %14452 = vtanh.f32 %v10595_v2  ;;  %v10596_v52 = vmul.f32 0.5, %v10532_v50  ;;  %v11461_v20 = vpop.f32.mrb[76].mxu1 }
 0x7fa   : > { %10720 = vst [vmem:[%s20229_s18 + $0x88] sm:$0xff] %v10688_v62  ;;  %v11462_v37 = vpop.f32.mrb[77].mxu1 }
 0x7fb   : > { %v14449_v12 = vpop.eup %14448  ;;  %14454 = vtanh.f32 %v10596_v52  ;;  %v11463_v54 = vadd.f32 %v11462_v37, %v11461_v20  ;;  %v11464_v58 = vpop.f32.mrb[78].mxu1 }
 0x7fc   : > { %v10657_v57 = vmul.f32 0.5, %v14449_v12  ;;  %v11465_v23 = vpop.f32.mrb[79].mxu1 }
 0x7fd   : > { %v14451_v39 = vpop.eup %14450  ;;  %v10537_v46 = vadd.f32 %v11463_v54, %v20219_v6  ;;  %v11466_v33 = vadd.f32 %v11465_v23, %v11464_v58 }
 0x7fe   : > { %v10689_v32 = vadd.f32 0.5, %v10657_v57  ;;  %v10658_v0 = vmul.f32 0.5, %v14451_v39 }
 0x7ff   : > { %v10597_v19 = vmul.f32 0.5, %v10537_v46  ;;  %v10540_v53 = vadd.f32 %v11466_v33, %v20219_v6 }
 0x800   : > { %10721 = vst [vmem:[%s20229_s18 + $0x90] sm:$0xff] %v10689_v32  ;;  %v10690_v36 = vadd.f32 0.5, %v10658_v0 }
 0x801   : > { %14456 = vtanh.f32 %v10597_v19  ;;  %v10598_v29 = vmul.f32 0.5, %v10540_v53  ;;  %v11467_v61 = vpop.f32.mrb[80].mxu1 }
 0x802   : > { %10722 = vst [vmem:[%s20229_s18 + $0x98] sm:$0xff] %v10690_v36  ;;  %v11468_v11 = vpop.f32.mrb[81].mxu1 }
 0x803   : > { %v14453_v40 = vpop.eup %14452  ;;  %14458 = vtanh.f32 %v10598_v29  ;;  %v11469_v27 = vadd.f32 %v11468_v11, %v11467_v61  ;;  %v11470_v18 = vpop.f32.mrb[82].mxu1 }
 0x804   : > { %v10659_v63 = vmul.f32 0.5, %v14453_v40  ;;  %v11471_v31 = vpop.f32.mrb[83].mxu1 }
 0x805   : > { %v14455_v13 = vpop.eup %14454  ;;  %v10545_v4 = vadd.f32 %v11469_v27, %v20219_v6  ;;  %v11472_v3 = vadd.f32 %v11471_v31, %v11470_v18 }
 0x806   : > { %v10691_v10 = vadd.f32 0.5, %v10659_v63  ;;  %v10660_v25 = vmul.f32 0.5, %v14455_v13 }
 0x807   : > { %v10599_v15 = vmul.f32 0.5, %v10545_v4  ;;  %v10548_v14 = vadd.f32 %v11472_v3, %v20219_v6 }
 0x808   : > { %10723 = vst [vmem:[%s20229_s18 + $0xa0] sm:$0xff] %v10691_v10  ;;  %v10692_v30 = vadd.f32 0.5, %v10660_v25 }
 0x809   : > { %14460 = vtanh.f32 %v10599_v15  ;;  %v10600_v7 = vmul.f32 0.5, %v10548_v14  ;;  %v11473_v44 = vpop.f32.mrb[84].mxu1 }
 0x80a   : > { %10724 = vst [vmem:[%s20229_s18 + $0xa8] sm:$0xff] %v10692_v30  ;;  %v11474_v16 = vpop.f32.mrb[85].mxu1 }
 0x80b   : > { %v14457_v35 = vpop.eup %14456  ;;  %14462 = vtanh.f32 %v10600_v7  ;;  %v11475_v1 = vadd.f32 %v11474_v16, %v11473_v44  ;;  %v11476_v49 = vpop.f32.mrb[86].mxu1 }
 0x80c   : > { %v10661_v55 = vmul.f32 0.5, %v14457_v35  ;;  %v11477_v45 = vpop.f32.mrb[87].mxu1 }
 0x80d   : > { %v14459_v34 = vpop.eup %14458  ;;  %v10553_v17 = vadd.f32 %v11475_v1, %v20219_v6  ;;  %v11478_v59 = vadd.f32 %v11477_v45, %v11476_v49 }
 0x80e   : > { %v10693_v9 = vadd.f32 0.5, %v10661_v55  ;;  %v10662_v5 = vmul.f32 0.5, %v14459_v34 }
 0x80f   : > { %v10601_v48 = vmul.f32 0.5, %v10553_v17  ;;  %v10556_v60 = vadd.f32 %v11478_v59, %v20219_v6 }
 0x810   : > { %10725 = vst [vmem:[%s20229_s18 + $0xb0] sm:$0xff] %v10693_v9  ;;  %v10694_v43 = vadd.f32 0.5, %v10662_v5 }
 0x811   : > { %14464 = vtanh.f32 %v10601_v48  ;;  %v10602_v26 = vmul.f32 0.5, %v10556_v60  ;;  %v11479_v22 = vpop.f32.mrb[88].mxu1 }
 0x812   : > { %10726 = vst [vmem:[%s20229_s18 + $0xb8] sm:$0xff] %v10694_v43  ;;  %v11480_v41 = vpop.f32.mrb[89].mxu1 }
 0x813   : > { %v14461_v24 = vpop.eup %14460  ;;  %14466 = vtanh.f32 %v10602_v26  ;;  %v11481_v8 = vadd.f32 %v11480_v41, %v11479_v22  ;;  %v11482_v47 = vpop.f32.mrb[90].mxu1 }
 0x814   : > { %v10663_v38 = vmul.f32 0.5, %v14461_v24  ;;  %v11483_v21 = vpop.f32.mrb[91].mxu1 }
 0x815   : > { %v14463_v28 = vpop.eup %14462  ;;  %v10561_v51 = vadd.f32 %v11481_v8, %v20219_v6  ;;  %v11484_v42 = vadd.f32 %v11483_v21, %v11482_v47 }
 0x816   : > { %v10695_v56 = vadd.f32 0.5, %v10663_v38  ;;  %v10664_v2 = vmul.f32 0.5, %v14463_v28 }
 0x817   : > { %v10603_v50 = vmul.f32 0.5, %v10561_v51  ;;  %v10564_v62 = vadd.f32 %v11484_v42, %v20219_v6 }
 0x818   : > { %10727 = vst [vmem:[%s20229_s18 + $0xc0] sm:$0xff] %v10695_v56  ;;  %v10696_v52 = vadd.f32 0.5, %v10664_v2 }
 0x819   : > { %14468 = vtanh.f32 %v10603_v50  ;;  %v10604_v20 = vmul.f32 0.5, %v10564_v62  ;;  %v11485_v37 = vpop.f32.mrb[92].mxu1 }
 0x81a   : > { %10728 = vst [vmem:[%s20229_s18 + $0xc8] sm:$0xff] %v10696_v52  ;;  %v11486_v12 = vpop.f32.mrb[93].mxu1 }
 0x81b   : > { %v14465_v54 = vpop.eup %14464  ;;  %14470 = vtanh.f32 %v10604_v20  ;;  %v11487_v58 = vadd.f32 %v11486_v12, %v11485_v37  ;;  %v11488_v57 = vpop.f32.mrb[94].mxu1 }
 0x81c   : > { %v10665_v23 = vmul.f32 0.5, %v14465_v54  ;;  %v11489_v39 = vpop.f32.mrb[95].mxu1 }
 0x81d   : > { %v14467_v46 = vpop.eup %14466  ;;  %v10569_v33 = vadd.f32 %v11487_v58, %v20219_v6  ;;  %v11490_v32 = vadd.f32 %v11489_v39, %v11488_v57 }
 0x81e   : > { %v10697_v0 = vadd.f32 0.5, %v10665_v23  ;;  %v10666_v19 = vmul.f32 0.5, %v14467_v46 }
 0x81f   : > { %v10605_v53 = vmul.f32 0.5, %v10569_v33  ;;  %v10572_v36 = vadd.f32 %v11490_v32, %v20219_v6 }
 0x820   : > { %10729 = vst [vmem:[%s20229_s18 + $0xd0] sm:$0xff] %v10697_v0  ;;  %v10698_v29 = vadd.f32 0.5, %v10666_v19 }
 0x821   : > { %14472 = vtanh.f32 %v10605_v53  ;;  %v10606_v61 = vmul.f32 0.5, %v10572_v36 }
 0x822   : > { %10730 = vst [vmem:[%s20229_s18 + $0xd8] sm:$0xff] %v10698_v29 }
 0x823   : > { %v14469_v11 = vpop.eup %14468  ;;  %14474 = vtanh.f32 %v10606_v61 }
 0x824   : > { %v10667_v40 = vmul.f32 0.5, %v14469_v11 }
 0x825   : > { %v14471_v27 = vpop.eup %14470 }
 0x826   : > { %v10699_v18 = vadd.f32 0.5, %v10667_v40  ;;  %v10668_v63 = vmul.f32 0.5, %v14471_v27 }
 0x828   : > { %10731 = vst [vmem:[%s20229_s18 + $0xe0] sm:$0xff] %v10699_v18  ;;  %v10700_v31 = vadd.f32 0.5, %v10668_v63 }
 0x82a   : > { %10732 = vst [vmem:[%s20229_s18 + $0xe8] sm:$0xff] %v10700_v31 }
 0x82b   : > { %v14473_v13 = vpop.eup %14472 }
 0x82c   : > { %v10669_v4 = vmul.f32 0.5, %v14473_v13 }
 0x82d   : > { %v14475_v3 = vpop.eup %14474 }
 0x82e   : > { %v10701_v6 = vadd.f32 0.5, %v10669_v4  ;;  %v10670_v10 = vmul.f32 0.5, %v14475_v3 }
 0x830   : > { %10733 = vst [vmem:[%s20229_s18 + $0xf0] sm:$0xff] %v10701_v6  ;;  %v10702_v25 = vadd.f32 0.5, %v10670_v10 }
 0x832   : > { %10734 = vst [vmem:[%s20229_s18 + $0xf8] sm:$0xff] %v10702_v25 }
 0x833 PF: > { %s19_s30 = sadd.s32 1, %s14513_s30  }
 0x834   : > { %p16_p4 = scmp.ge.s32.totalorder %s19_s30, 4  }
 0x836   :  { %18 = sbr.rel (!%p16_p4) target bundleno = 1 (0x1), region = 86 }

</bundles_post_ra>
